<compile_context>
chip_gen: v5e
topology: v5e:2x2
jax: 0.10.0
libtpu: 0.0.40
codegen_flags: <defaults>
</compile_context>

<pallas_src>
import jax
import jax.numpy as jnp
from jax.experimental import pallas as pl
from jax.experimental.pallas import tpu as pltpu


def _round_up(v, m):
    return ((v + m - 1) // m) * m


# ---------------------------------------------------------------------------
# Layer 1: (Bp, 12288) @ (12288, 2048) + b1, ReLU.
# Grid: (N // tn) parallel x (K // tk) reduction; accumulate straight into the
# resident output block, fuse bias + ReLU into the last reduction step.
# ---------------------------------------------------------------------------
def _fc1_kernel(x_ref, w_ref, b_ref, o_ref):
    k = pl.program_id(1)

    @pl.when(k == 0)
    def _():
        o_ref[...] = jnp.zeros_like(o_ref)

    o_ref[...] += jnp.dot(x_ref[...], w_ref[...],
                          preferred_element_type=jnp.float32)

    @pl.when(k == pl.num_programs(1) - 1)
    def _():
        o_ref[...] = jnp.maximum(o_ref[...] + b_ref[...], 0.0)


def _fc1(x, w, b, *, tk=2048, tn=1024):
    """x: (M, K) bf16, w: (K, N) bf16, b: (1, N) f32 -> (M, N) f32 (ReLU'd)."""
    M, K = x.shape
    _, N = w.shape
    assert K % tk == 0 and N % tn == 0 and M % 8 == 0
    return pl.pallas_call(
        _fc1_kernel,
        out_shape=jax.ShapeDtypeStruct((M, N), jnp.float32),
        grid_spec=pltpu.PrefetchScalarGridSpec(
            num_scalar_prefetch=0,
            grid=(N // tn, K // tk),
            in_specs=[
                pl.BlockSpec((M, tk), lambda n, k: (0, k)),
                pl.BlockSpec((tk, tn), lambda n, k: (k, n)),
                pl.BlockSpec((1, tn), lambda n, k: (0, n)),
            ],
            out_specs=pl.BlockSpec((M, tn), lambda n, k: (0, n)),
        ),
        compiler_params=pltpu.CompilerParams(
            dimension_semantics=("parallel", "arbitrary"),
        ),
    )(x, w, b)


# ---------------------------------------------------------------------------
# Layers 2-4 fused into one call: all padded weights resident in VMEM.
# ---------------------------------------------------------------------------
def _tail_kernel(h_ref, w2_ref, b2_ref, w3_ref, b3_ref, w4_ref, b4_ref, o_ref):
    h = h_ref[...]                                             # (M, 2048) f32
    h = jnp.dot(h.astype(jnp.bfloat16), w2_ref[...],
                preferred_element_type=jnp.float32) + b2_ref[...]
    h = jnp.maximum(h, 0.0)
    h = jnp.dot(h.astype(jnp.bfloat16), w3_ref[...],
                preferred_element_type=jnp.float32) + b3_ref[...]
    h = jnp.maximum(h, 0.0)
    h = jnp.dot(h.astype(jnp.bfloat16), w4_ref[...],
                preferred_element_type=jnp.float32) + b4_ref[...]
    o_ref[...] = h                                             # (M, 128) f32


def _tail(h, w2, b2, w3, b3, w4, b4):
    M = h.shape[0]
    N = w4.shape[1]
    return pl.pallas_call(
        _tail_kernel,
        out_shape=jax.ShapeDtypeStruct((M, N), jnp.float32),
    )(h, w2, b2, w3, b3, w4, b4)


# ---------------------------------------------------------------------------
# Parameters.
# ---------------------------------------------------------------------------
_DIMS = [(12288, 2048), (2048, 500), (500, 100), (100, 2)]
_PADDED = [(12288, 2048), (2048, 512), (512, 128), (128, 128)]


def init_params(key):
    """Deterministic synthetic f32 params matching MLP_CelebA shapes.

    Weights are stored transposed: (in_features, out_features); y = x @ W + b.
    """
    params = []
    for i, (d_in, d_out) in enumerate(_DIMS):
        kw, kb = jax.random.split(jax.random.fold_in(key, i))
        bound = 1.0 / jnp.sqrt(jnp.float32(d_in))
        w = jax.random.uniform(kw, (d_in, d_out), jnp.float32, -bound, bound)
        b = jax.random.uniform(kb, (d_out,), jnp.float32, -bound, bound)
        params.append((w, b))
    return params


def prepare_params(params):
    """Pad to 128-aligned shapes and cast weights to bf16 ONCE (not per call)."""
    prepared = []
    for (w, b), (kp, np_) in zip(params, _PADDED):
        k, n = w.shape
        if (k, n) != (kp, np_):
            w = jnp.zeros((kp, np_), w.dtype).at[:k, :n].set(w)
        w = w.astype(jnp.bfloat16)
        bp = jnp.zeros((1, np_), jnp.float32).at[0, :n].set(b)
        prepared.append((w, bp))
    return tuple(prepared)


def mlp_celeba_forward(x, prepared):
    """x: (B, 3, 64, 64) float32 (NCHW). Returns (B, 2) float32."""
    (w1, b1), (w2, b2), (w3, b3), (w4, b4) = prepared
    B = x.shape[0]
    x = x.reshape(B, -1)                       # (B, 12288), torch .view order
    Bp = _round_up(max(B, 8), 8)
    xp = jnp.zeros((Bp, x.shape[1]), jnp.bfloat16).at[:B].set(
        x.astype(jnp.bfloat16))
    h = _fc1(xp, w1, b1)                       # (Bp, 2048) f32, ReLU applied
    out = _tail(h, w2, b2, w3, b3, w4, b4)     # (Bp, 128) f32
    return out[:B, :2]


if __name__ == "__main__":
    key = jax.random.PRNGKey(0)
    k_x, k_p = jax.random.split(key)

    B = 2
    x = jax.random.normal(k_x, (B, 3, 64, 64), jnp.float32)  # 3*64*64 = 12288
    params = init_params(k_p)
    prepared = prepare_params(params)          # pad + bf16-cast once at init

    fwd = jax.jit(mlp_celeba_forward)
    out = jax.block_until_ready(fwd(x, prepared))
    assert out.shape == (B, 2) and out.dtype == jnp.float32

    # Reference in plain JAX using the same bf16-rounded weights/activations
    # and f32 accumulation (the kernel's documented numerics): padding, tiling
    # and layer fusion must not change the result beyond accumulation-order
    # noise.
    h = x.reshape(B, -1)
    for i, (w, b) in enumerate(params):
        h = jnp.dot(h.astype(jnp.bfloat16), w.astype(jnp.bfloat16),
                    preferred_element_type=jnp.float32) + b
        if i < 3:
            h = jnp.maximum(h, 0.0)
    assert jnp.allclose(out, h, atol=5e-3, rtol=5e-3), (
        f"max abs err {jnp.max(jnp.abs(out - h))}")

    print("KERNEL_OK")
</pallas_src>

<mosaic_0001>
module attributes {stable_mosaic.version = 11 : i64} {
  func.func @_fc1_kernel(%arg0: i32, %arg1: i32, %arg2: memref<8x2048xbf16, #tpu.memory_space<vmem>>, %arg3: memref<2048x1024xbf16, #tpu.memory_space<vmem>>, %arg4: memref<1x1024xf32, #tpu.memory_space<vmem>>, %arg5: memref<8x1024xf32, #tpu.memory_space<vmem>>) attributes {dimension_semantics = [#tpu.dimension_semantics<parallel>, #tpu.dimension_semantics<arbitrary>], iteration_bounds = array<i64: 2, 6>, scalar_prefetch = 0 : i64, scratch_operands = 0 : i64, tpu.core_type = #tpu.core_type<tc>, window_params = [{transform_indices = @transform_0, window_bounds = array<i64: 8, 2048>}, {transform_indices = @transform_1, window_bounds = array<i64: 2048, 1024>}, {transform_indices = @transform_2, window_bounds = array<i64: 1, 1024>}, {transform_indices = @transform_3, window_bounds = array<i64: 8, 1024>}]} {
    %c0_i32 = arith.constant 0 : i32
    %0 = arith.cmpi eq, %arg1, %c0_i32 : i32
    %1 = arith.extui %0 : i1 to i32
    %c0_i32_0 = arith.constant 0 : i32
    %2 = arith.cmpi ne, %1, %c0_i32_0 : i32
    scf.if %2 {
      %cst_9 = arith.constant 0.000000e+00 : f32
      %12 = vector.broadcast %cst_9 : f32 to vector<8x1024xf32>
      %c0_10 = arith.constant 0 : index
      %c0_11 = arith.constant 0 : index
      %13 = vector.load %arg5[%c0_10, %c0_11] : memref<8x1024xf32, #tpu.memory_space<vmem>>, vector<8x1024xf32>
      tpu.vector_store %arg5[%c0_10, %c0_11], %12 {strides = array<i32>} : memref<8x1024xf32, #tpu.memory_space<vmem>>, vector<8x1024xf32>,
    } else {
    }
    %c0 = arith.constant 0 : index
    %c0_1 = arith.constant 0 : index
    %3 = vector.load %arg5[%c0, %c0_1] : memref<8x1024xf32, #tpu.memory_space<vmem>>, vector<8x1024xf32>
    %c0_2 = arith.constant 0 : index
    %c0_3 = arith.constant 0 : index
    %4 = vector.load %arg2[%c0_2, %c0_3] : memref<8x2048xbf16, #tpu.memory_space<vmem>>, vector<8x2048xbf16>
    %c0_4 = arith.constant 0 : index
    %c0_5 = arith.constant 0 : index
    %5 = vector.load %arg3[%c0_4, %c0_5] : memref<2048x1024xbf16, #tpu.memory_space<vmem>>, vector<2048x1024xbf16>
    %cst = arith.constant dense<0.000000e+00> : vector<8x1024xf32>
    %6 = tpu.matmul %4, %5, %cst {dimension_numbers = #tpu.dot_dimension_numbers<[1], [0], [0], [1], [0, 0, 1, 1], [], []>} : vector<8x2048xbf16>, vector<2048x1024xbf16>, vector<8x1024xf32> -> vector<8x1024xf32>
    %7 = arith.addf %3, %6 : vector<8x1024xf32>
    %c0_6 = arith.constant 0 : index
    %c0_7 = arith.constant 0 : index
    %8 = vector.load %arg5[%c0_6, %c0_7] : memref<8x1024xf32, #tpu.memory_space<vmem>>, vector<8x1024xf32>
    tpu.vector_store %arg5[%c0_6, %c0_7], %7 {strides = array<i32>} : memref<8x1024xf32, #tpu.memory_space<vmem>>, vector<8x1024xf32>,
    %c5_i32 = arith.constant 5 : i32
    %9 = arith.cmpi eq, %arg1, %c5_i32 : i32
    %10 = arith.extui %9 : i1 to i32
    %c0_i32_8 = arith.constant 0 : i32
    %11 = arith.cmpi ne, %10, %c0_i32_8 : i32
    scf.if %11 {
      %c0_9 = arith.constant 0 : index
      %c0_10 = arith.constant 0 : index
      %12 = vector.load %arg5[%c0_9, %c0_10] : memref<8x1024xf32, #tpu.memory_space<vmem>>, vector<8x1024xf32>
      %c0_11 = arith.constant 0 : index
      %c0_12 = arith.constant 0 : index
      %13 = vector.load %arg4[%c0_11, %c0_12] : memref<1x1024xf32, #tpu.memory_space<vmem>>, vector<1x1024xf32>
      %14 = vector.broadcast %13 : vector<1x1024xf32> to vector<8x1024xf32>
      %15 = arith.addf %12, %14 : vector<8x1024xf32>
      %cst_13 = arith.constant 0.000000e+00 : f32
      %16 = vector.broadcast %cst_13 : f32 to vector<8x1024xf32>
      %17 = arith.maximumf %15, %16 : vector<8x1024xf32>
      %c0_14 = arith.constant 0 : index
      %c0_15 = arith.constant 0 : index
      %18 = vector.load %arg5[%c0_14, %c0_15] : memref<8x1024xf32, #tpu.memory_space<vmem>>, vector<8x1024xf32>
      tpu.vector_store %arg5[%c0_14, %c0_15], %17 {strides = array<i32>} : memref<8x1024xf32, #tpu.memory_space<vmem>>, vector<8x1024xf32>,
    } else {
    }
    return
  }
  func.func @transform_0(%arg0: i32, %arg1: i32) -> (i32, i32) {
    %c0_i32 = arith.constant 0 : i32
    %c0_i32_0 = arith.constant 0 : i32
    return %c0_i32, %arg1 : i32, i32
  }
  func.func @transform_1(%arg0: i32, %arg1: i32) -> (i32, i32) {
    %c0_i32 = arith.constant 0 : i32
    return %arg1, %arg0 : i32, i32
  }
  func.func @transform_2(%arg0: i32, %arg1: i32) -> (i32, i32) {
    %c0_i32 = arith.constant 0 : i32
    %c0_i32_0 = arith.constant 0 : i32
    return %c0_i32, %arg0 : i32, i32
  }
  func.func @transform_3(%arg0: i32, %arg1: i32) -> (i32, i32) {
    %c0_i32 = arith.constant 0 : i32
    %c0_i32_0 = arith.constant 0 : i32
    return %c0_i32, %arg0 : i32, i32
  }
}

module attributes {stable_mosaic.version = 11 : i64} {
  func.func @_tail_kernel(%arg0: memref<8x2048xf32, #tpu.memory_space<vmem>>, %arg1: memref<2048x512xbf16, #tpu.memory_space<vmem>>, %arg2: memref<1x512xf32, #tpu.memory_space<vmem>>, %arg3: memref<512x128xbf16, #tpu.memory_space<vmem>>, %arg4: memref<1x128xf32, #tpu.memory_space<vmem>>, %arg5: memref<128x128xbf16, #tpu.memory_space<vmem>>, %arg6: memref<1x128xf32, #tpu.memory_space<vmem>>, %arg7: memref<8x128xf32, #tpu.memory_space<vmem>>) attributes {dimension_semantics = [], scalar_prefetch = 0 : i64, scratch_operands = 0 : i64, tpu.core_type = #tpu.core_type<tc>} {
    %c0 = arith.constant 0 : index
    %c0_0 = arith.constant 0 : index
    %0 = vector.load %arg0[%c0, %c0_0] : memref<8x2048xf32, #tpu.memory_space<vmem>>, vector<8x2048xf32>
    %1 = arith.truncf %0 : vector<8x2048xf32> to vector<8x2048xbf16>
    %c0_1 = arith.constant 0 : index
    %c0_2 = arith.constant 0 : index
    %2 = vector.load %arg1[%c0_1, %c0_2] : memref<2048x512xbf16, #tpu.memory_space<vmem>>, vector<2048x512xbf16>
    %cst = arith.constant dense<0.000000e+00> : vector<8x512xf32>
    %3 = tpu.matmul %1, %2, %cst {dimension_numbers = #tpu.dot_dimension_numbers<[1], [0], [0], [1], [0, 0, 1, 1], [], []>} : vector<8x2048xbf16>, vector<2048x512xbf16>, vector<8x512xf32> -> vector<8x512xf32>
    %c0_3 = arith.constant 0 : index
    %c0_4 = arith.constant 0 : index
    %4 = vector.load %arg2[%c0_3, %c0_4] : memref<1x512xf32, #tpu.memory_space<vmem>>, vector<1x512xf32>
    %5 = vector.broadcast %4 : vector<1x512xf32> to vector<8x512xf32>
    %6 = arith.addf %3, %5 : vector<8x512xf32>
    %cst_5 = arith.constant 0.000000e+00 : f32
    %7 = vector.broadcast %cst_5 : f32 to vector<8x512xf32>
    %8 = arith.maximumf %6, %7 : vector<8x512xf32>
    %9 = arith.truncf %8 : vector<8x512xf32> to vector<8x512xbf16>
    %c0_6 = arith.constant 0 : index
    %c0_7 = arith.constant 0 : index
    %10 = vector.load %arg3[%c0_6, %c0_7] : memref<512x128xbf16, #tpu.memory_space<vmem>>, vector<512x128xbf16>
    %cst_8 = arith.constant dense<0.000000e+00> : vector<8x128xf32>
    %11 = tpu.matmul %9, %10, %cst_8 {dimension_numbers = #tpu.dot_dimension_numbers<[1], [0], [0], [1], [0, 0, 1, 1], [], []>} : vector<8x512xbf16>, vector<512x128xbf16>, vector<8x128xf32> -> vector<8x128xf32>
    %c0_9 = arith.constant 0 : index
    %c0_10 = arith.constant 0 : index
    %12 = vector.load %arg4[%c0_9, %c0_10] : memref<1x128xf32, #tpu.memory_space<vmem>>, vector<1x128xf32>
    %13 = vector.broadcast %12 : vector<1x128xf32> to vector<8x128xf32>
    %14 = arith.addf %11, %13 : vector<8x128xf32>
    %cst_11 = arith.constant 0.000000e+00 : f32
    %15 = vector.broadcast %cst_11 : f32 to vector<8x128xf32>
    %16 = arith.maximumf %14, %15 : vector<8x128xf32>
    %17 = arith.truncf %16 : vector<8x128xf32> to vector<8x128xbf16>
    %c0_12 = arith.constant 0 : index
    %c0_13 = arith.constant 0 : index
    %18 = vector.load %arg5[%c0_12, %c0_13] : memref<128x128xbf16, #tpu.memory_space<vmem>>, vector<128x128xbf16>
    %cst_14 = arith.constant dense<0.000000e+00> : vector<8x128xf32>
    %19 = tpu.matmul %17, %18, %cst_14 {dimension_numbers = #tpu.dot_dimension_numbers<[1], [0], [0], [1], [0, 0, 1, 1], [], []>} : vector<8x128xbf16>, vector<128x128xbf16>, vector<8x128xf32> -> vector<8x128xf32>
    %c0_15 = arith.constant 0 : index
    %c0_16 = arith.constant 0 : index
    %20 = vector.load %arg6[%c0_15, %c0_16] : memref<1x128xf32, #tpu.memory_space<vmem>>, vector<1x128xf32>
    %21 = vector.broadcast %20 : vector<1x128xf32> to vector<8x128xf32>
    %22 = arith.addf %19, %21 : vector<8x128xf32>
    %c0_17 = arith.constant 0 : index
    %c0_18 = arith.constant 0 : index
    %23 = vector.load %arg7[%c0_17, %c0_18] : memref<8x128xf32, #tpu.memory_space<vmem>>, vector<8x128xf32>
    tpu.vector_store %arg7[%c0_17, %c0_18], %22 {strides = array<i32>} : memref<8x128xf32, #tpu.memory_space<vmem>>, vector<8x128xf32>,
    return
  }
}

</mosaic_0001>

<bundles_post_ra>
// kernel: mlp_celeba_forward.3
= control target key start
LH: loop header
LB: loop body
LE: loop exit
PB: predicated region body
PF: predicated region fallthrough
CT: control target
= control target key end

     0   :  { %12 = vsyncpa [#allocation3], 0  ;;  %s7668_s0 = inlined_call_operand.vmem [shape: f32[8,2048], index: 0, kind: input, shape index: {}]   ;;  %s7669_s1 = inlined_call_operand.hbm [shape: bf16[2048,512], index: 1, kind: input, shape index: {}]   ;;  %s7670_s2 = inlined_call_operand.hbm [shape: f32[1,512], index: 2, kind: input, shape index: {}]   ;;  %s7671_s3 = inlined_call_operand.hbm [shape: bf16[512,128], index: 3, kind: input, shape index: {}]   ;;  %s7672_s4 = inlined_call_operand.hbm [shape: f32[1,128], index: 4, kind: input, shape index: {}]   ;;  %s7673_s5 = inlined_call_operand.hbm [shape: bf16[128,128], index: 5, kind: input, shape index: {}]   ;;  %s7674_s6 = inlined_call_operand.hbm [shape: f32[1,128], index: 6, kind: input, shape index: {}]   ;;  %s7675_s7 = inlined_call_operand.vmem [shape: f32[8,128], index: 7, kind: output, shape index: {}]  }
   0x1   :  { %13 = vsyncpa [#allocation5], 0 }
   0x2   :  { %14 = vsyncpa [#allocation8], 0  ;;  %s36_s26 = sshll.u32 %s7670_s2, 4  ;;  %s37_s26 = int_to_ptr.hbm [resolvable:$true] %s36_s26 }
   0x3   :  { %15 = vsyncpa [#allocation11], 0  ;;  %s7398_s27 = smov [#allocation4]   ;;  %s60_s8 = sshll.u32 %s7672_s4, 4  ;;  %s61_s8 = int_to_ptr.hbm [resolvable:$true] %s60_s8 }
   0x4   :  { %s38_s28 = sshll.u32 %s7398_s27, 4  ;;  %s7399_s9 = smov [#allocation7]   ;;  %s39_s28 = int_to_ptr.vmem [resolvable:$true] %s38_s28 }
   0x5   :  { %41 = dma.hbm_to_vmem [thread:$0]  %s37_s26, 64, %s39_s28, [#allocation5]  }
   0x6   :  { %s62_s10 = sshll.u32 %s7399_s9, 4  ;;  %s22_s13 = sshll.u32 %s7669_s1, 4  ;;  %s63_s10 = int_to_ptr.vmem [resolvable:$true] %s62_s10  ;;  %s23_s13 = int_to_ptr.hbm [resolvable:$true] %s22_s13 }
   0x7   :  { %65 = dma.hbm_to_vmem [thread:$0]  %s61_s8, 16, %s63_s10, [#allocation8]  }
   0x8   :  { %s7400_s2 = smov [#allocation2]   ;;  %s46_s17 = sshll.u32 %s7671_s3, 4  ;;  %s47_s17 = int_to_ptr.hbm [resolvable:$true] %s46_s17 }
   0x9   :  { %s24_s14 = sshll.u32 %s7400_s2, 4  ;;  %s7401_s18 = smov 256   ;;  %s25_s14 = int_to_ptr.vmem [resolvable:$true] %s24_s14 }
   0xa   :  { %s7402_s4 = smov 16   ;;  %s7403_s19 = smov [#allocation6]  }
   0xb   :  { %30 = dma.hbm_to_vmem [thread:$0]  %s23_s13, 65536, %s25_s14, [#allocation3], %s7401_s18, %s7401_s18, %s7402_s4  }
   0xc   :  { %s48_s20 = sshll.u32 %s7403_s19, 4  ;;  %s7404_s21 = smov 64   ;;  %s49_s20 = int_to_ptr.vmem [resolvable:$true] %s48_s20 }
   0xd   :  { %s7405_s22 = smov 4   ;;  %s70_s24 = sshll.u32 %s7673_s5, 4  ;;  %s71_s24 = int_to_ptr.hbm [resolvable:$true] %s70_s24 }
   0xe   :  { %54 = dma.hbm_to_vmem [thread:$0]  %s47_s17, 4096, %s49_s20, [#allocation5], %s7404_s21, %s7404_s21, %s7405_s22  }
   0xf   :  { %s7406_s25 = smov [#allocation9]   ;;  %s84_s28 = sshll.u32 %s7674_s6, 4  ;;  %s85_s28 = int_to_ptr.hbm [resolvable:$true] %s84_s28 }
  0x10   :  { %s72_s26 = sshll.u32 %s7406_s25, 4  ;;  %s7407_s29 = smov [#allocation10]   ;;  %s73_s26 = int_to_ptr.vmem [resolvable:$true] %s72_s26 }
  0x11   :  { %78 = dma.hbm_to_vmem [thread:$0]  %s71_s24, 1024, %s73_s26, [#allocation8], %s7404_s21, %s7404_s21, %s7405_s22  }
  0x12   :  { %s86_s30 = sshll.u32 %s7407_s29, 4  ;;  %s87_s30 = int_to_ptr.vmem [resolvable:$true] %s86_s30 }
  0x13   :  { %89 = dma.hbm_to_vmem [thread:$0]  %s85_s28, 16, %s87_s30, [#allocation11]  }
  0x14   :  { %7390 = dma.done.wait [#allocation3], 65536  }
  0x15   :  { %7391 = vsyncadd [#allocation3], 4294901760 }
  0x16   :  { %7392 = dma.done.wait [#allocation5], 4160  }
  0x17   :  { %7393 = vsyncadd [#allocation5], 4294963136 }
  0x18   :  { %7394 = dma.done.wait [#allocation8], 1040  }
  0x19   :  { %7395 = vsyncadd [#allocation8], 4294966256 }
  0x1a   :  { %7396 = dma.done.wait [#allocation11], 16  }
  0x1b   :  { %7397 = vsyncadd [#allocation11], 4294967280  ;;  %v4586_v0 = vld [vmem:[#allocation2 + $0xe0] sm:$0xf]  ;;  %v6710_v1 = vld [vmem:[#allocation2 + $0xec] sm:$0xf0] }
  0x1c   :  { %v4714_v2 = vld [vmem:[#allocation2 + $0x1e0] sm:$0xf]  ;;  %v4587_v3 = vor.u32 %v6710_v1, %v4586_v0  ;;  %v6742_v4 = vld [vmem:[#allocation2 + $0x1ec] sm:$0xf0] }
  0x1d   :  { %v4842_v5 = vld [vmem:[#allocation2 + $0x2e0] sm:$0xf]  ;;  %v6774_v6 = vld [vmem:[#allocation2 + $0x2ec] sm:$0xf0]  ;;  %v4715_v7 = vor.u32 %v6742_v4, %v4714_v2 }
  0x1e   :  { %v4843_v8 = vor.u32 %v6774_v6, %v4842_v5  ;;  %v4970_v9 = vld [vmem:[#allocation2 + $0x3e0] sm:$0xf]  ;;  %v6806_v10 = vld [vmem:[#allocation2 + $0x3ec] sm:$0xf0]  ;;  %3228 = vmatpush.bf16.msra.mxu0 %v4587_v3 }
  0x1f   :  { %v4570_v11 = vld [vmem:[#allocation2 + $0xc0] sm:$0xf]  ;;  %v4971_v12 = vor.u32 %v6806_v10, %v4970_v9  ;;  %v6706_v13 = vld [vmem:[#allocation2 + $0xcc] sm:$0xf0]  ;;  %3241 = vmatpush.bf16.msra.mxu1 %v4715_v7 }
  0x20   :  { %v4698_v14 = vld [vmem:[#allocation2 + $0x1c0] sm:$0xf]  ;;  %v6738_v15 = vld [vmem:[#allocation2 + $0x1cc] sm:$0xf0]  ;;  %3254 = vmatpush.bf16.msra.mxu2 %v4843_v8  ;;  %v4571_v16 = vor.u32 %v6706_v13, %v4570_v11 }
  0x21   :  { %v4699_v17 = vor.u32 %v6738_v15, %v4698_v14  ;;  %v4826_v18 = vld [vmem:[#allocation2 + $0x2c0] sm:$0xf]  ;;  %v6770_v19 = vld [vmem:[#allocation2 + $0x2cc] sm:$0xf0]  ;;  %3267 = vmatpush.bf16.msra.mxu3 %v4971_v12 }
  0x22   :  { %v4954_v20 = vld [vmem:[#allocation2 + $0x3c0] sm:$0xf]  ;;  %v4827_v21 = vor.u32 %v6770_v19, %v4826_v18  ;;  %v6802_v22 = vld [vmem:[#allocation2 + $0x3cc] sm:$0xf0]  ;;  %3229 = vmatpush.bf16.msra.mxu0 %v4571_v16 }
  0x23   :  { %v4554_v23 = vld [vmem:[#allocation2 + $0xa0] sm:$0xf]  ;;  %v6702_v24 = vld [vmem:[#allocation2 + $0xac] sm:$0xf0]  ;;  %v4955_v25 = vor.u32 %v6802_v22, %v4954_v20  ;;  %3242 = vmatpush.bf16.msra.mxu1 %v4699_v17 }
  0x24   :  { %v4682_v26 = vld [vmem:[#allocation2 + $0x1a0] sm:$0xf]  ;;  %v6734_v27 = vld [vmem:[#allocation2 + $0x1ac] sm:$0xf0]  ;;  %v4555_v29 = vor.u32 %v6702_v24, %v4554_v23  ;;  %3255 = vmatpush.bf16.msra.mxu2 %v4827_v21 }
  0x25   :  { %v4810_v28 = vld [vmem:[#allocation2 + $0x2a0] sm:$0xf]  ;;  %v6766_v30 = vld [vmem:[#allocation2 + $0x2ac] sm:$0xf0]  ;;  %v4683_v33 = vor.u32 %v6734_v27, %v4682_v26  ;;  %3268 = vmatpush.bf16.msra.mxu3 %v4955_v25 }
  0x26   :  { %v4938_v31 = vld [vmem:[#allocation2 + $0x3a0] sm:$0xf]  ;;  %v6798_v32 = vld [vmem:[#allocation2 + $0x3ac] sm:$0xf0]  ;;  %v4811_v34 = vor.u32 %v6766_v30, %v4810_v28  ;;  %3230 = vmatpush.bf16.msra.mxu0 %v4555_v29 }
  0x27   :  { %v4538_v35 = vld [vmem:[#allocation2 + $0x80] sm:$0xf]  ;;  %v6698_v36 = vld [vmem:[#allocation2 + $0x8c] sm:$0xf0]  ;;  %v4939_v38 = vor.u32 %v6798_v32, %v4938_v31  ;;  %3243 = vmatpush.bf16.msra.mxu1 %v4683_v33 }
  0x28   :  { %v4666_v37 = vld [vmem:[#allocation2 + $0x180] sm:$0xf]  ;;  %v6730_v39 = vld [vmem:[#allocation2 + $0x18c] sm:$0xf0]  ;;  %v4539_v44 = vor.u32 %v6698_v36, %v4538_v35  ;;  %3256 = vmatpush.bf16.msra.mxu2 %v4811_v34 }
  0x29   :  { %v4794_v40 = vld [vmem:[#allocation2 + $0x280] sm:$0xf]  ;;  %v6762_v41 = vld [vmem:[#allocation2 + $0x28c] sm:$0xf0]  ;;  %v4667_v45 = vor.u32 %v6730_v39, %v4666_v37  ;;  %3269 = vmatpush.bf16.msra.mxu3 %v4939_v38 }
  0x2a   :  { %v4922_v42 = vld [vmem:[#allocation2 + $0x380] sm:$0xf]  ;;  %v6794_v43 = vld [vmem:[#allocation2 + $0x38c] sm:$0xf0]  ;;  %v4795_v46 = vor.u32 %v6762_v41, %v4794_v40  ;;  %3231 = vmatpush.bf16.msra.mxu0 %v4539_v44 }
  0x2b   :  { %v4522_v47 = vld [vmem:[#allocation2 + $0x60] sm:$0xf]  ;;  %v6694_v48 = vld [vmem:[#allocation2 + $0x6c] sm:$0xf0]  ;;  %v4923_v50 = vor.u32 %v6794_v43, %v4922_v42  ;;  %3244 = vmatpush.bf16.msra.mxu1 %v4667_v45 }
  0x2c   :  { %v4650_v49 = vld [vmem:[#allocation2 + $0x160] sm:$0xf]  ;;  %v6726_v51 = vld [vmem:[#allocation2 + $0x16c] sm:$0xf0]  ;;  %v4523_v56 = vor.u32 %v6694_v48, %v4522_v47  ;;  %3257 = vmatpush.bf16.msra.mxu2 %v4795_v46 }
  0x2d   :  { %v4778_v52 = vld [vmem:[#allocation2 + $0x260] sm:$0xf]  ;;  %v6758_v53 = vld [vmem:[#allocation2 + $0x26c] sm:$0xf0]  ;;  %v4651_v57 = vor.u32 %v6726_v51, %v4650_v49  ;;  %3270 = vmatpush.bf16.msra.mxu3 %v4923_v50 }
  0x2e   :  { %v4906_v54 = vld [vmem:[#allocation2 + $0x360] sm:$0xf]  ;;  %v6790_v55 = vld [vmem:[#allocation2 + $0x36c] sm:$0xf0]  ;;  %v4779_v58 = vor.u32 %v6758_v53, %v4778_v52  ;;  %3232 = vmatpush.bf16.msra.mxu0 %v4523_v56 }
  0x2f   :  { %v4506_v59 = vld [vmem:[#allocation2 + $0x40] sm:$0xf]  ;;  %v6690_v60 = vld [vmem:[#allocation2 + $0x4c] sm:$0xf0]  ;;  %v4907_v62 = vor.u32 %v6790_v55, %v4906_v54  ;;  %3245 = vmatpush.bf16.msra.mxu1 %v4651_v57 }
  0x30   :  { %v4634_v61 = vld [vmem:[#allocation2 + $0x140] sm:$0xf]  ;;  %v6722_v63 = vld [vmem:[#allocation2 + $0x14c] sm:$0xf0]  ;;  %v4507_v4 = vor.u32 %v6690_v60, %v4506_v59  ;;  %3258 = vmatpush.bf16.msra.mxu2 %v4779_v58 }
  0x31   :  { %v4762_v0 = vld [vmem:[#allocation2 + $0x240] sm:$0xf]  ;;  %v6754_v1 = vld [vmem:[#allocation2 + $0x24c] sm:$0xf0]  ;;  %v4635_v5 = vor.u32 %v6722_v63, %v4634_v61  ;;  %3271 = vmatpush.bf16.msra.mxu3 %v4907_v62 }
  0x32   :  { %v4890_v2 = vld [vmem:[#allocation2 + $0x340] sm:$0xf]  ;;  %v6786_v3 = vld [vmem:[#allocation2 + $0x34c] sm:$0xf0]  ;;  %v4763_v6 = vor.u32 %v6754_v1, %v4762_v0  ;;  %3233 = vmatpush.bf16.msra.mxu0 %v4507_v4 }
  0x33   :  { %v4490_v7 = vld [vmem:[#allocation2 + $0x20] sm:$0xf]  ;;  %v6686_v8 = vld [vmem:[#allocation2 + $0x2c] sm:$0xf0]  ;;  %v4891_v10 = vor.u32 %v6786_v3, %v4890_v2  ;;  %3246 = vmatpush.bf16.msra.mxu1 %v4635_v5 }
  0x34   :  { %v4618_v9 = vld [vmem:[#allocation2 + $0x120] sm:$0xf]  ;;  %v6718_v11 = vld [vmem:[#allocation2 + $0x12c] sm:$0xf0]  ;;  %v4491_v16 = vor.u32 %v6686_v8, %v4490_v7  ;;  %3259 = vmatpush.bf16.msra.mxu2 %v4763_v6 }
  0x35   :  { %v4746_v12 = vld [vmem:[#allocation2 + $0x220] sm:$0xf]  ;;  %v6750_v13 = vld [vmem:[#allocation2 + $0x22c] sm:$0xf0]  ;;  %v4619_v19 = vor.u32 %v6718_v11, %v4618_v9  ;;  %3272 = vmatpush.bf16.msra.mxu3 %v4891_v10  ;;  %v117_v10 = vld [vmem:[%s7668_s0 + $0x18] sm:$0xff] }
  0x36   :  { %v4874_v14 = vld [vmem:[#allocation2 + $0x320] sm:$0xf]  ;;  %v6782_v15 = vld [vmem:[#allocation2 + $0x32c] sm:$0xf0]  ;;  %v4747_v20 = vor.u32 %v6750_v13, %v4746_v12  ;;  %3234 = vmatpush.bf16.msra.mxu0 %v4491_v16 }
  0x37   :  { %v4474_v17 = vld [vmem:[#allocation2] sm:$0xf]  ;;  %v6682_v18 = vld [vmem:[#allocation2 + $0xc] sm:$0xf0]  ;;  %v4875_v24 = vor.u32 %v6782_v15, %v4874_v14  ;;  %3247 = vmatpush.bf16.msra.mxu1 %v4619_v19  ;;  %v7479_v15 = vpack.c.bf16 %v117_v10, %v117_v10  ;;  %v115_v19 = vld [vmem:[%s7668_s0 + $0x8] sm:$0xff] }
  0x38   :  { %v4602_v21 = vld [vmem:[#allocation2 + $0x100] sm:$0xf]  ;;  %v6714_v22 = vld [vmem:[#allocation2 + $0x10c] sm:$0xf0]  ;;  %v4475_v31 = vor.u32 %v6682_v18, %v4474_v17  ;;  %3260 = vmatpush.bf16.msra.mxu2 %v4747_v20 }
  0x39   :  { %v4730_v23 = vld [vmem:[#allocation2 + $0x200] sm:$0xf]  ;;  %v6746_v25 = vld [vmem:[#allocation2 + $0x20c] sm:$0xf0]  ;;  %v4603_v35 = vor.u32 %v6714_v22, %v4602_v21  ;;  %3273 = vmatpush.bf16.msra.mxu3 %v4875_v24 }
  0x3a   :  { %v4858_v26 = vld [vmem:[#allocation2 + $0x300] sm:$0xf]  ;;  %v6778_v27 = vld [vmem:[#allocation2 + $0x30c] sm:$0xf0]  ;;  %v4731_v36 = vor.u32 %v6746_v25, %v4730_v23  ;;  %3235 = vmatpush.bf16.msra.mxu0 %v4475_v31  ;;  %v7487_v25 = vpack.c.bf16 %v115_v19, %v115_v19 }
  0x3b   :  { %v5098_v28 = vld [vmem:[#allocation2 + $0x4e0] sm:$0xf]  ;;  %v6838_v29 = vld [vmem:[#allocation2 + $0x4ec] sm:$0xf0]  ;;  %v4859_v39 = vor.u32 %v6778_v27, %v4858_v26  ;;  %3248 = vmatpush.bf16.msra.mxu1 %v4603_v35 }
  0x3c   :  { %v5226_v30 = vld [vmem:[#allocation2 + $0x5e0] sm:$0xf]  ;;  %v6870_v32 = vld [vmem:[#allocation2 + $0x5ec] sm:$0xf0]  ;;  %v5099_v40 = vor.u32 %v6838_v29, %v5098_v28  ;;  %3261 = vmatpush.bf16.msra.mxu2 %v4731_v36 }
  0x3d   :  { %v5354_v33 = vld [vmem:[#allocation2 + $0x6e0] sm:$0xf]  ;;  %v6902_v34 = vld [vmem:[#allocation2 + $0x6ec] sm:$0xf0]  ;;  %v5227_v41 = vor.u32 %v6870_v32, %v5226_v30  ;;  %3274 = vmatpush.bf16.msra.mxu3 %v4859_v39 }
  0x3e   :  { %v5482_v37 = vld [vmem:[#allocation2 + $0x7e0] sm:$0xf]  ;;  %v6934_v38 = vld [vmem:[#allocation2 + $0x7ec] sm:$0xf0]  ;;  %v5355_v42 = vor.u32 %v6902_v34, %v5354_v33  ;;  %3280 = vmatpush.bf16.msrb.mxu0 %v5099_v40  ;;  %3249 = vmatmul.bf16.vlgmr.msra.gmra.mxu1 %v7487_v25 }
  0x3f   :  { %v5082_v43 = vld [vmem:[#allocation2 + $0x4c0] sm:$0xf]  ;;  %v6834_v44 = vld [vmem:[#allocation2 + $0x4cc] sm:$0xf0]  ;;  %v5483_v46 = vor.u32 %v6934_v38, %v5482_v37  ;;  %3293 = vmatpush.bf16.msrb.mxu1 %v5227_v41 }
  0x40   :  { %v5210_v45 = vld [vmem:[#allocation2 + $0x5c0] sm:$0xf]  ;;  %v6866_v47 = vld [vmem:[#allocation2 + $0x5cc] sm:$0xf0]  ;;  %v5083_v52 = vor.u32 %v6834_v44, %v5082_v43  ;;  %3306 = vmatpush.bf16.msrb.mxu2 %v5355_v42  ;;  %3275 = vmatmul.bf16.vlgmr.msra.gmra.mxu3 %v7479_v15 }
  0x41   :  { %v5338_v48 = vld [vmem:[#allocation2 + $0x6c0] sm:$0xf]  ;;  %v6898_v49 = vld [vmem:[#allocation2 + $0x6cc] sm:$0xf0]  ;;  %v5211_v54 = vor.u32 %v6866_v47, %v5210_v45  ;;  %3319 = vmatpush.bf16.msrb.mxu3 %v5483_v46 }
  0x42   :  { %v5466_v50 = vld [vmem:[#allocation2 + $0x7c0] sm:$0xf]  ;;  %v6930_v51 = vld [vmem:[#allocation2 + $0x7cc] sm:$0xf0]  ;;  %v5339_v55 = vor.u32 %v6898_v49, %v5338_v48  ;;  %3281 = vmatpush.bf16.msrb.mxu0 %v5083_v52 }
  0x43   :  { %v5066_v53 = vld [vmem:[#allocation2 + $0x4a0] sm:$0xf]  ;;  %v6830_v56 = vld [vmem:[#allocation2 + $0x4ac] sm:$0xf0]  ;;  %v5467_v59 = vor.u32 %v6930_v51, %v5466_v50  ;;  %3294 = vmatpush.bf16.msrb.mxu1 %v5211_v54 }
  0x44   :  { %v5194_v57 = vld [vmem:[#allocation2 + $0x5a0] sm:$0xf]  ;;  %v6862_v58 = vld [vmem:[#allocation2 + $0x5ac] sm:$0xf0]  ;;  %v5067_v0 = vor.u32 %v6830_v56, %v5066_v53  ;;  %3307 = vmatpush.bf16.msrb.mxu2 %v5339_v55 }
  0x45   :  { %v5322_v60 = vld [vmem:[#allocation2 + $0x6a0] sm:$0xf]  ;;  %v6894_v61 = vld [vmem:[#allocation2 + $0x6ac] sm:$0xf0]  ;;  %v5195_v1 = vor.u32 %v6862_v58, %v5194_v57  ;;  %3320 = vmatpush.bf16.msrb.mxu3 %v5467_v59 }
  0x46   :  { %v5450_v62 = vld [vmem:[#allocation2 + $0x7a0] sm:$0xf]  ;;  %v6926_v63 = vld [vmem:[#allocation2 + $0x7ac] sm:$0xf0]  ;;  %v5323_v5 = vor.u32 %v6894_v61, %v5322_v60  ;;  %3282 = vmatpush.bf16.msrb.mxu0 %v5067_v0 }
  0x47   :  { %v5050_v2 = vld [vmem:[#allocation2 + $0x480] sm:$0xf]  ;;  %v116_v3 = vld [vmem:[%s7668_s0 + $0x10] sm:$0xff]  ;;  %v5451_v11 = vor.u32 %v6926_v63, %v5450_v62  ;;  %3295 = vmatpush.bf16.msrb.mxu1 %v5195_v1 }
  0x48   :  { %v114_v4 = vld [vmem:[%s7668_s0] sm:$0xff]  ;;  %v6826_v6 = vld [vmem:[#allocation2 + $0x48c] sm:$0xf0]  ;;  %v7472_v8 = vpack.c.bf16 %v116_v3, %v116_v3  ;;  %3308 = vmatpush.bf16.msrb.mxu2 %v5323_v5 }
  0x49   :  { %v5178_v7 = vld [vmem:[#allocation2 + $0x580] sm:$0xf]  ;;  %v7474_v9 = vpack.c.bf16 %v114_v4, %v114_v4  ;;  %v6858_v12 = vld [vmem:[#allocation2 + $0x58c] sm:$0xf0]  ;;  %v5051_v18 = vor.u32 %v6826_v6, %v5050_v2  ;;  %3321 = vmatpush.bf16.msrb.mxu3 %v5451_v11 }
  0x4a   :  { %v5306_v13 = vld [vmem:[#allocation2 + $0x680] sm:$0xf]  ;;  %v6890_v14 = vld [vmem:[#allocation2 + $0x68c] sm:$0xf0]  ;;  %3262 = vmatmul.bf16.vlgmr.msra.gmra.mxu2 %v7472_v8  ;;  %v5179_v20 = vor.u32 %v6858_v12, %v5178_v7 }
  0x4b   :  { %v5434_v16 = vld [vmem:[#allocation2 + $0x780] sm:$0xf]  ;;  %v6922_v17 = vld [vmem:[#allocation2 + $0x78c] sm:$0xf0]  ;;  %3236 = vmatmul.bf16.vlgmr.msra.gmra.mxu0 %v7474_v9  ;;  %v5307_v21 = vor.u32 %v6890_v14, %v5306_v13 }
  0x4c   :  { %v5034_v22 = vld [vmem:[#allocation2 + $0x460] sm:$0xf]  ;;  %v6822_v23 = vld [vmem:[#allocation2 + $0x46c] sm:$0xf0]  ;;  %v5435_v26 = vor.u32 %v6922_v17, %v5434_v16  ;;  %3283 = vmatpush.bf16.msrb.mxu0 %v5051_v18  ;;  %3296 = vmatpush.bf16.msrb.mxu1 %v5179_v20 }
  0x4d   :  { %v5162_v24 = vld [vmem:[#allocation2 + $0x560] sm:$0xf]  ;;  %v6854_v27 = vld [vmem:[#allocation2 + $0x56c] sm:$0xf0]  ;;  %v5035_v32 = vor.u32 %v6822_v23, %v5034_v22  ;;  %3309 = vmatpush.bf16.msrb.mxu2 %v5307_v21  ;;  %v121_v23 = vld [vmem:[%s7668_s0 + $0x38] sm:$0xff] }
  0x4e   :  { %v5290_v28 = vld [vmem:[#allocation2 + $0x660] sm:$0xf]  ;;  %v6886_v29 = vld [vmem:[#allocation2 + $0x66c] sm:$0xf0]  ;;  %v5163_v33 = vor.u32 %v6854_v27, %v5162_v24  ;;  %3322 = vmatpush.bf16.msrb.mxu3 %v5435_v26 }
  0x4f   :  { %v5418_v30 = vld [vmem:[#allocation2 + $0x760] sm:$0xf]  ;;  %v6918_v31 = vld [vmem:[#allocation2 + $0x76c] sm:$0xf0]  ;;  %v5291_v34 = vor.u32 %v6886_v29, %v5290_v28  ;;  %v119_v29 = vld [vmem:[%s7668_s0 + $0x28] sm:$0xff] }
  0x50   :  { %v5018_v35 = vld [vmem:[#allocation2 + $0x440] sm:$0xf]  ;;  %v6818_v36 = vld [vmem:[#allocation2 + $0x44c] sm:$0xf0]  ;;  %v5419_v38 = vor.u32 %v6918_v31, %v5418_v30  ;;  %3284 = vmatpush.bf16.msrb.mxu0 %v5035_v32  ;;  %3297 = vmatpush.bf16.msrb.mxu1 %v5163_v33 }
  0x51   :  { %v5146_v37 = vld [vmem:[#allocation2 + $0x540] sm:$0xf]  ;;  %v6850_v39 = vld [vmem:[#allocation2 + $0x54c] sm:$0xf0]  ;;  %v5019_v44 = vor.u32 %v6818_v36, %v5018_v35  ;;  %3310 = vmatpush.bf16.msrb.mxu2 %v5291_v34 }
  0x52   :  { %v5274_v40 = vld [vmem:[#allocation2 + $0x640] sm:$0xf]  ;;  %v6882_v41 = vld [vmem:[#allocation2 + $0x64c] sm:$0xf0]  ;;  %v5147_v45 = vor.u32 %v6850_v39, %v5146_v37  ;;  %3323 = vmatpush.bf16.msrb.mxu3 %v5419_v38  ;;  %v7506_v38 = vpack.c.bf16 %v121_v23, %v121_v23 }
  0x53   :  { %v5402_v42 = vld [vmem:[#allocation2 + $0x740] sm:$0xf]  ;;  %v6914_v43 = vld [vmem:[#allocation2 + $0x74c] sm:$0xf0]  ;;  %v5275_v46 = vor.u32 %v6882_v41, %v5274_v40  ;;  %v7508_v40 = vpack.c.bf16 %v119_v29, %v119_v29 }
  0x54   :  { %v5002_v47 = vld [vmem:[#allocation2 + $0x420] sm:$0xf]  ;;  %v6814_v48 = vld [vmem:[#allocation2 + $0x42c] sm:$0xf0]  ;;  %v5403_v50 = vor.u32 %v6914_v43, %v5402_v42  ;;  %3285 = vmatpush.bf16.msrb.mxu0 %v5019_v44  ;;  %3298 = vmatpush.bf16.msrb.mxu1 %v5147_v45 }
  0x55   :  { %v5130_v49 = vld [vmem:[#allocation2 + $0x520] sm:$0xf]  ;;  %v6846_v51 = vld [vmem:[#allocation2 + $0x52c] sm:$0xf0]  ;;  %v5003_v56 = vor.u32 %v6814_v48, %v5002_v47  ;;  %3311 = vmatpush.bf16.msrb.mxu2 %v5275_v46 }
  0x56   :  { %v5258_v52 = vld [vmem:[#allocation2 + $0x620] sm:$0xf]  ;;  %v6878_v53 = vld [vmem:[#allocation2 + $0x62c] sm:$0xf0]  ;;  %v5131_v59 = vor.u32 %v6846_v51, %v5130_v49  ;;  %3324 = vmatpush.bf16.msrb.mxu3 %v5403_v50 }
  0x57   :  { %v5386_v54 = vld [vmem:[#allocation2 + $0x720] sm:$0xf]  ;;  %v6910_v55 = vld [vmem:[#allocation2 + $0x72c] sm:$0xf0]  ;;  %v5259_v60 = vor.u32 %v6878_v53, %v5258_v52 }
  0x58   :  { %v4986_v57 = vld [vmem:[#allocation2 + $0x400] sm:$0xf]  ;;  %v6810_v58 = vld [vmem:[#allocation2 + $0x40c] sm:$0xf0]  ;;  %v5387_v0 = vor.u32 %v6910_v55, %v5386_v54  ;;  %3286 = vmatpush.bf16.msrb.mxu0 %v5003_v56  ;;  %3299 = vmatpush.bf16.msrb.mxu1 %v5131_v59 }
  0x59   :  { %v5114_v61 = vld [vmem:[#allocation2 + $0x500] sm:$0xf]  ;;  %v6842_v62 = vld [vmem:[#allocation2 + $0x50c] sm:$0xf0]  ;;  %v4987_v7 = vor.u32 %v6810_v58, %v4986_v57  ;;  %3312 = vmatpush.bf16.msrb.mxu2 %v5259_v60 }
  0x5a   :  { %v5242_v63 = vld [vmem:[#allocation2 + $0x600] sm:$0xf]  ;;  %v6874_v1 = vld [vmem:[#allocation2 + $0x60c] sm:$0xf0]  ;;  %v5115_v13 = vor.u32 %v6842_v62, %v5114_v61  ;;  %3325 = vmatpush.bf16.msrb.mxu3 %v5387_v0 }
  0x5b   :  { %v5370_v2 = vld [vmem:[#allocation2 + $0x700] sm:$0xf]  ;;  %v6906_v3 = vld [vmem:[#allocation2 + $0x70c] sm:$0xf0]  ;;  %v5243_v14 = vor.u32 %v6874_v1, %v5242_v63 }
  0x5c   :  { %v5610_v4 = vld [vmem:[#allocation2 + $0x8e0] sm:$0xf]  ;;  %v6966_v5 = vld [vmem:[#allocation2 + $0x8ec] sm:$0xf0]  ;;  %v5371_v19 = vor.u32 %v6906_v3, %v5370_v2  ;;  %3287 = vmatpush.bf16.msrb.mxu0 %v4987_v7  ;;  %3300 = vmatpush.bf16.msrb.mxu1 %v5115_v13 }
  0x5d   :  { %v5738_v6 = vld [vmem:[#allocation2 + $0x9e0] sm:$0xf]  ;;  %v6998_v10 = vld [vmem:[#allocation2 + $0x9ec] sm:$0xf0]  ;;  %v5611_v20 = vor.u32 %v6966_v5, %v5610_v4  ;;  %3313 = vmatpush.bf16.msrb.mxu2 %v5243_v14 }
  0x5e   :  { %v5866_v11 = vld [vmem:[#allocation2 + $0xae0] sm:$0xf]  ;;  %v7030_v12 = vld [vmem:[#allocation2 + $0xaec] sm:$0xf0]  ;;  %v5739_v24 = vor.u32 %v6998_v10, %v5738_v6  ;;  %3326 = vmatpush.bf16.msrb.mxu3 %v5371_v19 }
  0x5f   :  { %v5994_v16 = vld [vmem:[#allocation2 + $0xbe0] sm:$0xf]  ;;  %v7062_v17 = vld [vmem:[#allocation2 + $0xbec] sm:$0xf0]  ;;  %v5867_v26 = vor.u32 %v7030_v12, %v5866_v11  ;;  %3301 = vmatmul.bf16.vlgmr.msrb.gmra.mxu1 %v7508_v40 }
  0x60   :  { %v120_v18 = vld [vmem:[%s7668_s0 + $0x30] sm:$0xff]  ;;  %v5594_v21 = vld [vmem:[#allocation2 + $0x8c0] sm:$0xf]  ;;  %v5995_v30 = vor.u32 %v7062_v17, %v5994_v16  ;;  %3332 = vmatpush.bf16.msra.mxu0 %v5611_v20  ;;  %3345 = vmatpush.bf16.msra.mxu1 %v5739_v24 }
  0x61   :  { %v118_v22 = vld [vmem:[%s7668_s0 + $0x20] sm:$0xff]  ;;  %v6962_v27 = vld [vmem:[#allocation2 + $0x8cc] sm:$0xf0]  ;;  %v7502_v34 = vpack.c.bf16 %v120_v18, %v120_v18  ;;  %3358 = vmatpush.bf16.msra.mxu2 %v5867_v26  ;;  %3327 = vmatmul.bf16.vlgmr.msrb.gmra.mxu3 %v7506_v38 }
  0x62   :  { %v5722_v28 = vld [vmem:[#allocation2 + $0x9c0] sm:$0xf]  ;;  %v6994_v31 = vld [vmem:[#allocation2 + $0x9cc] sm:$0xf0]  ;;  %v7504_v37 = vpack.c.bf16 %v118_v22, %v118_v22  ;;  %v5595_v39 = vor.u32 %v6962_v27, %v5594_v21  ;;  %3371 = vmatpush.bf16.msra.mxu3 %v5995_v30 }
  0x63   :  { %v5850_v32 = vld [vmem:[#allocation2 + $0xac0] sm:$0xf]  ;;  %v7026_v33 = vld [vmem:[#allocation2 + $0xacc] sm:$0xf0]  ;;  %v5723_v41 = vor.u32 %v6994_v31, %v5722_v28  ;;  %3314 = vmatmul.bf16.vlgmr.msrb.gmra.mxu2 %v7502_v34 }
  0x64   :  { %v5978_v35 = vld [vmem:[#allocation2 + $0xbc0] sm:$0xf]  ;;  %v7058_v36 = vld [vmem:[#allocation2 + $0xbcc] sm:$0xf0]  ;;  %v5851_v42 = vor.u32 %v7026_v33, %v5850_v32  ;;  %3288 = vmatmul.bf16.vlgmr.msrb.gmra.mxu0 %v7504_v37 }
  0x65   :  { %v5578_v43 = vld [vmem:[#allocation2 + $0x8a0] sm:$0xf]  ;;  %v6958_v44 = vld [vmem:[#allocation2 + $0x8ac] sm:$0xf0]  ;;  %v5979_v46 = vor.u32 %v7058_v36, %v5978_v35  ;;  %3333 = vmatpush.bf16.msra.mxu0 %v5595_v39  ;;  %3346 = vmatpush.bf16.msra.mxu1 %v5723_v41 }
  0x66   :  { %v5706_v45 = vld [vmem:[#allocation2 + $0x9a0] sm:$0xf]  ;;  %v6990_v47 = vld [vmem:[#allocation2 + $0x9ac] sm:$0xf0]  ;;  %v5579_v52 = vor.u32 %v6958_v44, %v5578_v43  ;;  %3359 = vmatpush.bf16.msra.mxu2 %v5851_v42 }
  0x67   :  { %v5834_v48 = vld [vmem:[#allocation2 + $0xaa0] sm:$0xf]  ;;  %v7022_v49 = vld [vmem:[#allocation2 + $0xaac] sm:$0xf0]  ;;  %v5707_v53 = vor.u32 %v6990_v47, %v5706_v45  ;;  %3372 = vmatpush.bf16.msra.mxu3 %v5979_v46 }
  0x68   :  { %v5962_v50 = vld [vmem:[#allocation2 + $0xba0] sm:$0xf]  ;;  %v7054_v51 = vld [vmem:[#allocation2 + $0xbac] sm:$0xf0]  ;;  %v5835_v54 = vor.u32 %v7022_v49, %v5834_v48 }
  0x69   :  { %v5562_v55 = vld [vmem:[#allocation2 + $0x880] sm:$0xf]  ;;  %v6954_v56 = vld [vmem:[#allocation2 + $0x88c] sm:$0xf0]  ;;  %v5963_v58 = vor.u32 %v7054_v51, %v5962_v50  ;;  %3334 = vmatpush.bf16.msra.mxu0 %v5579_v52  ;;  %3347 = vmatpush.bf16.msra.mxu1 %v5707_v53 }
  0x6a   :  { %v5690_v57 = vld [vmem:[#allocation2 + $0x980] sm:$0xf]  ;;  %v6986_v59 = vld [vmem:[#allocation2 + $0x98c] sm:$0xf0]  ;;  %v5563_v0 = vor.u32 %v6954_v56, %v5562_v55  ;;  %3360 = vmatpush.bf16.msra.mxu2 %v5835_v54 }
  0x6b   :  { %v5818_v60 = vld [vmem:[#allocation2 + $0xa80] sm:$0xf]  ;;  %v7018_v61 = vld [vmem:[#allocation2 + $0xa8c] sm:$0xf0]  ;;  %v5691_v1 = vor.u32 %v6986_v59, %v5690_v57  ;;  %3373 = vmatpush.bf16.msra.mxu3 %v5963_v58 }
  0x6c   :  { %v5946_v62 = vld [vmem:[#allocation2 + $0xb80] sm:$0xf]  ;;  %v7050_v63 = vld [vmem:[#allocation2 + $0xb8c] sm:$0xf0]  ;;  %v5819_v2 = vor.u32 %v7018_v61, %v5818_v60 }
  0x6d   :  { %v5546_v3 = vld [vmem:[#allocation2 + $0x860] sm:$0xf]  ;;  %v6950_v4 = vld [vmem:[#allocation2 + $0x86c] sm:$0xf0]  ;;  %v5947_v6 = vor.u32 %v7050_v63, %v5946_v62  ;;  %3335 = vmatpush.bf16.msra.mxu0 %v5563_v0  ;;  %3348 = vmatpush.bf16.msra.mxu1 %v5691_v1 }
  0x6e   :  { %v5674_v5 = vld [vmem:[#allocation2 + $0x960] sm:$0xf]  ;;  %v6982_v7 = vld [vmem:[#allocation2 + $0x96c] sm:$0xf0]  ;;  %v5547_v14 = vor.u32 %v6950_v4, %v5546_v3  ;;  %3361 = vmatpush.bf16.msra.mxu2 %v5819_v2 }
  0x6f   :  { %v5802_v10 = vld [vmem:[#allocation2 + $0xa60] sm:$0xf]  ;;  %v7014_v11 = vld [vmem:[#allocation2 + $0xa6c] sm:$0xf0]  ;;  %v5675_v16 = vor.u32 %v6982_v7, %v5674_v5  ;;  %3374 = vmatpush.bf16.msra.mxu3 %v5947_v6  ;;  %v123_v7 = vld [vmem:[%s7668_s0 + $0x48] sm:$0xff] }
  0x70   :  { %v5930_v12 = vld [vmem:[#allocation2 + $0xb60] sm:$0xf]  ;;  %v7046_v13 = vld [vmem:[#allocation2 + $0xb6c] sm:$0xf0]  ;;  %v5803_v17 = vor.u32 %v7014_v11, %v5802_v10  ;;  %v125_v10 = vld [vmem:[%s7668_s0 + $0x58] sm:$0xff] }
  0x71   :  { %v5530_v18 = vld [vmem:[#allocation2 + $0x840] sm:$0xf]  ;;  %v6946_v19 = vld [vmem:[#allocation2 + $0x84c] sm:$0xf0]  ;;  %v5931_v21 = vor.u32 %v7046_v13, %v5930_v12  ;;  %3336 = vmatpush.bf16.msra.mxu0 %v5547_v14  ;;  %3349 = vmatpush.bf16.msra.mxu1 %v5675_v16 }
  0x72   :  { %v5658_v20 = vld [vmem:[#allocation2 + $0x940] sm:$0xf]  ;;  %v6978_v22 = vld [vmem:[#allocation2 + $0x94c] sm:$0xf0]  ;;  %v5531_v28 = vor.u32 %v6946_v19, %v5530_v18  ;;  %3362 = vmatpush.bf16.msra.mxu2 %v5803_v17 }
  0x73   :  { %v5786_v23 = vld [vmem:[#allocation2 + $0xa40] sm:$0xf]  ;;  %v7010_v24 = vld [vmem:[#allocation2 + $0xa4c] sm:$0xf0]  ;;  %v5659_v29 = vor.u32 %v6978_v22, %v5658_v20  ;;  %3375 = vmatpush.bf16.msra.mxu3 %v5931_v21 }
  0x74   :  { %v5914_v26 = vld [vmem:[#allocation2 + $0xb40] sm:$0xf]  ;;  %v7042_v27 = vld [vmem:[#allocation2 + $0xb4c] sm:$0xf0]  ;;  %v5787_v30 = vor.u32 %v7010_v24, %v5786_v23  ;;  %v7530_v23 = vpack.c.bf16 %v123_v7, %v123_v7 }
  0x75   :  { %v5514_v31 = vld [vmem:[#allocation2 + $0x820] sm:$0xf]  ;;  %v6942_v32 = vld [vmem:[#allocation2 + $0x82c] sm:$0xf0]  ;;  %v5915_v35 = vor.u32 %v7042_v27, %v5914_v26  ;;  %3337 = vmatpush.bf16.msra.mxu0 %v5531_v28  ;;  %3350 = vmatpush.bf16.msra.mxu1 %v5659_v29  ;;  %v7532_v27 = vpack.c.bf16 %v125_v10, %v125_v10 }
  0x76   :  { %v5642_v33 = vld [vmem:[#allocation2 + $0x920] sm:$0xf]  ;;  %v6974_v36 = vld [vmem:[#allocation2 + $0x92c] sm:$0xf0]  ;;  %v5515_v45 = vor.u32 %v6942_v32, %v5514_v31  ;;  %3363 = vmatpush.bf16.msra.mxu2 %v5787_v30 }
  0x77   :  { %v5770_v39 = vld [vmem:[#allocation2 + $0xa20] sm:$0xf]  ;;  %v7006_v41 = vld [vmem:[#allocation2 + $0xa2c] sm:$0xf0]  ;;  %v5643_v49 = vor.u32 %v6974_v36, %v5642_v33  ;;  %3376 = vmatpush.bf16.msra.mxu3 %v5915_v35 }
  0x78   :  { %v5898_v42 = vld [vmem:[#allocation2 + $0xb20] sm:$0xf]  ;;  %v7038_v43 = vld [vmem:[#allocation2 + $0xb2c] sm:$0xf0]  ;;  %v5771_v50 = vor.u32 %v7006_v41, %v5770_v39 }
  0x79   :  { %v5498_v44 = vld [vmem:[#allocation2 + $0x800] sm:$0xf]  ;;  %v6938_v46 = vld [vmem:[#allocation2 + $0x80c] sm:$0xf0]  ;;  %v5899_v54 = vor.u32 %v7038_v43, %v5898_v42  ;;  %3338 = vmatpush.bf16.msra.mxu0 %v5515_v45  ;;  %3351 = vmatpush.bf16.msra.mxu1 %v5643_v49 }
  0x7a   :  { %v5626_v47 = vld [vmem:[#allocation2 + $0x900] sm:$0xf]  ;;  %v6970_v48 = vld [vmem:[#allocation2 + $0x90c] sm:$0xf0]  ;;  %v5499_v60 = vor.u32 %v6938_v46, %v5498_v44  ;;  %3364 = vmatpush.bf16.msra.mxu2 %v5771_v50 }
  0x7b   :  { %v5754_v51 = vld [vmem:[#allocation2 + $0xa00] sm:$0xf]  ;;  %v7002_v52 = vld [vmem:[#allocation2 + $0xa0c] sm:$0xf0]  ;;  %v5627_v63 = vor.u32 %v6970_v48, %v5626_v47  ;;  %3377 = vmatpush.bf16.msra.mxu3 %v5899_v54 }
  0x7c   :  { %v5882_v53 = vld [vmem:[#allocation2 + $0xb00] sm:$0xf]  ;;  %v7034_v55 = vld [vmem:[#allocation2 + $0xb0c] sm:$0xf0]  ;;  %v5755_v0 = vor.u32 %v7002_v52, %v5754_v51 }
  0x7d   :  { %v6122_v56 = vld [vmem:[#allocation2 + $0xce0] sm:$0xf]  ;;  %v7094_v57 = vld [vmem:[#allocation2 + $0xcec] sm:$0xf0]  ;;  %v5883_v4 = vor.u32 %v7034_v55, %v5882_v53  ;;  %3339 = vmatpush.bf16.msra.mxu0 %v5499_v60  ;;  %3352 = vmatpush.bf16.msra.mxu1 %v5627_v63 }
  0x7e   :  { %v6250_v58 = vld [vmem:[#allocation2 + $0xde0] sm:$0xf]  ;;  %v7126_v59 = vld [vmem:[#allocation2 + $0xdec] sm:$0xf0]  ;;  %v6123_v5 = vor.u32 %v7094_v57, %v6122_v56  ;;  %3365 = vmatpush.bf16.msra.mxu2 %v5755_v0 }
  0x7f   :  { %v6378_v61 = vld [vmem:[#allocation2 + $0xee0] sm:$0xf]  ;;  %v7158_v62 = vld [vmem:[#allocation2 + $0xeec] sm:$0xf0]  ;;  %v6251_v11 = vor.u32 %v7126_v59, %v6250_v58  ;;  %3378 = vmatpush.bf16.msra.mxu3 %v5883_v4 }
  0x80   :  { %v6506_v1 = vld [vmem:[#allocation2 + $0xfe0] sm:$0xf]  ;;  %v7190_v2 = vld [vmem:[#allocation2 + $0xfec] sm:$0xf0]  ;;  %v6379_v12 = vor.u32 %v7158_v62, %v6378_v61  ;;  %3353 = vmatmul.bf16.vlgmr.msra.gmra.mxu1 %v7530_v23 }
  0x81   :  { %v122_v3 = vld [vmem:[%s7668_s0 + $0x40] sm:$0xff]  ;;  %v124_v6 = vld [vmem:[%s7668_s0 + $0x50] sm:$0xff]  ;;  %v6507_v17 = vor.u32 %v7190_v2, %v6506_v1  ;;  %3384 = vmatpush.bf16.msrb.mxu0 %v6123_v5  ;;  %3397 = vmatpush.bf16.msrb.mxu1 %v6251_v11 }
  0x82   :  { %v6106_v13 = vld [vmem:[#allocation2 + $0xcc0] sm:$0xf]  ;;  %v7090_v14 = vld [vmem:[#allocation2 + $0xccc] sm:$0xf0]  ;;  %v7526_v18 = vpack.c.bf16 %v122_v3, %v122_v3  ;;  %v7528_v22 = vpack.c.bf16 %v124_v6, %v124_v6  ;;  %3410 = vmatpush.bf16.msrb.mxu2 %v6379_v12  ;;  %3379 = vmatmul.bf16.vlgmr.msra.gmra.mxu3 %v7532_v27 }
  0x83   :  { %v6234_v16 = vld [vmem:[#allocation2 + $0xdc0] sm:$0xf]  ;;  %v7122_v19 = vld [vmem:[#allocation2 + $0xdcc] sm:$0xf0]  ;;  %v6107_v28 = vor.u32 %v7090_v14, %v6106_v13  ;;  %3423 = vmatpush.bf16.msrb.mxu3 %v6507_v17 }
  0x84   :  { %v6362_v20 = vld [vmem:[#allocation2 + $0xec0] sm:$0xf]  ;;  %v7154_v21 = vld [vmem:[#allocation2 + $0xecc] sm:$0xf0]  ;;  %v6235_v29 = vor.u32 %v7122_v19, %v6234_v16  ;;  %3340 = vmatmul.bf16.vlgmr.msra.gmra.mxu0 %v7526_v18  ;;  %3366 = vmatmul.bf16.vlgmr.msra.gmra.mxu2 %v7528_v22 }
  0x85   :  { %v6490_v24 = vld [vmem:[#allocation2 + $0xfc0] sm:$0xf]  ;;  %v7186_v26 = vld [vmem:[#allocation2 + $0xfcc] sm:$0xf0]  ;;  %v6363_v30 = vor.u32 %v7154_v21, %v6362_v20  ;;  %3385 = vmatpush.bf16.msrb.mxu0 %v6107_v28 }
  0x86   :  { %v6090_v31 = vld [vmem:[#allocation2 + $0xca0] sm:$0xf]  ;;  %v7086_v32 = vld [vmem:[#allocation2 + $0xcac] sm:$0xf0]  ;;  %v6491_v35 = vor.u32 %v7186_v26, %v6490_v24  ;;  %3398 = vmatpush.bf16.msrb.mxu1 %v6235_v29 }
  0x87   :  { %v6218_v33 = vld [vmem:[#allocation2 + $0xda0] sm:$0xf]  ;;  %v7118_v36 = vld [vmem:[#allocation2 + $0xdac] sm:$0xf0]  ;;  %v6091_v44 = vor.u32 %v7086_v32, %v6090_v31  ;;  %3411 = vmatpush.bf16.msrb.mxu2 %v6363_v30 }
  0x88   :  { %v6346_v39 = vld [vmem:[#allocation2 + $0xea0] sm:$0xf]  ;;  %v7150_v41 = vld [vmem:[#allocation2 + $0xeac] sm:$0xf0]  ;;  %v6219_v45 = vor.u32 %v7118_v36, %v6218_v33  ;;  %3424 = vmatpush.bf16.msrb.mxu3 %v6491_v35 }
  0x89   :  { %v6474_v42 = vld [vmem:[#allocation2 + $0xfa0] sm:$0xf]  ;;  %v7182_v43 = vld [vmem:[#allocation2 + $0xfac] sm:$0xf0]  ;;  %v6347_v46 = vor.u32 %v7150_v41, %v6346_v39  ;;  %3386 = vmatpush.bf16.msrb.mxu0 %v6091_v44 }
  0x8a   :  { %v6074_v47 = vld [vmem:[#allocation2 + $0xc80] sm:$0xf]  ;;  %v7082_v48 = vld [vmem:[#allocation2 + $0xc8c] sm:$0xf0]  ;;  %v6475_v50 = vor.u32 %v7182_v43, %v6474_v42  ;;  %3399 = vmatpush.bf16.msrb.mxu1 %v6219_v45 }
  0x8b   :  { %v6202_v49 = vld [vmem:[#allocation2 + $0xd80] sm:$0xf]  ;;  %v7114_v51 = vld [vmem:[#allocation2 + $0xd8c] sm:$0xf0]  ;;  %v6075_v56 = vor.u32 %v7082_v48, %v6074_v47  ;;  %3412 = vmatpush.bf16.msrb.mxu2 %v6347_v46 }
  0x8c   :  { %v6330_v52 = vld [vmem:[#allocation2 + $0xe80] sm:$0xf]  ;;  %v7146_v53 = vld [vmem:[#allocation2 + $0xe8c] sm:$0xf0]  ;;  %v6203_v57 = vor.u32 %v7114_v51, %v6202_v49  ;;  %3425 = vmatpush.bf16.msrb.mxu3 %v6475_v50 }
  0x8d   :  { %v6458_v54 = vld [vmem:[#allocation2 + $0xf80] sm:$0xf]  ;;  %v7178_v55 = vld [vmem:[#allocation2 + $0xf8c] sm:$0xf0]  ;;  %v6331_v58 = vor.u32 %v7146_v53, %v6330_v52  ;;  %3387 = vmatpush.bf16.msrb.mxu0 %v6075_v56  ;;  %v6708_v52 = vld [vmem:[#allocation2 + $0xe4] sm:$0xf] }
  0x8e   :  { %v6058_v59 = vld [vmem:[#allocation2 + $0xc60] sm:$0xf]  ;;  %v7078_v60 = vld [vmem:[#allocation2 + $0xc6c] sm:$0xf0]  ;;  %v6459_v62 = vor.u32 %v7178_v55, %v6458_v54  ;;  %3400 = vmatpush.bf16.msrb.mxu1 %v6203_v57  ;;  %v4588_v53 = vld [vmem:[#allocation2 + $0xf0] sm:$0xf0] }
  0x8f   :  { %v6186_v61 = vld [vmem:[#allocation2 + $0xd60] sm:$0xf]  ;;  %v7110_v63 = vld [vmem:[#allocation2 + $0xd6c] sm:$0xf0]  ;;  %v6059_v4 = vor.u32 %v7078_v60, %v6058_v59  ;;  %3413 = vmatpush.bf16.msrb.mxu2 %v6331_v58  ;;  %v6740_v54 = vld [vmem:[#allocation2 + $0x1e4] sm:$0xf] }
  0x90   :  { %v6314_v0 = vld [vmem:[#allocation2 + $0xe60] sm:$0xf]  ;;  %v7142_v1 = vld [vmem:[#allocation2 + $0xe6c] sm:$0xf0]  ;;  %v6187_v5 = vor.u32 %v7110_v63, %v6186_v61  ;;  %3426 = vmatpush.bf16.msrb.mxu3 %v6459_v62  ;;  %v4716_v56 = vld [vmem:[#allocation2 + $0x1f0] sm:$0xf0] }
  0x91   :  { %v6442_v2 = vld [vmem:[#allocation2 + $0xf60] sm:$0xf]  ;;  %v7174_v3 = vld [vmem:[#allocation2 + $0xf6c] sm:$0xf0]  ;;  %v6315_v6 = vor.u32 %v7142_v1, %v6314_v0  ;;  %3388 = vmatpush.bf16.msrb.mxu0 %v6059_v4  ;;  %v6772_v57 = vld [vmem:[#allocation2 + $0x2e4] sm:$0xf]  ;;  %v4591_v1 = vor.u32 %v6708_v52, %v4588_v53 }
  0x92   :  { %v6042_v7 = vld [vmem:[#allocation2 + $0xc40] sm:$0xf]  ;;  %v7074_v10 = vld [vmem:[#allocation2 + $0xc4c] sm:$0xf0]  ;;  %v6443_v12 = vor.u32 %v7174_v3, %v6442_v2  ;;  %3401 = vmatpush.bf16.msrb.mxu1 %v6187_v5  ;;  %v4844_v58 = vld [vmem:[#allocation2 + $0x2f0] sm:$0xf0]  ;;  %v4719_v5 = vor.u32 %v6740_v54, %v4716_v56 }
  0x93   :  { %v6170_v11 = vld [vmem:[#allocation2 + $0xd40] sm:$0xf]  ;;  %v7106_v13 = vld [vmem:[#allocation2 + $0xd4c] sm:$0xf0]  ;;  %v6043_v20 = vor.u32 %v7074_v10, %v6042_v7  ;;  %3414 = vmatpush.bf16.msrb.mxu2 %v6315_v6  ;;  %v6804_v61 = vld [vmem:[#allocation2 + $0x3e4] sm:$0xf]  ;;  %v4847_v6 = vor.u32 %v6772_v57, %v4844_v58 }
  0x94   :  { %v6298_v14 = vld [vmem:[#allocation2 + $0xe40] sm:$0xf]  ;;  %v7138_v16 = vld [vmem:[#allocation2 + $0xe4c] sm:$0xf0]  ;;  %v6171_v21 = vor.u32 %v7106_v13, %v6170_v11  ;;  %3427 = vmatpush.bf16.msrb.mxu3 %v6443_v12  ;;  %v4972_v62 = vld [vmem:[#allocation2 + $0x3f0] sm:$0xf0] }
  0x95   :  { %v6426_v17 = vld [vmem:[#allocation2 + $0xf40] sm:$0xf]  ;;  %v7170_v19 = vld [vmem:[#allocation2 + $0xf4c] sm:$0xf0]  ;;  %v6299_v24 = vor.u32 %v7138_v16, %v6298_v14  ;;  %3389 = vmatpush.bf16.msrb.mxu0 %v6043_v20  ;;  %v127_v3 = vld [vmem:[%s7668_s0 + $0x68] sm:$0xff]  ;;  %v4975_v12 = vor.u32 %v6804_v61, %v4972_v62 }
  0x96   :  { %v6026_v26 = vld [vmem:[#allocation2 + $0xc20] sm:$0xf]  ;;  %v7070_v28 = vld [vmem:[#allocation2 + $0xc2c] sm:$0xf0]  ;;  %v6427_v30 = vor.u32 %v7170_v19, %v6426_v17  ;;  %3402 = vmatpush.bf16.msrb.mxu1 %v6171_v21  ;;  %v129_v4 = vld [vmem:[%s7668_s0 + $0x78] sm:$0xff]  ;;  %v7554_v20 = vpack.c.bf16 %v127_v3, %v127_v3 }
  0x97   :  { %v6154_v29 = vld [vmem:[#allocation2 + $0xd20] sm:$0xf]  ;;  %v7102_v31 = vld [vmem:[#allocation2 + $0xd2c] sm:$0xf0]  ;;  %v6027_v39 = vor.u32 %v7070_v28, %v6026_v26  ;;  %3415 = vmatpush.bf16.msrb.mxu2 %v6299_v24  ;;  %v6704_v7 = vld [vmem:[#allocation2 + $0xc4] sm:$0xf]  ;;  %v7556_v26 = vpack.c.bf16 %v129_v4, %v129_v4 }
  0x98   :  { %v6282_v32 = vld [vmem:[#allocation2 + $0xe20] sm:$0xf]  ;;  %v7134_v33 = vld [vmem:[#allocation2 + $0xe2c] sm:$0xf0]  ;;  %v6155_v43 = vor.u32 %v7102_v31, %v6154_v29  ;;  %3428 = vmatpush.bf16.msrb.mxu3 %v6427_v30  ;;  %v4572_v10 = vld [vmem:[#allocation2 + $0xd0] sm:$0xf0] }
  0x99   :  { %v6410_v35 = vld [vmem:[#allocation2 + $0xf20] sm:$0xf]  ;;  %v7166_v36 = vld [vmem:[#allocation2 + $0xf2c] sm:$0xf0]  ;;  %v6283_v44 = vor.u32 %v7134_v33, %v6282_v32  ;;  %3390 = vmatpush.bf16.msrb.mxu0 %v6027_v39  ;;  %v6736_v11 = vld [vmem:[#allocation2 + $0x1c4] sm:$0xf]  ;;  %v4575_v28 = vor.u32 %v6704_v7, %v4572_v10 }
  0x9a   :  { %v6010_v41 = vld [vmem:[#allocation2 + $0xc00] sm:$0xf]  ;;  %v7066_v42 = vld [vmem:[#allocation2 + $0xc0c] sm:$0xf0]  ;;  %v6411_v48 = vor.u32 %v7166_v36, %v6410_v35  ;;  %3403 = vmatpush.bf16.msrb.mxu1 %v6155_v43  ;;  %v4700_v14 = vld [vmem:[#allocation2 + $0x1d0] sm:$0xf0] }
  0x9b   :  { %v6138_v45 = vld [vmem:[#allocation2 + $0xd00] sm:$0xf]  ;;  %v7098_v46 = vld [vmem:[#allocation2 + $0xd0c] sm:$0xf0]  ;;  %v6011_v55 = vor.u32 %v7066_v42, %v6010_v41  ;;  %3416 = vmatpush.bf16.msrb.mxu2 %v6283_v44  ;;  %v6768_v16 = vld [vmem:[#allocation2 + $0x2c4] sm:$0xf]  ;;  %v4703_v29 = vor.u32 %v6736_v11, %v4700_v14 }
  0x9c   :  { %v6266_v47 = vld [vmem:[#allocation2 + $0xe00] sm:$0xf]  ;;  %v7130_v49 = vld [vmem:[#allocation2 + $0xe0c] sm:$0xf0]  ;;  %v6139_v59 = vor.u32 %v7098_v46, %v6138_v45  ;;  %3429 = vmatpush.bf16.msrb.mxu3 %v6411_v48  ;;  %v4828_v17 = vld [vmem:[#allocation2 + $0x2d0] sm:$0xf0] }
  0x9d   :  { %v6394_v50 = vld [vmem:[#allocation2 + $0xf00] sm:$0xf]  ;;  %v7162_v51 = vld [vmem:[#allocation2 + $0xf0c] sm:$0xf0]  ;;  %v6267_v60 = vor.u32 %v7130_v49, %v6266_v47  ;;  %3391 = vmatpush.bf16.msrb.mxu0 %v6011_v55  ;;  %v6800_v21 = vld [vmem:[#allocation2 + $0x3c4] sm:$0xf]  ;;  %v4831_v30 = vor.u32 %v6768_v16, %v4828_v17 }
  0x9e   :  { %v126_v63 = vld [vmem:[%s7668_s0 + $0x60] sm:$0xff]  ;;  %v6395_v0 = vor.u32 %v7162_v51, %v6394_v50  ;;  %v128_v2 = vld [vmem:[%s7668_s0 + $0x70] sm:$0xff]  ;;  %3404 = vmatpush.bf16.msrb.mxu1 %v6139_v59 }
  0x9f   :  { %v7550_v13 = vpack.c.bf16 %v126_v63, %v126_v63  ;;  %3417 = vmatpush.bf16.msrb.mxu2 %v6267_v60  ;;  %v7552_v19 = vpack.c.bf16 %v128_v2, %v128_v2  ;;  %v4956_v24 = vld [vmem:[#allocation2 + $0x3d0] sm:$0xf0]  ;;  %v6700_v31 = vld [vmem:[#allocation2 + $0xa4] sm:$0xf] }
  0xa0   :  { %3430 = vmatpush.bf16.msrb.mxu3 %v6395_v0  ;;  %v4556_v32 = vld [vmem:[#allocation2 + $0xb0] sm:$0xf0]  ;;  %v6732_v33 = vld [vmem:[#allocation2 + $0x1a4] sm:$0xf]  ;;  %v4959_v35 = vor.u32 %v6800_v21, %v4956_v24 }
  0xa1   :  { %3436 = vmatpush.bf16.msra.mxu0 %v4591_v1  ;;  %v4684_v36 = vld [vmem:[#allocation2 + $0x1b0] sm:$0xf0]  ;;  %v6764_v39 = vld [vmem:[#allocation2 + $0x2a4] sm:$0xf]  ;;  %3405 = vmatmul.bf16.vlgmr.msrb.gmra.mxu1 %v7554_v20  ;;  %v4559_v44 = vor.u32 %v6700_v31, %v4556_v32 }
  0xa2   :  { %3449 = vmatpush.bf16.msra.mxu1 %v4719_v5  ;;  %3392 = vmatmul.bf16.vlgmr.msrb.gmra.mxu0 %v7550_v13  ;;  %v4812_v41 = vld [vmem:[#allocation2 + $0x2b0] sm:$0xf0]  ;;  %v6796_v42 = vld [vmem:[#allocation2 + $0x3a4] sm:$0xf]  ;;  %v4687_v45 = vor.u32 %v6732_v33, %v4684_v36 }
  0xa3   :  { %3462 = vmatpush.bf16.msra.mxu2 %v4847_v6  ;;  %v4940_v43 = vld [vmem:[#allocation2 + $0x3b0] sm:$0xf0]  ;;  %3431 = vmatmul.bf16.vlgmr.msrb.gmra.mxu3 %v7556_v26  ;;  %v4815_v46 = vor.u32 %v6764_v39, %v4812_v41  ;;  %v6696_v47 = vld [vmem:[#allocation2 + $0x84] sm:$0xf] }
  0xa4   :  { %3475 = vmatpush.bf16.msra.mxu3 %v4975_v12  ;;  %3418 = vmatmul.bf16.vlgmr.msrb.gmra.mxu2 %v7552_v19  ;;  %v4540_v48 = vld [vmem:[#allocation2 + $0x90] sm:$0xf0]  ;;  %v6728_v49 = vld [vmem:[#allocation2 + $0x184] sm:$0xf]  ;;  %v4943_v50 = vor.u32 %v6796_v42, %v4940_v43 }
  0xa5   :  { %3437 = vmatpush.bf16.msra.mxu0 %v4575_v28  ;;  %v4668_v51 = vld [vmem:[#allocation2 + $0x190] sm:$0xf0]  ;;  %v6760_v52 = vld [vmem:[#allocation2 + $0x284] sm:$0xf]  ;;  %v4543_v56 = vor.u32 %v6696_v47, %v4540_v48 }
  0xa6   :  { %3450 = vmatpush.bf16.msra.mxu1 %v4703_v29  ;;  %v4796_v53 = vld [vmem:[#allocation2 + $0x290] sm:$0xf0]  ;;  %v6792_v54 = vld [vmem:[#allocation2 + $0x384] sm:$0xf]  ;;  %v4671_v57 = vor.u32 %v6728_v49, %v4668_v51 }
  0xa7   :  { %3463 = vmatpush.bf16.msra.mxu2 %v4831_v30  ;;  %v4924_v55 = vld [vmem:[#allocation2 + $0x390] sm:$0xf0]  ;;  %v4799_v58 = vor.u32 %v6760_v52, %v4796_v53  ;;  %v6692_v59 = vld [vmem:[#allocation2 + $0x64] sm:$0xf] }
  0xa8   :  { %3476 = vmatpush.bf16.msra.mxu3 %v4959_v35  ;;  %v4524_v60 = vld [vmem:[#allocation2 + $0x70] sm:$0xf0]  ;;  %v6724_v61 = vld [vmem:[#allocation2 + $0x164] sm:$0xf]  ;;  %v4927_v62 = vor.u32 %v6792_v54, %v4924_v55 }
  0xa9   :  { %3438 = vmatpush.bf16.msra.mxu0 %v4559_v44  ;;  %v4652_v63 = vld [vmem:[#allocation2 + $0x170] sm:$0xf0]  ;;  %v6756_v0 = vld [vmem:[#allocation2 + $0x264] sm:$0xf]  ;;  %v4527_v4 = vor.u32 %v6692_v59, %v4524_v60 }
  0xaa   :  { %3451 = vmatpush.bf16.msra.mxu1 %v4687_v45  ;;  %v4780_v1 = vld [vmem:[#allocation2 + $0x270] sm:$0xf0]  ;;  %v6788_v2 = vld [vmem:[#allocation2 + $0x364] sm:$0xf]  ;;  %v4655_v5 = vor.u32 %v6724_v61, %v4652_v63 }
  0xab   :  { %3464 = vmatpush.bf16.msra.mxu2 %v4815_v46  ;;  %v4908_v3 = vld [vmem:[#allocation2 + $0x370] sm:$0xf0]  ;;  %v4783_v6 = vor.u32 %v6756_v0, %v4780_v1  ;;  %v6688_v7 = vld [vmem:[#allocation2 + $0x44] sm:$0xf] }
  0xac   :  { %3477 = vmatpush.bf16.msra.mxu3 %v4943_v50  ;;  %v4508_v10 = vld [vmem:[#allocation2 + $0x50] sm:$0xf0]  ;;  %v6720_v11 = vld [vmem:[#allocation2 + $0x144] sm:$0xf]  ;;  %v4911_v12 = vor.u32 %v6788_v2, %v4908_v3 }
  0xad   :  { %3439 = vmatpush.bf16.msra.mxu0 %v4543_v56  ;;  %v4636_v14 = vld [vmem:[#allocation2 + $0x150] sm:$0xf0]  ;;  %v6752_v16 = vld [vmem:[#allocation2 + $0x244] sm:$0xf]  ;;  %v4511_v28 = vor.u32 %v6688_v7, %v4508_v10 }
  0xae   :  { %3452 = vmatpush.bf16.msra.mxu1 %v4671_v57  ;;  %v4764_v17 = vld [vmem:[#allocation2 + $0x250] sm:$0xf0]  ;;  %v6784_v21 = vld [vmem:[#allocation2 + $0x344] sm:$0xf]  ;;  %v4639_v29 = vor.u32 %v6720_v11, %v4636_v14 }
  0xaf   :  { %3465 = vmatpush.bf16.msra.mxu2 %v4799_v58  ;;  %v4892_v24 = vld [vmem:[#allocation2 + $0x350] sm:$0xf0]  ;;  %v4767_v30 = vor.u32 %v6752_v16, %v4764_v17  ;;  %v6684_v31 = vld [vmem:[#allocation2 + $0x24] sm:$0xf] }
  0xb0   :  { %3478 = vmatpush.bf16.msra.mxu3 %v4927_v62  ;;  %v4492_v32 = vld [vmem:[#allocation2 + $0x30] sm:$0xf0]  ;;  %v6716_v33 = vld [vmem:[#allocation2 + $0x124] sm:$0xf]  ;;  %v4895_v35 = vor.u32 %v6784_v21, %v4892_v24 }
  0xb1   :  { %3440 = vmatpush.bf16.msra.mxu0 %v4527_v4  ;;  %v4620_v36 = vld [vmem:[#allocation2 + $0x130] sm:$0xf0]  ;;  %v6748_v39 = vld [vmem:[#allocation2 + $0x224] sm:$0xf]  ;;  %v4495_v44 = vor.u32 %v6684_v31, %v4492_v32 }
  0xb2   :  { %3453 = vmatpush.bf16.msra.mxu1 %v4655_v5  ;;  %v4748_v41 = vld [vmem:[#allocation2 + $0x230] sm:$0xf0]  ;;  %v6780_v42 = vld [vmem:[#allocation2 + $0x324] sm:$0xf]  ;;  %v4623_v47 = vor.u32 %v6716_v33, %v4620_v36 }
  0xb3   :  { %3466 = vmatpush.bf16.msra.mxu2 %v4783_v6  ;;  %v4876_v43 = vld [vmem:[#allocation2 + $0x330] sm:$0xf0]  ;;  %v6680_v45 = vld [vmem:[#allocation2 + $0x4] sm:$0xf]  ;;  %v4751_v48 = vor.u32 %v6748_v39, %v4748_v41 }
  0xb4   :  { %3479 = vmatpush.bf16.msra.mxu3 %v4911_v12  ;;  %v4476_v46 = vld [vmem:[#allocation2 + $0x10] sm:$0xf0]  ;;  %v6712_v49 = vld [vmem:[#allocation2 + $0x104] sm:$0xf]  ;;  %v4879_v52 = vor.u32 %v6780_v42, %v4876_v43 }
  0xb5   :  { %3441 = vmatpush.bf16.msra.mxu0 %v4511_v28  ;;  %v4604_v50 = vld [vmem:[#allocation2 + $0x110] sm:$0xf0]  ;;  %v6744_v51 = vld [vmem:[#allocation2 + $0x204] sm:$0xf]  ;;  %v4479_v59 = vor.u32 %v6680_v45, %v4476_v46 }
  0xb6   :  { %3454 = vmatpush.bf16.msra.mxu1 %v4639_v29  ;;  %v4732_v53 = vld [vmem:[#allocation2 + $0x210] sm:$0xf0]  ;;  %v6776_v54 = vld [vmem:[#allocation2 + $0x304] sm:$0xf]  ;;  %v4607_v63 = vor.u32 %v6712_v49, %v4604_v50 }
  0xb7   :  { %3467 = vmatpush.bf16.msra.mxu2 %v4767_v30  ;;  %v4860_v55 = vld [vmem:[#allocation2 + $0x310] sm:$0xf0]  ;;  %v6836_v56 = vld [vmem:[#allocation2 + $0x4e4] sm:$0xf]  ;;  %v4735_v0 = vor.u32 %v6744_v51, %v4732_v53 }
  0xb8   :  { %3480 = vmatpush.bf16.msra.mxu3 %v4895_v35  ;;  %v5100_v57 = vld [vmem:[#allocation2 + $0x4f0] sm:$0xf0]  ;;  %v6868_v58 = vld [vmem:[#allocation2 + $0x5e4] sm:$0xf]  ;;  %v4863_v3 = vor.u32 %v6776_v54, %v4860_v55  ;;  %v658_v54 = vld [vmem:[#allocation4] sm:$0xf] }
  0xb9   :  { %3442 = vmatpush.bf16.msra.mxu0 %v4495_v44  ;;  %v5228_v60 = vld [vmem:[#allocation2 + $0x5f0] sm:$0xf0]  ;;  %v6900_v61 = vld [vmem:[#allocation2 + $0x6e4] sm:$0xf]  ;;  %v5103_v4 = vor.u32 %v6836_v56, %v5100_v57 }
  0xba   :  { %v5356_v62 = vld [vmem:[#allocation2 + $0x6f0] sm:$0xf0]  ;;  %3455 = vmatpush.bf16.msra.mxu1 %v4623_v47  ;;  %v6932_v1 = vld [vmem:[#allocation2 + $0x7e4] sm:$0xf]  ;;  %v5231_v5 = vor.u32 %v6868_v58, %v5228_v60 }
  0xbb   :  { %3468 = vmatpush.bf16.msra.mxu2 %v4751_v48  ;;  %v5484_v2 = vld [vmem:[#allocation2 + $0x7f0] sm:$0xf0]  ;;  %v5359_v6 = vor.u32 %v6900_v61, %v5356_v62  ;;  %v6832_v7 = vld [vmem:[#allocation2 + $0x4c4] sm:$0xf] }
  0xbc   :  { %3481 = vmatpush.bf16.msra.mxu3 %v4879_v52  ;;  %v5084_v10 = vld [vmem:[#allocation2 + $0x4d0] sm:$0xf0]  ;;  %v6864_v11 = vld [vmem:[#allocation2 + $0x5c4] sm:$0xf]  ;;  %v5487_v12 = vor.u32 %v6932_v1, %v5484_v2 }
  0xbd   :  { %3443 = vmatpush.bf16.msra.mxu0 %v4479_v59  ;;  %v5212_v14 = vld [vmem:[#allocation2 + $0x5d0] sm:$0xf0]  ;;  %v6896_v16 = vld [vmem:[#allocation2 + $0x6c4] sm:$0xf]  ;;  %v5087_v28 = vor.u32 %v6832_v7, %v5084_v10 }
  0xbe   :  { %v5340_v17 = vld [vmem:[#allocation2 + $0x6d0] sm:$0xf0]  ;;  %3456 = vmatpush.bf16.msra.mxu1 %v4607_v63  ;;  %v6928_v21 = vld [vmem:[#allocation2 + $0x7c4] sm:$0xf]  ;;  %v5215_v29 = vor.u32 %v6864_v11, %v5212_v14  ;;  %v660_v63 = vperm.slane %v658_v54, 0 }
  0xbf   :  { %3469 = vmatpush.bf16.msra.mxu2 %v4735_v0  ;;  %v5468_v24 = vld [vmem:[#allocation2 + $0x7d0] sm:$0xf0]  ;;  %v5343_v30 = vor.u32 %v6896_v16, %v5340_v17  ;;  %v6828_v31 = vld [vmem:[#allocation2 + $0x4a4] sm:$0xf] }
  0xc0   :  { %3482 = vmatpush.bf16.msra.mxu3 %v4863_v3  ;;  %v5068_v32 = vld [vmem:[#allocation2 + $0x4b0] sm:$0xf0]  ;;  %v6860_v33 = vld [vmem:[#allocation2 + $0x5a4] sm:$0xf]  ;;  %v5471_v35 = vor.u32 %v6928_v21, %v5468_v24  ;;  %3444 = vmatmul.bf16.vlgmr.msra.gmra.mxu0 %v7474_v9 }
  0xc1   :  { %3488 = vmatpush.bf16.msrb.mxu0 %v5103_v4  ;;  %v5196_v36 = vld [vmem:[#allocation2 + $0x5b0] sm:$0xf0]  ;;  %v6892_v39 = vld [vmem:[#allocation2 + $0x6a4] sm:$0xf]  ;;  %v5071_v44 = vor.u32 %v6828_v31, %v5068_v32  ;;  %3457 = vmatmul.bf16.vlgmr.msra.gmra.mxu1 %v7487_v25 }
  0xc2   :  { %3501 = vmatpush.bf16.msrb.mxu1 %v5231_v5  ;;  %v5324_v41 = vld [vmem:[#allocation2 + $0x6b0] sm:$0xf0]  ;;  %3470 = vmatmul.bf16.vlgmr.msra.gmra.mxu2 %v7472_v8  ;;  %v6924_v42 = vld [vmem:[#allocation2 + $0x7a4] sm:$0xf]  ;;  %v5199_v46 = vor.u32 %v6860_v33, %v5196_v36  ;;  %v3250_v33 = vpop.f32.mrf.mxu1 }
  0xc3   :  { %3514 = vmatpush.bf16.msrb.mxu2 %v5359_v6  ;;  %v5452_v43 = vld [vmem:[#allocation2 + $0x7b0] sm:$0xf0]  ;;  %3483 = vmatmul.bf16.vlgmr.msra.gmra.mxu3 %v7479_v15  ;;  %v6824_v45 = vld [vmem:[#allocation2 + $0x484] sm:$0xf]  ;;  %v5327_v47 = vor.u32 %v6892_v39, %v5324_v41 }
  0xc4   :  { %3527 = vmatpush.bf16.msrb.mxu3 %v5487_v12  ;;  %v5052_v48 = vld [vmem:[#allocation2 + $0x490] sm:$0xf0]  ;;  %v6856_v49 = vld [vmem:[#allocation2 + $0x584] sm:$0xf]  ;;  %v5455_v51 = vor.u32 %v6924_v42, %v5452_v43 }
  0xc5   :  { %3489 = vmatpush.bf16.msrb.mxu0 %v5087_v28  ;;  %v5180_v50 = vld [vmem:[#allocation2 + $0x590] sm:$0xf0]  ;;  %v6888_v52 = vld [vmem:[#allocation2 + $0x684] sm:$0xf]  ;;  %v5055_v57 = vor.u32 %v6824_v45, %v5052_v48 }
  0xc6   :  { %3502 = vmatpush.bf16.msrb.mxu1 %v5215_v29  ;;  %v5308_v53 = vld [vmem:[#allocation2 + $0x690] sm:$0xf0]  ;;  %v6920_v55 = vld [vmem:[#allocation2 + $0x784] sm:$0xf]  ;;  %v5183_v59 = vor.u32 %v6856_v49, %v5180_v50 }
  0xc7   :  { %3515 = vmatpush.bf16.msrb.mxu2 %v5343_v30  ;;  %v5436_v56 = vld [vmem:[#allocation2 + $0x790] sm:$0xf0]  ;;  %v6820_v58 = vld [vmem:[#allocation2 + $0x464] sm:$0xf]  ;;  %v5311_v60 = vor.u32 %v6888_v52, %v5308_v53  ;;  %v3276_v52 = vpop.f32.mrf.mxu3 }
  0xc8   :  { %3528 = vmatpush.bf16.msrb.mxu3 %v5471_v35  ;;  %v5036_v61 = vld [vmem:[#allocation2 + $0x470] sm:$0xf0]  ;;  %v6852_v62 = vld [vmem:[#allocation2 + $0x564] sm:$0xf]  ;;  %v5439_v0 = vor.u32 %v6920_v55, %v5436_v56  ;;  %v3237_v7 = vpop.f32.mrf.mxu0 }
  0xc9   :  { %3490 = vmatpush.bf16.msrb.mxu0 %v5071_v44  ;;  %v5164_v1 = vld [vmem:[#allocation2 + $0x570] sm:$0xf0]  ;;  %v6884_v2 = vld [vmem:[#allocation2 + $0x664] sm:$0xf]  ;;  %v5039_v6 = vor.u32 %v6820_v58, %v5036_v61  ;;  %v3238_v17 = vadd.f32 %v3237_v7, %v660_v63 }
  0xca   :  { %3503 = vmatpush.bf16.msrb.mxu1 %v5199_v46  ;;  %v5292_v3 = vld [vmem:[#allocation2 + $0x670] sm:$0xf0]  ;;  %v6916_v4 = vld [vmem:[#allocation2 + $0x764] sm:$0xf]  ;;  %v5167_v10 = vor.u32 %v6852_v62, %v5164_v1 }
  0xcb   :  { %3516 = vmatpush.bf16.msrb.mxu2 %v5327_v47  ;;  %v5420_v5 = vld [vmem:[#allocation2 + $0x770] sm:$0xf0]  ;;  %v5295_v11 = vor.u32 %v6884_v2, %v5292_v3  ;;  %v6816_v12 = vld [vmem:[#allocation2 + $0x444] sm:$0xf]  ;;  %v3251_v43 = vadd.f32 %v3250_v33, %v3238_v17 }
  0xcc   :  { %3529 = vmatpush.bf16.msrb.mxu3 %v5455_v51  ;;  %v5020_v14 = vld [vmem:[#allocation2 + $0x450] sm:$0xf0]  ;;  %v6848_v16 = vld [vmem:[#allocation2 + $0x544] sm:$0xf]  ;;  %v5423_v21 = vor.u32 %v6916_v4, %v5420_v5 }
  0xcd   :  { %3491 = vmatpush.bf16.msrb.mxu0 %v5055_v57  ;;  %v5148_v24 = vld [vmem:[#allocation2 + $0x550] sm:$0xf0]  ;;  %v6880_v28 = vld [vmem:[#allocation2 + $0x644] sm:$0xf]  ;;  %v5023_v32 = vor.u32 %v6816_v12, %v5020_v14  ;;  %v3263_v48 = vpop.f32.mrf.mxu2  ;;  %v3252_v12 = vpop.f32.mrf.mxu1 }
  0xce   :  { %3504 = vmatpush.bf16.msrb.mxu1 %v5183_v59  ;;  %v5276_v29 = vld [vmem:[#allocation2 + $0x650] sm:$0xf0]  ;;  %v6912_v30 = vld [vmem:[#allocation2 + $0x744] sm:$0xf]  ;;  %v5151_v35 = vor.u32 %v6848_v16, %v5148_v24  ;;  %v3264_v51 = vadd.f32 %v3263_v48, %v3251_v43 }
  0xcf   :  { %3517 = vmatpush.bf16.msrb.mxu2 %v5311_v60  ;;  %v5404_v31 = vld [vmem:[#allocation2 + $0x750] sm:$0xf0]  ;;  %v5279_v36 = vor.u32 %v6880_v28, %v5276_v29  ;;  %v6812_v39 = vld [vmem:[#allocation2 + $0x424] sm:$0xf] }
  0xd0   :  { %3530 = vmatpush.bf16.msrb.mxu3 %v5439_v0  ;;  %v5004_v41 = vld [vmem:[#allocation2 + $0x430] sm:$0xf0]  ;;  %v6844_v42 = vld [vmem:[#allocation2 + $0x524] sm:$0xf]  ;;  %v5407_v44 = vor.u32 %v6912_v30, %v5404_v31  ;;  %v3239_v56 = vpop.f32.mrf.mxu0  ;;  %v7566_v62 = vadd.f32 %v3276_v52, %v3264_v51 }
  0xd1   :  { %3492 = vmatpush.bf16.msrb.mxu0 %v5039_v6  ;;  %v5132_v45 = vld [vmem:[#allocation2 + $0x530] sm:$0xf0]  ;;  %v6876_v46 = vld [vmem:[#allocation2 + $0x624] sm:$0xf]  ;;  %v5007_v53 = vor.u32 %v6812_v39, %v5004_v41 }
  0xd2   :  { %3505 = vmatpush.bf16.msrb.mxu1 %v5167_v10  ;;  %v5260_v47 = vld [vmem:[#allocation2 + $0x630] sm:$0xf0]  ;;  %v6908_v49 = vld [vmem:[#allocation2 + $0x724] sm:$0xf]  ;;  %v5135_v57 = vor.u32 %v6844_v42, %v5132_v45 }
  0xd3   :  { %3518 = vmatpush.bf16.msrb.mxu2 %v5295_v11  ;;  %v5388_v50 = vld [vmem:[#allocation2 + $0x730] sm:$0xf0]  ;;  %v6808_v54 = vld [vmem:[#allocation2 + $0x404] sm:$0xf]  ;;  %v5263_v58 = vor.u32 %v6876_v46, %v5260_v47 }
  0xd4   :  { %3531 = vmatpush.bf16.msrb.mxu3 %v5423_v21  ;;  %v4988_v55 = vld [vmem:[#allocation2 + $0x410] sm:$0xf0]  ;;  %v6840_v59 = vld [vmem:[#allocation2 + $0x504] sm:$0xf]  ;;  %v5391_v63 = vor.u32 %v6908_v49, %v5388_v50 }
  0xd5   :  { %3493 = vmatpush.bf16.msrb.mxu0 %v5023_v32  ;;  %v5116_v60 = vld [vmem:[#allocation2 + $0x510] sm:$0xf0]  ;;  %v6872_v61 = vld [vmem:[#allocation2 + $0x604] sm:$0xf]  ;;  %v4991_v6 = vor.u32 %v6808_v54, %v4988_v55  ;;  %v3265_v29 = vpop.f32.mrf.mxu2 }
  0xd6   :  { %3506 = vmatpush.bf16.msrb.mxu1 %v5151_v35  ;;  %v5244_v0 = vld [vmem:[#allocation2 + $0x610] sm:$0xf0]  ;;  %v6904_v1 = vld [vmem:[#allocation2 + $0x704] sm:$0xf]  ;;  %v5119_v14 = vor.u32 %v6840_v59, %v5116_v60 }
  0xd7   :  { %3519 = vmatpush.bf16.msrb.mxu2 %v5279_v36  ;;  %v5372_v2 = vld [vmem:[#allocation2 + $0x710] sm:$0xf0]  ;;  %v6964_v3 = vld [vmem:[#allocation2 + $0x8e4] sm:$0xf]  ;;  %v5247_v16 = vor.u32 %v6872_v61, %v5244_v0  ;;  %v3278_v36 = vpop.f32.mrf.mxu3 }
  0xd8   :  { %3532 = vmatpush.bf16.msrb.mxu3 %v5407_v44  ;;  %v5612_v4 = vld [vmem:[#allocation2 + $0x8f0] sm:$0xf0]  ;;  %v6996_v5 = vld [vmem:[#allocation2 + $0x9e4] sm:$0xf]  ;;  %v5375_v24 = vor.u32 %v6904_v1, %v5372_v2 }
  0xd9   :  { %3494 = vmatpush.bf16.msrb.mxu0 %v5007_v53  ;;  %v5740_v7 = vld [vmem:[#allocation2 + $0x9f0] sm:$0xf0]  ;;  %v7028_v10 = vld [vmem:[#allocation2 + $0xae4] sm:$0xf]  ;;  %v5615_v28 = vor.u32 %v6964_v3, %v5612_v4 }
  0xda   :  { %v5868_v11 = vld [vmem:[#allocation2 + $0xaf0] sm:$0xf0]  ;;  %3507 = vmatpush.bf16.msrb.mxu1 %v5135_v57  ;;  %v7060_v17 = vld [vmem:[#allocation2 + $0xbe4] sm:$0xf]  ;;  %v5743_v30 = vor.u32 %v6996_v5, %v5740_v7 }
  0xdb   :  { %3520 = vmatpush.bf16.msrb.mxu2 %v5263_v58  ;;  %v5996_v21 = vld [vmem:[#allocation2 + $0xbf0] sm:$0xf0]  ;;  %v5871_v31 = vor.u32 %v7028_v10, %v5868_v11  ;;  %v6960_v32 = vld [vmem:[#allocation2 + $0x8c4] sm:$0xf] }
  0xdc   :  { %3533 = vmatpush.bf16.msrb.mxu3 %v5391_v63  ;;  %v5596_v33 = vld [vmem:[#allocation2 + $0x8d0] sm:$0xf0]  ;;  %v6992_v35 = vld [vmem:[#allocation2 + $0x9c4] sm:$0xf]  ;;  %v5999_v39 = vor.u32 %v7060_v17, %v5996_v21 }
  0xdd   :  { %3495 = vmatpush.bf16.msrb.mxu0 %v4991_v6  ;;  %v5724_v41 = vld [vmem:[#allocation2 + $0x9d0] sm:$0xf0]  ;;  %v7024_v42 = vld [vmem:[#allocation2 + $0xac4] sm:$0xf]  ;;  %v5599_v46 = vor.u32 %v6960_v32, %v5596_v33 }
  0xde   :  { %v5852_v43 = vld [vmem:[#allocation2 + $0xad0] sm:$0xf0]  ;;  %3508 = vmatpush.bf16.msrb.mxu1 %v5119_v14  ;;  %v7056_v44 = vld [vmem:[#allocation2 + $0xbc4] sm:$0xf]  ;;  %v5727_v47 = vor.u32 %v6992_v35, %v5724_v41 }
  0xdf   :  { %3521 = vmatpush.bf16.msrb.mxu2 %v5247_v16  ;;  %v5980_v45 = vld [vmem:[#allocation2 + $0xbd0] sm:$0xf0]  ;;  %v5855_v48 = vor.u32 %v7024_v42, %v5852_v43  ;;  %v6956_v49 = vld [vmem:[#allocation2 + $0x8a4] sm:$0xf] }
  0xe0   :  { %3534 = vmatpush.bf16.msrb.mxu3 %v5375_v24  ;;  %v5580_v50 = vld [vmem:[#allocation2 + $0x8b0] sm:$0xf0]  ;;  %v6988_v51 = vld [vmem:[#allocation2 + $0x9a4] sm:$0xf]  ;;  %v5983_v52 = vor.u32 %v7056_v44, %v5980_v45  ;;  %3496 = vmatmul.bf16.vlgmr.msrb.gmra.mxu0 %v7504_v37  ;;  %v3302_v24 = vpop.f32.mrf.mxu1 }
  0xe1   :  { %3540 = vmatpush.bf16.msra.mxu0 %v5615_v28  ;;  %v5708_v53 = vld [vmem:[#allocation2 + $0x9b0] sm:$0xf0]  ;;  %v7020_v54 = vld [vmem:[#allocation2 + $0xaa4] sm:$0xf]  ;;  %v5583_v58 = vor.u32 %v6956_v49, %v5580_v50  ;;  %3509 = vmatmul.bf16.vlgmr.msrb.gmra.mxu1 %v7508_v40  ;;  %v3289_v10 = vpop.f32.mrf.mxu0 }
  0xe2   :  { %3553 = vmatpush.bf16.msra.mxu1 %v5743_v30  ;;  %3522 = vmatmul.bf16.vlgmr.msrb.gmra.mxu2 %v7502_v34  ;;  %v5836_v55 = vld [vmem:[#allocation2 + $0xab0] sm:$0xf0]  ;;  %v7052_v56 = vld [vmem:[#allocation2 + $0xba4] sm:$0xf]  ;;  %v5711_v59 = vor.u32 %v6988_v51, %v5708_v53  ;;  %v3290_v21 = vadd.f32 %v3289_v10, %v7566_v62 }
  0xe3   :  { %3566 = vmatpush.bf16.msra.mxu2 %v5871_v31  ;;  %v5964_v57 = vld [vmem:[#allocation2 + $0xbb0] sm:$0xf0]  ;;  %3535 = vmatmul.bf16.vlgmr.msrb.gmra.mxu3 %v7506_v38  ;;  %v5839_v60 = vor.u32 %v7020_v54, %v5836_v55  ;;  %v6952_v61 = vld [vmem:[#allocation2 + $0x884] sm:$0xf] }
  0xe4   :  { %3579 = vmatpush.bf16.msra.mxu3 %v5999_v39  ;;  %v5564_v63 = vld [vmem:[#allocation2 + $0x890] sm:$0xf0]  ;;  %v6984_v0 = vld [vmem:[#allocation2 + $0x984] sm:$0xf]  ;;  %v5967_v1 = vor.u32 %v7052_v56, %v5964_v57  ;;  %v3303_v35 = vadd.f32 %v3302_v24, %v3290_v21  ;;  %v3328_v50 = vpop.f32.mrf.mxu3 }
  0xe5   :  { %3541 = vmatpush.bf16.msra.mxu0 %v5599_v46  ;;  %v5692_v2 = vld [vmem:[#allocation2 + $0x990] sm:$0xf0]  ;;  %v7016_v3 = vld [vmem:[#allocation2 + $0xa84] sm:$0xf]  ;;  %v5567_v7 = vor.u32 %v6952_v61, %v5564_v63 }
  0xe6   :  { %3554 = vmatpush.bf16.msra.mxu1 %v5727_v47  ;;  %v5820_v4 = vld [vmem:[#allocation2 + $0xa90] sm:$0xf0]  ;;  %v7048_v5 = vld [vmem:[#allocation2 + $0xb84] sm:$0xf]  ;;  %v5695_v11 = vor.u32 %v6984_v0, %v5692_v2  ;;  %v3315_v45 = vpop.f32.mrf.mxu2 }
  0xe7   :  { %3567 = vmatpush.bf16.msra.mxu2 %v5855_v48  ;;  %v5948_v6 = vld [vmem:[#allocation2 + $0xb90] sm:$0xf0]  ;;  %v5823_v12 = vor.u32 %v7016_v3, %v5820_v4  ;;  %v6948_v14 = vld [vmem:[#allocation2 + $0x864] sm:$0xf]  ;;  %v3316_v49 = vadd.f32 %v3315_v45, %v3303_v35 }
  0xe8   :  { %3580 = vmatpush.bf16.msra.mxu3 %v5983_v52  ;;  %v5548_v16 = vld [vmem:[#allocation2 + $0x870] sm:$0xf0]  ;;  %v6980_v17 = vld [vmem:[#allocation2 + $0x964] sm:$0xf]  ;;  %v5951_v28 = vor.u32 %v7048_v5, %v5948_v6  ;;  %v3304_v61 = vpop.f32.mrf.mxu1 }
  0xe9   :  { %3542 = vmatpush.bf16.msra.mxu0 %v5583_v58  ;;  %v5676_v29 = vld [vmem:[#allocation2 + $0x970] sm:$0xf0]  ;;  %v7012_v30 = vld [vmem:[#allocation2 + $0xa64] sm:$0xf]  ;;  %v5551_v36 = vor.u32 %v6948_v14, %v5548_v16  ;;  %v7573_v54 = vadd.f32 %v3328_v50, %v3316_v49  ;;  %v3291_v55 = vpop.f32.mrf.mxu0 }
  0xea   :  { %3555 = vmatpush.bf16.msra.mxu1 %v5711_v59  ;;  %v5804_v31 = vld [vmem:[#allocation2 + $0xa70] sm:$0xf0]  ;;  %v7044_v32 = vld [vmem:[#allocation2 + $0xb64] sm:$0xf]  ;;  %v5679_v39 = vor.u32 %v6980_v17, %v5676_v29 }
  0xeb   :  { %3568 = vmatpush.bf16.msra.mxu2 %v5839_v60  ;;  %v5932_v33 = vld [vmem:[#allocation2 + $0xb70] sm:$0xf0]  ;;  %v5807_v41 = vor.u32 %v7012_v30, %v5804_v31  ;;  %v6944_v42 = vld [vmem:[#allocation2 + $0x844] sm:$0xf] }
  0xec   :  { %3581 = vmatpush.bf16.msra.mxu3 %v5967_v1  ;;  %v5532_v43 = vld [vmem:[#allocation2 + $0x850] sm:$0xf0]  ;;  %v6976_v44 = vld [vmem:[#allocation2 + $0x944] sm:$0xf]  ;;  %v5935_v62 = vor.u32 %v7044_v32, %v5932_v33  ;;  %v3330_v30 = vpop.f32.mrf.mxu3 }
  0xed   :  { %3543 = vmatpush.bf16.msra.mxu0 %v5567_v7  ;;  %v5660_v46 = vld [vmem:[#allocation2 + $0x950] sm:$0xf0]  ;;  %v7008_v47 = vld [vmem:[#allocation2 + $0xa44] sm:$0xf]  ;;  %v5535_v53 = vor.u32 %v6944_v42, %v5532_v43 }
  0xee   :  { %3556 = vmatpush.bf16.msra.mxu1 %v5695_v11  ;;  %v5788_v48 = vld [vmem:[#allocation2 + $0xa50] sm:$0xf0]  ;;  %v7040_v51 = vld [vmem:[#allocation2 + $0xb44] sm:$0xf]  ;;  %v5663_v56 = vor.u32 %v6976_v44, %v5660_v46  ;;  %v3317_v17 = vpop.f32.mrf.mxu2 }
  0xef   :  { %3569 = vmatpush.bf16.msra.mxu2 %v5823_v12  ;;  %v5916_v52 = vld [vmem:[#allocation2 + $0xb50] sm:$0xf0]  ;;  %v5791_v57 = vor.u32 %v7008_v47, %v5788_v48  ;;  %v6940_v58 = vld [vmem:[#allocation2 + $0x824] sm:$0xf] }
  0xf0   :  { %3582 = vmatpush.bf16.msra.mxu3 %v5951_v28  ;;  %v5516_v59 = vld [vmem:[#allocation2 + $0x830] sm:$0xf0]  ;;  %v6972_v60 = vld [vmem:[#allocation2 + $0x924] sm:$0xf]  ;;  %v5919_v63 = vor.u32 %v7040_v51, %v5916_v52 }
  0xf1   :  { %3544 = vmatpush.bf16.msra.mxu0 %v5551_v36  ;;  %v5644_v0 = vld [vmem:[#allocation2 + $0x930] sm:$0xf0]  ;;  %v7004_v1 = vld [vmem:[#allocation2 + $0xa24] sm:$0xf]  ;;  %v5519_v5 = vor.u32 %v6940_v58, %v5516_v59 }
  0xf2   :  { %3557 = vmatpush.bf16.msra.mxu1 %v5679_v39  ;;  %v5772_v2 = vld [vmem:[#allocation2 + $0xa30] sm:$0xf0]  ;;  %v7036_v3 = vld [vmem:[#allocation2 + $0xb24] sm:$0xf]  ;;  %v5647_v10 = vor.u32 %v6972_v60, %v5644_v0 }
  0xf3   :  { %3570 = vmatpush.bf16.msra.mxu2 %v5807_v41  ;;  %v5900_v4 = vld [vmem:[#allocation2 + $0xb30] sm:$0xf0]  ;;  %v6936_v6 = vld [vmem:[#allocation2 + $0x804] sm:$0xf]  ;;  %v5775_v11 = vor.u32 %v7004_v1, %v5772_v2 }
  0xf4   :  { %3583 = vmatpush.bf16.msra.mxu3 %v5935_v62  ;;  %v5500_v7 = vld [vmem:[#allocation2 + $0x810] sm:$0xf0]  ;;  %v6968_v12 = vld [vmem:[#allocation2 + $0x904] sm:$0xf]  ;;  %v5903_v21 = vor.u32 %v7036_v3, %v5900_v4 }
  0xf5   :  { %3545 = vmatpush.bf16.msra.mxu0 %v5535_v53  ;;  %v5628_v14 = vld [vmem:[#allocation2 + $0x910] sm:$0xf0]  ;;  %v7000_v16 = vld [vmem:[#allocation2 + $0xa04] sm:$0xf]  ;;  %v5503_v35 = vor.u32 %v6936_v6, %v5500_v7 }
  0xf6   :  { %3558 = vmatpush.bf16.msra.mxu1 %v5663_v56  ;;  %v5756_v24 = vld [vmem:[#allocation2 + $0xa10] sm:$0xf0]  ;;  %v7032_v28 = vld [vmem:[#allocation2 + $0xb04] sm:$0xf]  ;;  %v5631_v42 = vor.u32 %v6968_v12, %v5628_v14 }
  0xf7   :  { %3571 = vmatpush.bf16.msra.mxu2 %v5791_v57  ;;  %v5884_v29 = vld [vmem:[#allocation2 + $0xb10] sm:$0xf0]  ;;  %v7092_v31 = vld [vmem:[#allocation2 + $0xce4] sm:$0xf]  ;;  %v5759_v43 = vor.u32 %v7000_v16, %v5756_v24 }
  0xf8   :  { %3584 = vmatpush.bf16.msra.mxu3 %v5919_v63  ;;  %v6124_v32 = vld [vmem:[#allocation2 + $0xcf0] sm:$0xf0]  ;;  %v7124_v33 = vld [vmem:[#allocation2 + $0xde4] sm:$0xf]  ;;  %v5887_v62 = vor.u32 %v7032_v28, %v5884_v29 }
  0xf9   :  { %3546 = vmatpush.bf16.msra.mxu0 %v5519_v5  ;;  %v6252_v36 = vld [vmem:[#allocation2 + $0xdf0] sm:$0xf0]  ;;  %v7156_v39 = vld [vmem:[#allocation2 + $0xee4] sm:$0xf]  ;;  %v6127_v46 = vor.u32 %v7092_v31, %v6124_v32 }
  0xfa   :  { %v6380_v41 = vld [vmem:[#allocation2 + $0xef0] sm:$0xf0]  ;;  %3559 = vmatpush.bf16.msra.mxu1 %v5647_v10  ;;  %v7188_v44 = vld [vmem:[#allocation2 + $0xfe4] sm:$0xf]  ;;  %v6255_v47 = vor.u32 %v7124_v33, %v6252_v36 }
  0xfb   :  { %3572 = vmatpush.bf16.msra.mxu2 %v5775_v11  ;;  %v6508_v45 = vld [vmem:[#allocation2 + $0xff0] sm:$0xf0]  ;;  %v6383_v48 = vor.u32 %v7156_v39, %v6380_v41  ;;  %v7088_v49 = vld [vmem:[#allocation2 + $0xcc4] sm:$0xf] }
  0xfc   :  { %3585 = vmatpush.bf16.msra.mxu3 %v5903_v21  ;;  %v6108_v50 = vld [vmem:[#allocation2 + $0xcd0] sm:$0xf0]  ;;  %v7120_v51 = vld [vmem:[#allocation2 + $0xdc4] sm:$0xf]  ;;  %v6511_v52 = vor.u32 %v7188_v44, %v6508_v45 }
  0xfd   :  { %3547 = vmatpush.bf16.msra.mxu0 %v5503_v35  ;;  %v6236_v53 = vld [vmem:[#allocation2 + $0xdd0] sm:$0xf0]  ;;  %v7152_v55 = vld [vmem:[#allocation2 + $0xec4] sm:$0xf]  ;;  %v6111_v59 = vor.u32 %v7088_v49, %v6108_v50  ;;  %v3354_v36 = vpop.f32.mrf.mxu1 }
  0xfe   :  { %v6364_v56 = vld [vmem:[#allocation2 + $0xed0] sm:$0xf0]  ;;  %3560 = vmatpush.bf16.msra.mxu1 %v5631_v42  ;;  %v7184_v57 = vld [vmem:[#allocation2 + $0xfc4] sm:$0xf]  ;;  %v6239_v60 = vor.u32 %v7120_v51, %v6236_v53 }
  0xff   :  { %3573 = vmatpush.bf16.msra.mxu2 %v5759_v43  ;;  %v6492_v58 = vld [vmem:[#allocation2 + $0xfd0] sm:$0xf0]  ;;  %v6367_v61 = vor.u32 %v7152_v55, %v6364_v56  ;;  %v7084_v63 = vld [vmem:[#allocation2 + $0xca4] sm:$0xf] }
 0x100   :  { %3586 = vmatpush.bf16.msra.mxu3 %v5887_v62  ;;  %v6092_v0 = vld [vmem:[#allocation2 + $0xcb0] sm:$0xf0]  ;;  %v7116_v1 = vld [vmem:[#allocation2 + $0xda4] sm:$0xf]  ;;  %3548 = vmatmul.bf16.vlgmr.msra.gmra.mxu0 %v7526_v18  ;;  %v6495_v2 = vor.u32 %v7184_v57, %v6492_v58 }
 0x101   :  { %3592 = vmatpush.bf16.msrb.mxu0 %v6127_v46  ;;  %v6220_v3 = vld [vmem:[#allocation2 + $0xdb0] sm:$0xf0]  ;;  %v7148_v4 = vld [vmem:[#allocation2 + $0xea4] sm:$0xf]  ;;  %3561 = vmatmul.bf16.vlgmr.msra.gmra.mxu1 %v7530_v23  ;;  %v6095_v10 = vor.u32 %v7084_v63, %v6092_v0  ;;  %v3341_v30 = vpop.f32.mrf.mxu0 }
 0x102   :  { %3605 = vmatpush.bf16.msrb.mxu1 %v6255_v47  ;;  %v6348_v5 = vld [vmem:[#allocation2 + $0xeb0] sm:$0xf0]  ;;  %3574 = vmatmul.bf16.vlgmr.msra.gmra.mxu2 %v7528_v22  ;;  %v7180_v6 = vld [vmem:[#allocation2 + $0xfa4] sm:$0xf]  ;;  %v6223_v11 = vor.u32 %v7116_v1, %v6220_v3  ;;  %v3342_v33 = vadd.f32 %v3341_v30, %v7573_v54 }
 0x103   :  { %3618 = vmatpush.bf16.msrb.mxu2 %v6383_v48  ;;  %v6476_v7 = vld [vmem:[#allocation2 + $0xfb0] sm:$0xf0]  ;;  %3587 = vmatmul.bf16.vlgmr.msra.gmra.mxu3 %v7532_v27  ;;  %v6351_v12 = vor.u32 %v7148_v4, %v6348_v5  ;;  %v7080_v14 = vld [vmem:[#allocation2 + $0xc84] sm:$0xf] }
 0x104   :  { %3631 = vmatpush.bf16.msrb.mxu3 %v6511_v52  ;;  %v6076_v16 = vld [vmem:[#allocation2 + $0xc90] sm:$0xf0]  ;;  %v7112_v17 = vld [vmem:[#allocation2 + $0xd84] sm:$0xf]  ;;  %v6479_v21 = vor.u32 %v7180_v6, %v6476_v7  ;;  %v3355_v62 = vadd.f32 %v3354_v36, %v3342_v33 }
 0x105   :  { %3593 = vmatpush.bf16.msrb.mxu0 %v6111_v59  ;;  %v6204_v24 = vld [vmem:[#allocation2 + $0xd90] sm:$0xf0]  ;;  %v7144_v28 = vld [vmem:[#allocation2 + $0xe84] sm:$0xf]  ;;  %v6079_v35 = vor.u32 %v7080_v14, %v6076_v16  ;;  %v3380_v0 = vpop.f32.mrf.mxu3  ;;  %v3356_v5 = vpop.f32.mrf.mxu1 }
 0x106   :  { %3606 = vmatpush.bf16.msrb.mxu1 %v6239_v60  ;;  %v6332_v29 = vld [vmem:[#allocation2 + $0xe90] sm:$0xf0]  ;;  %v7176_v31 = vld [vmem:[#allocation2 + $0xf84] sm:$0xf]  ;;  %v6207_v39 = vor.u32 %v7112_v17, %v6204_v24  ;;  %v6771_v5 = vld [vmem:[#allocation2 + $0x2d4] sm:$0xf0] }
 0x107   :  { %3619 = vmatpush.bf16.msrb.mxu2 %v6367_v61  ;;  %v6460_v32 = vld [vmem:[#allocation2 + $0xf90] sm:$0xf0]  ;;  %v6335_v41 = vor.u32 %v7144_v28, %v6332_v29  ;;  %v7076_v42 = vld [vmem:[#allocation2 + $0xc64] sm:$0xf]  ;;  %v3367_v58 = vpop.f32.mrf.mxu2 }
 0x108   :  { %3632 = vmatpush.bf16.msrb.mxu3 %v6495_v2  ;;  %v6060_v43 = vld [vmem:[#allocation2 + $0xc70] sm:$0xf0]  ;;  %v7108_v44 = vld [vmem:[#allocation2 + $0xd64] sm:$0xf]  ;;  %v6463_v45 = vor.u32 %v7176_v31, %v6460_v32  ;;  %v3368_v63 = vadd.f32 %v3367_v58, %v3355_v62 }
 0x109   :  { %3594 = vmatpush.bf16.msrb.mxu0 %v6095_v10  ;;  %v6188_v46 = vld [vmem:[#allocation2 + $0xd70] sm:$0xf0]  ;;  %v7140_v47 = vld [vmem:[#allocation2 + $0xe64] sm:$0xf]  ;;  %v6063_v51 = vor.u32 %v7076_v42, %v6060_v43  ;;  %v3343_v3 = vpop.f32.mrf.mxu0 }
 0x10a   :  { %3607 = vmatpush.bf16.msrb.mxu1 %v6223_v11  ;;  %v6316_v48 = vld [vmem:[#allocation2 + $0xe70] sm:$0xf0]  ;;  %v7172_v49 = vld [vmem:[#allocation2 + $0xf64] sm:$0xf]  ;;  %v6191_v54 = vor.u32 %v7108_v44, %v6188_v46  ;;  %v7580_v6 = vadd.f32 %v3380_v0, %v3368_v63  ;;  %v4594_v46 = vld [vmem:[#allocation2 + $0xe8] sm:$0xf] }
 0x10b   :  { %3620 = vmatpush.bf16.msrb.mxu2 %v6351_v12  ;;  %v6444_v50 = vld [vmem:[#allocation2 + $0xf70] sm:$0xf0]  ;;  %v6319_v52 = vor.u32 %v7140_v47, %v6316_v48  ;;  %v7072_v53 = vld [vmem:[#allocation2 + $0xc44] sm:$0xf]  ;;  %v6711_v47 = vld [vmem:[#allocation2 + $0xf4] sm:$0xf0] }
 0x10c   :  { %3633 = vmatpush.bf16.msrb.mxu3 %v6479_v21  ;;  %v6044_v55 = vld [vmem:[#allocation2 + $0xc50] sm:$0xf0]  ;;  %v7104_v56 = vld [vmem:[#allocation2 + $0xd44] sm:$0xf]  ;;  %v6447_v57 = vor.u32 %v7172_v49, %v6444_v50  ;;  %v4722_v48 = vld [vmem:[#allocation2 + $0x1e8] sm:$0xf] }
 0x10d   :  { %3595 = vmatpush.bf16.msrb.mxu0 %v6079_v35  ;;  %v6172_v59 = vld [vmem:[#allocation2 + $0xd50] sm:$0xf0]  ;;  %v7136_v60 = vld [vmem:[#allocation2 + $0xe44] sm:$0xf]  ;;  %v6047_v4 = vor.u32 %v7072_v53, %v6044_v55  ;;  %v3382_v49 = vpop.f32.mrf.mxu3  ;;  %v4578_v63 = vld [vmem:[#allocation2 + $0xc8] sm:$0xf] }
 0x10e   :  { %3608 = vmatpush.bf16.msrb.mxu1 %v6207_v39  ;;  %v6300_v61 = vld [vmem:[#allocation2 + $0xe50] sm:$0xf0]  ;;  %v7168_v1 = vld [vmem:[#allocation2 + $0xf44] sm:$0xf]  ;;  %v6175_v7 = vor.u32 %v7104_v56, %v6172_v59  ;;  %v4978_v56 = vld [vmem:[#allocation2 + $0x3e8] sm:$0xf]  ;;  %v4595_v59 = vor.u32 %v6711_v47, %v4594_v46 }
 0x10f   :  { %3621 = vmatpush.bf16.msrb.mxu2 %v6335_v41  ;;  %v6428_v2 = vld [vmem:[#allocation2 + $0xf50] sm:$0xf0]  ;;  %v6303_v10 = vor.u32 %v7136_v60, %v6300_v61  ;;  %v7068_v11 = vld [vmem:[#allocation2 + $0xc24] sm:$0xf]  ;;  %v3369_v62 = vpop.f32.mrf.mxu2  ;;  %v6707_v0 = vld [vmem:[#allocation2 + $0xd4] sm:$0xf0] }
 0x110   :  { %3634 = vmatpush.bf16.msrb.mxu3 %v6463_v45  ;;  %v6028_v12 = vld [vmem:[#allocation2 + $0xc30] sm:$0xf0]  ;;  %v7100_v14 = vld [vmem:[#allocation2 + $0xd24] sm:$0xf]  ;;  %v6431_v16 = vor.u32 %v7168_v1, %v6428_v2  ;;  %v4706_v1 = vld [vmem:[#allocation2 + $0x1c8] sm:$0xf] }
 0x111   :  { %3596 = vmatpush.bf16.msrb.mxu0 %v6063_v51  ;;  %v6156_v17 = vld [vmem:[#allocation2 + $0xd30] sm:$0xf0]  ;;  %v7132_v21 = vld [vmem:[#allocation2 + $0xe24] sm:$0xf]  ;;  %v6031_v30 = vor.u32 %v7068_v11, %v6028_v12  ;;  %v6743_v51 = vld [vmem:[#allocation2 + $0x1f4] sm:$0xf0]  ;;  %v4579_v11 = vor.u32 %v6707_v0, %v4578_v63 }
 0x112   :  { %3609 = vmatpush.bf16.msrb.mxu1 %v6191_v54  ;;  %v6284_v24 = vld [vmem:[#allocation2 + $0xe30] sm:$0xf0]  ;;  %v7164_v28 = vld [vmem:[#allocation2 + $0xf24] sm:$0xf]  ;;  %v6159_v33 = vor.u32 %v7100_v14, %v6156_v17  ;;  %v4850_v54 = vld [vmem:[#allocation2 + $0x2e8] sm:$0xf]  ;;  %v4723_v60 = vor.u32 %v6743_v51, %v4722_v48 }
 0x113   :  { %3622 = vmatpush.bf16.msrb.mxu2 %v6319_v52  ;;  %v6412_v29 = vld [vmem:[#allocation2 + $0xf30] sm:$0xf0]  ;;  %v7064_v31 = vld [vmem:[#allocation2 + $0xc04] sm:$0xf]  ;;  %v6287_v35 = vor.u32 %v7132_v21, %v6284_v24  ;;  %v6775_v52 = vld [vmem:[#allocation2 + $0x2f4] sm:$0xf0] }
 0x114   :  { %3635 = vmatpush.bf16.msrb.mxu3 %v6447_v57  ;;  %v6012_v32 = vld [vmem:[#allocation2 + $0xc10] sm:$0xf0]  ;;  %v7096_v36 = vld [vmem:[#allocation2 + $0xd04] sm:$0xf]  ;;  %v6415_v42 = vor.u32 %v7164_v28, %v6412_v29  ;;  %v6807_v57 = vld [vmem:[#allocation2 + $0x3f4] sm:$0xf0]  ;;  %v4851_v61 = vor.u32 %v6775_v52, %v4850_v54 }
 0x115   :  { %3597 = vmatpush.bf16.msrb.mxu0 %v6047_v4  ;;  %v6140_v39 = vld [vmem:[#allocation2 + $0xd10] sm:$0xf0]  ;;  %v7128_v41 = vld [vmem:[#allocation2 + $0xe04] sm:$0xf]  ;;  %v6015_v50 = vor.u32 %v7064_v31, %v6012_v32  ;;  %v4979_v2 = vor.u32 %v6807_v57, %v4978_v56  ;;  %v6739_v3 = vld [vmem:[#allocation2 + $0x1d4] sm:$0xf0] }
 0x116   :  { %3610 = vmatpush.bf16.msrb.mxu1 %v6175_v7  ;;  %v6268_v43 = vld [vmem:[#allocation2 + $0xe10] sm:$0xf0]  ;;  %v7160_v44 = vld [vmem:[#allocation2 + $0xf04] sm:$0xf]  ;;  %v6143_v53 = vor.u32 %v7096_v36, %v6140_v39  ;;  %v4834_v4 = vld [vmem:[#allocation2 + $0x2c8] sm:$0xf]  ;;  %v4707_v12 = vor.u32 %v6739_v3, %v4706_v1 }
 0x117   :  { %3623 = vmatpush.bf16.msrb.mxu2 %v6303_v10  ;;  %v6396_v45 = vld [vmem:[#allocation2 + $0xf10] sm:$0xf0]  ;;  %v6271_v55 = vor.u32 %v7128_v41, %v6268_v43  ;;  %v4962_v7 = vld [vmem:[#allocation2 + $0x3c8] sm:$0xf]  ;;  %v6803_v10 = vld [vmem:[#allocation2 + $0x3d4] sm:$0xf0]  ;;  %v4835_v14 = vor.u32 %v6771_v5, %v4834_v4 }
 0x118   :  { %3636 = vmatpush.bf16.msrb.mxu3 %v6431_v16  ;;  %v6399_v58 = vor.u32 %v7160_v44, %v6396_v45  ;;  %v4562_v16 = vld [vmem:[#allocation2 + $0xa8] sm:$0xf]  ;;  %v6703_v17 = vld [vmem:[#allocation2 + $0xb4] sm:$0xf0]  ;;  %v4963_v24 = vor.u32 %v6803_v10, %v4962_v7 }
 0x119   :  { %3598 = vmatpush.bf16.msrb.mxu0 %v6031_v30  ;;  %v4690_v21 = vld [vmem:[#allocation2 + $0x1a8] sm:$0xf]  ;;  %v6735_v28 = vld [vmem:[#allocation2 + $0x1b4] sm:$0xf0] }
 0x11a   :  { %3611 = vmatpush.bf16.msrb.mxu1 %v6159_v33  ;;  %v4818_v29 = vld [vmem:[#allocation2 + $0x2a8] sm:$0xf]  ;;  %v6767_v30 = vld [vmem:[#allocation2 + $0x2b4] sm:$0xf0]  ;;  %v4563_v33 = vor.u32 %v6703_v17, %v4562_v16 }
 0x11b   :  { %3624 = vmatpush.bf16.msrb.mxu2 %v6287_v35  ;;  %v4946_v31 = vld [vmem:[#allocation2 + $0x3a8] sm:$0xf]  ;;  %v6799_v32 = vld [vmem:[#allocation2 + $0x3b4] sm:$0xf0]  ;;  %v4691_v35 = vor.u32 %v6735_v28, %v4690_v21  ;;  %v4819_v36 = vor.u32 %v6767_v30, %v4818_v29 }
 0x11c   :  { %3637 = vmatpush.bf16.msrb.mxu3 %v6415_v42  ;;  %v4546_v39 = vld [vmem:[#allocation2 + $0x88] sm:$0xf]  ;;  %v6699_v41 = vld [vmem:[#allocation2 + $0x94] sm:$0xf0]  ;;  %v4947_v43 = vor.u32 %v6799_v32, %v4946_v31 }
 0x11d   :  { %3599 = vmatpush.bf16.msrb.mxu0 %v6015_v50  ;;  %v4674_v42 = vld [vmem:[#allocation2 + $0x188] sm:$0xf]  ;;  %v6731_v44 = vld [vmem:[#allocation2 + $0x194] sm:$0xf0]  ;;  %v4547_v50 = vor.u32 %v6699_v41, %v4546_v39 }
 0x11e   :  { %3612 = vmatpush.bf16.msrb.mxu1 %v6143_v53  ;;  %v4802_v45 = vld [vmem:[#allocation2 + $0x288] sm:$0xf]  ;;  %v6763_v62 = vld [vmem:[#allocation2 + $0x294] sm:$0xf0]  ;;  %v3406_v51 = vpop.f32.mrf.mxu1  ;;  %v4675_v54 = vor.u32 %v6731_v44, %v4674_v42 }
 0x11f   :  { %3625 = vmatpush.bf16.msrb.mxu2 %v6271_v55  ;;  %v3393_v46 = vpop.f32.mrf.mxu0  ;;  %v4930_v47 = vld [vmem:[#allocation2 + $0x388] sm:$0xf]  ;;  %v6795_v48 = vld [vmem:[#allocation2 + $0x394] sm:$0xf0]  ;;  %v4803_v52 = vor.u32 %v6763_v62, %v4802_v45 }
 0x120   :  { %3638 = vmatpush.bf16.msrb.mxu3 %v6399_v58  ;;  %3600 = vmatmul.bf16.vlgmr.msrb.gmra.mxu0 %v7550_v13  ;;  %v3394_v49 = vadd.f32 %v3393_v46, %v7580_v6  ;;  %v4530_v53 = vld [vmem:[#allocation2 + $0x68] sm:$0xf]  ;;  %v6695_v55 = vld [vmem:[#allocation2 + $0x74] sm:$0xf0]  ;;  %v4931_v57 = vor.u32 %v6795_v48, %v4930_v47 }
 0x121   :  { %3644 = vmatpush.bf16.msra.mxu0 %v4595_v59  ;;  %3613 = vmatmul.bf16.vlgmr.msrb.gmra.mxu1 %v7554_v20  ;;  %v4658_v56 = vld [vmem:[#allocation2 + $0x168] sm:$0xf]  ;;  %v6727_v59 = vld [vmem:[#allocation2 + $0x174] sm:$0xf0]  ;;  %v4531_v1 = vor.u32 %v6695_v55, %v4530_v53 }
 0x122   :  { %3657 = vmatpush.bf16.msra.mxu1 %v4723_v60  ;;  %3626 = vmatmul.bf16.vlgmr.msrb.gmra.mxu2 %v7552_v19  ;;  %v3407_v58 = vadd.f32 %v3406_v51, %v3394_v49  ;;  %v4786_v60 = vld [vmem:[#allocation2 + $0x268] sm:$0xf]  ;;  %v6791_v0 = vld [vmem:[#allocation2 + $0x374] sm:$0xf0]  ;;  %v4659_v6 = vor.u32 %v6727_v59, %v4658_v56 }
 0x123   :  { %3670 = vmatpush.bf16.msra.mxu2 %v4851_v61  ;;  %3639 = vmatmul.bf16.vlgmr.msrb.gmra.mxu3 %v7556_v26  ;;  %v6759_v61 = vld [vmem:[#allocation2 + $0x274] sm:$0xf0]  ;;  %v4914_v63 = vld [vmem:[#allocation2 + $0x368] sm:$0xf] }
 0x124   :  { %3683 = vmatpush.bf16.msra.mxu3 %v4979_v2  ;;  %v4787_v2 = vor.u32 %v6759_v61, %v4786_v60  ;;  %v4514_v3 = vld [vmem:[#allocation2 + $0x48] sm:$0xf]  ;;  %v6691_v4 = vld [vmem:[#allocation2 + $0x54] sm:$0xf0]  ;;  %v4915_v7 = vor.u32 %v6791_v0, %v4914_v63 }
 0x125   :  { %3645 = vmatpush.bf16.msra.mxu0 %v4579_v11  ;;  %v4642_v5 = vld [vmem:[#allocation2 + $0x148] sm:$0xf]  ;;  %v6723_v11 = vld [vmem:[#allocation2 + $0x154] sm:$0xf0]  ;;  %v4515_v29 = vor.u32 %v6691_v4, %v4514_v3 }
 0x126   :  { %3658 = vmatpush.bf16.msra.mxu1 %v4707_v12  ;;  %v4770_v12 = vld [vmem:[#allocation2 + $0x248] sm:$0xf]  ;;  %v3432_v17 = vpop.f32.mrf.mxu3  ;;  %v3408_v30 = vpop.f32.mrf.mxu1  ;;  %v4643_v32 = vor.u32 %v6723_v11, %v4642_v5  ;;  %v6719_v42 = vld [vmem:[#allocation2 + $0x134] sm:$0xf0] }
 0x127   :  { %3671 = vmatpush.bf16.msra.mxu2 %v4835_v14  ;;  %v3419_v10 = vpop.f32.mrf.mxu2  ;;  %v6755_v14 = vld [vmem:[#allocation2 + $0x254] sm:$0xf0]  ;;  %v4898_v21 = vld [vmem:[#allocation2 + $0x348] sm:$0xf]  ;;  %v3395_v28 = vpop.f32.mrf.mxu0 }
 0x128   :  { %3684 = vmatpush.bf16.msra.mxu3 %v4963_v24  ;;  %v3420_v16 = vadd.f32 %v3419_v10, %v3407_v58  ;;  %v6787_v24 = vld [vmem:[#allocation2 + $0x354] sm:$0xf0]  ;;  %v4626_v39 = vld [vmem:[#allocation2 + $0x128] sm:$0xf] }
 0x129   :  { %3646 = vmatpush.bf16.msra.mxu0 %v4563_v33  ;;  %v4771_v33 = vor.u32 %v6755_v14, %v4770_v12  ;;  %v4899_v41 = vor.u32 %v6787_v24, %v4898_v21  ;;  %v6751_v44 = vld [vmem:[#allocation2 + $0x234] sm:$0xf0]  ;;  %v4882_v45 = vld [vmem:[#allocation2 + $0x328] sm:$0xf]  ;;  %v4627_v49 = vor.u32 %v6719_v42, %v4626_v39 }
 0x12a   :  { %3659 = vmatpush.bf16.msra.mxu1 %v4691_v35  ;;  %v7587_v31 = vadd.f32 %v3432_v17, %v3420_v16  ;;  %v4498_v35 = vld [vmem:[#allocation2 + $0x28] sm:$0xf]  ;;  %v6783_v62 = vld [vmem:[#allocation2 + $0x334] sm:$0xf0] }
 0x12b   :  { %3672 = vmatpush.bf16.msra.mxu2 %v4819_v36  ;;  %v6687_v36 = vld [vmem:[#allocation2 + $0x34] sm:$0xf0]  ;;  %v4482_v47 = vld [vmem:[#allocation2 + $0x8] sm:$0xf]  ;;  %v4883_v53 = vor.u32 %v6783_v62, %v4882_v45 }
 0x12c   :  { %3685 = vmatpush.bf16.msra.mxu3 %v4947_v43  ;;  %v4754_v43 = vld [vmem:[#allocation2 + $0x228] sm:$0xf]  ;;  %v4499_v46 = vor.u32 %v6687_v36, %v4498_v35  ;;  %v6683_v48 = vld [vmem:[#allocation2 + $0x14] sm:$0xf0] }
 0x12d   :  { %3647 = vmatpush.bf16.msra.mxu0 %v4547_v50  ;;  %v4755_v50 = vor.u32 %v6751_v44, %v4754_v43  ;;  %v4610_v51 = vld [vmem:[#allocation2 + $0x108] sm:$0xf]  ;;  %v6747_v55 = vld [vmem:[#allocation2 + $0x214] sm:$0xf0]  ;;  %v4483_v0 = vor.u32 %v6683_v48, %v4482_v47 }
 0x12e   :  { %3660 = vmatpush.bf16.msra.mxu1 %v4675_v54  ;;  %v6715_v54 = vld [vmem:[#allocation2 + $0x114] sm:$0xf0]  ;;  %v4866_v56 = vld [vmem:[#allocation2 + $0x308] sm:$0xf]  ;;  %v3434_v63 = vpop.f32.mrf.mxu3 }
 0x12f   :  { %3673 = vmatpush.bf16.msra.mxu2 %v4803_v52  ;;  %v4738_v52 = vld [vmem:[#allocation2 + $0x208] sm:$0xf]  ;;  %v3421_v58 = vpop.f32.mrf.mxu2  ;;  %v6839_v60 = vld [vmem:[#allocation2 + $0x4f4] sm:$0xf0]  ;;  %v4611_v3 = vor.u32 %v6715_v54, %v4610_v51 }
 0x130   :  { %3686 = vmatpush.bf16.msra.mxu3 %v4931_v57  ;;  %v6779_v57 = vld [vmem:[#allocation2 + $0x314] sm:$0xf0]  ;;  %v5106_v59 = vld [vmem:[#allocation2 + $0x4e8] sm:$0xf]  ;;  %v4739_v4 = vor.u32 %v6747_v55, %v4738_v52  ;;  %v7244_v55 = vld [vmem:[#allocation4] sm:$0xf] }
 0x131   :  { %3648 = vmatpush.bf16.msra.mxu0 %v4531_v1  ;;  %v5234_v61 = vld [vmem:[#allocation2 + $0x5e8] sm:$0xf]  ;;  %v6871_v1 = vld [vmem:[#allocation2 + $0x5f4] sm:$0xf0]  ;;  %v4867_v10 = vor.u32 %v6779_v57, %v4866_v56  ;;  %v5107_v11 = vor.u32 %v6839_v60, %v5106_v59  ;;  %v661_v56 = vperm.slane %v7244_v55, 1 }
 0x132   :  { %3661 = vmatpush.bf16.msra.mxu1 %v4659_v6  ;;  %v5362_v6 = vld [vmem:[#allocation2 + $0x6e8] sm:$0xf]  ;;  %v5235_v12 = vor.u32 %v6871_v1, %v5234_v61  ;;  %v6835_v17 = vld [vmem:[#allocation2 + $0x4d4] sm:$0xf0] }
 0x133   :  { %3674 = vmatpush.bf16.msra.mxu2 %v4787_v2  ;;  %v6903_v2 = vld [vmem:[#allocation2 + $0x6f4] sm:$0xf0]  ;;  %v5490_v5 = vld [vmem:[#allocation2 + $0x7e8] sm:$0xf] }
 0x134   :  { %3687 = vmatpush.bf16.msra.mxu3 %v4915_v7  ;;  %v6935_v7 = vld [vmem:[#allocation2 + $0x7f4] sm:$0xf0]  ;;  %v5363_v14 = vor.u32 %v6903_v2, %v5362_v6  ;;  %v5090_v16 = vld [vmem:[#allocation2 + $0x4c8] sm:$0xf] }
 0x135   :  { %3649 = vmatpush.bf16.msra.mxu0 %v4515_v29  ;;  %v5218_v21 = vld [vmem:[#allocation2 + $0x5c8] sm:$0xf]  ;;  %v5491_v24 = vor.u32 %v6935_v7, %v5490_v5  ;;  %v6867_v28 = vld [vmem:[#allocation2 + $0x5d4] sm:$0xf0]  ;;  %v5091_v35 = vor.u32 %v6835_v17, %v5090_v16 }
 0x136   :  { %3662 = vmatpush.bf16.msra.mxu1 %v4643_v32  ;;  %v5346_v29 = vld [vmem:[#allocation2 + $0x6c8] sm:$0xf]  ;;  %v6899_v30 = vld [vmem:[#allocation2 + $0x6d4] sm:$0xf0]  ;;  %v5219_v36 = vor.u32 %v6867_v28, %v5218_v21 }
 0x137   :  { %3675 = vmatpush.bf16.msra.mxu2 %v4771_v33  ;;  %v5474_v32 = vld [vmem:[#allocation2 + $0x7c8] sm:$0xf]  ;;  %v6931_v33 = vld [vmem:[#allocation2 + $0x7d4] sm:$0xf0]  ;;  %v5347_v39 = vor.u32 %v6899_v30, %v5346_v29 }
 0x138   :  { %3688 = vmatpush.bf16.msra.mxu3 %v4899_v41  ;;  %v5074_v41 = vld [vmem:[#allocation2 + $0x4a8] sm:$0xf]  ;;  %v6831_v42 = vld [vmem:[#allocation2 + $0x4b4] sm:$0xf0]  ;;  %v5475_v44 = vor.u32 %v6931_v33, %v5474_v32 }
 0x139   :  { %3650 = vmatpush.bf16.msra.mxu0 %v4499_v46  ;;  %v5202_v43 = vld [vmem:[#allocation2 + $0x5a8] sm:$0xf]  ;;  %v6863_v45 = vld [vmem:[#allocation2 + $0x5b4] sm:$0xf0] }
 0x13a   :  { %3663 = vmatpush.bf16.msra.mxu1 %v4627_v49  ;;  %v5330_v62 = vld [vmem:[#allocation2 + $0x6a8] sm:$0xf]  ;;  %v6895_v46 = vld [vmem:[#allocation2 + $0x6b4] sm:$0xf0]  ;;  %v5075_v49 = vor.u32 %v6831_v42, %v5074_v41  ;;  %v5203_v51 = vor.u32 %v6863_v45, %v5202_v43 }
 0x13b   :  { %3676 = vmatpush.bf16.msra.mxu2 %v4755_v50  ;;  %v5458_v47 = vld [vmem:[#allocation2 + $0x7a8] sm:$0xf]  ;;  %v6927_v48 = vld [vmem:[#allocation2 + $0x7b4] sm:$0xf0]  ;;  %v5331_v54 = vor.u32 %v6895_v46, %v5330_v62 }
 0x13c   :  { %3689 = vmatpush.bf16.msra.mxu3 %v4883_v53  ;;  %v5058_v50 = vld [vmem:[#allocation2 + $0x488] sm:$0xf]  ;;  %v6827_v52 = vld [vmem:[#allocation2 + $0x494] sm:$0xf0]  ;;  %v5459_v57 = vor.u32 %v6927_v48, %v5458_v47 }
 0x13d   :  { %3651 = vmatpush.bf16.msra.mxu0 %v4483_v0  ;;  %v5186_v53 = vld [vmem:[#allocation2 + $0x588] sm:$0xf]  ;;  %v6859_v58 = vld [vmem:[#allocation2 + $0x594] sm:$0xf0]  ;;  %v5059_v0 = vor.u32 %v6827_v52, %v5058_v50  ;;  %v3445_v1 = vpop.f32.mrf.mxu0 }
 0x13e   :  { %3664 = vmatpush.bf16.msra.mxu1 %v4611_v3  ;;  %v5314_v59 = vld [vmem:[#allocation2 + $0x688] sm:$0xf]  ;;  %v6891_v60 = vld [vmem:[#allocation2 + $0x694] sm:$0xf0]  ;;  %v5187_v6 = vor.u32 %v6859_v58, %v5186_v53  ;;  %v3446_v7 = vadd.f32 %v3445_v1, %v661_v56 }
 0x13f   :  { %3677 = vmatpush.bf16.msra.mxu2 %v4739_v4  ;;  %v5442_v61 = vld [vmem:[#allocation2 + $0x788] sm:$0xf]  ;;  %v6923_v63 = vld [vmem:[#allocation2 + $0x794] sm:$0xf0]  ;;  %v5315_v2 = vor.u32 %v6891_v60, %v5314_v59 }
 0x140   :  { %3690 = vmatpush.bf16.msra.mxu3 %v4867_v10  ;;  %3652 = vmatmul.bf16.vlgmr.msra.gmra.mxu0 %v7474_v9  ;;  %v5042_v3 = vld [vmem:[#allocation2 + $0x468] sm:$0xf]  ;;  %v6823_v4 = vld [vmem:[#allocation2 + $0x474] sm:$0xf0]  ;;  %v3458_v10 = vpop.f32.mrf.mxu1 }
 0x141   :  { %3696 = vmatpush.bf16.msrb.mxu0 %v5107_v11  ;;  %3665 = vmatmul.bf16.vlgmr.msra.gmra.mxu1 %v7487_v25  ;;  %v5170_v5 = vld [vmem:[#allocation2 + $0x568] sm:$0xf]  ;;  %v5443_v11 = vor.u32 %v6923_v63, %v5442_v61  ;;  %v6887_v16 = vld [vmem:[#allocation2 + $0x674] sm:$0xf0]  ;;  %v5043_v28 = vor.u32 %v6823_v4, %v5042_v3 }
 0x142   :  { %3709 = vmatpush.bf16.msrb.mxu1 %v5235_v12  ;;  %3678 = vmatmul.bf16.vlgmr.msra.gmra.mxu2 %v7472_v8  ;;  %v6855_v12 = vld [vmem:[#allocation2 + $0x574] sm:$0xf0]  ;;  %v5426_v17 = vld [vmem:[#allocation2 + $0x768] sm:$0xf] }
 0x143   :  { %3722 = vmatpush.bf16.msrb.mxu2 %v5363_v14  ;;  %3691 = vmatmul.bf16.vlgmr.msra.gmra.mxu3 %v7479_v15  ;;  %v5298_v14 = vld [vmem:[#allocation2 + $0x668] sm:$0xf]  ;;  %v6919_v21 = vld [vmem:[#allocation2 + $0x774] sm:$0xf0]  ;;  %v5171_v29 = vor.u32 %v6855_v12, %v5170_v5 }
 0x144   :  { %3735 = vmatpush.bf16.msrb.mxu3 %v5491_v24  ;;  %v3459_v24 = vadd.f32 %v3458_v10, %v3446_v7  ;;  %v5299_v30 = vor.u32 %v6887_v16, %v5298_v14  ;;  %v5026_v32 = vld [vmem:[#allocation2 + $0x448] sm:$0xf]  ;;  %v6819_v33 = vld [vmem:[#allocation2 + $0x454] sm:$0xf0] }
 0x145   :  { %3697 = vmatpush.bf16.msrb.mxu0 %v5091_v35  ;;  %v5154_v35 = vld [vmem:[#allocation2 + $0x548] sm:$0xf]  ;;  %v6851_v41 = vld [vmem:[#allocation2 + $0x554] sm:$0xf0]  ;;  %v5027_v47 = vor.u32 %v6819_v33, %v5026_v32 }
 0x146   :  { %3710 = vmatpush.bf16.msrb.mxu1 %v5219_v36  ;;  %v3471_v36 = vpop.f32.mrf.mxu2  ;;  %v5282_v42 = vld [vmem:[#allocation2 + $0x648] sm:$0xf]  ;;  %v6883_v43 = vld [vmem:[#allocation2 + $0x654] sm:$0xf0]  ;;  %v3484_v45 = vpop.f32.mrf.mxu3  ;;  %v5155_v50 = vor.u32 %v6851_v41, %v5154_v35 }
 0x147   :  { %3723 = vmatpush.bf16.msrb.mxu2 %v5347_v39  ;;  %v5427_v39 = vor.u32 %v6919_v21, %v5426_v17  ;;  %v5410_v62 = vld [vmem:[#allocation2 + $0x748] sm:$0xf]  ;;  %v6915_v46 = vld [vmem:[#allocation2 + $0x754] sm:$0xf0] }
 0x148   :  { %3736 = vmatpush.bf16.msrb.mxu3 %v5475_v44  ;;  %v3472_v44 = vadd.f32 %v3471_v36, %v3459_v24  ;;  %v6815_v52 = vld [vmem:[#allocation2 + $0x434] sm:$0xf0]  ;;  %v5138_v53 = vld [vmem:[#allocation2 + $0x528] sm:$0xf]  ;;  %v3460_v55 = vpop.f32.mrf.mxu1  ;;  %v5411_v56 = vor.u32 %v6915_v46, %v5410_v62 }
 0x149   :  { %3698 = vmatpush.bf16.msrb.mxu0 %v5075_v49  ;;  %v3447_v49 = vpop.f32.mrf.mxu0  ;;  %v5266_v58 = vld [vmem:[#allocation2 + $0x628] sm:$0xf]  ;;  %v6879_v59 = vld [vmem:[#allocation2 + $0x634] sm:$0xf0] }
 0x14a   :  { %3711 = vmatpush.bf16.msrb.mxu1 %v5203_v51  ;;  %v7593_v48 = vadd.f32 %v3484_v45, %v3472_v44  ;;  %v5283_v51 = vor.u32 %v6883_v43, %v5282_v42  ;;  %v5394_v60 = vld [vmem:[#allocation2 + $0x728] sm:$0xf]  ;;  %v6911_v61 = vld [vmem:[#allocation2 + $0x734] sm:$0xf0] }
 0x14b   :  { %3724 = vmatpush.bf16.msrb.mxu2 %v5331_v54  ;;  %v5010_v54 = vld [vmem:[#allocation2 + $0x428] sm:$0xf]  ;;  %v6811_v1 = vld [vmem:[#allocation2 + $0x414] sm:$0xf0]  ;;  %v5395_v10 = vor.u32 %v6911_v61, %v5394_v60 }
 0x14c   :  { %3737 = vmatpush.bf16.msrb.mxu3 %v5459_v57  ;;  %v6847_v57 = vld [vmem:[#allocation2 + $0x534] sm:$0xf0]  ;;  %v5011_v63 = vor.u32 %v6815_v52, %v5010_v54  ;;  %v5122_v3 = vld [vmem:[#allocation2 + $0x508] sm:$0xf] }
 0x14d   :  { %3699 = vmatpush.bf16.msrb.mxu0 %v5059_v0  ;;  %v4994_v0 = vld [vmem:[#allocation2 + $0x408] sm:$0xf]  ;;  %v6843_v4 = vld [vmem:[#allocation2 + $0x514] sm:$0xf0] }
 0x14e   :  { %3712 = vmatpush.bf16.msrb.mxu1 %v5187_v6  ;;  %v5139_v6 = vor.u32 %v6847_v57, %v5138_v53  ;;  %v5250_v5 = vld [vmem:[#allocation2 + $0x608] sm:$0xf]  ;;  %v3473_v7 = vpop.f32.mrf.mxu2  ;;  %v6907_v14 = vld [vmem:[#allocation2 + $0x714] sm:$0xf0]  ;;  %v3486_v16 = vpop.f32.mrf.mxu3  ;;  %v5123_v33 = vor.u32 %v6843_v4, %v5122_v3 }
 0x14f   :  { %3725 = vmatpush.bf16.msrb.mxu2 %v5315_v2  ;;  %v5267_v2 = vor.u32 %v6879_v59, %v5266_v58  ;;  %v5378_v12 = vld [vmem:[#allocation2 + $0x708] sm:$0xf]  ;;  %v6967_v21 = vld [vmem:[#allocation2 + $0x8f4] sm:$0xf0] }
 0x150   :  { %3738 = vmatpush.bf16.msrb.mxu3 %v5443_v11  ;;  %v6875_v11 = vld [vmem:[#allocation2 + $0x614] sm:$0xf0]  ;;  %v5618_v17 = vld [vmem:[#allocation2 + $0x8e8] sm:$0xf]  ;;  %v5379_v41 = vor.u32 %v6907_v14, %v5378_v12 }
 0x151   :  { %3700 = vmatpush.bf16.msrb.mxu0 %v5043_v28  ;;  %v5746_v24 = vld [vmem:[#allocation2 + $0x9e8] sm:$0xf]  ;;  %v4995_v28 = vor.u32 %v6811_v1, %v4994_v0  ;;  %v7031_v32 = vld [vmem:[#allocation2 + $0xaf4] sm:$0xf0]  ;;  %v5251_v35 = vor.u32 %v6875_v11, %v5250_v5  ;;  %v5619_v42 = vor.u32 %v6967_v21, %v5618_v17 }
 0x152   :  { %3713 = vmatpush.bf16.msrb.mxu1 %v5171_v29  ;;  %v6999_v29 = vld [vmem:[#allocation2 + $0x9f4] sm:$0xf0]  ;;  %v6002_v36 = vld [vmem:[#allocation2 + $0xbe8] sm:$0xf] }
 0x153   :  { %3726 = vmatpush.bf16.msrb.mxu2 %v5299_v30  ;;  %v5874_v30 = vld [vmem:[#allocation2 + $0xae8] sm:$0xf]  ;;  %v5747_v43 = vor.u32 %v6999_v29, %v5746_v24  ;;  %v6963_v62 = vld [vmem:[#allocation2 + $0x8d4] sm:$0xf0] }
 0x154   :  { %3739 = vmatpush.bf16.msrb.mxu3 %v5427_v39  ;;  %v7063_v39 = vld [vmem:[#allocation2 + $0xbf4] sm:$0xf0]  ;;  %v5875_v44 = vor.u32 %v7031_v32, %v5874_v30  ;;  %v5602_v45 = vld [vmem:[#allocation2 + $0x8c8] sm:$0xf] }
 0x155   :  { %3701 = vmatpush.bf16.msrb.mxu0 %v5027_v47  ;;  %v5730_v46 = vld [vmem:[#allocation2 + $0x9c8] sm:$0xf]  ;;  %v6003_v47 = vor.u32 %v7063_v39, %v6002_v36  ;;  %v6995_v49 = vld [vmem:[#allocation2 + $0x9d4] sm:$0xf0]  ;;  %v5603_v53 = vor.u32 %v6963_v62, %v5602_v45 }
 0x156   :  { %3714 = vmatpush.bf16.msrb.mxu1 %v5155_v50  ;;  %v5858_v50 = vld [vmem:[#allocation2 + $0xac8] sm:$0xf]  ;;  %v7059_v52 = vld [vmem:[#allocation2 + $0xbd4] sm:$0xf0]  ;;  %v5731_v55 = vor.u32 %v6995_v49, %v5730_v46 }
 0x157   :  { %3727 = vmatpush.bf16.msrb.mxu2 %v5283_v51  ;;  %v7027_v51 = vld [vmem:[#allocation2 + $0xad4] sm:$0xf0]  ;;  %v5986_v54 = vld [vmem:[#allocation2 + $0xbc8] sm:$0xf] }
 0x158   :  { %3740 = vmatpush.bf16.msrb.mxu3 %v5411_v56  ;;  %v5859_v56 = vor.u32 %v7027_v51, %v5858_v50  ;;  %v5586_v57 = vld [vmem:[#allocation2 + $0x8a8] sm:$0xf]  ;;  %v6959_v58 = vld [vmem:[#allocation2 + $0x8b4] sm:$0xf0]  ;;  %v5987_v60 = vor.u32 %v7059_v52, %v5986_v54 }
 0x159   :  { %3702 = vmatpush.bf16.msrb.mxu0 %v5011_v63  ;;  %v5714_v59 = vld [vmem:[#allocation2 + $0x9a8] sm:$0xf]  ;;  %v6991_v61 = vld [vmem:[#allocation2 + $0x9b4] sm:$0xf0] }
 0x15a   :  { %3715 = vmatpush.bf16.msrb.mxu1 %v5139_v6  ;;  %v5842_v63 = vld [vmem:[#allocation2 + $0xaa8] sm:$0xf]  ;;  %v7023_v0 = vld [vmem:[#allocation2 + $0xab4] sm:$0xf0]  ;;  %v5715_v3 = vor.u32 %v6991_v61, %v5714_v59 }
 0x15b   :  { %3728 = vmatpush.bf16.msrb.mxu2 %v5267_v2  ;;  %v5970_v1 = vld [vmem:[#allocation2 + $0xba8] sm:$0xf]  ;;  %v7055_v6 = vld [vmem:[#allocation2 + $0xbb4] sm:$0xf0]  ;;  %v5587_v2 = vor.u32 %v6959_v58, %v5586_v57  ;;  %v5843_v4 = vor.u32 %v7023_v0, %v5842_v63 }
 0x15c   :  { %3741 = vmatpush.bf16.msrb.mxu3 %v5395_v10  ;;  %v5570_v5 = vld [vmem:[#allocation2 + $0x888] sm:$0xf]  ;;  %v6955_v7 = vld [vmem:[#allocation2 + $0x894] sm:$0xf0]  ;;  %v5971_v11 = vor.u32 %v7055_v6, %v5970_v1 }
 0x15d   :  { %3703 = vmatpush.bf16.msrb.mxu0 %v4995_v28  ;;  %v5698_v10 = vld [vmem:[#allocation2 + $0x988] sm:$0xf]  ;;  %v6987_v12 = vld [vmem:[#allocation2 + $0x994] sm:$0xf0]  ;;  %v5571_v24 = vor.u32 %v6955_v7, %v5570_v5  ;;  %v3497_v28 = vpop.f32.mrf.mxu0 }
 0x15e   :  { %3716 = vmatpush.bf16.msrb.mxu1 %v5123_v33  ;;  %v5826_v14 = vld [vmem:[#allocation2 + $0xa88] sm:$0xf]  ;;  %v7019_v16 = vld [vmem:[#allocation2 + $0xa94] sm:$0xf0]  ;;  %v5699_v29 = vor.u32 %v6987_v12, %v5698_v10  ;;  %v3498_v36 = vadd.f32 %v3497_v28, %v7593_v48  ;;  %v3510_v39 = vpop.f32.mrf.mxu1 }
 0x15f   :  { %3729 = vmatpush.bf16.msrb.mxu2 %v5251_v35  ;;  %v5954_v17 = vld [vmem:[#allocation2 + $0xb88] sm:$0xf]  ;;  %v7051_v21 = vld [vmem:[#allocation2 + $0xb94] sm:$0xf0]  ;;  %v5827_v30 = vor.u32 %v7019_v16, %v5826_v14 }
 0x160   :  { %3742 = vmatpush.bf16.msrb.mxu3 %v5379_v41  ;;  %3704 = vmatmul.bf16.vlgmr.msrb.gmra.mxu0 %v7504_v37  ;;  %v5554_v32 = vld [vmem:[#allocation2 + $0x868] sm:$0xf]  ;;  %v6951_v33 = vld [vmem:[#allocation2 + $0x874] sm:$0xf0]  ;;  %v5955_v41 = vor.u32 %v7051_v21, %v5954_v17  ;;  %v3511_v46 = vadd.f32 %v3510_v39, %v3498_v36 }
 0x161   :  { %3748 = vmatpush.bf16.msra.mxu0 %v5619_v42  ;;  %3717 = vmatmul.bf16.vlgmr.msrb.gmra.mxu1 %v7508_v40  ;;  %v5682_v35 = vld [vmem:[#allocation2 + $0x968] sm:$0xf]  ;;  %v6983_v42 = vld [vmem:[#allocation2 + $0x974] sm:$0xf0] }
 0x162   :  { %3761 = vmatpush.bf16.msra.mxu1 %v5747_v43  ;;  %3730 = vmatmul.bf16.vlgmr.msrb.gmra.mxu2 %v7502_v34  ;;  %v5810_v43 = vld [vmem:[#allocation2 + $0xa68] sm:$0xf]  ;;  %v7047_v62 = vld [vmem:[#allocation2 + $0xb74] sm:$0xf0]  ;;  %v5683_v49 = vor.u32 %v6983_v42, %v5682_v35 }
 0x163   :  { %3774 = vmatpush.bf16.msra.mxu2 %v5875_v44  ;;  %3743 = vmatmul.bf16.vlgmr.msrb.gmra.mxu3 %v7506_v38  ;;  %v7015_v44 = vld [vmem:[#allocation2 + $0xa74] sm:$0xf0]  ;;  %v5938_v45 = vld [vmem:[#allocation2 + $0xb68] sm:$0xf] }
 0x164   :  { %3787 = vmatpush.bf16.msra.mxu3 %v6003_v47  ;;  %v5555_v47 = vor.u32 %v6951_v33, %v5554_v32  ;;  %v5811_v50 = vor.u32 %v7015_v44, %v5810_v43  ;;  %v5538_v51 = vld [vmem:[#allocation2 + $0x848] sm:$0xf]  ;;  %v6947_v54 = vld [vmem:[#allocation2 + $0x854] sm:$0xf0]  ;;  %v5939_v48 = vor.u32 %v7047_v62, %v5938_v45 }
 0x165   :  { %3749 = vmatpush.bf16.msra.mxu0 %v5603_v53  ;;  %v5666_v52 = vld [vmem:[#allocation2 + $0x948] sm:$0xf]  ;;  %v3523_v53 = vpop.f32.mrf.mxu2  ;;  %v7011_v57 = vld [vmem:[#allocation2 + $0xa54] sm:$0xf0]  ;;  %v5539_v63 = vor.u32 %v6947_v54, %v5538_v51  ;;  %v3499_v1 = vpop.f32.mrf.mxu0 }
 0x166   :  { %3762 = vmatpush.bf16.msra.mxu1 %v5731_v55  ;;  %v6979_v55 = vld [vmem:[#allocation2 + $0x954] sm:$0xf0]  ;;  %v3524_v58 = vadd.f32 %v3523_v53, %v3511_v46  ;;  %v3536_v59 = vpop.f32.mrf.mxu3  ;;  %v5650_v5 = vld [vmem:[#allocation2 + $0x928] sm:$0xf]  ;;  %v3512_v7 = vpop.f32.mrf.mxu1 }
 0x167   :  { %3775 = vmatpush.bf16.msra.mxu2 %v5859_v56  ;;  %v5794_v56 = vld [vmem:[#allocation2 + $0xa48] sm:$0xf]  ;;  %v7043_v61 = vld [vmem:[#allocation2 + $0xb54] sm:$0xf0]  ;;  %v5667_v6 = vor.u32 %v6979_v55, %v5666_v52 }
 0x168   :  { %3788 = vmatpush.bf16.msra.mxu3 %v5987_v60  ;;  %v5922_v60 = vld [vmem:[#allocation2 + $0xb48] sm:$0xf]  ;;  %v7600_v0 = vadd.f32 %v3536_v59, %v3524_v58  ;;  %v7007_v14 = vld [vmem:[#allocation2 + $0xa34] sm:$0xf0] }
 0x169   :  { %3750 = vmatpush.bf16.msra.mxu0 %v5587_v2  ;;  %v5795_v2 = vor.u32 %v7011_v57, %v5794_v56  ;;  %v5923_v10 = vor.u32 %v7043_v61, %v5922_v60  ;;  %v5778_v12 = vld [vmem:[#allocation2 + $0xa28] sm:$0xf]  ;;  %v7039_v17 = vld [vmem:[#allocation2 + $0xb34] sm:$0xf0] }
 0x16a   :  { %3763 = vmatpush.bf16.msra.mxu1 %v5715_v3  ;;  %v5522_v3 = vld [vmem:[#allocation2 + $0x828] sm:$0xf]  ;;  %v6939_v28 = vld [vmem:[#allocation2 + $0x814] sm:$0xf0] }
 0x16b   :  { %3776 = vmatpush.bf16.msra.mxu2 %v5843_v4  ;;  %v6943_v4 = vld [vmem:[#allocation2 + $0x834] sm:$0xf0]  ;;  %v5906_v16 = vld [vmem:[#allocation2 + $0xb28] sm:$0xf] }
 0x16c   :  { %3789 = vmatpush.bf16.msra.mxu3 %v5971_v11  ;;  %v6975_v11 = vld [vmem:[#allocation2 + $0x934] sm:$0xf0]  ;;  %v5523_v21 = vor.u32 %v6943_v4, %v5522_v3  ;;  %v5634_v32 = vld [vmem:[#allocation2 + $0x908] sm:$0xf]  ;;  %v5907_v39 = vor.u32 %v7039_v17, %v5906_v16 }
 0x16d   :  { %3751 = vmatpush.bf16.msra.mxu0 %v5571_v24  ;;  %v5506_v24 = vld [vmem:[#allocation2 + $0x808] sm:$0xf]  ;;  %v6971_v33 = vld [vmem:[#allocation2 + $0x914] sm:$0xf0]  ;;  %v3525_v36 = vpop.f32.mrf.mxu2 }
 0x16e   :  { %3764 = vmatpush.bf16.msra.mxu1 %v5699_v29  ;;  %v5651_v29 = vor.u32 %v6975_v11, %v5650_v5  ;;  %v5762_v35 = vld [vmem:[#allocation2 + $0xa08] sm:$0xf]  ;;  %v7035_v43 = vld [vmem:[#allocation2 + $0xb14] sm:$0xf0]  ;;  %v3538_v44 = vpop.f32.mrf.mxu3  ;;  %v5635_v54 = vor.u32 %v6971_v33, %v5634_v32 }
 0x16f   :  { %3777 = vmatpush.bf16.msra.mxu2 %v5827_v30  ;;  %v5779_v30 = vor.u32 %v7007_v14, %v5778_v12  ;;  %v5890_v42 = vld [vmem:[#allocation2 + $0xb08] sm:$0xf]  ;;  %v7095_v62 = vld [vmem:[#allocation2 + $0xcf4] sm:$0xf0] }
 0x170   :  { %3790 = vmatpush.bf16.msra.mxu3 %v5955_v41  ;;  %v7003_v41 = vld [vmem:[#allocation2 + $0xa14] sm:$0xf0]  ;;  %v6130_v45 = vld [vmem:[#allocation2 + $0xce8] sm:$0xf]  ;;  %v5891_v55 = vor.u32 %v7035_v43, %v5890_v42 }
 0x171   :  { %3752 = vmatpush.bf16.msra.mxu0 %v5555_v47  ;;  %v6258_v46 = vld [vmem:[#allocation2 + $0xde8] sm:$0xf]  ;;  %v5507_v47 = vor.u32 %v6939_v28, %v5506_v24  ;;  %v7159_v51 = vld [vmem:[#allocation2 + $0xef4] sm:$0xf0]  ;;  %v5763_v52 = vor.u32 %v7003_v41, %v5762_v35  ;;  %v6131_v56 = vor.u32 %v7095_v62, %v6130_v45 }
 0x172   :  { %3765 = vmatpush.bf16.msra.mxu1 %v5683_v49  ;;  %v7127_v49 = vld [vmem:[#allocation2 + $0xdf4] sm:$0xf0]  ;;  %v6514_v53 = vld [vmem:[#allocation2 + $0xfe8] sm:$0xf] }
 0x173   :  { %3778 = vmatpush.bf16.msra.mxu2 %v5811_v50  ;;  %v6386_v50 = vld [vmem:[#allocation2 + $0xee8] sm:$0xf]  ;;  %v6259_v57 = vor.u32 %v7127_v49, %v6258_v46  ;;  %v7091_v60 = vld [vmem:[#allocation2 + $0xcd4] sm:$0xf0] }
 0x174   :  { %3791 = vmatpush.bf16.msra.mxu3 %v5939_v48  ;;  %v7191_v48 = vld [vmem:[#allocation2 + $0xff4] sm:$0xf0]  ;;  %v6387_v58 = vor.u32 %v7159_v51, %v6386_v50  ;;  %v6114_v59 = vld [vmem:[#allocation2 + $0xcc8] sm:$0xf] }
 0x175   :  { %3753 = vmatpush.bf16.msra.mxu0 %v5539_v63  ;;  %v6242_v61 = vld [vmem:[#allocation2 + $0xdc8] sm:$0xf]  ;;  %v6515_v63 = vor.u32 %v7191_v48, %v6514_v53  ;;  %v7123_v1 = vld [vmem:[#allocation2 + $0xdd4] sm:$0xf0]  ;;  %v6115_v5 = vor.u32 %v7091_v60, %v6114_v59 }
 0x176   :  { %3766 = vmatpush.bf16.msra.mxu1 %v5667_v6  ;;  %v6370_v6 = vld [vmem:[#allocation2 + $0xec8] sm:$0xf]  ;;  %v7187_v4 = vld [vmem:[#allocation2 + $0xfd4] sm:$0xf0]  ;;  %v6243_v7 = vor.u32 %v7123_v1, %v6242_v61 }
 0x177   :  { %3779 = vmatpush.bf16.msra.mxu2 %v5795_v2  ;;  %v7155_v2 = vld [vmem:[#allocation2 + $0xed4] sm:$0xf0]  ;;  %v6498_v3 = vld [vmem:[#allocation2 + $0xfc8] sm:$0xf] }
 0x178   :  { %3792 = vmatpush.bf16.msra.mxu3 %v5923_v10  ;;  %v6371_v10 = vor.u32 %v7155_v2, %v6370_v6  ;;  %v6098_v11 = vld [vmem:[#allocation2 + $0xca8] sm:$0xf]  ;;  %v7087_v12 = vld [vmem:[#allocation2 + $0xcb4] sm:$0xf0]  ;;  %v6499_v16 = vor.u32 %v7187_v4, %v6498_v3 }
 0x179   :  { %3754 = vmatpush.bf16.msra.mxu0 %v5523_v21  ;;  %v6226_v14 = vld [vmem:[#allocation2 + $0xda8] sm:$0xf]  ;;  %v7119_v17 = vld [vmem:[#allocation2 + $0xdb4] sm:$0xf0] }
 0x17a   :  { %3767 = vmatpush.bf16.msra.mxu1 %v5651_v29  ;;  %v6354_v21 = vld [vmem:[#allocation2 + $0xea8] sm:$0xf]  ;;  %v7151_v24 = vld [vmem:[#allocation2 + $0xeb4] sm:$0xf0]  ;;  %v6227_v32 = vor.u32 %v7119_v17, %v6226_v14 }
 0x17b   :  { %3780 = vmatpush.bf16.msra.mxu2 %v5779_v30  ;;  %v6482_v28 = vld [vmem:[#allocation2 + $0xfa8] sm:$0xf]  ;;  %v7183_v29 = vld [vmem:[#allocation2 + $0xfb4] sm:$0xf0]  ;;  %v6099_v30 = vor.u32 %v7087_v12, %v6098_v11  ;;  %v6355_v33 = vor.u32 %v7151_v24, %v6354_v21 }
 0x17c   :  { %3793 = vmatpush.bf16.msra.mxu3 %v5907_v39  ;;  %v6082_v35 = vld [vmem:[#allocation2 + $0xc88] sm:$0xf]  ;;  %v7083_v36 = vld [vmem:[#allocation2 + $0xc94] sm:$0xf0]  ;;  %v6483_v41 = vor.u32 %v7183_v29, %v6482_v28 }
 0x17d   :  { %3755 = vmatpush.bf16.msra.mxu0 %v5507_v47  ;;  %v6210_v39 = vld [vmem:[#allocation2 + $0xd88] sm:$0xf]  ;;  %v7115_v42 = vld [vmem:[#allocation2 + $0xd94] sm:$0xf0]  ;;  %v3549_v45 = vpop.f32.mrf.mxu0  ;;  %v6083_v49 = vor.u32 %v7083_v36, %v6082_v35 }
 0x17e   :  { %3768 = vmatpush.bf16.msra.mxu1 %v5635_v54  ;;  %v6338_v43 = vld [vmem:[#allocation2 + $0xe88] sm:$0xf]  ;;  %v7147_v44 = vld [vmem:[#allocation2 + $0xe94] sm:$0xf0]  ;;  %v3550_v47 = vadd.f32 %v3549_v45, %v7600_v0  ;;  %v3562_v50 = vpop.f32.mrf.mxu1  ;;  %v6211_v51 = vor.u32 %v7115_v42, %v6210_v39 }
 0x17f   :  { %3781 = vmatpush.bf16.msra.mxu2 %v5763_v52  ;;  %v6466_v62 = vld [vmem:[#allocation2 + $0xf88] sm:$0xf]  ;;  %v7179_v46 = vld [vmem:[#allocation2 + $0xf94] sm:$0xf0]  ;;  %v6339_v54 = vor.u32 %v7147_v44, %v6338_v43 }
 0x180   :  { %3794 = vmatpush.bf16.msra.mxu3 %v5891_v55  ;;  %3756 = vmatmul.bf16.vlgmr.msra.gmra.mxu0 %v7526_v18  ;;  %v6066_v52 = vld [vmem:[#allocation2 + $0xc68] sm:$0xf]  ;;  %v7079_v53 = vld [vmem:[#allocation2 + $0xc74] sm:$0xf0]  ;;  %v6467_v55 = vor.u32 %v7179_v46, %v6466_v62 }
 0x181   :  { %3800 = vmatpush.bf16.msrb.mxu0 %v6131_v56  ;;  %3769 = vmatmul.bf16.vlgmr.msra.gmra.mxu1 %v7530_v23  ;;  %v6194_v48 = vld [vmem:[#allocation2 + $0xd68] sm:$0xf]  ;;  %v3563_v56 = vadd.f32 %v3562_v50, %v3550_v47  ;;  %v7143_v59 = vld [vmem:[#allocation2 + $0xe74] sm:$0xf0] }
 0x182   :  { %3813 = vmatpush.bf16.msrb.mxu1 %v6259_v57  ;;  %3782 = vmatmul.bf16.vlgmr.msra.gmra.mxu2 %v7528_v22  ;;  %v7111_v57 = vld [vmem:[#allocation2 + $0xd74] sm:$0xf0]  ;;  %v6450_v60 = vld [vmem:[#allocation2 + $0xf68] sm:$0xf] }
 0x183   :  { %3826 = vmatpush.bf16.msrb.mxu2 %v6387_v58  ;;  %3795 = vmatmul.bf16.vlgmr.msra.gmra.mxu3 %v7532_v27  ;;  %v6322_v58 = vld [vmem:[#allocation2 + $0xe68] sm:$0xf]  ;;  %v7175_v61 = vld [vmem:[#allocation2 + $0xf74] sm:$0xf0]  ;;  %v6195_v0 = vor.u32 %v7111_v57, %v6194_v48 }
 0x184   :  { %3839 = vmatpush.bf16.msrb.mxu3 %v6515_v63  ;;  %v6067_v63 = vor.u32 %v7079_v53, %v6066_v52  ;;  %v6323_v1 = vor.u32 %v7143_v59, %v6322_v58  ;;  %v6050_v6 = vld [vmem:[#allocation2 + $0xc48] sm:$0xf]  ;;  %v7075_v2 = vld [vmem:[#allocation2 + $0xc54] sm:$0xf0]  ;;  %v6451_v4 = vor.u32 %v7175_v61, %v6450_v60  ;;  %v6709_v58 = vld [vmem:[#allocation2 + $0xec] sm:$0xf] }
 0x185   :  { %3801 = vmatpush.bf16.msrb.mxu0 %v6115_v5  ;;  %v6178_v3 = vld [vmem:[#allocation2 + $0xd48] sm:$0xf]  ;;  %v3575_v5 = vpop.f32.mrf.mxu2  ;;  %v7139_v11 = vld [vmem:[#allocation2 + $0xe54] sm:$0xf0]  ;;  %v3551_v21 = vpop.f32.mrf.mxu0  ;;  %v6051_v24 = vor.u32 %v7075_v2, %v6050_v6  ;;  %v4596_v59 = vld [vmem:[#allocation2 + $0xf8] sm:$0xf0] }
 0x186   :  { %3814 = vmatpush.bf16.msrb.mxu1 %v6243_v7  ;;  %v7107_v7 = vld [vmem:[#allocation2 + $0xd54] sm:$0xf0]  ;;  %v3576_v12 = vadd.f32 %v3575_v5, %v3563_v56  ;;  %v3588_v14 = vpop.f32.mrf.mxu3  ;;  %v3564_v28 = vpop.f32.mrf.mxu1  ;;  %v6162_v36 = vld [vmem:[#allocation2 + $0xd28] sm:$0xf]  ;;  %v6741_v60 = vld [vmem:[#allocation2 + $0x1ec] sm:$0xf] }
 0x187   :  { %3827 = vmatpush.bf16.msrb.mxu2 %v6371_v10  ;;  %v6306_v10 = vld [vmem:[#allocation2 + $0xe48] sm:$0xf]  ;;  %v7171_v17 = vld [vmem:[#allocation2 + $0xf54] sm:$0xf0]  ;;  %v4852_v6 = vld [vmem:[#allocation2 + $0x2f8] sm:$0xf0] }
 0x188   :  { %3840 = vmatpush.bf16.msrb.mxu3 %v6499_v16  ;;  %v6434_v16 = vld [vmem:[#allocation2 + $0xf48] sm:$0xf]  ;;  %v7607_v29 = vadd.f32 %v3588_v14, %v3576_v12  ;;  %v7071_v35 = vld [vmem:[#allocation2 + $0xc34] sm:$0xf0]  ;;  %v4980_v5 = vld [vmem:[#allocation2 + $0x3f8] sm:$0xf0] }
 0x189   :  { %3802 = vmatpush.bf16.msrb.mxu0 %v6099_v30  ;;  %v6179_v30 = vor.u32 %v7107_v7, %v6178_v3  ;;  %v6435_v39 = vor.u32 %v7171_v17, %v6434_v16  ;;  %v6290_v42 = vld [vmem:[#allocation2 + $0xe28] sm:$0xf]  ;;  %v7135_v43 = vld [vmem:[#allocation2 + $0xe34] sm:$0xf0]  ;;  %v6705_v14 = vld [vmem:[#allocation2 + $0xcc] sm:$0xf] }
 0x18a   :  { %3815 = vmatpush.bf16.msrb.mxu1 %v6227_v32  ;;  %v6307_v32 = vor.u32 %v7139_v11, %v6306_v10  ;;  %v6418_v44 = vld [vmem:[#allocation2 + $0xf28] sm:$0xf]  ;;  %v7167_v45 = vld [vmem:[#allocation2 + $0xf34] sm:$0xf0]  ;;  %v6291_v50 = vor.u32 %v7135_v43, %v6290_v42  ;;  %v4599_v10 = vor.u32 %v6709_v58, %v4596_v59  ;;  %v4580_v16 = vld [vmem:[#allocation2 + $0xd8] sm:$0xf0] }
 0x18b   :  { %3828 = vmatpush.bf16.msrb.mxu2 %v6355_v33  ;;  %v6034_v33 = vld [vmem:[#allocation2 + $0xc28] sm:$0xf]  ;;  %v7067_v47 = vld [vmem:[#allocation2 + $0xc14] sm:$0xf0]  ;;  %v6419_v53 = vor.u32 %v7167_v45, %v6418_v44  ;;  %v6737_v17 = vld [vmem:[#allocation2 + $0x1cc] sm:$0xf] }
 0x18c   :  { %3841 = vmatpush.bf16.msrb.mxu3 %v6483_v41  ;;  %v7103_v41 = vld [vmem:[#allocation2 + $0xd34] sm:$0xf0]  ;;  %v6035_v62 = vor.u32 %v7071_v35, %v6034_v33  ;;  %v6018_v46 = vld [vmem:[#allocation2 + $0xc08] sm:$0xf]  ;;  %v6769_v28 = vld [vmem:[#allocation2 + $0x2cc] sm:$0xf]  ;;  %v4583_v35 = vor.u32 %v6705_v14, %v4580_v16 }
 0x18d   :  { %3803 = vmatpush.bf16.msrb.mxu0 %v6083_v49  ;;  %v6163_v49 = vor.u32 %v7103_v41, %v6162_v36  ;;  %v6274_v52 = vld [vmem:[#allocation2 + $0xe08] sm:$0xf]  ;;  %v7131_v48 = vld [vmem:[#allocation2 + $0xe14] sm:$0xf0]  ;;  %v3577_v57 = vpop.f32.mrf.mxu2  ;;  %v4964_v33 = vld [vmem:[#allocation2 + $0x3d8] sm:$0xf0] }
 0x18e   :  { %3816 = vmatpush.bf16.msrb.mxu1 %v6211_v51  ;;  %v6146_v51 = vld [vmem:[#allocation2 + $0xd08] sm:$0xf]  ;;  %v7163_v56 = vld [vmem:[#allocation2 + $0xf14] sm:$0xf0]  ;;  %v3590_v61 = vpop.f32.mrf.mxu3  ;;  %v6275_v3 = vor.u32 %v7131_v48, %v6274_v52  ;;  %v6701_v41 = vld [vmem:[#allocation2 + $0xac] sm:$0xf] }
 0x18f   :  { %3829 = vmatpush.bf16.msrb.mxu2 %v6339_v54  ;;  %v7099_v54 = vld [vmem:[#allocation2 + $0xd14] sm:$0xf0]  ;;  %v4564_v42 = vld [vmem:[#allocation2 + $0xb8] sm:$0xf0]  ;;  %v6733_v43 = vld [vmem:[#allocation2 + $0x1ac] sm:$0xf] }
 0x190   :  { %3842 = vmatpush.bf16.msrb.mxu3 %v6467_v55  ;;  %v6402_v55 = vld [vmem:[#allocation2 + $0xf08] sm:$0xf]  ;;  %v6147_v2 = vor.u32 %v7099_v54, %v6146_v51  ;;  %v4692_v45 = vld [vmem:[#allocation2 + $0x1b8] sm:$0xf0]  ;;  %v6697_v52 = vld [vmem:[#allocation2 + $0x8c] sm:$0xf] }
 0x191   :  { %3804 = vmatpush.bf16.msrb.mxu0 %v6067_v63  ;;  %v6019_v63 = vor.u32 %v7067_v47, %v6018_v46  ;;  %v6403_v7 = vor.u32 %v7163_v56, %v6402_v55  ;;  %v4820_v46 = vld [vmem:[#allocation2 + $0x2b8] sm:$0xf0]  ;;  %v6797_v47 = vld [vmem:[#allocation2 + $0x3ac] sm:$0xf]  ;;  %v4695_v51 = vor.u32 %v6733_v43, %v4692_v45 }
 0x192   :  { %3817 = vmatpush.bf16.msrb.mxu1 %v6195_v0  ;;  %v4724_v0 = vld [vmem:[#allocation2 + $0x1f8] sm:$0xf0]  ;;  %v6729_v48 = vld [vmem:[#allocation2 + $0x18c] sm:$0xf] }
 0x193   :  { %3830 = vmatpush.bf16.msrb.mxu2 %v6323_v1  ;;  %v6773_v1 = vld [vmem:[#allocation2 + $0x2ec] sm:$0xf]  ;;  %v4727_v11 = vor.u32 %v6741_v60, %v4724_v0  ;;  %v4676_v56 = vld [vmem:[#allocation2 + $0x198] sm:$0xf0] }
 0x194   :  { %3843 = vmatpush.bf16.msrb.mxu3 %v6451_v4  ;;  %v6805_v4 = vld [vmem:[#allocation2 + $0x3ec] sm:$0xf]  ;;  %v4855_v12 = vor.u32 %v6773_v1, %v4852_v6  ;;  %v4804_v58 = vld [vmem:[#allocation2 + $0x298] sm:$0xf0]  ;;  %v4679_v6 = vor.u32 %v6729_v48, %v4676_v56 }
 0x195   :  { %3805 = vmatpush.bf16.msrb.mxu0 %v6051_v24  ;;  %v4983_v21 = vor.u32 %v6805_v4, %v4980_v5  ;;  %v4708_v24 = vld [vmem:[#allocation2 + $0x1d8] sm:$0xf0]  ;;  %v6761_v57 = vld [vmem:[#allocation2 + $0x28c] sm:$0xf] }
 0x196   :  { %3818 = vmatpush.bf16.msrb.mxu1 %v6179_v30  ;;  %v4836_v30 = vld [vmem:[#allocation2 + $0x2d8] sm:$0xf0]  ;;  %v4711_v36 = vor.u32 %v6737_v17, %v4708_v24  ;;  %v6793_v60 = vld [vmem:[#allocation2 + $0x38c] sm:$0xf] }
 0x197   :  { %3831 = vmatpush.bf16.msrb.mxu2 %v6307_v32  ;;  %v6801_v32 = vld [vmem:[#allocation2 + $0x3cc] sm:$0xf]  ;;  %v4932_v61 = vld [vmem:[#allocation2 + $0x398] sm:$0xf0] }
 0x198   :  { %3844 = vmatpush.bf16.msrb.mxu3 %v6435_v39  ;;  %v4839_v39 = vor.u32 %v6769_v28, %v4836_v30  ;;  %v4967_v44 = vor.u32 %v6801_v32, %v4964_v33  ;;  %v4532_v4 = vld [vmem:[#allocation2 + $0x78] sm:$0xf0]  ;;  %v6725_v5 = vld [vmem:[#allocation2 + $0x16c] sm:$0xf] }
 0x199   :  { %3806 = vmatpush.bf16.msrb.mxu0 %v6035_v62  ;;  %v6765_v62 = vld [vmem:[#allocation2 + $0x2ac] sm:$0xf]  ;;  %v4788_v14 = vld [vmem:[#allocation2 + $0x278] sm:$0xf0] }
 0x19a   :  { %3819 = vmatpush.bf16.msrb.mxu1 %v6163_v49  ;;  %v4948_v49 = vld [vmem:[#allocation2 + $0x3b8] sm:$0xf0]  ;;  %v4823_v54 = vor.u32 %v6765_v62, %v4820_v46  ;;  %v6789_v16 = vld [vmem:[#allocation2 + $0x36c] sm:$0xf] }
 0x19b   :  { %3832 = vmatpush.bf16.msrb.mxu2 %v6291_v50  ;;  %v4567_v50 = vor.u32 %v6701_v41, %v4564_v42  ;;  %v4951_v55 = vor.u32 %v6797_v47, %v4948_v49  ;;  %v4916_v17 = vld [vmem:[#allocation2 + $0x378] sm:$0xf0]  ;;  %v6689_v28 = vld [vmem:[#allocation2 + $0x4c] sm:$0xf] }
 0x19c   :  { %3845 = vmatpush.bf16.msrb.mxu3 %v6419_v53  ;;  %v4548_v53 = vld [vmem:[#allocation2 + $0x98] sm:$0xf0]  ;;  %v6721_v32 = vld [vmem:[#allocation2 + $0x14c] sm:$0xf]  ;;  %v4919_v33 = vor.u32 %v6789_v16, %v4916_v17 }
 0x19d   :  { %3807 = vmatpush.bf16.msrb.mxu0 %v6019_v63  ;;  %v3601_v59 = vpop.f32.mrf.mxu0  ;;  %v4551_v0 = vor.u32 %v6697_v52, %v4548_v53  ;;  %v4516_v30 = vld [vmem:[#allocation2 + $0x58] sm:$0xf0]  ;;  %v6717_v53 = vld [vmem:[#allocation2 + $0x12c] sm:$0xf] }
 0x19e   :  { %3820 = vmatpush.bf16.msrb.mxu1 %v6147_v2  ;;  %v3602_v63 = vadd.f32 %v3601_v59, %v7607_v29  ;;  %v3614_v1 = vpop.f32.mrf.mxu1  ;;  %v4807_v2 = vor.u32 %v6761_v57, %v4804_v58  ;;  %v4772_v41 = vld [vmem:[#allocation2 + $0x258] sm:$0xf0]  ;;  %v4519_v46 = vor.u32 %v6689_v28, %v4516_v30  ;;  %v6749_v56 = vld [vmem:[#allocation2 + $0x22c] sm:$0xf] }
 0x19f   :  { %3833 = vmatpush.bf16.msrb.mxu2 %v6275_v3  ;;  %v6693_v3 = vld [vmem:[#allocation2 + $0x6c] sm:$0xf]  ;;  %v4900_v45 = vld [vmem:[#allocation2 + $0x358] sm:$0xf0] }
 0x1a0   :  { %3846 = vmatpush.bf16.msrb.mxu3 %v6403_v7  ;;  %3808 = vmatmul.bf16.vlgmr.msrb.gmra.mxu0 %v7550_v13  ;;  %v4935_v7 = vor.u32 %v6793_v60, %v4932_v61  ;;  %v4500_v52 = vld [vmem:[#allocation2 + $0x38] sm:$0xf0]  ;;  %v6781_v58 = vld [vmem:[#allocation2 + $0x32c] sm:$0xf] }
 0x1a1   :  { %3852 = vmatpush.bf16.msra.mxu0 %v4599_v10  ;;  %3821 = vmatmul.bf16.vlgmr.msrb.gmra.mxu1 %v7554_v20  ;;  %v3615_v10 = vadd.f32 %v3614_v1, %v3602_v63  ;;  %v4756_v57 = vld [vmem:[#allocation2 + $0x238] sm:$0xf0]  ;;  %v6681_v61 = vld [vmem:[#allocation2 + $0xc] sm:$0xf] }
 0x1a2   :  { %3865 = vmatpush.bf16.msra.mxu1 %v4727_v11  ;;  %3834 = vmatmul.bf16.vlgmr.msrb.gmra.mxu2 %v7552_v19  ;;  %v4660_v11 = vld [vmem:[#allocation2 + $0x178] sm:$0xf0]  ;;  %v4759_v1 = vor.u32 %v6749_v56, %v4756_v57  ;;  %v6869_v16 = vld [vmem:[#allocation2 + $0x5ec] sm:$0xf] }
 0x1a3   :  { %3878 = vmatpush.bf16.msra.mxu2 %v4855_v12  ;;  %3847 = vmatmul.bf16.vlgmr.msrb.gmra.mxu3 %v7556_v26  ;;  %v6757_v12 = vld [vmem:[#allocation2 + $0x26c] sm:$0xf]  ;;  %v4663_v29 = vor.u32 %v6725_v5, %v4660_v11  ;;  %v4884_v59 = vld [vmem:[#allocation2 + $0x338] sm:$0xf0] }
 0x1a4   :  { %3891 = vmatpush.bf16.msra.mxu3 %v4983_v21  ;;  %v4535_v21 = vor.u32 %v6693_v3, %v4532_v4  ;;  %v4791_v24 = vor.u32 %v6757_v12, %v4788_v14  ;;  %v4484_v63 = vld [vmem:[#allocation2 + $0x18] sm:$0xf0]  ;;  %v6745_v3 = vld [vmem:[#allocation2 + $0x20c] sm:$0xf]  ;;  %v4887_v4 = vor.u32 %v6781_v58, %v4884_v59 }
 0x1a5   :  { %3853 = vmatpush.bf16.msra.mxu0 %v4583_v35  ;;  %v3627_v35 = vpop.f32.mrf.mxu2  ;;  %v3603_v62 = vpop.f32.mrf.mxu0  ;;  %v4740_v5 = vld [vmem:[#allocation2 + $0x218] sm:$0xf0]  ;;  %v6837_v12 = vld [vmem:[#allocation2 + $0x4ec] sm:$0xf] }
 0x1a6   :  { %3866 = vmatpush.bf16.msra.mxu1 %v4711_v36  ;;  %v4644_v36 = vld [vmem:[#allocation2 + $0x158] sm:$0xf0]  ;;  %v3628_v42 = vadd.f32 %v3627_v35, %v3615_v10  ;;  %v3640_v43 = vpop.f32.mrf.mxu3  ;;  %v3616_v47 = vpop.f32.mrf.mxu1  ;;  %v6861_v57 = vld [vmem:[#allocation2 + $0x5ac] sm:$0xf] }
 0x1a7   :  { %3879 = vmatpush.bf16.msra.mxu2 %v4839_v39  ;;  %v6753_v39 = vld [vmem:[#allocation2 + $0x24c] sm:$0xf]  ;;  %v4868_v10 = vld [vmem:[#allocation2 + $0x318] sm:$0xf0] }
 0x1a8   :  { %3892 = vmatpush.bf16.msra.mxu3 %v4967_v44  ;;  %v6785_v44 = vld [vmem:[#allocation2 + $0x34c] sm:$0xf]  ;;  %v7614_v49 = vadd.f32 %v3640_v43, %v3628_v42  ;;  %v5108_v14 = vld [vmem:[#allocation2 + $0x4f8] sm:$0xf0] }
 0x1a9   :  { %3854 = vmatpush.bf16.msra.mxu0 %v4567_v50  ;;  %v4647_v50 = vor.u32 %v6721_v32, %v4644_v36  ;;  %v4903_v48 = vor.u32 %v6785_v44, %v4900_v45  ;;  %v5364_v28 = vld [vmem:[#allocation2 + $0x6f8] sm:$0xf0]  ;;  %v4743_v32 = vor.u32 %v6745_v3, %v4740_v5  ;;  %v6833_v43 = vld [vmem:[#allocation2 + $0x4cc] sm:$0xf] }
 0x1aa   :  { %3867 = vmatpush.bf16.msra.mxu1 %v4695_v51  ;;  %v4775_v51 = vor.u32 %v6753_v39, %v4772_v41  ;;  %v5492_v35 = vld [vmem:[#allocation2 + $0x7f8] sm:$0xf0]  ;;  %v5111_v39 = vor.u32 %v6837_v12, %v5108_v14  ;;  %v6865_v45 = vld [vmem:[#allocation2 + $0x5cc] sm:$0xf] }
 0x1ab   :  { %3880 = vmatpush.bf16.msra.mxu2 %v4823_v54  ;;  %v6685_v54 = vld [vmem:[#allocation2 + $0x2c] sm:$0xf]  ;;  %v5092_v44 = vld [vmem:[#allocation2 + $0x4d8] sm:$0xf0] }
 0x1ac   :  { %3893 = vmatpush.bf16.msra.mxu3 %v4951_v55  ;;  %v4628_v55 = vld [vmem:[#allocation2 + $0x138] sm:$0xf0]  ;;  %v4503_v60 = vor.u32 %v6685_v54, %v4500_v52  ;;  %v6897_v47 = vld [vmem:[#allocation2 + $0x6cc] sm:$0xf]  ;;  %v5095_v52 = vor.u32 %v6833_v43, %v5092_v44 }
 0x1ad   :  { %3855 = vmatpush.bf16.msra.mxu0 %v4551_v0  ;;  %v4631_v0 = vor.u32 %v6717_v53, %v4628_v55  ;;  %v3629_v11 = vpop.f32.mrf.mxu2  ;;  %v5476_v54 = vld [vmem:[#allocation2 + $0x7d8] sm:$0xf0]  ;;  %v6829_v55 = vld [vmem:[#allocation2 + $0x4ac] sm:$0xf] }
 0x1ae   :  { %3868 = vmatpush.bf16.msra.mxu1 %v4679_v6  ;;  %v6713_v6 = vld [vmem:[#allocation2 + $0x10c] sm:$0xf]  ;;  %v3642_v17 = vpop.f32.mrf.mxu3  ;;  %v5076_v56 = vld [vmem:[#allocation2 + $0x4b8] sm:$0xf0] }
 0x1af   :  { %3881 = vmatpush.bf16.msra.mxu2 %v4807_v2  ;;  %v4612_v2 = vld [vmem:[#allocation2 + $0x118] sm:$0xf0]  ;;  %v6857_v5 = vld [vmem:[#allocation2 + $0x58c] sm:$0xf] }
 0x1b0   :  { %3894 = vmatpush.bf16.msra.mxu3 %v4935_v7  ;;  %v6777_v7 = vld [vmem:[#allocation2 + $0x30c] sm:$0xf]  ;;  %v4615_v30 = vor.u32 %v6713_v6, %v4612_v2  ;;  %v5204_v59 = vld [vmem:[#allocation2 + $0x5b8] sm:$0xf0] }
 0x1b1   :  { %3856 = vmatpush.bf16.msra.mxu0 %v4535_v21  ;;  %v4487_v21 = vor.u32 %v6681_v61, %v4484_v63  ;;  %v4871_v36 = vor.u32 %v6777_v7, %v4868_v10  ;;  %v5332_v61 = vld [vmem:[#allocation2 + $0x6b8] sm:$0xf0]  ;;  %v6925_v63 = vld [vmem:[#allocation2 + $0x7ac] sm:$0xf]  ;;  %v5207_v2 = vor.u32 %v6861_v57, %v5204_v59  ;;  %v7620_v7 = vld [vmem:[#allocation4] sm:$0xf] }
 0x1b2   :  { %3869 = vmatpush.bf16.msra.mxu1 %v4663_v29  ;;  %v5236_v29 = vld [vmem:[#allocation2 + $0x5f8] sm:$0xf0]  ;;  %v6825_v6 = vld [vmem:[#allocation2 + $0x48c] sm:$0xf] }
 0x1b3   :  { %3882 = vmatpush.bf16.msra.mxu2 %v4791_v24  ;;  %v6901_v24 = vld [vmem:[#allocation2 + $0x6ec] sm:$0xf]  ;;  %v5239_v41 = vor.u32 %v6869_v16, %v5236_v29  ;;  %v5444_v14 = vld [vmem:[#allocation2 + $0x798] sm:$0xf0] }
 0x1b4   :  { %3895 = vmatpush.bf16.msra.mxu3 %v4919_v33  ;;  %v6933_v33 = vld [vmem:[#allocation2 + $0x7ec] sm:$0xf]  ;;  %v5367_v42 = vor.u32 %v6901_v24, %v5364_v28  ;;  %v5044_v24 = vld [vmem:[#allocation2 + $0x478] sm:$0xf0] }
 0x1b5   :  { %3857 = vmatpush.bf16.msra.mxu0 %v4519_v46  ;;  %v5495_v62 = vor.u32 %v6933_v33, %v5492_v35  ;;  %v5220_v46 = vld [vmem:[#allocation2 + $0x5d8] sm:$0xf0]  ;;  %v6889_v11 = vld [vmem:[#allocation2 + $0x68c] sm:$0xf] }
 0x1b6   :  { %3870 = vmatpush.bf16.msra.mxu1 %v4647_v50  ;;  %v5348_v50 = vld [vmem:[#allocation2 + $0x6d8] sm:$0xf0]  ;;  %v5223_v53 = vor.u32 %v6865_v45, %v5220_v46  ;;  %v6921_v12 = vld [vmem:[#allocation2 + $0x78c] sm:$0xf] }
 0x1b7   :  { %3883 = vmatpush.bf16.msra.mxu2 %v4775_v51  ;;  %v6929_v51 = vld [vmem:[#allocation2 + $0x7cc] sm:$0xf]  ;;  %v5447_v33 = vor.u32 %v6921_v12, %v5444_v14  ;;  %v5172_v35 = vld [vmem:[#allocation2 + $0x578] sm:$0xf0] }
 0x1b8   :  { %3896 = vmatpush.bf16.msra.mxu3 %v4903_v48  ;;  %v5351_v48 = vor.u32 %v6897_v47, %v5348_v50  ;;  %v5479_v58 = vor.u32 %v6929_v51, %v5476_v54  ;;  %v6821_v29 = vld [vmem:[#allocation2 + $0x46c] sm:$0xf]  ;;  %v5028_v47 = vld [vmem:[#allocation2 + $0x458] sm:$0xf0] }
 0x1b9   :  { %3858 = vmatpush.bf16.msra.mxu0 %v4503_v60  ;;  %v6893_v60 = vld [vmem:[#allocation2 + $0x6ac] sm:$0xf]  ;;  %v5047_v44 = vor.u32 %v6821_v29, %v5044_v24  ;;  %v4996_v14 = vld [vmem:[#allocation2 + $0x418] sm:$0xf0] }
 0x1ba   :  { %3871 = vmatpush.bf16.msra.mxu1 %v4631_v0  ;;  %v5460_v0 = vld [vmem:[#allocation2 + $0x7b8] sm:$0xf0]  ;;  %v5335_v3 = vor.u32 %v6893_v60, %v5332_v61  ;;  %v6853_v28 = vld [vmem:[#allocation2 + $0x56c] sm:$0xf] }
 0x1bb   :  { %3884 = vmatpush.bf16.msra.mxu2 %v4759_v1  ;;  %v5079_v1 = vor.u32 %v6829_v55, %v5076_v56  ;;  %v5463_v10 = vor.u32 %v6925_v63, %v5460_v0  ;;  %v5175_v45 = vor.u32 %v6853_v28, %v5172_v35  ;;  %v6817_v46 = vld [vmem:[#allocation2 + $0x44c] sm:$0xf] }
 0x1bc   :  { %3897 = vmatpush.bf16.msra.mxu3 %v4887_v4  ;;  %v5060_v4 = vld [vmem:[#allocation2 + $0x498] sm:$0xf0]  ;;  %v6849_v50 = vld [vmem:[#allocation2 + $0x54c] sm:$0xf]  ;;  %v5031_v59 = vor.u32 %v6817_v46, %v5028_v47 }
 0x1bd   :  { %3859 = vmatpush.bf16.msra.mxu0 %v4487_v21  ;;  %v5063_v16 = vor.u32 %v6825_v6, %v5060_v4  ;;  %v6913_v57 = vld [vmem:[#allocation2 + $0x74c] sm:$0xf]  ;;  %v5012_v6 = vld [vmem:[#allocation2 + $0x438] sm:$0xf0] }
 0x1be   :  { %3872 = vmatpush.bf16.msra.mxu1 %v4615_v30  ;;  %v6809_v12 = vld [vmem:[#allocation2 + $0x40c] sm:$0xf] }
 0x1bf   :  { %3885 = vmatpush.bf16.msra.mxu2 %v4743_v32  ;;  %v3666_v32 = vpop.f32.mrf.mxu1  ;;  %v6873_v29 = vld [vmem:[#allocation2 + $0x60c] sm:$0xf] }
 0x1c0   :  { %3898 = vmatpush.bf16.msra.mxu3 %v4871_v36  ;;  %3860 = vmatmul.bf16.vlgmr.msra.gmra.mxu0 %v7474_v9  ;;  %v5188_v9 = vld [vmem:[#allocation2 + $0x598] sm:$0xf0]  ;;  %v6885_v36 = vld [vmem:[#allocation2 + $0x66c] sm:$0xf] }
 0x1c1   :  { %3904 = vmatpush.bf16.msrb.mxu0 %v5111_v39  ;;  %3873 = vmatmul.bf16.vlgmr.msra.gmra.mxu1 %v7487_v25  ;;  %v3653_v25 = vpop.f32.mrf.mxu0  ;;  %v5191_v17 = vor.u32 %v6857_v5, %v5188_v9  ;;  %v5300_v39 = vld [vmem:[#allocation2 + $0x678] sm:$0xf0]  ;;  %v6909_v9 = vld [vmem:[#allocation2 + $0x72c] sm:$0xf] }
 0x1c2   :  { %3917 = vmatpush.bf16.msrb.mxu1 %v5239_v41  ;;  %3886 = vmatmul.bf16.vlgmr.msra.gmra.mxu2 %v7472_v8  ;;  %v662_v8 = vperm.slane %v7620_v7, 2  ;;  %v6917_v41 = vld [vmem:[#allocation2 + $0x76c] sm:$0xf]  ;;  %v5140_v5 = vld [vmem:[#allocation2 + $0x538] sm:$0xf0] }
 0x1c3   :  { %3930 = vmatpush.bf16.msrb.mxu2 %v5367_v42  ;;  %3899 = vmatmul.bf16.vlgmr.msra.gmra.mxu3 %v7479_v15  ;;  %v5316_v15 = vld [vmem:[#allocation2 + $0x698] sm:$0xf0]  ;;  %v7061_v47 = vld [vmem:[#allocation2 + $0xbec] sm:$0xf] }
 0x1c4   :  { %3943 = vmatpush.bf16.msrb.mxu3 %v5495_v62  ;;  %v5319_v21 = vor.u32 %v6889_v11, %v5316_v15  ;;  %v3654_v30 = vadd.f32 %v3653_v25, %v662_v8  ;;  %v5428_v42 = vld [vmem:[#allocation2 + $0x778] sm:$0xf0]  ;;  %v5303_v62 = vor.u32 %v6885_v36, %v5300_v39  ;;  %v6877_v8 = vld [vmem:[#allocation2 + $0x62c] sm:$0xf] }
 0x1c5   :  { %3905 = vmatpush.bf16.msrb.mxu0 %v5095_v52  ;;  %v3679_v51 = vpop.f32.mrf.mxu2  ;;  %v5431_v54 = vor.u32 %v6917_v41, %v5428_v42  ;;  %v5156_v52 = vld [vmem:[#allocation2 + $0x558] sm:$0xf0]  ;;  %v6965_v36 = vld [vmem:[#allocation2 + $0x8ec] sm:$0xf]  ;;  %v4999_v42 = vor.u32 %v6809_v12, %v4996_v14 }
 0x1c6   :  { %3918 = vmatpush.bf16.msrb.mxu1 %v5223_v53  ;;  %v3667_v43 = vadd.f32 %v3666_v32, %v3654_v30  ;;  %v6881_v53 = vld [vmem:[#allocation2 + $0x64c] sm:$0xf]  ;;  %v3692_v56 = vpop.f32.mrf.mxu3  ;;  %v5159_v63 = vor.u32 %v6849_v50, %v5156_v52  ;;  %v5396_v11 = vld [vmem:[#allocation2 + $0x738] sm:$0xf0] }
 0x1c7   :  { %3931 = vmatpush.bf16.msrb.mxu2 %v5351_v48  ;;  %v5284_v48 = vld [vmem:[#allocation2 + $0x658] sm:$0xf0]  ;;  %v5399_v28 = vor.u32 %v6909_v9, %v5396_v11  ;;  %v6905_v32 = vld [vmem:[#allocation2 + $0x70c] sm:$0xf] }
 0x1c8   :  { %3944 = vmatpush.bf16.msrb.mxu3 %v5479_v58  ;;  %v3680_v55 = vadd.f32 %v3679_v51, %v3667_v43  ;;  %v5412_v58 = vld [vmem:[#allocation2 + $0x758] sm:$0xf0]  ;;  %v5287_v0 = vor.u32 %v6881_v53, %v5284_v48  ;;  %v6997_v41 = vld [vmem:[#allocation2 + $0x9ec] sm:$0xf] }
 0x1c9   :  { %3906 = vmatpush.bf16.msrb.mxu0 %v5079_v1  ;;  %v3655_v61 = vpop.f32.mrf.mxu0  ;;  %v6813_v1 = vld [vmem:[#allocation2 + $0x42c] sm:$0xf]  ;;  %v5415_v4 = vor.u32 %v6913_v57, %v5412_v58  ;;  %v5252_v30 = vld [vmem:[#allocation2 + $0x618] sm:$0xf0] }
 0x1ca   :  { %3919 = vmatpush.bf16.msrb.mxu1 %v5207_v2  ;;  %v7623_v60 = vadd.f32 %v3692_v56, %v3680_v55  ;;  %v6845_v2 = vld [vmem:[#allocation2 + $0x52c] sm:$0xf]  ;;  %v5015_v15 = vor.u32 %v6813_v1, %v5012_v6  ;;  %v5620_v39 = vld [vmem:[#allocation2 + $0x8f8] sm:$0xf0]  ;;  %v5255_v46 = vor.u32 %v6873_v29, %v5252_v30 }
 0x1cb   :  { %3932 = vmatpush.bf16.msrb.mxu2 %v5335_v3  ;;  %v3668_v3 = vpop.f32.mrf.mxu1  ;;  %v5748_v43 = vld [vmem:[#allocation2 + $0x9f8] sm:$0xf0]  ;;  %v6961_v48 = vld [vmem:[#allocation2 + $0x8cc] sm:$0xf] }
 0x1cc   :  { %3945 = vmatpush.bf16.msrb.mxu3 %v5463_v10  ;;  %v5268_v10 = vld [vmem:[#allocation2 + $0x638] sm:$0xf0]  ;;  %v5751_v52 = vor.u32 %v6997_v41, %v5748_v43  ;;  %v6993_v56 = vld [vmem:[#allocation2 + $0x9cc] sm:$0xf] }
 0x1cd   :  { %3907 = vmatpush.bf16.msrb.mxu0 %v5063_v16  ;;  %v5143_v16 = vor.u32 %v6845_v2, %v5140_v5  ;;  %v5271_v25 = vor.u32 %v6877_v8, %v5268_v10  ;;  %v3681_v24 = vpop.f32.mrf.mxu2  ;;  %v6004_v50 = vld [vmem:[#allocation2 + $0xbf8] sm:$0xf0]  ;;  %v6957_v3 = vld [vmem:[#allocation2 + $0x8ac] sm:$0xf] }
 0x1ce   :  { %3920 = vmatpush.bf16.msrb.mxu1 %v5191_v17  ;;  %v6841_v17 = vld [vmem:[#allocation2 + $0x50c] sm:$0xf]  ;;  %v3694_v35 = vpop.f32.mrf.mxu3  ;;  %v5604_v55 = vld [vmem:[#allocation2 + $0x8d8] sm:$0xf0]  ;;  %v6007_v57 = vor.u32 %v7061_v47, %v6004_v50 }
 0x1cf   :  { %3933 = vmatpush.bf16.msrb.mxu2 %v5319_v21  ;;  %v5124_v21 = vld [vmem:[#allocation2 + $0x518] sm:$0xf0]  ;;  %v5607_v1 = vor.u32 %v6961_v48, %v5604_v55  ;;  %v6989_v5 = vld [vmem:[#allocation2 + $0x9ac] sm:$0xf] }
 0x1d0   :  { %3946 = vmatpush.bf16.msrb.mxu3 %v5447_v33  ;;  %v5380_v33 = vld [vmem:[#allocation2 + $0x718] sm:$0xf0]  ;;  %v7021_v9 = vld [vmem:[#allocation2 + $0xaac] sm:$0xf] }
 0x1d1   :  { %3908 = vmatpush.bf16.msrb.mxu0 %v5047_v44  ;;  %v7029_v44 = vld [vmem:[#allocation2 + $0xaec] sm:$0xf]  ;;  %v5383_v51 = vor.u32 %v6905_v32, %v5380_v33  ;;  %v5732_v58 = vld [vmem:[#allocation2 + $0x9d8] sm:$0xf0] }
 0x1d2   :  { %3921 = vmatpush.bf16.msrb.mxu1 %v5175_v45  ;;  %v5876_v45 = vld [vmem:[#allocation2 + $0xaf8] sm:$0xf0]  ;;  %v5735_v6 = vor.u32 %v6993_v56, %v5732_v58  ;;  %v7049_v32 = vld [vmem:[#allocation2 + $0xb8c] sm:$0xf] }
 0x1d3   :  { %3934 = vmatpush.bf16.msrb.mxu2 %v5303_v62  ;;  %v5127_v62 = vor.u32 %v6841_v17, %v5124_v21  ;;  %v5879_v53 = vor.u32 %v7029_v44, %v5876_v45  ;;  %v5860_v61 = vld [vmem:[#allocation2 + $0xad8] sm:$0xf0]  ;;  %v6953_v17 = vld [vmem:[#allocation2 + $0x88c] sm:$0xf] }
 0x1d4   :  { %3947 = vmatpush.bf16.msrb.mxu3 %v5431_v54  ;;  %v5623_v54 = vor.u32 %v6965_v36, %v5620_v39  ;;  %v5716_v10 = vld [vmem:[#allocation2 + $0x9b8] sm:$0xf0]  ;;  %v6949_v36 = vld [vmem:[#allocation2 + $0x86c] sm:$0xf] }
 0x1d5   :  { %3909 = vmatpush.bf16.msrb.mxu0 %v5031_v59  ;;  %v7025_v59 = vld [vmem:[#allocation2 + $0xacc] sm:$0xf]  ;;  %v5844_v11 = vld [vmem:[#allocation2 + $0xab8] sm:$0xf0] }
 0x1d6   :  { %3922 = vmatpush.bf16.msrb.mxu1 %v5159_v63  ;;  %v7057_v63 = vld [vmem:[#allocation2 + $0xbcc] sm:$0xf]  ;;  %v5863_v2 = vor.u32 %v7025_v59, %v5860_v61  ;;  %v5972_v12 = vld [vmem:[#allocation2 + $0xbb8] sm:$0xf0] }
 0x1d7   :  { %3935 = vmatpush.bf16.msrb.mxu2 %v5287_v0  ;;  %v5988_v0 = vld [vmem:[#allocation2 + $0xbd8] sm:$0xf0]  ;;  %v6981_v41 = vld [vmem:[#allocation2 + $0x96c] sm:$0xf] }
 0x1d8   :  { %3948 = vmatpush.bf16.msrb.mxu3 %v5415_v4  ;;  %v5588_v4 = vld [vmem:[#allocation2 + $0x8b8] sm:$0xf0]  ;;  %v5991_v8 = vor.u32 %v7057_v63, %v5988_v0  ;;  %v7013_v45 = vld [vmem:[#allocation2 + $0xa6c] sm:$0xf] }
 0x1d9   :  { %3910 = vmatpush.bf16.msrb.mxu0 %v5015_v15  ;;  %v7053_v15 = vld [vmem:[#allocation2 + $0xbac] sm:$0xf]  ;;  %v5591_v14 = vor.u32 %v6957_v3, %v5588_v4  ;;  %v5572_v21 = vld [vmem:[#allocation2 + $0x898] sm:$0xf0] }
 0x1da   :  { %3923 = vmatpush.bf16.msrb.mxu1 %v5143_v16  ;;  %v5719_v16 = vor.u32 %v6989_v5, %v5716_v10  ;;  %v5975_v29 = vor.u32 %v7053_v15, %v5972_v12  ;;  %v5700_v24 = vld [vmem:[#allocation2 + $0x998] sm:$0xf0]  ;;  %v6977_v48 = vld [vmem:[#allocation2 + $0x94c] sm:$0xf] }
 0x1db   :  { %3936 = vmatpush.bf16.msrb.mxu2 %v5271_v25  ;;  %v5847_v25 = vor.u32 %v7021_v9, %v5844_v11  ;;  %v5828_v30 = vld [vmem:[#allocation2 + $0xa98] sm:$0xf0]  ;;  %v7009_v58 = vld [vmem:[#allocation2 + $0xa4c] sm:$0xf] }
 0x1dc   :  { %3949 = vmatpush.bf16.msrb.mxu3 %v5399_v28  ;;  %v7017_v28 = vld [vmem:[#allocation2 + $0xa8c] sm:$0xf]  ;;  %v5556_v39 = vld [vmem:[#allocation2 + $0x878] sm:$0xf0] }
 0x1dd   :  { %3911 = vmatpush.bf16.msrb.mxu0 %v4999_v42  ;;  %v7629_v33 = vpop.f32.mrf.mxu0  ;;  %v5831_v35 = vor.u32 %v7017_v28, %v5828_v30  ;;  %v5684_v44 = vld [vmem:[#allocation2 + $0x978] sm:$0xf0]  ;;  %v5559_v50 = vor.u32 %v6949_v36, %v5556_v39  ;;  %v7041_v63 = vld [vmem:[#allocation2 + $0xb4c] sm:$0xf] }
 0x1de   :  { %3924 = vmatpush.bf16.msrb.mxu1 %v5127_v62  ;;  %v7631_v42 = vpop.f32.mrf.mxu1  ;;  %v5812_v62 = vld [vmem:[#allocation2 + $0xa78] sm:$0xf0]  ;;  %v6941_v4 = vld [vmem:[#allocation2 + $0x82c] sm:$0xf] }
 0x1df   :  { %3937 = vmatpush.bf16.msrb.mxu2 %v5255_v46  ;;  %v7045_v46 = vld [vmem:[#allocation2 + $0xb6c] sm:$0xf]  ;;  %v5940_v47 = vld [vmem:[#allocation2 + $0xb78] sm:$0xf0] }
 0x1e0   :  { %3950 = vmatpush.bf16.msrb.mxu3 %v5383_v51  ;;  %3912 = vmatmul.bf16.vlgmr.msrb.gmra.mxu0 %v7504_v37  ;;  %v5956_v37 = vld [vmem:[#allocation2 + $0xb98] sm:$0xf0]  ;;  %v5687_v51 = vor.u32 %v6981_v41, %v5684_v44  ;;  %v5943_v56 = vor.u32 %v7045_v46, %v5940_v47  ;;  %v7005_v15 = vld [vmem:[#allocation2 + $0xa2c] sm:$0xf] }
 0x1e1   :  { %3956 = vmatpush.bf16.msra.mxu0 %v5623_v54  ;;  %3925 = vmatmul.bf16.vlgmr.msrb.gmra.mxu1 %v7508_v40  ;;  %v5959_v43 = vor.u32 %v7049_v32, %v5956_v37  ;;  %v5815_v54 = vor.u32 %v7013_v45, %v5812_v62  ;;  %v5796_v59 = vld [vmem:[#allocation2 + $0xa58] sm:$0xf0]  ;;  %v7001_v30 = vld [vmem:[#allocation2 + $0xa0c] sm:$0xf] }
 0x1e2   :  { %3969 = vmatpush.bf16.msra.mxu1 %v5751_v52  ;;  %3938 = vmatmul.bf16.vlgmr.msrb.gmra.mxu2 %v7502_v34  ;;  %v6985_v34 = vld [vmem:[#allocation2 + $0x98c] sm:$0xf]  ;;  %v5924_v0 = vld [vmem:[#allocation2 + $0xb58] sm:$0xf0]  ;;  %v5799_v3 = vor.u32 %v7009_v58, %v5796_v59 }
 0x1e3   :  { %3982 = vmatpush.bf16.msra.mxu2 %v5879_v53  ;;  %3951 = vmatmul.bf16.vlgmr.msrb.gmra.mxu3 %v7506_v38  ;;  %v5575_v38 = vor.u32 %v6953_v17, %v5572_v21  ;;  %v5703_v40 = vor.u32 %v6985_v34, %v5700_v24  ;;  %v6945_v52 = vld [vmem:[#allocation2 + $0x84c] sm:$0xf]  ;;  %v5540_v53 = vld [vmem:[#allocation2 + $0x858] sm:$0xf0]  ;;  %v5927_v9 = vor.u32 %v7041_v63, %v5924_v0 }
 0x1e4   :  { %3995 = vmatpush.bf16.msra.mxu3 %v6007_v57  ;;  %v5668_v57 = vld [vmem:[#allocation2 + $0x958] sm:$0xf0]  ;;  %v6937_v17 = vld [vmem:[#allocation2 + $0x80c] sm:$0xf] }
 0x1e5   :  { %3957 = vmatpush.bf16.msra.mxu0 %v5607_v1  ;;  %v7633_v55 = vpop.f32.mrf.mxu2  ;;  %v5543_v1 = vor.u32 %v6945_v52, %v5540_v53  ;;  %v5524_v5 = vld [vmem:[#allocation2 + $0x838] sm:$0xf0]  ;;  %v6969_v24 = vld [vmem:[#allocation2 + $0x90c] sm:$0xf] }
 0x1e6   :  { %3970 = vmatpush.bf16.msra.mxu1 %v5735_v6  ;;  %v7635_v61 = vpop.f32.mrf.mxu3  ;;  %v3707_v6 = vpop.f32.mrf.mxu0  ;;  %v5652_v11 = vld [vmem:[#allocation2 + $0x938] sm:$0xf0]  ;;  %v7093_v39 = vld [vmem:[#allocation2 + $0xcec] sm:$0xf] }
 0x1e7   :  { %3983 = vmatpush.bf16.msra.mxu2 %v5863_v2  ;;  %v5671_v2 = vor.u32 %v6977_v48, %v5668_v57  ;;  %v3720_v10 = vpop.f32.mrf.mxu1  ;;  %v5780_v12 = vld [vmem:[#allocation2 + $0xa38] sm:$0xf0]  ;;  %v7157_v62 = vld [vmem:[#allocation2 + $0xeec] sm:$0xf] }
 0x1e8   :  { %3996 = vmatpush.bf16.msra.mxu3 %v5991_v8  ;;  %v6973_v8 = vld [vmem:[#allocation2 + $0x92c] sm:$0xf]  ;;  %v5508_v21 = vld [vmem:[#allocation2 + $0x818] sm:$0xf0] }
 0x1e9   :  { %3958 = vmatpush.bf16.msra.mxu0 %v5591_v14  ;;  %v7037_v14 = vld [vmem:[#allocation2 + $0xb2c] sm:$0xf]  ;;  %v5655_v34 = vor.u32 %v6973_v8, %v5652_v11  ;;  %v5636_v28 = vld [vmem:[#allocation2 + $0x918] sm:$0xf0]  ;;  %v5511_v44 = vor.u32 %v6937_v17, %v5508_v21 }
 0x1ea   :  { %3971 = vmatpush.bf16.msra.mxu1 %v5719_v16  ;;  %v5908_v16 = vld [vmem:[#allocation2 + $0xb38] sm:$0xf0]  ;;  %v5639_v47 = vor.u32 %v6969_v24, %v5636_v28  ;;  %v7089_v57 = vld [vmem:[#allocation2 + $0xccc] sm:$0xf] }
 0x1eb   :  { %3984 = vmatpush.bf16.msra.mxu2 %v5847_v25  ;;  %v5527_v25 = vor.u32 %v6941_v4, %v5524_v5  ;;  %v5911_v37 = vor.u32 %v7037_v14, %v5908_v16  ;;  %v6132_v41 = vld [vmem:[#allocation2 + $0xcf8] sm:$0xf0]  ;;  %v7121_v59 = vld [vmem:[#allocation2 + $0xdcc] sm:$0xf] }
 0x1ec   :  { %3997 = vmatpush.bf16.msra.mxu3 %v5975_v29  ;;  %v5783_v29 = vor.u32 %v7005_v15, %v5780_v12  ;;  %v6260_v45 = vld [vmem:[#allocation2 + $0xdf8] sm:$0xf0]  ;;  %v6135_v53 = vor.u32 %v7093_v39, %v6132_v41  ;;  %v7085_v10 = vld [vmem:[#allocation2 + $0xcac] sm:$0xf] }
 0x1ed   :  { %3959 = vmatpush.bf16.msra.mxu0 %v5575_v38  ;;  %v3733_v32 = vpop.f32.mrf.mxu2  ;;  %v5764_v38 = vld [vmem:[#allocation2 + $0xa18] sm:$0xf0]  ;;  %v7117_v11 = vld [vmem:[#allocation2 + $0xdac] sm:$0xf] }
 0x1ee   :  { %3972 = vmatpush.bf16.msra.mxu1 %v5703_v40  ;;  %v7033_v40 = vld [vmem:[#allocation2 + $0xb0c] sm:$0xf]  ;;  %v3746_v36 = vpop.f32.mrf.mxu3  ;;  %v6388_v46 = vld [vmem:[#allocation2 + $0xef8] sm:$0xf0] }
 0x1ef   :  { %3985 = vmatpush.bf16.msra.mxu2 %v5831_v35  ;;  %v5892_v35 = vld [vmem:[#allocation2 + $0xb18] sm:$0xf0]  ;;  %v7149_v14 = vld [vmem:[#allocation2 + $0xeac] sm:$0xf] }
 0x1f0   :  { %3998 = vmatpush.bf16.msra.mxu3 %v5959_v43  ;;  %v7125_v43 = vld [vmem:[#allocation2 + $0xdec] sm:$0xf]  ;;  %v5895_v52 = vor.u32 %v7033_v40, %v5892_v35  ;;  %v6116_v58 = vld [vmem:[#allocation2 + $0xcd8] sm:$0xf0] }
 0x1f1   :  { %3960 = vmatpush.bf16.msra.mxu0 %v5559_v50  ;;  %v5767_v50 = vor.u32 %v7001_v30, %v5764_v38  ;;  %v6263_v48 = vor.u32 %v7125_v43, %v6260_v45  ;;  %v6244_v0 = vld [vmem:[#allocation2 + $0xdd8] sm:$0xf0]  ;;  %v6119_v4 = vor.u32 %v7089_v57, %v6116_v58  ;;  %v7081_v24 = vld [vmem:[#allocation2 + $0xc8c] sm:$0xf] }
 0x1f2   :  { %3973 = vmatpush.bf16.msra.mxu1 %v5687_v51  ;;  %v7189_v51 = vld [vmem:[#allocation2 + $0xfec] sm:$0xf]  ;;  %v6372_v6 = vld [vmem:[#allocation2 + $0xed8] sm:$0xf0]  ;;  %v6247_v5 = vor.u32 %v7121_v59, %v6244_v0 }
 0x1f3   :  { %3986 = vmatpush.bf16.msra.mxu2 %v5815_v54  ;;  %v6516_v54 = vld [vmem:[#allocation2 + $0xff8] sm:$0xf0]  ;;  %v7113_v28 = vld [vmem:[#allocation2 + $0xd8c] sm:$0xf] }
 0x1f4   :  { %3999 = vmatpush.bf16.msra.mxu3 %v5943_v56  ;;  %v6391_v56 = vor.u32 %v7157_v62, %v6388_v46  ;;  %v6519_v63 = vor.u32 %v7189_v51, %v6516_v54  ;;  %v6228_v12 = vld [vmem:[#allocation2 + $0xdb8] sm:$0xf0]  ;;  %v7077_v41 = vld [vmem:[#allocation2 + $0xc6c] sm:$0xf] }
 0x1f5   :  { %3961 = vmatpush.bf16.msra.mxu0 %v5543_v1  ;;  %v7153_v1 = vld [vmem:[#allocation2 + $0xecc] sm:$0xf]  ;;  %v6356_v16 = vld [vmem:[#allocation2 + $0xeb8] sm:$0xf0] }
 0x1f6   :  { %3974 = vmatpush.bf16.msra.mxu1 %v5671_v2  ;;  %v7185_v2 = vld [vmem:[#allocation2 + $0xfcc] sm:$0xf]  ;;  %v6375_v8 = vor.u32 %v7153_v1, %v6372_v6  ;;  %v6484_v17 = vld [vmem:[#allocation2 + $0xfb8] sm:$0xf0] }
 0x1f7   :  { %3987 = vmatpush.bf16.msra.mxu2 %v5799_v3  ;;  %v6500_v3 = vld [vmem:[#allocation2 + $0xfd8] sm:$0xf0]  ;;  %v7141_v46 = vld [vmem:[#allocation2 + $0xe6c] sm:$0xf] }
 0x1f8   :  { %4000 = vmatpush.bf16.msra.mxu3 %v5927_v9  ;;  %v6100_v9 = vld [vmem:[#allocation2 + $0xcb8] sm:$0xf0]  ;;  %v6503_v15 = vor.u32 %v7185_v2, %v6500_v3  ;;  %v7105_v57 = vld [vmem:[#allocation2 + $0xd4c] sm:$0xf] }
 0x1f9   :  { %3962 = vmatpush.bf16.msra.mxu0 %v5527_v25  ;;  %v7181_v25 = vld [vmem:[#allocation2 + $0xfac] sm:$0xf]  ;;  %v6103_v21 = vor.u32 %v7085_v10, %v6100_v9  ;;  %v6212_v32 = vld [vmem:[#allocation2 + $0xd98] sm:$0xf0] }
 0x1fa   :  { %3975 = vmatpush.bf16.msra.mxu1 %v5655_v34  ;;  %v6231_v34 = vor.u32 %v7117_v11, %v6228_v12  ;;  %v6487_v30 = vor.u32 %v7181_v25, %v6484_v17  ;;  %v6468_v40 = vld [vmem:[#allocation2 + $0xf98] sm:$0xf0]  ;;  %v6215_v36 = vor.u32 %v7113_v28, %v6212_v32  ;;  %v7137_v0 = vld [vmem:[#allocation2 + $0xe4c] sm:$0xf] }
 0x1fb   :  { %3988 = vmatpush.bf16.msra.mxu2 %v5783_v29  ;;  %v6359_v29 = vor.u32 %v7149_v14, %v6356_v16  ;;  %v6068_v43 = vld [vmem:[#allocation2 + $0xc78] sm:$0xf0]  ;;  %v7169_v2 = vld [vmem:[#allocation2 + $0xf4c] sm:$0xf] }
 0x1fc   :  { %4001 = vmatpush.bf16.msra.mxu3 %v5911_v37  ;;  %v7145_v37 = vld [vmem:[#allocation2 + $0xe8c] sm:$0xf]  ;;  %v6196_v62 = vld [vmem:[#allocation2 + $0xd78] sm:$0xf0]  ;;  %v6071_v54 = vor.u32 %v7077_v41, %v6068_v43 }
 0x1fd   :  { %3963 = vmatpush.bf16.msra.mxu0 %v5511_v44  ;;  %v7641_v38 = vpop.f32.mrf.mxu0  ;;  %v7109_v44 = vld [vmem:[#allocation2 + $0xd6c] sm:$0xf]  ;;  %v6452_v51 = vld [vmem:[#allocation2 + $0xf78] sm:$0xf0] }
 0x1fe   :  { %3976 = vmatpush.bf16.msra.mxu1 %v5639_v47  ;;  %v7643_v35 = vpop.f32.mrf.mxu1  ;;  %v6324_v47 = vld [vmem:[#allocation2 + $0xe78] sm:$0xf0]  ;;  %v7101_v14 = vld [vmem:[#allocation2 + $0xd2c] sm:$0xf] }
 0x1ff   :  { %3989 = vmatpush.bf16.msra.mxu2 %v5767_v50  ;;  %v7173_v50 = vld [vmem:[#allocation2 + $0xf6c] sm:$0xf]  ;;  %v6308_v1 = vld [vmem:[#allocation2 + $0xe58] sm:$0xf0] }
 0x200   :  { %4002 = vmatpush.bf16.msra.mxu3 %v5895_v52  ;;  %3964 = vmatmul.bf16.vlgmr.msra.gmra.mxu0 %v7526_v18  ;;  %v6084_v18 = vld [vmem:[#allocation2 + $0xc98] sm:$0xf0]  ;;  %v6199_v52 = vor.u32 %v7109_v44, %v6196_v62  ;;  %v6455_v58 = vor.u32 %v7173_v50, %v6452_v51  ;;  %v6311_v11 = vor.u32 %v7137_v0, %v6308_v1  ;;  %v7133_v17 = vld [vmem:[#allocation2 + $0xe2c] sm:$0xf] }
 0x201   :  { %4008 = vmatpush.bf16.msrb.mxu0 %v6135_v53  ;;  %3977 = vmatmul.bf16.vlgmr.msra.gmra.mxu1 %v7530_v23  ;;  %v7177_v23 = vld [vmem:[#allocation2 + $0xf8c] sm:$0xf]  ;;  %v6327_v53 = vor.u32 %v7141_v46, %v6324_v47  ;;  %v6436_v3 = vld [vmem:[#allocation2 + $0xf58] sm:$0xf0] }
 0x202   :  { %4021 = vmatpush.bf16.msrb.mxu1 %v6263_v48  ;;  %3990 = vmatmul.bf16.vlgmr.msra.gmra.mxu2 %v7528_v22  ;;  %v6340_v22 = vld [vmem:[#allocation2 + $0xe98] sm:$0xf0]  ;;  %v6471_v45 = vor.u32 %v7177_v23, %v6468_v40  ;;  %v7073_v48 = vld [vmem:[#allocation2 + $0xc4c] sm:$0xf]  ;;  %v6439_v16 = vor.u32 %v7169_v2, %v6436_v3 }
 0x203   :  { %4034 = vmatpush.bf16.msrb.mxu2 %v6391_v56  ;;  %4003 = vmatmul.bf16.vlgmr.msra.gmra.mxu3 %v7532_v27  ;;  %v6087_v27 = vor.u32 %v7081_v24, %v6084_v18  ;;  %v6343_v39 = vor.u32 %v7145_v37, %v6340_v22  ;;  %v6052_v56 = vld [vmem:[#allocation2 + $0xc58] sm:$0xf0]  ;;  %v7065_v28 = vld [vmem:[#allocation2 + $0xc0c] sm:$0xf] }
 0x204   :  { %4047 = vmatpush.bf16.msrb.mxu3 %v6519_v63  ;;  %v6180_v63 = vld [vmem:[#allocation2 + $0xd58] sm:$0xf0]  ;;  %v7097_v32 = vld [vmem:[#allocation2 + $0xd0c] sm:$0xf] }
 0x205   :  { %4009 = vmatpush.bf16.msrb.mxu0 %v6119_v4  ;;  %v7645_v59 = vpop.f32.mrf.mxu2  ;;  %v3759_v4 = vpop.f32.mrf.mxu0  ;;  %v6183_v9 = vor.u32 %v7105_v57, %v6180_v63  ;;  %v6036_v12 = vld [vmem:[#allocation2 + $0xc38] sm:$0xf0]  ;;  %v7129_v23 = vld [vmem:[#allocation2 + $0xe0c] sm:$0xf]  ;;  %v7196_v63 = vld [vmem:[#allocation6 + $0x20] sm:$0xff] }
 0x206   :  { %4022 = vmatpush.bf16.msrb.mxu1 %v6247_v5  ;;  %v7647_v6 = vpop.f32.mrf.mxu3  ;;  %v3706_v5 = vadd.f32 %v7629_v33, %v7623_v60  ;;  %v3772_v10 = vpop.f32.mrf.mxu1  ;;  %v6164_v25 = vld [vmem:[#allocation2 + $0xd38] sm:$0xf0] }
 0x207   :  { %4035 = vmatpush.bf16.msrb.mxu2 %v6375_v8  ;;  %v6055_v8 = vor.u32 %v7073_v48, %v6052_v56  ;;  %v6167_v33 = vor.u32 %v7101_v14, %v6164_v25  ;;  %v6148_v22 = vld [vmem:[#allocation2 + $0xd18] sm:$0xf0]  ;;  %v7197_v48 = vld [vmem:[#allocation6 + $0x28] sm:$0xff] }
 0x208   :  { %4048 = vmatpush.bf16.msrb.mxu3 %v6503_v15  ;;  %v7069_v15 = vld [vmem:[#allocation2 + $0xc2c] sm:$0xf]  ;;  %v3719_v24 = vadd.f32 %v7631_v42, %v3706_v5  ;;  %v6276_v40 = vld [vmem:[#allocation2 + $0xe18] sm:$0xf0]  ;;  %v6151_v44 = vor.u32 %v7097_v32, %v6148_v22  ;;  %v663_v32 = vperm.slane %v7620_v7, 3  ;;  %v7222_v7 = vld [vmem:[#allocation6 + $0xf0] sm:$0xff] }
 0x209   :  { %4010 = vmatpush.bf16.msrb.mxu0 %v6103_v21  ;;  %v6292_v21 = vld [vmem:[#allocation2 + $0xe38] sm:$0xf0]  ;;  %v6039_v60 = vor.u32 %v7069_v15, %v6036_v12  ;;  %v7213_v56 = vld [vmem:[#allocation6 + $0xa8] sm:$0xff] }
 0x20a   :  { %4023 = vmatpush.bf16.msrb.mxu1 %v6231_v34  ;;  %v7165_v34 = vld [vmem:[#allocation2 + $0xf2c] sm:$0xf]  ;;  %v6295_v18 = vor.u32 %v7133_v17, %v6292_v21  ;;  %v3732_v42 = vadd.f32 %v7633_v55, %v3719_v24  ;;  %v7199_v46 = vld [vmem:[#allocation6 + $0x38] sm:$0xff]  ;;  %v7198_v55 = vld [vmem:[#allocation6 + $0x30] sm:$0xff] }
 0x20b   :  { %4036 = vmatpush.bf16.msrb.mxu2 %v6359_v29  ;;  %v6420_v29 = vld [vmem:[#allocation2 + $0xf38] sm:$0xf0]  ;;  %v7201_v12 = vld [vmem:[#allocation6 + $0x48] sm:$0xff]  ;;  %v7192_v21 = vld [vmem:[#allocation6] sm:$0xff] }
 0x20c   :  { %4049 = vmatpush.bf16.msrb.mxu3 %v6487_v30  ;;  %v6020_v30 = vld [vmem:[#allocation2 + $0xc18] sm:$0xf0]  ;;  %v6423_v37 = vor.u32 %v7165_v34, %v6420_v29  ;;  %v3745_v51 = vadd.f32 %v7635_v61, %v3732_v42  ;;  %v7209_v14 = vld [vmem:[#allocation6 + $0x88] sm:$0xff]  ;;  %v4060_v34 = vmax.f32 %v7587_v31, 0.0  ;;  %v7200_v29 = vld [vmem:[#allocation6 + $0x40] sm:$0xff] }
 0x20d   :  { %4011 = vmatpush.bf16.msrb.mxu0 %v6087_v27  ;;  %v3785_v27 = vpop.f32.mrf.mxu2  ;;  %v6023_v43 = vor.u32 %v7065_v28, %v6020_v30  ;;  %v7207_v47 = vld [vmem:[#allocation6 + $0x78] sm:$0xff]  ;;  %v7208_v24 = vld [vmem:[#allocation6 + $0x80] sm:$0xff] }
 0x20e   :  { %4024 = vmatpush.bf16.msrb.mxu1 %v6215_v36  ;;  %v7161_v36 = vld [vmem:[#allocation2 + $0xf0c] sm:$0xf]  ;;  %v3798_v41 = vpop.f32.mrf.mxu3  ;;  %v7215_v50 = vld [vmem:[#allocation6 + $0xb8] sm:$0xff] }
 0x20f   :  { %4037 = vmatpush.bf16.msrb.mxu2 %v6343_v39  ;;  %v6404_v39 = vld [vmem:[#allocation2 + $0xf18] sm:$0xf0] }
 0x210   :  { %4050 = vmatpush.bf16.msrb.mxu3 %v6471_v45  ;;  %v6279_v45 = vor.u32 %v7129_v23, %v6276_v40  ;;  %v6407_v62 = vor.u32 %v7161_v36, %v6404_v39  ;;  %v7203_v1 = vld [vmem:[#allocation6 + $0x58] sm:$0xff] }
 0x211   :  { %4012 = vmatpush.bf16.msrb.mxu0 %v6071_v54  ;;  %v3758_v54 = vadd.f32 %v7641_v38, %v3745_v51  ;;  %v7205_v38 = vld [vmem:[#allocation6 + $0x68] sm:$0xff]  ;;  %v7211_v2 = vld [vmem:[#allocation6 + $0x98] sm:$0xff] }
 0x212   :  { %4025 = vmatpush.bf16.msrb.mxu1 %v6199_v52  ;;  %v7206_v52 = vld [vmem:[#allocation6 + $0x70] sm:$0xff] }
 0x213   :  { %4038 = vmatpush.bf16.msrb.mxu2 %v6327_v53  ;;  %v7214_v53 = vld [vmem:[#allocation6 + $0xb0] sm:$0xff]  ;;  %v3771_v61 = vadd.f32 %v7643_v35, %v3758_v54  ;;  %v7195_v35 = vld [vmem:[#allocation6 + $0x18] sm:$0xff] }
 0x214   :  { %4051 = vmatpush.bf16.msrb.mxu3 %v6455_v58 }
 0x215   :  { %4013 = vmatpush.bf16.msrb.mxu0 %v6055_v8  ;;  %v3784_v57 = vadd.f32 %v7645_v59, %v3771_v61  ;;  %v7194_v8 = vld [vmem:[#allocation6 + $0x10] sm:$0xff]  ;;  %v7219_v61 = vld [vmem:[#allocation6 + $0xd8] sm:$0xff] }
 0x216   :  { %4026 = vmatpush.bf16.msrb.mxu1 %v6183_v9  ;;  %v7202_v9 = vld [vmem:[#allocation6 + $0x50] sm:$0xff] }
 0x217   :  { %4039 = vmatpush.bf16.msrb.mxu2 %v6311_v11  ;;  %v7210_v11 = vld [vmem:[#allocation6 + $0x90] sm:$0xff] }
 0x218   :  { %4052 = vmatpush.bf16.msrb.mxu3 %v6439_v16 }
 0x219   :  { %4014 = vmatpush.bf16.msrb.mxu0 %v6039_v60  ;;  %v4061_v60 = vmax.f32 %v7614_v49, 0.0 }
 0x21a   :  { %4027 = vmatpush.bf16.msrb.mxu1 %v6167_v33 }
 0x21b   :  { %4040 = vmatpush.bf16.msrb.mxu2 %v6295_v18  ;;  %v4064_v18 = vpack.c.bf16 %v4060_v34, %v4060_v34  ;;  %v4065_v28 = vpack.c.bf16 %v4061_v60, %v4061_v60  ;;  %v7231_v34 = vld [vmem:[#allocation9 + $0x38] sm:$0xff] }
 0x21c   :  { %4053 = vmatpush.bf16.msrb.mxu3 %v6423_v37 }
 0x21d   :  { %4015 = vmatpush.bf16.msrb.mxu0 %v6023_v43  ;;  %v3809_v58 = vpop.f32.mrf.mxu0 }
 0x21e   :  { %4028 = vmatpush.bf16.msrb.mxu1 %v6151_v44 }
 0x21f   :  { %4041 = vmatpush.bf16.msrb.mxu2 %v6279_v45 }
 0x220   :  { %4054 = vmatpush.bf16.msrb.mxu3 %v6407_v62  ;;  %4016 = vmatmul.bf16.vlgmr.msrb.gmra.mxu0 %v7550_v13  ;;  %v3822_v13 = vpop.f32.mrf.mxu1 }
 0x221   :  { %4328 = vmatpush.bf16.msra.mxu0 %v7199_v46  ;;  %4029 = vmatmul.bf16.vlgmr.msrb.gmra.mxu1 %v7554_v20  ;;  %v7204_v20 = vld [vmem:[#allocation6 + $0x60] sm:$0xff] }
 0x222   :  { %4341 = vmatpush.bf16.msra.mxu1 %v7207_v47  ;;  %4042 = vmatmul.bf16.vlgmr.msrb.gmra.mxu2 %v7552_v19  ;;  %v7212_v19 = vld [vmem:[#allocation6 + $0xa0] sm:$0xff]  ;;  %v7223_v47 = vld [vmem:[#allocation6 + $0xf8] sm:$0xff] }
 0x223   :  { %4354 = vmatpush.bf16.msra.mxu2 %v7215_v50  ;;  %4055 = vmatmul.bf16.vlgmr.msrb.gmra.mxu3 %v7556_v26  ;;  %v3797_v26 = vadd.f32 %v7647_v6, %v3784_v57  ;;  %v7193_v6 = vld [vmem:[#allocation6 + $0x8] sm:$0xff] }
 0x224   :  { %4367 = vmatpush.bf16.msra.mxu3 %v7223_v47  ;;  %v7217_v57 = vld [vmem:[#allocation6 + $0xc8] sm:$0xff] }
 0x225   :  { %4329 = vmatpush.bf16.msra.mxu0 %v7198_v55  ;;  %v3810_v0 = vadd.f32 %v3809_v58, %v3797_v26  ;;  %v3835_v3 = vpop.f32.mrf.mxu2  ;;  %v3811_v59 = vpop.f32.mrf.mxu0  ;;  %v7221_v55 = vld [vmem:[#allocation6 + $0xe8] sm:$0xff]  ;;  %v7216_v26 = vld [vmem:[#allocation6 + $0xc0] sm:$0xff] }
 0x226   :  { %4342 = vmatpush.bf16.msra.mxu1 %v7206_v52  ;;  %v3848_v4 = vpop.f32.mrf.mxu3 }
 0x227   :  { %4355 = vmatpush.bf16.msra.mxu2 %v7214_v53  ;;  %v3823_v5 = vadd.f32 %v3822_v13, %v3810_v0  ;;  %v7220_v53 = vld [vmem:[#allocation6 + $0xe0] sm:$0xff] }
 0x228   :  { %v3824_v10 = vpop.f32.mrf.mxu1  ;;  %4368 = vmatpush.bf16.msra.mxu3 %v7222_v7 }
 0x229   :  { %4330 = vmatpush.bf16.msra.mxu0 %v7197_v48  ;;  %v3836_v15 = vadd.f32 %v3835_v3, %v3823_v5 }
 0x22a   :  { %4343 = vmatpush.bf16.msra.mxu1 %v7205_v38 }
 0x22b   :  { %4356 = vmatpush.bf16.msra.mxu2 %v7213_v56  ;;  %v3849_v16 = vadd.f32 %v3848_v4, %v3836_v15  ;;  %v7218_v56 = vld [vmem:[#allocation6 + $0xd0] sm:$0xff] }
 0x22c   :  { %4369 = vmatpush.bf16.msra.mxu3 %v7221_v55 }
 0x22d   :  { %4331 = vmatpush.bf16.msra.mxu0 %v7196_v63  ;;  %v3837_v25 = vpop.f32.mrf.mxu2  ;;  %v4062_v33 = vmax.f32 %v3849_v16, 0.0 }
 0x22e   :  { %4344 = vmatpush.bf16.msra.mxu1 %v7204_v20  ;;  %v3850_v17 = vpop.f32.mrf.mxu3 }
 0x22f   :  { %4357 = vmatpush.bf16.msra.mxu2 %v7212_v19  ;;  %v4066_v30 = vpack.c.bf16 %v4062_v33, %v4062_v33 }
 0x230   :  { %4370 = vmatpush.bf16.msra.mxu3 %v7220_v53 }
 0x231   :  { %4332 = vmatpush.bf16.msra.mxu0 %v7195_v35 }
 0x232   :  { %4345 = vmatpush.bf16.msra.mxu1 %v7203_v1 }
 0x233   :  { %4358 = vmatpush.bf16.msra.mxu2 %v7211_v2 }
 0x234   :  { %4371 = vmatpush.bf16.msra.mxu3 %v7219_v61 }
 0x235   :  { %4333 = vmatpush.bf16.msra.mxu0 %v7194_v8 }
 0x236   :  { %4346 = vmatpush.bf16.msra.mxu1 %v7202_v9 }
 0x237   :  { %4359 = vmatpush.bf16.msra.mxu2 %v7210_v11 }
 0x238   :  { %4372 = vmatpush.bf16.msra.mxu3 %v7218_v56 }
 0x239   :  { %4334 = vmatpush.bf16.msra.mxu0 %v7193_v6 }
 0x23a   :  { %4347 = vmatpush.bf16.msra.mxu1 %v7201_v12 }
 0x23b   :  { %4360 = vmatpush.bf16.msra.mxu2 %v7209_v14 }
 0x23c   :  { %4373 = vmatpush.bf16.msra.mxu3 %v7217_v57 }
 0x23d   :  { %4335 = vmatpush.bf16.msra.mxu0 %v7192_v21  ;;  %v3861_v37 = vpop.f32.mrf.mxu0 }
 0x23e   :  { %4348 = vmatpush.bf16.msra.mxu1 %v7200_v29  ;;  %v3862_v31 = vadd.f32 %v3861_v37, %v663_v32  ;;  %v3874_v22 = vpop.f32.mrf.mxu1  ;;  %v7227_v32 = vld [vmem:[#allocation9 + $0x18] sm:$0xff] }
 0x23f   :  { %4361 = vmatpush.bf16.msra.mxu2 %v7208_v24  ;;  %v7230_v24 = vld [vmem:[#allocation9 + $0x30] sm:$0xff] }
 0x240   :  { %4336 = vmatmul.bf16.vlgmr.msra.gmra.mxu0 %v4064_v18  ;;  %v3875_v23 = vadd.f32 %v3874_v22, %v3862_v31  ;;  %4374 = vmatpush.bf16.msra.mxu3 %v7216_v26  ;;  %v7229_v18 = vld [vmem:[#allocation9 + $0x28] sm:$0xff] }
 0x241   :  { %4349 = vmatmul.bf16.vlgmr.msra.gmra.mxu1 %v4065_v28  ;;  %4450 = vmatpush.bf16.msrb.mxu0 %v7231_v34  ;;  %v7228_v28 = vld [vmem:[#allocation9 + $0x20] sm:$0xff] }
 0x242   :  { %4362 = vmatmul.bf16.vlgmr.msra.gmra.mxu2 %v4066_v30  ;;  %v7242_v30 = vld [vmem:[#allocation7] ss:$0 sm:$0xff] }
 0x245   :  { %v3887_v40 = vpop.f32.mrf.mxu2  ;;  %v3863_v39 = vpop.f32.mrf.mxu0  ;;  %4451 = vmatpush.bf16.msrb.mxu0 %v7230_v24 }
 0x246   :  { %v3888_v27 = vadd.f32 %v3887_v40, %v3875_v23  ;;  %v3900_v36 = vpop.f32.mrf.mxu3  ;;  %v3876_v41 = vpop.f32.mrf.mxu1  ;;  %v7226_v23 = vld [vmem:[#allocation9 + $0x10] sm:$0xff] }
 0x248   :  { %v3901_v49 = vadd.f32 %v3900_v36, %v3888_v27 }
 0x249   :  { %4452 = vmatpush.bf16.msrb.mxu0 %v7229_v18 }
 0x24d   :  { %v3889_v42 = vpop.f32.mrf.mxu2  ;;  %4453 = vmatpush.bf16.msrb.mxu0 %v7228_v28 }
 0x24e   :  { %v3902_v43 = vpop.f32.mrf.mxu3  ;;  %v7225_v42 = vld [vmem:[#allocation9 + $0x8] sm:$0xff] }
 0x24f   :  { %v7224_v43 = vld [vmem:[#allocation9] sm:$0xff] }
 0x251   :  { %4454 = vmatpush.bf16.msrb.mxu0 %v7227_v32 }
 0x255   :  { %4455 = vmatpush.bf16.msrb.mxu0 %v7226_v23 }
 0x259   :  { %4456 = vmatpush.bf16.msrb.mxu0 %v7225_v42 }
 0x25d   :  { %v3913_v44 = vpop.f32.mrf.mxu0  ;;  %4457 = vmatpush.bf16.msrb.mxu0 %v7224_v43 }
 0x25e   :  { %v3926_v45 = vpop.f32.mrf.mxu1  ;;  %v3914_v58 = vadd.f32 %v3913_v44, %v3901_v49 }
 0x260   :  { %v3927_v0 = vadd.f32 %v3926_v45, %v3914_v58 }
 0x265   :  { %v3939_v62 = vpop.f32.mrf.mxu2  ;;  %v3915_v50 = vpop.f32.mrf.mxu0 }
 0x266   :  { %v3952_v46 = vpop.f32.mrf.mxu3  ;;  %v3928_v51 = vpop.f32.mrf.mxu1  ;;  %v3940_v35 = vadd.f32 %v3939_v62, %v3927_v0  ;;  %v7243_v50 = vld [vmem:[#allocation10] ss:$0 sm:$0xff] }
 0x268   :  { %v3953_v3 = vadd.f32 %v3952_v46, %v3940_v35 }
 0x26d   :  { %v3941_v54 = vpop.f32.mrf.mxu2 }
 0x26e   :  { %v3954_v52 = vpop.f32.mrf.mxu3 }
 0x27d   :  { %v3965_v48 = vpop.f32.mrf.mxu0 }
 0x27e   :  { %v3978_v38 = vpop.f32.mrf.mxu1  ;;  %v3966_v4 = vadd.f32 %v3965_v48, %v3953_v3 }
 0x280   :  { %v3979_v59 = vadd.f32 %v3978_v38, %v3966_v4 }
 0x285   :  { %v3991_v63 = vpop.f32.mrf.mxu2  ;;  %v3967_v20 = vpop.f32.mrf.mxu0 }
 0x286   :  { %v4004_v13 = vpop.f32.mrf.mxu3  ;;  %v3980_v19 = vpop.f32.mrf.mxu1  ;;  %v3992_v5 = vadd.f32 %v3991_v63, %v3979_v59 }
 0x288   :  { %v4005_v8 = vadd.f32 %v4004_v13, %v3992_v5 }
 0x28d   :  { %v3993_v1 = vpop.f32.mrf.mxu2 }
 0x28e   :  { %v4006_v2 = vpop.f32.mrf.mxu3 }
 0x29d   :  { %v4017_v10 = vpop.f32.mrf.mxu0 }
 0x29e   :  { %v4030_v9 = vpop.f32.mrf.mxu1  ;;  %v4018_v11 = vadd.f32 %v4017_v10, %v4005_v8 }
 0x2a0   :  { %v4031_v15 = vadd.f32 %v4030_v9, %v4018_v11 }
 0x2a5   :  { %v4043_v6 = vpop.f32.mrf.mxu2  ;;  %v4019_v16 = vpop.f32.mrf.mxu0 }
 0x2a6   :  { %v4056_v12 = vpop.f32.mrf.mxu3  ;;  %v4044_v14 = vadd.f32 %v4043_v6, %v4031_v15  ;;  %v4032_v25 = vpop.f32.mrf.mxu1 }
 0x2a8   :  { %v4057_v17 = vadd.f32 %v4056_v12, %v4044_v14 }
 0x2aa   :  { %v4063_v21 = vmax.f32 %v4057_v17, 0.0 }
 0x2ac   :  { %v4067_v29 = vpack.c.bf16 %v4063_v21, %v4063_v21 }
 0x2ad   :  { %v4045_v60 = vpop.f32.mrf.mxu2 }
 0x2ae   :  { %v4058_v33 = vpop.f32.mrf.mxu3  ;;  %4375 = vmatmul.bf16.vlgmr.msra.gmra.mxu3 %v4067_v29 }
 0x2bd   :  { %v4337_v37 = vpop.f32.mrf.mxu0 }
 0x2be   :  { %v4338_v31 = vadd.f32 %v7242_v30, %v4337_v37  ;;  %v4350_v22 = vpop.f32.mrf.mxu1 }
 0x2c0   :  { %v4351_v40 = vadd.f32 %v4350_v22, %v4338_v31 }
 0x2c5   :  { %v4363_v27 = vpop.f32.mrf.mxu2  ;;  %v4339_v49 = vpop.f32.mrf.mxu0 }
 0x2c6   :  { %v4364_v36 = vadd.f32 %v4363_v27, %v4351_v40  ;;  %v4352_v39 = vpop.f32.mrf.mxu1 }
 0x2cd   :  { %v4365_v41 = vpop.f32.mrf.mxu2 }
 0x331   :  { %v4376_v44 = vpop.f32.mrf.mxu3 }
 0x332   :  { %v4377_v45 = vadd.f32 %v4376_v44, %v4364_v36 }
 0x334   :  { %v4380_v62 = vmax.f32 %v4377_v45, 0.0 }
 0x336   :  { %v4381_v46 = vpack.c.bf16 %v4380_v62, %v4380_v62 }
 0x338   :  { %4458 = vmatmul.bf16.vlgmr.msrb.gmra.mxu0 %v4381_v46 }
 0x339   :  { %v4378_v47 = vpop.f32.mrf.mxu3 }
 0x3b5   :  { %v4459_v51 = vpop.f32.mrf.mxu0 }
 0x3b6   :  { %v4460_v7 = vadd.f32 %v7243_v50, %v4459_v51 }
 0x3b8   :  { %4463 = vst [vmem:[%s7675_s7] sm:$0xff] %v4460_v7 }
 0x3bd   :  { %v4461_v54 = vpop.f32.mrf.mxu0 }
 0x3be   :  { %4468 = vsyncpa [#allocation3], 1 }
 0x3bf   :  { %4469 = vsyncpa [#allocation5], 1 }
 0x3c0   :  { %4470 = vsyncpa [#allocation8], 1 }
 0x3c1   :  { %4471 = vsyncpa [#allocation11], 1 }

// kernel: mlp_celeba_forward.2
= control target key start
LH: loop header
LB: loop body
LE: loop exit
PB: predicated region body
PF: predicated region fallthrough
CT: control target
= control target key end

     0   :  { %s16425_s0 = inlined_call_operand.vmem [shape: bf16[8,12288], index: 0, kind: input, shape index: {}]   ;;  %s16426_s1 = inlined_call_operand.hbm [shape: bf16[12288,2048], index: 1, kind: input, shape index: {}]   ;;  %s16427_s2 = inlined_call_operand.hbm [shape: f32[1,2048], index: 2, kind: input, shape index: {}]   ;;  %s16428_s3 = inlined_call_operand.vmem [shape: f32[8,2048], index: 3, kind: output, shape index: {}]  }
   0x1   :  { %16431 = sst [smem:[#allocation10_spill]] %s16426_s1 }
   0x2   :  { %8 = vsyncpa [#allocation3], 0 }
   0x3   :  { %10 = vsyncpa [#allocation3 + $0x1], 0 }
   0x4   :  { %11 = vsyncpa [#allocation5], 0 }
   0x5   :  { %13 = vsyncpa [#allocation5 + $0x1], 0  ;;  %s13781_s12 = smov 0   ;;  %s13783_s13 = smov 0  }
   0x6   :  { %s13785_s14 = smov 0   ;;  %s13787_s15 = smov 0  }
   0x7   :  { %s13789_s16 = smov 0   ;;  %s13791_s17 = smov 0  }
   0x8   :  { %s13793_s18 = smov 0   ;;  %s13795_s19 = smov 0  }
   0x9   :  { %s13797_s20 = smov 0   ;;  %s13799_s21 = smov 0  }
   0xa   :  { %s13801_s22 = smov 0  }
   0xb LB: > { %s28_s23 = sadd.s32 1, %s13747_s20  ;;  %s31_s24 = sadd.s32 1, %s13751_s21  ;;  %s13755_s22 = sphi %s13801_s22, %s19_s22   ;;  %s13751_s21 = sphi %s13799_s21, %s16450_s21   ;;  %s13747_s20 = sphi %s13797_s20, %s16449_s20   ;;  %s13743_s19 = sphi %s13795_s19, %s16448_s19   ;;  %s13739_s18 = sphi %s13793_s18, %s16447_s18   ;;  %s13735_s17 = sphi %s13791_s17, %s16446_s17   ;;  %s13731_s16 = sphi %s13789_s16, %s16445_s16   ;;  %s13727_s15 = sphi %s13787_s15, %s16444_s15   ;;  %s13723_s14 = sphi %s13785_s14, %s16443_s14   ;;  %s13719_s13 = sphi %s13783_s13, %s16442_s13   ;;  %s13715_s12 = sphi %s13781_s12, %s16441_s12  }
   0xc   : > { %p29_p0 = scmp.ge.s32.totalorder %s28_s23, 6  ;;  %p73_p1 = scmp.ne.s32.totalorder %s13735_s17, %s13731_s16 }
   0xd   : > { %p74_p2 = scmp.eq.s32.totalorder %s13755_s22, 0  ;;  %s66_s25 = sadd.s32 1, %s13735_s17 }
   0xe   : > { %s16452_s23 = smov (%p29_p0, %s28_s23), 0  ;;  %s16454_s24 = smov (!%p29_p0, %s31_s24), %s13751_s21 }
   0xf   : > { %16432 = sst [smem:[#allocation8_spill]] %s16452_s23  ;;  %p75_p3 = por %p74_p2, %p73_p1 }
  0x10   : > { %p13508_p4 = scmp.lt.s32.totalorder %s13755_s22, 12  ;;  %s164_s26 = sand.u32 1, %s13735_s17  }
  0x11   : > { %s8360_s27 = sshll.u32 %s13751_s21, 3  ;;  %s8358_s28 = sshll.u32 %s164_s26, 13 }
  0x12   : > { %s12472_s29 = sshll.u32 %s13747_s20, 12  ;;  %s168_s4 = scalar_lea.vmem [#allocation2], %s8358_s28 }
  0x13   : > { %s174_s30 = sadd.s32 %s12472_s29, %s8360_s27  ;;  %s179_s5 = sshll.u32 %s168_s4, 4  ;;  %s180_s5 = int_to_ptr.vmem [resolvable:$true] %s179_s5 }
  0x14   : > { %s8362_s6 = sshll.u32 %s174_s30, 2  ;;  %s16433_s1 = sld [smem:[#allocation10_spill]] }
  0x15   : > { %p13502_p5 = pnand %p13508_p4, %p75_p3  ;;  %s165_s11 = scalar_lea.sflag [#allocation3], %s164_s26 }
  0x16   : > { %s13757_s28 = smov 1024   ;;  %s13758_s29 = smov 512  }
  0x17   : > { %s13759_s30 = smov 32   ;;  %p8365_p6 = scmp.ge.s32.totalorder %s13755_s22, 1 }
  0x18   : > { %p206_p7 = scmp.lt.s32.totalorder %s13755_s22, 13  ;;  %s61_s4 = ssub.s32 %s13747_s20, %s16452_s23 }
  0x19   : > { %s8354_s26 = sadd.s32 4294967295, %s13755_s22   ;;  %p33_p9 = scmp.ge.s32.totalorder %s16454_s24, 2 }
  0x1a   : > { %s176_s9 = scalar_lea.hbm %s16433_s1, %s8362_s6  ;;  %p13864_p8 = pnand %p8365_p6, %p206_p7 }
  0x1b   : > { %s177_s10 = sshll.u32 %s176_s9, 4  ;;  %p79_p10 = scmp.ne.s32.totalorder %s13731_s16, %s13727_s15  ;;  %s178_s10 = int_to_ptr.hbm [resolvable:$true] %s177_s10 }
  0x1c   : > { %13504 = dma.hbm_to_vmem [thread:$0]  (!%p13502_p5), %s178_s10, 131072, %s180_s5, %s165_s11, %s13757_s28, %s13758_s29, %s13759_s30  }
  0x1d   : > { %p80_p11 = scmp.eq.s32.totalorder %s8354_s26, 0  ;;  %s16456_s24 = smov (%p33_p9, %s16454_s24), 0 }
  0x1e   : > { %16435 = sst [smem:[#allocation9_spill]] %s16456_s24  ;;  %s92_s7 = sadd.s32 1, %s13723_s14 }
  0x1f   : > { %p13875_p12 = por %p80_p11, %p79_p10  ;;  %s62_s8 = ssub.s32 %s13751_s21, %s16456_s24 }
  0x20   : > { %p105_p13 = scmp.ne.s32.totalorder %s13719_s13, %s13715_s12  ;;  %s63_s9 = sor.u32 %s62_s8, %s61_s4 }
  0x21   : > { %p90_p0 = scmp.eq.s32.totalorder %s62_s8, 0  ;;  %p64_p1 = scmp.eq.s32.totalorder %s63_s9, 0 }
  0x22   : > { %p99_p3 = scmp.ne.s32.totalorder %s13723_s14, %s13719_s13  ;;  %p13894_p5 = por %p105_p13, %p80_p11 }
  0x23   : > { %s13887_s10 = scalar_select %p90_p0, %s13723_s14, %s92_s7  }
  0x24   : > { %s13892_s15 = scalar_select %p64_p1, %s13735_s17, %s66_s25  }
  0x25   : > { %s189_s28 = sand.u32 1, %s13723_s14   ;;  %p101_p6 = por %p99_p3, %p74_p2 }
  0x26   : > { %s8363_s29 = sshll.u32 %s189_s28, 3  ;;  %s197_s4 = scalar_lea.hbm %s16427_s2, %s8360_s27 }
  0x27   : > { %s199_s26 = sshll.u32 %s197_s4, 4  ;;  %s193_s8 = scalar_lea.vmem [#allocation4], %s8363_s29  ;;  %s200_s26 = int_to_ptr.hbm [resolvable:$true] %s199_s26 }
  0x28   : > { %s201_s7 = sshll.u32 %s193_s8, 4  ;;  %p13505_p7 = pnand %p13508_p4, %p101_p6  ;;  %s202_s7 = int_to_ptr.vmem [resolvable:$true] %s201_s7 }
  0x29   : > { %s190_s25 = scalar_lea.sflag [#allocation5], %s189_s28  ;;  %210 = sbr.rel (%p13864_p8) target bundleno = 2084 (0x824), region = 32 }
  0x2a   : > { %13507 = dma.hbm_to_vmem [thread:$0]  (!%p13505_p7), %s200_s26, 128, %s202_s7, %s190_s25  }
  0x2b   : > { %s212_s9 = sand.u32 (!%p13864_p8), 1, %s13731_s16  }
  0x2c   : > { %s8366_s1 = sshll.u32 (!%p13864_p8), %s212_s9, 13  ;;  %s213_s24 = scalar_lea.sflag (!%p13864_p8), [#allocation3], %s212_s9 }
  0x2d   : > { %s13911_s23 = scalar_lea.vmem (!%p13864_p8), [#allocation2], %s8366_s1 }
  0x2e   : > { %13706 = dma.done.wait (%p13875_p12), %s213_s24, 131072  }
  0x2f   : > { %13708 = vsyncadd (%p13875_p12), %s213_s24, 4294836224  ;;  %s222_s27 = sand.u32 1, %s13719_s13  }
  0x30   : > { %s13918_s28 = sshll.u32 %s222_s27, 3  ;;  %s223_s6 = scalar_lea.sflag [#allocation5], %s222_s27 }
  0x31   : > { %s226_s29 = scalar_lea.vmem [#allocation4], %s13918_s28 }
  0x32   : > { %13710 = dma.done.wait (%p13894_p5), %s223_s6, 128  }
  0x33   : > { %13712 = vsyncadd (%p13894_p5), %s223_s6, 4294967168  ;;  %s8368_s1 = sshll.u32 %s13739_s18, 4  ;;  %s8370_s12 = sshll.u32 %s13743_s19, 3 }
  0x34   : > { %p261_p2 = scmp.lt.s32.totalorder %s8368_s1, 95  ;;  %p270_p4 = scmp.lt.s32.totalorder %s8370_s12, 15 }
  0x35   : > { %p8372_p8 = scmp.ne.s32.totalorder %s13739_s18, 0 }
  0x36   : > { %s16458_s1 = smov (!%p261_p2, %s8368_s1), 95  ;;  %s16460_s12 = smov (!%p270_p4, %s8370_s12), 15 }
  0x37   : > { %s8369_s24 = sshll.u32 %s16458_s1, 2  ;;  %s8371_s26 = sshll.u32 %s16460_s12, 3 }
  0x38   : > { %s13930_s4 = scalar_lea.vmem %s16425_s0, %s8369_s24  ;;  %s13935_s11 = scalar_lea.vmem %s16428_s3, %s8371_s26 }
  0x39   : > { %278 = sbr.rel (%p8372_p8) target bundleno = 71 (0x47), region = 44 }
  0x3e   : > { %v13760_v0 = vmov 0.0  }
  0x3f   : > { %279 = vst [vmem:[%s13935_s11] sm:$0xff] %v13760_v0 }
  0x40   : > { %280 = vst [vmem:[%s13935_s11 + $0x8] sm:$0xff] %v13760_v0 }
  0x41   : > { %281 = vst [vmem:[%s13935_s11 + $0x10] sm:$0xff] %v13760_v0 }
  0x42   : > { %282 = vst [vmem:[%s13935_s11 + $0x18] sm:$0xff] %v13760_v0 }
  0x43   : > { %283 = vst [vmem:[%s13935_s11 + $0x20] sm:$0xff] %v13760_v0 }
  0x44   : > { %284 = vst [vmem:[%s13935_s11 + $0x28] sm:$0xff] %v13760_v0 }
  0x45   : > { %285 = vst [vmem:[%s13935_s11 + $0x30] sm:$0xff] %v13760_v0 }
  0x46   : > { %286 = vst [vmem:[%s13935_s11 + $0x38] sm:$0xff] %v13760_v0 }
  0x47 PF: > { %v8599_v1 = vld [vmem:[%s13911_s23 + $0x1c0] sm:$0xf]  ;;  %p12469_p9 = scmp.ne.s32.totalorder %s13739_s18, 5 }
  0x48   : > { %v12533_v2 = vld [vmem:[%s13911_s23 + $0x1dc] sm:$0xf0] }
  0x49   : > { %v8855_v3 = vld [vmem:[%s13911_s23 + $0x3c0] sm:$0xf]  ;;  %v8600_v4 = vor.u32 %v12533_v2, %v8599_v1 }
  0x4a   : > { %v12597_v5 = vld [vmem:[%s13911_s23 + $0x3dc] sm:$0xf0] }
  0x4b   : > { %v9111_v6 = vld [vmem:[%s13911_s23 + $0x5c0] sm:$0xf]  ;;  %v8856_v8 = vor.u32 %v12597_v5, %v8855_v3  ;;  %6503 = vmatpush.bf16.msra.mxu0 %v8600_v4 }
  0x4c   : > { %v12661_v7 = vld [vmem:[%s13911_s23 + $0x5dc] sm:$0xf0] }
  0x4d   : > { %v9112_v9 = vor.u32 %v12661_v7, %v9111_v6  ;;  %v9367_v10 = vld [vmem:[%s13911_s23 + $0x7c0] sm:$0xf]  ;;  %6516 = vmatpush.bf16.msra.mxu1 %v8856_v8 }
  0x4e   : > { %v12725_v11 = vld [vmem:[%s13911_s23 + $0x7dc] sm:$0xf0] }
  0x4f   : > { %v8567_v12 = vld [vmem:[%s13911_s23 + $0x180] sm:$0xf]  ;;  %v9368_v13 = vor.u32 %v12725_v11, %v9367_v10  ;;  %6529 = vmatpush.bf16.msra.mxu2 %v9112_v9 }
  0x50   : > { %v12525_v14 = vld [vmem:[%s13911_s23 + $0x19c] sm:$0xf0] }
  0x51   : > { %v8823_v15 = vld [vmem:[%s13911_s23 + $0x380] sm:$0xf]  ;;  %v8568_v17 = vor.u32 %v12525_v14, %v8567_v12  ;;  %6542 = vmatpush.bf16.msra.mxu3 %v9368_v13 }
  0x52   : > { %v12589_v16 = vld [vmem:[%s13911_s23 + $0x39c] sm:$0xf0] }
  0x53   : > { %v8824_v18 = vor.u32 %v12589_v16, %v8823_v15  ;;  %v9079_v19 = vld [vmem:[%s13911_s23 + $0x580] sm:$0xf]  ;;  %6504 = vmatpush.bf16.msra.mxu0 %v8568_v17 }
  0x54   : > { %v12653_v20 = vld [vmem:[%s13911_s23 + $0x59c] sm:$0xf0] }
  0x55   : > { %v9335_v21 = vld [vmem:[%s13911_s23 + $0x780] sm:$0xf]  ;;  %v9080_v22 = vor.u32 %v12653_v20, %v9079_v19  ;;  %6517 = vmatpush.bf16.msra.mxu1 %v8824_v18 }
  0x56   : > { %v12717_v23 = vld [vmem:[%s13911_s23 + $0x79c] sm:$0xf0] }
  0x57   : > { %v8535_v24 = vld [vmem:[%s13911_s23 + $0x140] sm:$0xf]  ;;  %v9336_v26 = vor.u32 %v12717_v23, %v9335_v21  ;;  %6530 = vmatpush.bf16.msra.mxu2 %v9080_v22 }
  0x58   : > { %v12517_v25 = vld [vmem:[%s13911_s23 + $0x15c] sm:$0xf0] }
  0x59   : > { %v8791_v27 = vld [vmem:[%s13911_s23 + $0x340] sm:$0xf]  ;;  %v8536_v30 = vor.u32 %v12517_v25, %v8535_v24  ;;  %6543 = vmatpush.bf16.msra.mxu3 %v9336_v26 }
  0x5a   : > { %v12581_v28 = vld [vmem:[%s13911_s23 + $0x35c] sm:$0xf0] }
  0x5b   : > { %v9047_v29 = vld [vmem:[%s13911_s23 + $0x540] sm:$0xf]  ;;  %v8792_v34 = vor.u32 %v12581_v28, %v8791_v27  ;;  %6505 = vmatpush.bf16.msra.mxu0 %v8536_v30 }
  0x5c   : > { %v12645_v31 = vld [vmem:[%s13911_s23 + $0x55c] sm:$0xf0] }
  0x5d   : > { %v9303_v32 = vld [vmem:[%s13911_s23 + $0x740] sm:$0xf]  ;;  %v9048_v35 = vor.u32 %v12645_v31, %v9047_v29  ;;  %6518 = vmatpush.bf16.msra.mxu1 %v8792_v34 }
  0x5e   : > { %v12709_v33 = vld [vmem:[%s13911_s23 + $0x75c] sm:$0xf0] }
  0x5f   : > { %v8503_v36 = vld [vmem:[%s13911_s23 + $0x100] sm:$0xf]  ;;  %v9304_v39 = vor.u32 %v12709_v33, %v9303_v32  ;;  %6531 = vmatpush.bf16.msra.mxu2 %v9048_v35 }
  0x60   : > { %v12509_v37 = vld [vmem:[%s13911_s23 + $0x11c] sm:$0xf0] }
  0x61   : > { %v8759_v38 = vld [vmem:[%s13911_s23 + $0x300] sm:$0xf]  ;;  %v8504_v45 = vor.u32 %v12509_v37, %v8503_v36  ;;  %6544 = vmatpush.bf16.msra.mxu3 %v9304_v39 }
  0x62   : > { %v12573_v40 = vld [vmem:[%s13911_s23 + $0x31c] sm:$0xf0] }
  0x63   : > { %v9015_v41 = vld [vmem:[%s13911_s23 + $0x500] sm:$0xf]  ;;  %v8760_v46 = vor.u32 %v12573_v40, %v8759_v38  ;;  %6506 = vmatpush.bf16.msra.mxu0 %v8504_v45 }
  0x64   : > { %v12637_v42 = vld [vmem:[%s13911_s23 + $0x51c] sm:$0xf0] }
  0x65   : > { %v9271_v43 = vld [vmem:[%s13911_s23 + $0x700] sm:$0xf]  ;;  %v9016_v47 = vor.u32 %v12637_v42, %v9015_v41  ;;  %6519 = vmatpush.bf16.msra.mxu1 %v8760_v46 }
  0x66   : > { %v12701_v44 = vld [vmem:[%s13911_s23 + $0x71c] sm:$0xf0] }
  0x67   : > { %v8471_v48 = vld [vmem:[%s13911_s23 + $0xc0] sm:$0xf]  ;;  %v9272_v51 = vor.u32 %v12701_v44, %v9271_v43  ;;  %6532 = vmatpush.bf16.msra.mxu2 %v9016_v47 }
  0x68   : > { %v12501_v49 = vld [vmem:[%s13911_s23 + $0xdc] sm:$0xf0] }
  0x69   : > { %v8727_v50 = vld [vmem:[%s13911_s23 + $0x2c0] sm:$0xf]  ;;  %v8472_v57 = vor.u32 %v12501_v49, %v8471_v48  ;;  %6545 = vmatpush.bf16.msra.mxu3 %v9272_v51 }
  0x6a   : > { %v12565_v52 = vld [vmem:[%s13911_s23 + $0x2dc] sm:$0xf0] }
  0x6b   : > { %v8983_v53 = vld [vmem:[%s13911_s23 + $0x4c0] sm:$0xf]  ;;  %v8728_v58 = vor.u32 %v12565_v52, %v8727_v50  ;;  %6507 = vmatpush.bf16.msra.mxu0 %v8472_v57 }
  0x6c   : > { %v12629_v54 = vld [vmem:[%s13911_s23 + $0x4dc] sm:$0xf0] }
  0x6d   : > { %v9239_v55 = vld [vmem:[%s13911_s23 + $0x6c0] sm:$0xf]  ;;  %v8984_v59 = vor.u32 %v12629_v54, %v8983_v53  ;;  %6520 = vmatpush.bf16.msra.mxu1 %v8728_v58 }
  0x6e   : > { %v12693_v56 = vld [vmem:[%s13911_s23 + $0x6dc] sm:$0xf0] }
  0x6f   : > { %v8439_v60 = vld [vmem:[%s13911_s23 + $0x80] sm:$0xf]  ;;  %v9240_v63 = vor.u32 %v12693_v56, %v9239_v55  ;;  %6533 = vmatpush.bf16.msra.mxu2 %v8984_v59  ;;  %v296_v59 = vld [vmem:[%s13930_s4 + $0x8] sm:$0xff] }
  0x70   : > { %v12493_v61 = vld [vmem:[%s13911_s23 + $0x9c] sm:$0xf0] }
  0x71   : > { %v8695_v62 = vld [vmem:[%s13911_s23 + $0x280] sm:$0xf]  ;;  %v8440_v5 = vor.u32 %v12493_v61, %v8439_v60  ;;  %6546 = vmatpush.bf16.msra.mxu3 %v9240_v63 }
  0x72   : > { %v12557_v0 = vld [vmem:[%s13911_s23 + $0x29c] sm:$0xf0] }
  0x73   : > { %v8951_v1 = vld [vmem:[%s13911_s23 + $0x480] sm:$0xf]  ;;  %v8696_v6 = vor.u32 %v12557_v0, %v8695_v62  ;;  %6508 = vmatpush.bf16.msra.mxu0 %v8440_v5  ;;  %v1337_v0 = vunpack.c.l.b16 %v296_v59 }
  0x74   : > { %v12621_v2 = vld [vmem:[%s13911_s23 + $0x49c] sm:$0xf0] }
  0x75   : > { %v9207_v3 = vld [vmem:[%s13911_s23 + $0x680] sm:$0xf]  ;;  %v8952_v7 = vor.u32 %v12621_v2, %v8951_v1  ;;  %6521 = vmatpush.bf16.msra.mxu1 %v8696_v6  ;;  %v1338_v1 = vunpack.c.h.b16 %v296_v59  ;;  %v14035_v5 = vpack.c.b16 %v1337_v0, %v1337_v0 }
  0x76   : > { %v12685_v4 = vld [vmem:[%s13911_s23 + $0x69c] sm:$0xf0] }
  0x77   : > { %v8407_v8 = vld [vmem:[%s13911_s23 + $0x40] sm:$0xf]  ;;  %v9208_v11 = vor.u32 %v12685_v4, %v9207_v3  ;;  %6534 = vmatpush.bf16.msra.mxu2 %v8952_v7  ;;  %v14038_v7 = vpack.c.b16 %v1338_v1, %v1338_v1 }
  0x78   : > { %v12485_v9 = vld [vmem:[%s13911_s23 + $0x5c] sm:$0xf0] }
  0x79   : > { %v8663_v10 = vld [vmem:[%s13911_s23 + $0x240] sm:$0xf]  ;;  %v8408_v17 = vor.u32 %v12485_v9, %v8407_v8  ;;  %6547 = vmatpush.bf16.msra.mxu3 %v9208_v11 }
  0x7a   : > { %v12549_v12 = vld [vmem:[%s13911_s23 + $0x25c] sm:$0xf0] }
  0x7b   : > { %v8919_v13 = vld [vmem:[%s13911_s23 + $0x440] sm:$0xf]  ;;  %v8664_v20 = vor.u32 %v12549_v12, %v8663_v10  ;;  %6509 = vmatpush.bf16.msra.mxu0 %v8408_v17 }
  0x7c   : > { %v12613_v14 = vld [vmem:[%s13911_s23 + $0x45c] sm:$0xf0] }
  0x7d   : > { %v9175_v15 = vld [vmem:[%s13911_s23 + $0x640] sm:$0xf]  ;;  %v8920_v21 = vor.u32 %v12613_v14, %v8919_v13  ;;  %6522 = vmatpush.bf16.msra.mxu1 %v8664_v20 }
  0x7e   : > { %v12677_v16 = vld [vmem:[%s13911_s23 + $0x65c] sm:$0xf0] }
  0x7f   : > { %v8375_v18 = vld [vmem:[%s13911_s23] sm:$0xf]  ;;  %v9176_v25 = vor.u32 %v12677_v16, %v9175_v15  ;;  %6535 = vmatpush.bf16.msra.mxu2 %v8920_v21 }
  0x80   : > { %v12477_v19 = vld [vmem:[%s13911_s23 + $0x1c] sm:$0xf0] }
  0x81   : > { %v8631_v22 = vld [vmem:[%s13911_s23 + $0x200] sm:$0xf]  ;;  %v8376_v32 = vor.u32 %v12477_v19, %v8375_v18  ;;  %6548 = vmatpush.bf16.msra.mxu3 %v9176_v25 }
  0x82   : > { %v12541_v23 = vld [vmem:[%s13911_s23 + $0x21c] sm:$0xf0] }
  0x83   : > { %v8887_v24 = vld [vmem:[%s13911_s23 + $0x400] sm:$0xf]  ;;  %v8632_v36 = vor.u32 %v12541_v23, %v8631_v22  ;;  %6510 = vmatpush.bf16.msra.mxu0 %v8376_v32 }
  0x84   : > { %v12605_v26 = vld [vmem:[%s13911_s23 + $0x41c] sm:$0xf0] }
  0x85   : > { %v9143_v27 = vld [vmem:[%s13911_s23 + $0x600] sm:$0xf]  ;;  %v8888_v37 = vor.u32 %v12605_v26, %v8887_v24  ;;  %6523 = vmatpush.bf16.msra.mxu1 %v8632_v36 }
  0x86   : > { %v12669_v28 = vld [vmem:[%s13911_s23 + $0x61c] sm:$0xf0] }
  0x87   : > { %v9623_v29 = vld [vmem:[%s13911_s23 + $0x9c0] sm:$0xf]  ;;  %v9144_v40 = vor.u32 %v12669_v28, %v9143_v27  ;;  %6536 = vmatpush.bf16.msra.mxu2 %v8888_v37 }
  0x88   : > { %v12789_v30 = vld [vmem:[%s13911_s23 + $0x9dc] sm:$0xf0] }
  0x89   : > { %v9879_v31 = vld [vmem:[%s13911_s23 + $0xbc0] sm:$0xf]  ;;  %v9624_v41 = vor.u32 %v12789_v30, %v9623_v29  ;;  %6549 = vmatpush.bf16.msra.mxu3 %v9144_v40 }
  0x8a   : > { %v12853_v33 = vld [vmem:[%s13911_s23 + $0xbdc] sm:$0xf0]  ;;  %6537 = vmatmul.bf16.vlgmr.msra.gmra.mxu2 %v14035_v5 }
  0x8b   : > { %v10135_v34 = vld [vmem:[%s13911_s23 + $0xdc0] sm:$0xf]  ;;  %v9880_v42 = vor.u32 %v12853_v33, %v9879_v31  ;;  %6555 = vmatpush.bf16.msrb.mxu0 %v9624_v41 }
  0x8c   : > { %v12917_v35 = vld [vmem:[%s13911_s23 + $0xddc] sm:$0xf0]  ;;  %6550 = vmatmul.bf16.vlgmr.msra.gmra.mxu3 %v14038_v7 }
  0x8d   : > { %v10391_v38 = vld [vmem:[%s13911_s23 + $0xfc0] sm:$0xf]  ;;  %v10136_v43 = vor.u32 %v12917_v35, %v10135_v34  ;;  %6568 = vmatpush.bf16.msrb.mxu1 %v9880_v42 }
  0x8e   : > { %v12981_v39 = vld [vmem:[%s13911_s23 + $0xfdc] sm:$0xf0] }
  0x8f   : > { %v9591_v44 = vld [vmem:[%s13911_s23 + $0x980] sm:$0xf]  ;;  %v10392_v47 = vor.u32 %v12981_v39, %v10391_v38  ;;  %6581 = vmatpush.bf16.msrb.mxu2 %v10136_v43 }
  0x90   : > { %v12781_v45 = vld [vmem:[%s13911_s23 + $0x99c] sm:$0xf0] }
  0x91   : > { %v9847_v46 = vld [vmem:[%s13911_s23 + $0xb80] sm:$0xf]  ;;  %v9592_v53 = vor.u32 %v12781_v45, %v9591_v44  ;;  %6594 = vmatpush.bf16.msrb.mxu3 %v10392_v47 }
  0x92   : > { %v12845_v48 = vld [vmem:[%s13911_s23 + $0xb9c] sm:$0xf0] }
  0x93   : > { %v10103_v49 = vld [vmem:[%s13911_s23 + $0xd80] sm:$0xf]  ;;  %v9848_v55 = vor.u32 %v12845_v48, %v9847_v46  ;;  %6556 = vmatpush.bf16.msrb.mxu0 %v9592_v53 }
  0x94   : > { %v12909_v50 = vld [vmem:[%s13911_s23 + $0xd9c] sm:$0xf0] }
  0x95   : > { %v10359_v51 = vld [vmem:[%s13911_s23 + $0xf80] sm:$0xf]  ;;  %v10104_v56 = vor.u32 %v12909_v50, %v10103_v49  ;;  %6569 = vmatpush.bf16.msrb.mxu1 %v9848_v55 }
  0x96   : > { %v12973_v52 = vld [vmem:[%s13911_s23 + $0xf9c] sm:$0xf0] }
  0x97   : > { %v9559_v54 = vld [vmem:[%s13911_s23 + $0x940] sm:$0xf]  ;;  %v10360_v60 = vor.u32 %v12973_v52, %v10359_v51  ;;  %6582 = vmatpush.bf16.msrb.mxu2 %v10104_v56 }
  0x98   : > { %v12773_v57 = vld [vmem:[%s13911_s23 + $0x95c] sm:$0xf0] }
  0x99   : > { %v9815_v58 = vld [vmem:[%s13911_s23 + $0xb40] sm:$0xf]  ;;  %v9560_v4 = vor.u32 %v12773_v57, %v9559_v54  ;;  %6595 = vmatpush.bf16.msrb.mxu3 %v10360_v60 }
  0x9a   : > { %v12837_v61 = vld [vmem:[%s13911_s23 + $0xb5c] sm:$0xf0] }
  0x9b   : > { %v10071_v62 = vld [vmem:[%s13911_s23 + $0xd40] sm:$0xf]  ;;  %v9816_v8 = vor.u32 %v12837_v61, %v9815_v58  ;;  %6557 = vmatpush.bf16.msrb.mxu0 %v9560_v4  ;;  %v298_v4 = vld [vmem:[%s13930_s4 + $0x18] sm:$0xff] }
  0x9c   : > { %v12901_v63 = vld [vmem:[%s13911_s23 + $0xd5c] sm:$0xf0] }
  0x9d   : > { %v10327_v2 = vld [vmem:[%s13911_s23 + $0xf40] sm:$0xf]  ;;  %v10072_v9 = vor.u32 %v12901_v63, %v10071_v62  ;;  %6570 = vmatpush.bf16.msrb.mxu1 %v9816_v8 }
  0x9e   : > { %v12965_v3 = vld [vmem:[%s13911_s23 + $0xf5c] sm:$0xf0] }
  0x9f   : > { %v295_v6 = vld [vmem:[%s13930_s4] sm:$0xff]  ;;  %v10328_v15 = vor.u32 %v12965_v3, %v10327_v2  ;;  %6583 = vmatpush.bf16.msrb.mxu2 %v10072_v9 }
  0xa0   : > { %v9527_v10 = vld [vmem:[%s13911_s23 + $0x900] sm:$0xf]  ;;  %v1335_v13 = vunpack.c.l.b16 %v295_v6  ;;  %v1336_v14 = vunpack.c.h.b16 %v295_v6 }
  0xa1   : > { %v12765_v11 = vld [vmem:[%s13911_s23 + $0x91c] sm:$0xf0]  ;;  %6596 = vmatpush.bf16.msrb.mxu3 %v10328_v15 }
  0xa2   : > { %v9783_v12 = vld [vmem:[%s13911_s23 + $0xb00] sm:$0xf]  ;;  %v14049_v21 = vpack.c.b16 %v1335_v13, %v1335_v13  ;;  %v14052_v22 = vpack.c.b16 %v1336_v14, %v1336_v14  ;;  %v9528_v23 = vor.u32 %v12765_v11, %v9527_v10  ;;  %v297_v10 = vld [vmem:[%s13930_s4 + $0x10] sm:$0xff] }
  0xa3   : > { %v12829_v16 = vld [vmem:[%s13911_s23 + $0xb1c] sm:$0xf0] }
  0xa4   : > { %v10039_v17 = vld [vmem:[%s13911_s23 + $0xd00] sm:$0xf]  ;;  %v9784_v24 = vor.u32 %v12829_v16, %v9783_v12  ;;  %6511 = vmatmul.bf16.vlgmr.msra.gmra.mxu0 %v14049_v21  ;;  %6524 = vmatmul.bf16.vlgmr.msra.gmra.mxu1 %v14052_v22 }
  0xa5   : > { %v12893_v18 = vld [vmem:[%s13911_s23 + $0xd1c] sm:$0xf0]  ;;  %6558 = vmatpush.bf16.msrb.mxu0 %v9528_v23 }
  0xa6   : > { %v10295_v19 = vld [vmem:[%s13911_s23 + $0xf00] sm:$0xf]  ;;  %v10040_v25 = vor.u32 %v12893_v18, %v10039_v17  ;;  %6571 = vmatpush.bf16.msrb.mxu1 %v9784_v24  ;;  %v1341_v18 = vunpack.c.l.b16 %v298_v4 }
  0xa7   : > { %v12957_v20 = vld [vmem:[%s13911_s23 + $0xf1c] sm:$0xf0] }
  0xa8   : > { %v9495_v26 = vld [vmem:[%s13911_s23 + $0x8c0] sm:$0xf]  ;;  %v10296_v29 = vor.u32 %v12957_v20, %v10295_v19  ;;  %6584 = vmatpush.bf16.msrb.mxu2 %v10040_v25  ;;  %v1339_v25 = vunpack.c.l.b16 %v297_v10 }
  0xa9   : > { %v12757_v27 = vld [vmem:[%s13911_s23 + $0x8dc] sm:$0xf0] }
  0xaa   : > { %v9751_v28 = vld [vmem:[%s13911_s23 + $0xac0] sm:$0xf]  ;;  %v9496_v35 = vor.u32 %v12757_v27, %v9495_v26  ;;  %6597 = vmatpush.bf16.msrb.mxu3 %v10296_v29  ;;  %v1342_v26 = vunpack.c.h.b16 %v298_v4  ;;  %v1340_v29 = vunpack.c.h.b16 %v297_v10 }
  0xab   : > { %v12821_v30 = vld [vmem:[%s13911_s23 + $0xadc] sm:$0xf0] }
  0xac   : > { %v10007_v31 = vld [vmem:[%s13911_s23 + $0xcc0] sm:$0xf]  ;;  %v9752_v36 = vor.u32 %v12821_v30, %v9751_v28  ;;  %6559 = vmatpush.bf16.msrb.mxu0 %v9496_v35 }
  0xad   : > { %v12885_v32 = vld [vmem:[%s13911_s23 + $0xcdc] sm:$0xf0] }
  0xae   : > { %v10263_v33 = vld [vmem:[%s13911_s23 + $0xec0] sm:$0xf]  ;;  %v10008_v37 = vor.u32 %v12885_v32, %v10007_v31  ;;  %6572 = vmatpush.bf16.msrb.mxu1 %v9752_v36 }
  0xaf   : > { %v12949_v34 = vld [vmem:[%s13911_s23 + $0xedc] sm:$0xf0] }
  0xb0   : > { %v9463_v38 = vld [vmem:[%s13911_s23 + $0x880] sm:$0xf]  ;;  %v10264_v41 = vor.u32 %v12949_v34, %v10263_v33  ;;  %6585 = vmatpush.bf16.msrb.mxu2 %v10008_v37 }
  0xb1   : > { %v12749_v39 = vld [vmem:[%s13911_s23 + $0x89c] sm:$0xf0] }
  0xb2   : > { %v9719_v40 = vld [vmem:[%s13911_s23 + $0xa80] sm:$0xf]  ;;  %v9464_v47 = vor.u32 %v12749_v39, %v9463_v38  ;;  %6598 = vmatpush.bf16.msrb.mxu3 %v10264_v41  ;;  %v14104_v39 = vpack.c.b16 %v1341_v18, %v1341_v18 }
  0xb3   : > { %v12813_v42 = vld [vmem:[%s13911_s23 + $0xa9c] sm:$0xf0] }
  0xb4   : > { %v9975_v43 = vld [vmem:[%s13911_s23 + $0xc80] sm:$0xf]  ;;  %v9720_v48 = vor.u32 %v12813_v42, %v9719_v40  ;;  %6560 = vmatpush.bf16.msrb.mxu0 %v9464_v47  ;;  %v14108_v42 = vpack.c.b16 %v1339_v25, %v1339_v25 }
  0xb5   : > { %v12877_v44 = vld [vmem:[%s13911_s23 + $0xc9c] sm:$0xf0] }
  0xb6   : > { %v10231_v45 = vld [vmem:[%s13911_s23 + $0xe80] sm:$0xf]  ;;  %v9976_v49 = vor.u32 %v12877_v44, %v9975_v43  ;;  %6573 = vmatpush.bf16.msrb.mxu1 %v9720_v48  ;;  %v14110_v43 = vpack.c.b16 %v1342_v26, %v1342_v26 }
  0xb7   : > { %v12941_v46 = vld [vmem:[%s13911_s23 + $0xe9c] sm:$0xf0] }
  0xb8   : > { %v9431_v50 = vld [vmem:[%s13911_s23 + $0x840] sm:$0xf]  ;;  %v10232_v53 = vor.u32 %v12941_v46, %v10231_v45  ;;  %6586 = vmatpush.bf16.msrb.mxu2 %v9976_v49  ;;  %v14112_v45 = vpack.c.b16 %v1340_v29, %v1340_v29 }
  0xb9   : > { %v12741_v51 = vld [vmem:[%s13911_s23 + $0x85c] sm:$0xf0] }
  0xba   : > { %v9687_v52 = vld [vmem:[%s13911_s23 + $0xa40] sm:$0xf]  ;;  %v9432_v60 = vor.u32 %v12741_v51, %v9431_v50  ;;  %6599 = vmatpush.bf16.msrb.mxu3 %v10232_v53 }
  0xbb   : > { %v12805_v54 = vld [vmem:[%s13911_s23 + $0xa5c] sm:$0xf0] }
  0xbc   : > { %v9943_v55 = vld [vmem:[%s13911_s23 + $0xc40] sm:$0xf]  ;;  %v9688_v0 = vor.u32 %v12805_v54, %v9687_v52  ;;  %6561 = vmatpush.bf16.msrb.mxu0 %v9432_v60 }
  0xbd   : > { %v12869_v56 = vld [vmem:[%s13911_s23 + $0xc5c] sm:$0xf0] }
  0xbe   : > { %v10199_v57 = vld [vmem:[%s13911_s23 + $0xe40] sm:$0xf]  ;;  %v9944_v1 = vor.u32 %v12869_v56, %v9943_v55  ;;  %6574 = vmatpush.bf16.msrb.mxu1 %v9688_v0 }
  0xbf   : > { %v12933_v58 = vld [vmem:[%s13911_s23 + $0xe5c] sm:$0xf0] }
  0xc0   : > { %v9399_v59 = vld [vmem:[%s13911_s23 + $0x800] sm:$0xf]  ;;  %v10200_v6 = vor.u32 %v12933_v58, %v10199_v57  ;;  %6587 = vmatpush.bf16.msrb.mxu2 %v9944_v1 }
  0xc1   : > { %v12733_v61 = vld [vmem:[%s13911_s23 + $0x81c] sm:$0xf0] }
  0xc2   : > { %v9655_v62 = vld [vmem:[%s13911_s23 + $0xa00] sm:$0xf]  ;;  %v9400_v14 = vor.u32 %v12733_v61, %v9399_v59  ;;  %6600 = vmatpush.bf16.msrb.mxu3 %v10200_v6 }
  0xc3   : > { %v12797_v63 = vld [vmem:[%s13911_s23 + $0xa1c] sm:$0xf0] }
  0xc4   : > { %v9911_v2 = vld [vmem:[%s13911_s23 + $0xc00] sm:$0xf]  ;;  %v9656_v19 = vor.u32 %v12797_v63, %v9655_v62  ;;  %6562 = vmatpush.bf16.msrb.mxu0 %v9400_v14 }
  0xc5   : > { %v12861_v3 = vld [vmem:[%s13911_s23 + $0xc1c] sm:$0xf0] }
  0xc6   : > { %v10167_v8 = vld [vmem:[%s13911_s23 + $0xe00] sm:$0xf]  ;;  %v9912_v20 = vor.u32 %v12861_v3, %v9911_v2  ;;  %6575 = vmatpush.bf16.msrb.mxu1 %v9656_v19 }
  0xc7   : > { %v12925_v9 = vld [vmem:[%s13911_s23 + $0xe1c] sm:$0xf0]  ;;  %6563 = vmatmul.bf16.vlgmr.msrb.gmra.mxu0 %v14108_v42 }
  0xc8   : > { %v10647_v11 = vld [vmem:[%s13911_s23 + $0x11c0] sm:$0xf]  ;;  %v10168_v27 = vor.u32 %v12925_v9, %v10167_v8  ;;  %6588 = vmatpush.bf16.msrb.mxu2 %v9912_v20 }
  0xc9   : > { %v13045_v12 = vld [vmem:[%s13911_s23 + $0x11dc] sm:$0xf0]  ;;  %6576 = vmatmul.bf16.vlgmr.msrb.gmra.mxu1 %v14112_v45 }
  0xca   : > { %v10903_v13 = vld [vmem:[%s13911_s23 + $0x13c0] sm:$0xf]  ;;  %v10648_v28 = vor.u32 %v13045_v12, %v10647_v11  ;;  %6601 = vmatpush.bf16.msrb.mxu3 %v10168_v27 }
  0xcb   : > { %v13109_v15 = vld [vmem:[%s13911_s23 + $0x13dc] sm:$0xf0]  ;;  %6589 = vmatmul.bf16.vlgmr.msrb.gmra.mxu2 %v14104_v39 }
  0xcc   : > { %v11159_v16 = vld [vmem:[%s13911_s23 + $0x15c0] sm:$0xf]  ;;  %v10904_v30 = vor.u32 %v13109_v15, %v10903_v13  ;;  %6607 = vmatpush.bf16.msra.mxu0 %v10648_v28 }
  0xcd   : > { %v13173_v17 = vld [vmem:[%s13911_s23 + $0x15dc] sm:$0xf0]  ;;  %6602 = vmatmul.bf16.vlgmr.msrb.gmra.mxu3 %v14110_v43 }
  0xce   : > { %v11415_v23 = vld [vmem:[%s13911_s23 + $0x17c0] sm:$0xf]  ;;  %v11160_v31 = vor.u32 %v13173_v17, %v11159_v16  ;;  %6620 = vmatpush.bf16.msra.mxu1 %v10904_v30 }
  0xcf   : > { %v13237_v24 = vld [vmem:[%s13911_s23 + $0x17dc] sm:$0xf0] }
  0xd0   : > { %v10615_v32 = vld [vmem:[%s13911_s23 + $0x1180] sm:$0xf]  ;;  %v11416_v35 = vor.u32 %v13237_v24, %v11415_v23  ;;  %6633 = vmatpush.bf16.msra.mxu2 %v11160_v31 }
  0xd1   : > { %v13037_v33 = vld [vmem:[%s13911_s23 + $0x119c] sm:$0xf0] }
  0xd2   : > { %v10871_v34 = vld [vmem:[%s13911_s23 + $0x1380] sm:$0xf]  ;;  %v10616_v44 = vor.u32 %v13037_v33, %v10615_v32  ;;  %6646 = vmatpush.bf16.msra.mxu3 %v11416_v35 }
  0xd3   : > { %v13101_v36 = vld [vmem:[%s13911_s23 + $0x139c] sm:$0xf0] }
  0xd4   : > { %v11127_v37 = vld [vmem:[%s13911_s23 + $0x1580] sm:$0xf]  ;;  %v10872_v46 = vor.u32 %v13101_v36, %v10871_v34  ;;  %6608 = vmatpush.bf16.msra.mxu0 %v10616_v44 }
  0xd5   : > { %v13165_v38 = vld [vmem:[%s13911_s23 + $0x159c] sm:$0xf0] }
  0xd6   : > { %v11383_v40 = vld [vmem:[%s13911_s23 + $0x1780] sm:$0xf]  ;;  %v11128_v47 = vor.u32 %v13165_v38, %v11127_v37  ;;  %6621 = vmatpush.bf16.msra.mxu1 %v10872_v46 }
  0xd7   : > { %v13229_v41 = vld [vmem:[%s13911_s23 + $0x179c] sm:$0xf0] }
  0xd8   : > { %v10583_v48 = vld [vmem:[%s13911_s23 + $0x1140] sm:$0xf]  ;;  %v11384_v51 = vor.u32 %v13229_v41, %v11383_v40  ;;  %6634 = vmatpush.bf16.msra.mxu2 %v11128_v47 }
  0xd9   : > { %v13029_v49 = vld [vmem:[%s13911_s23 + $0x115c] sm:$0xf0] }
  0xda   : > { %v10839_v50 = vld [vmem:[%s13911_s23 + $0x1340] sm:$0xf]  ;;  %v10584_v57 = vor.u32 %v13029_v49, %v10583_v48  ;;  %6647 = vmatpush.bf16.msra.mxu3 %v11384_v51 }
  0xdb   : > { %v13093_v52 = vld [vmem:[%s13911_s23 + $0x135c] sm:$0xf0] }
  0xdc   : > { %v11095_v53 = vld [vmem:[%s13911_s23 + $0x1540] sm:$0xf]  ;;  %v10840_v58 = vor.u32 %v13093_v52, %v10839_v50  ;;  %6609 = vmatpush.bf16.msra.mxu0 %v10584_v57 }
  0xdd   : > { %v13157_v54 = vld [vmem:[%s13911_s23 + $0x155c] sm:$0xf0] }
  0xde   : > { %v11351_v55 = vld [vmem:[%s13911_s23 + $0x1740] sm:$0xf]  ;;  %v11096_v59 = vor.u32 %v13157_v54, %v11095_v53  ;;  %6622 = vmatpush.bf16.msra.mxu1 %v10840_v58 }
  0xdf   : > { %v13221_v56 = vld [vmem:[%s13911_s23 + $0x175c] sm:$0xf0] }
  0xe0   : > { %v10551_v60 = vld [vmem:[%s13911_s23 + $0x1100] sm:$0xf]  ;;  %v11352_v63 = vor.u32 %v13221_v56, %v11351_v55  ;;  %6635 = vmatpush.bf16.msra.mxu2 %v11096_v59 }
  0xe1   : > { %v13021_v61 = vld [vmem:[%s13911_s23 + $0x111c] sm:$0xf0] }
  0xe2   : > { %v10807_v62 = vld [vmem:[%s13911_s23 + $0x1300] sm:$0xf]  ;;  %v10552_v6 = vor.u32 %v13021_v61, %v10551_v60  ;;  %6648 = vmatpush.bf16.msra.mxu3 %v11352_v63 }
  0xe3   : > { %v13085_v0 = vld [vmem:[%s13911_s23 + $0x131c] sm:$0xf0] }
  0xe4   : > { %v11063_v1 = vld [vmem:[%s13911_s23 + $0x1500] sm:$0xf]  ;;  %v10808_v8 = vor.u32 %v13085_v0, %v10807_v62  ;;  %6610 = vmatpush.bf16.msra.mxu0 %v10552_v6  ;;  %v300_v62 = vld [vmem:[%s13930_s4 + $0x28] sm:$0xff] }
  0xe5   : > { %v13149_v2 = vld [vmem:[%s13911_s23 + $0x151c] sm:$0xf0] }
  0xe6   : > { %v11319_v3 = vld [vmem:[%s13911_s23 + $0x1700] sm:$0xf]  ;;  %v11064_v9 = vor.u32 %v13149_v2, %v11063_v1  ;;  %6623 = vmatpush.bf16.msra.mxu1 %v10808_v8 }
  0xe7   : > { %v13213_v4 = vld [vmem:[%s13911_s23 + $0x171c] sm:$0xf0] }
  0xe8   : > { %v10519_v10 = vld [vmem:[%s13911_s23 + $0x10c0] sm:$0xf]  ;;  %v11320_v13 = vor.u32 %v13213_v4, %v11319_v3  ;;  %6636 = vmatpush.bf16.msra.mxu2 %v11064_v9 }
  0xe9   : > { %v13013_v11 = vld [vmem:[%s13911_s23 + $0x10dc] sm:$0xf0] }
  0xea   : > { %v10775_v12 = vld [vmem:[%s13911_s23 + $0x12c0] sm:$0xf]  ;;  %v10520_v19 = vor.u32 %v13013_v11, %v10519_v10  ;;  %6649 = vmatpush.bf16.msra.mxu3 %v11320_v13  ;;  %v1345_v13 = vunpack.c.l.b16 %v300_v62 }
  0xeb   : > { %v13077_v14 = vld [vmem:[%s13911_s23 + $0x12dc] sm:$0xf0] }
  0xec   : > { %v11031_v15 = vld [vmem:[%s13911_s23 + $0x14c0] sm:$0xf]  ;;  %v10776_v20 = vor.u32 %v13077_v14, %v10775_v12  ;;  %6611 = vmatpush.bf16.msra.mxu0 %v10520_v19 }
  0xed   : > { %v13141_v16 = vld [vmem:[%s13911_s23 + $0x14dc] sm:$0xf0] }
  0xee   : > { %v11287_v17 = vld [vmem:[%s13911_s23 + $0x16c0] sm:$0xf]  ;;  %v11032_v23 = vor.u32 %v13141_v16, %v11031_v15  ;;  %6624 = vmatpush.bf16.msra.mxu1 %v10776_v20 }
  0xef   : > { %v13205_v18 = vld [vmem:[%s13911_s23 + $0x16dc] sm:$0xf0] }
  0xf0   : > { %v10487_v24 = vld [vmem:[%s13911_s23 + $0x1080] sm:$0xf]  ;;  %v11288_v27 = vor.u32 %v13205_v18, %v11287_v17  ;;  %6637 = vmatpush.bf16.msra.mxu2 %v11032_v23  ;;  %v1346_v17 = vunpack.c.h.b16 %v300_v62 }
  0xf1   : > { %v13005_v25 = vld [vmem:[%s13911_s23 + $0x109c] sm:$0xf0] }
  0xf2   : > { %v10743_v26 = vld [vmem:[%s13911_s23 + $0x1280] sm:$0xf]  ;;  %v10488_v33 = vor.u32 %v13005_v25, %v10487_v24  ;;  %6650 = vmatpush.bf16.msra.mxu3 %v11288_v27 }
  0xf3   : > { %v13069_v28 = vld [vmem:[%s13911_s23 + $0x129c] sm:$0xf0] }
  0xf4   : > { %v10999_v29 = vld [vmem:[%s13911_s23 + $0x1480] sm:$0xf]  ;;  %v10744_v34 = vor.u32 %v13069_v28, %v10743_v26  ;;  %6612 = vmatpush.bf16.msra.mxu0 %v10488_v33 }
  0xf5   : > { %v13133_v30 = vld [vmem:[%s13911_s23 + $0x149c] sm:$0xf0] }
  0xf6   : > { %v11255_v31 = vld [vmem:[%s13911_s23 + $0x1680] sm:$0xf]  ;;  %v11000_v35 = vor.u32 %v13133_v30, %v10999_v29  ;;  %6625 = vmatpush.bf16.msra.mxu1 %v10744_v34  ;;  %v14184_v30 = vpack.c.b16 %v1345_v13, %v1345_v13  ;;  %v14190_v34 = vpack.c.b16 %v1346_v17, %v1346_v17 }
  0xf7   : > { %v13197_v32 = vld [vmem:[%s13911_s23 + $0x169c] sm:$0xf0] }
  0xf8   : > { %v10455_v36 = vld [vmem:[%s13911_s23 + $0x1040] sm:$0xf]  ;;  %v11256_v40 = vor.u32 %v13197_v32, %v11255_v31  ;;  %6638 = vmatpush.bf16.msra.mxu2 %v11000_v35 }
  0xf9   : > { %v12997_v37 = vld [vmem:[%s13911_s23 + $0x105c] sm:$0xf0] }
  0xfa   : > { %v10711_v38 = vld [vmem:[%s13911_s23 + $0x1240] sm:$0xf]  ;;  %v10456_v50 = vor.u32 %v12997_v37, %v10455_v36  ;;  %6651 = vmatpush.bf16.msra.mxu3 %v11256_v40 }
  0xfb   : > { %v13061_v41 = vld [vmem:[%s13911_s23 + $0x125c] sm:$0xf0] }
  0xfc   : > { %v10967_v44 = vld [vmem:[%s13911_s23 + $0x1440] sm:$0xf]  ;;  %v10712_v54 = vor.u32 %v13061_v41, %v10711_v38  ;;  %6613 = vmatpush.bf16.msra.mxu0 %v10456_v50 }
  0xfd   : > { %v13125_v46 = vld [vmem:[%s13911_s23 + $0x145c] sm:$0xf0] }
  0xfe   : > { %v11223_v47 = vld [vmem:[%s13911_s23 + $0x1640] sm:$0xf]  ;;  %v10968_v55 = vor.u32 %v13125_v46, %v10967_v44  ;;  %6626 = vmatpush.bf16.msra.mxu1 %v10712_v54 }
  0xff   : > { %v13189_v48 = vld [vmem:[%s13911_s23 + $0x165c] sm:$0xf0] }
 0x100   : > { %v10423_v49 = vld [vmem:[%s13911_s23 + $0x1000] sm:$0xf]  ;;  %v11224_v59 = vor.u32 %v13189_v48, %v11223_v47  ;;  %6639 = vmatpush.bf16.msra.mxu2 %v10968_v55 }
 0x101   : > { %v12989_v51 = vld [vmem:[%s13911_s23 + $0x101c] sm:$0xf0] }
 0x102   : > { %v10679_v52 = vld [vmem:[%s13911_s23 + $0x1200] sm:$0xf]  ;;  %v10424_v2 = vor.u32 %v12989_v51, %v10423_v49  ;;  %6652 = vmatpush.bf16.msra.mxu3 %v11224_v59 }
 0x103   : > { %v13053_v53 = vld [vmem:[%s13911_s23 + $0x121c] sm:$0xf0] }
 0x104   : > { %v10935_v56 = vld [vmem:[%s13911_s23 + $0x1400] sm:$0xf]  ;;  %v10680_v9 = vor.u32 %v13053_v53, %v10679_v52  ;;  %6614 = vmatpush.bf16.msra.mxu0 %v10424_v2 }
 0x105   : > { %v13117_v57 = vld [vmem:[%s13911_s23 + $0x141c] sm:$0xf0] }
 0x106   : > { %v299_v58 = vld [vmem:[%s13930_s4 + $0x20] sm:$0xff]  ;;  %v10936_v10 = vor.u32 %v13117_v57, %v10935_v56  ;;  %6627 = vmatpush.bf16.msra.mxu1 %v10680_v9 }
 0x107   : > { %v11191_v60 = vld [vmem:[%s13911_s23 + $0x1600] sm:$0xf]  ;;  %v1343_v8 = vunpack.c.l.b16 %v299_v58  ;;  %v1344_v14 = vunpack.c.h.b16 %v299_v58 }
 0x108   : > { %v13181_v61 = vld [vmem:[%s13911_s23 + $0x161c] sm:$0xf0]  ;;  %6640 = vmatpush.bf16.msra.mxu2 %v10936_v10 }
 0x109   : > { %v11671_v63 = vld [vmem:[%s13911_s23 + $0x19c0] sm:$0xf]  ;;  %v11192_v15 = vor.u32 %v13181_v61, %v11191_v60  ;;  %v14179_v26 = vpack.c.b16 %v1343_v8, %v1343_v8  ;;  %v14186_v31 = vpack.c.b16 %v1344_v14, %v1344_v14 }
 0x10a   : > { %v13301_v0 = vld [vmem:[%s13911_s23 + $0x19dc] sm:$0xf0] }
 0x10b   : > { %v11927_v1 = vld [vmem:[%s13911_s23 + $0x1bc0] sm:$0xf]  ;;  %v11672_v16 = vor.u32 %v13301_v0, %v11671_v63  ;;  %6653 = vmatpush.bf16.msra.mxu3 %v11192_v15  ;;  %6615 = vmatmul.bf16.vlgmr.msra.gmra.mxu0 %v14179_v26 }
 0x10c   : > { %v13365_v3 = vld [vmem:[%s13911_s23 + $0x1bdc] sm:$0xf0]  ;;  %6641 = vmatmul.bf16.vlgmr.msra.gmra.mxu2 %v14184_v30  ;;  %6628 = vmatmul.bf16.vlgmr.msra.gmra.mxu1 %v14186_v31 }
 0x10d   : > { %v12183_v4 = vld [vmem:[%s13911_s23 + $0x1dc0] sm:$0xf]  ;;  %v11928_v18 = vor.u32 %v13365_v3, %v11927_v1  ;;  %6659 = vmatpush.bf16.msrb.mxu0 %v11672_v16 }
 0x10e   : > { %v13429_v6 = vld [vmem:[%s13911_s23 + $0x1ddc] sm:$0xf0]  ;;  %6654 = vmatmul.bf16.vlgmr.msra.gmra.mxu3 %v14190_v34 }
 0x10f   : > { %v12439_v11 = vld [vmem:[%s13911_s23 + $0x1fc0] sm:$0xf]  ;;  %v12184_v19 = vor.u32 %v13429_v6, %v12183_v4  ;;  %6672 = vmatpush.bf16.msrb.mxu1 %v11928_v18 }
 0x110   : > { %v13493_v12 = vld [vmem:[%s13911_s23 + $0x1fdc] sm:$0xf0] }
 0x111   : > { %v11639_v20 = vld [vmem:[%s13911_s23 + $0x1980] sm:$0xf]  ;;  %v12440_v25 = vor.u32 %v13493_v12, %v12439_v11  ;;  %6685 = vmatpush.bf16.msrb.mxu2 %v12184_v19 }
 0x112   : > { %v13293_v23 = vld [vmem:[%s13911_s23 + $0x199c] sm:$0xf0] }
 0x113   : > { %v11895_v24 = vld [vmem:[%s13911_s23 + $0x1b80] sm:$0xf]  ;;  %v11640_v35 = vor.u32 %v13293_v23, %v11639_v20  ;;  %6698 = vmatpush.bf16.msrb.mxu3 %v12440_v25 }
 0x114   : > { %v13357_v27 = vld [vmem:[%s13911_s23 + $0x1b9c] sm:$0xf0] }
 0x115   : > { %v12151_v28 = vld [vmem:[%s13911_s23 + $0x1d80] sm:$0xf]  ;;  %v11896_v36 = vor.u32 %v13357_v27, %v11895_v24  ;;  %6660 = vmatpush.bf16.msrb.mxu0 %v11640_v35 }
 0x116   : > { %v13421_v29 = vld [vmem:[%s13911_s23 + $0x1d9c] sm:$0xf0] }
 0x117   : > { %v12407_v32 = vld [vmem:[%s13911_s23 + $0x1f80] sm:$0xf]  ;;  %v12152_v37 = vor.u32 %v13421_v29, %v12151_v28  ;;  %6673 = vmatpush.bf16.msrb.mxu1 %v11896_v36 }
 0x118   : > { %v13485_v33 = vld [vmem:[%s13911_s23 + $0x1f9c] sm:$0xf0] }
 0x119   : > { %v11607_v38 = vld [vmem:[%s13911_s23 + $0x1940] sm:$0xf]  ;;  %v12408_v44 = vor.u32 %v13485_v33, %v12407_v32  ;;  %6686 = vmatpush.bf16.msrb.mxu2 %v12152_v37 }
 0x11a   : > { %v13285_v40 = vld [vmem:[%s13911_s23 + $0x195c] sm:$0xf0] }
 0x11b   : > { %v11863_v41 = vld [vmem:[%s13911_s23 + $0x1b40] sm:$0xf]  ;;  %v11608_v51 = vor.u32 %v13285_v40, %v11607_v38  ;;  %6699 = vmatpush.bf16.msrb.mxu3 %v12408_v44 }
 0x11c   : > { %v13349_v46 = vld [vmem:[%s13911_s23 + $0x1b5c] sm:$0xf0] }
 0x11d   : > { %v12119_v47 = vld [vmem:[%s13911_s23 + $0x1d40] sm:$0xf]  ;;  %v11864_v52 = vor.u32 %v13349_v46, %v11863_v41  ;;  %6661 = vmatpush.bf16.msrb.mxu0 %v11608_v51 }
 0x11e   : > { %v13413_v48 = vld [vmem:[%s13911_s23 + $0x1d5c] sm:$0xf0] }
 0x11f   : > { %v12375_v49 = vld [vmem:[%s13911_s23 + $0x1f40] sm:$0xf]  ;;  %v12120_v53 = vor.u32 %v13413_v48, %v12119_v47  ;;  %6674 = vmatpush.bf16.msrb.mxu1 %v11864_v52 }
 0x120   : > { %v13477_v50 = vld [vmem:[%s13911_s23 + $0x1f5c] sm:$0xf0] }
 0x121   : > { %v11575_v54 = vld [vmem:[%s13911_s23 + $0x1900] sm:$0xf]  ;;  %v12376_v57 = vor.u32 %v13477_v50, %v12375_v49  ;;  %6687 = vmatpush.bf16.msrb.mxu2 %v12120_v53 }
 0x122   : > { %v13277_v55 = vld [vmem:[%s13911_s23 + $0x191c] sm:$0xf0] }
 0x123   : > { %v11831_v56 = vld [vmem:[%s13911_s23 + $0x1b00] sm:$0xf]  ;;  %v11576_v63 = vor.u32 %v13277_v55, %v11575_v54  ;;  %6700 = vmatpush.bf16.msrb.mxu3 %v12376_v57 }
 0x124   : > { %v13341_v58 = vld [vmem:[%s13911_s23 + $0x1b1c] sm:$0xf0] }
 0x125   : > { %v12087_v59 = vld [vmem:[%s13911_s23 + $0x1d00] sm:$0xf]  ;;  %v11832_v0 = vor.u32 %v13341_v58, %v11831_v56  ;;  %6662 = vmatpush.bf16.msrb.mxu0 %v11576_v63  ;;  %v301_v56 = vld [vmem:[%s13930_s4 + $0x30] sm:$0xff]  ;;  %v12593_v63 = vld [vmem:[%s13911_s23 + $0x3c4] sm:$0xf] }
 0x126   : > { %v13405_v60 = vld [vmem:[%s13911_s23 + $0x1d1c] sm:$0xf0] }
 0x127   : > { %v12343_v61 = vld [vmem:[%s13911_s23 + $0x1f00] sm:$0xf]  ;;  %v12088_v1 = vor.u32 %v13405_v60, %v12087_v59  ;;  %6675 = vmatpush.bf16.msrb.mxu1 %v11832_v0  ;;  %v302_v60 = vld [vmem:[%s13930_s4 + $0x38] sm:$0xff] }
 0x128   : > { %v13469_v62 = vld [vmem:[%s13911_s23 + $0x1f1c] sm:$0xf0] }
 0x129   : > { %v11543_v2 = vld [vmem:[%s13911_s23 + $0x18c0] sm:$0xf]  ;;  %v12344_v6 = vor.u32 %v13469_v62, %v12343_v61  ;;  %6688 = vmatpush.bf16.msrb.mxu2 %v12088_v1  ;;  %v12529_v61 = vld [vmem:[%s13911_s23 + $0x1c4] sm:$0xf] }
 0x12a   : > { %v13269_v3 = vld [vmem:[%s13911_s23 + $0x18dc] sm:$0xf0]  ;;  %v8601_v62 = vld [vmem:[%s13911_s23 + $0x1e0] sm:$0xf0] }
 0x12b   : > { %v11799_v4 = vld [vmem:[%s13911_s23 + $0x1ac0] sm:$0xf]  ;;  %v11544_v13 = vor.u32 %v13269_v3, %v11543_v2  ;;  %6701 = vmatpush.bf16.msrb.mxu3 %v12344_v6  ;;  %v8857_v1 = vld [vmem:[%s13911_s23 + $0x3e0] sm:$0xf0] }
 0x12c   : > { %v13333_v8 = vld [vmem:[%s13911_s23 + $0x1adc] sm:$0xf0]  ;;  %v12657_v2 = vld [vmem:[%s13911_s23 + $0x5c4] sm:$0xf] }
 0x12d   : > { %v12055_v9 = vld [vmem:[%s13911_s23 + $0x1cc0] sm:$0xf]  ;;  %v11800_v14 = vor.u32 %v13333_v8, %v11799_v4  ;;  %6663 = vmatpush.bf16.msrb.mxu0 %v11544_v13  ;;  %v9113_v3 = vld [vmem:[%s13911_s23 + $0x5e0] sm:$0xf0]  ;;  %v1347_v4 = vunpack.c.l.b16 %v301_v56 }
 0x12e   : > { %v13397_v10 = vld [vmem:[%s13911_s23 + $0x1cdc] sm:$0xf0] }
 0x12f   : > { %v12311_v11 = vld [vmem:[%s13911_s23 + $0x1ec0] sm:$0xf]  ;;  %v12056_v15 = vor.u32 %v13397_v10, %v12055_v9  ;;  %6676 = vmatpush.bf16.msrb.mxu1 %v11800_v14  ;;  %v12721_v9 = vld [vmem:[%s13911_s23 + $0x7c4] sm:$0xf]  ;;  %v8604_v14 = vor.u32 %v12529_v61, %v8601_v62 }
 0x130   : > { %v13461_v12 = vld [vmem:[%s13911_s23 + $0x1edc] sm:$0xf0]  ;;  %v9369_v10 = vld [vmem:[%s13911_s23 + $0x7e0] sm:$0xf0] }
 0x131   : > { %v11511_v16 = vld [vmem:[%s13911_s23 + $0x1880] sm:$0xf]  ;;  %v12312_v19 = vor.u32 %v13461_v12, %v12311_v11  ;;  %6689 = vmatpush.bf16.msrb.mxu2 %v12056_v15  ;;  %v1349_v11 = vunpack.c.l.b16 %v302_v60  ;;  %v1348_v12 = vunpack.c.h.b16 %v301_v56  ;;  %v1350_v15 = vunpack.c.h.b16 %v302_v60  ;;  %v12505_v56 = vld [vmem:[%s13911_s23 + $0x104] sm:$0xf] }
 0x132   : > { %v13261_v17 = vld [vmem:[%s13911_s23 + $0x189c] sm:$0xf0]  ;;  %v8761_v60 = vld [vmem:[%s13911_s23 + $0x320] sm:$0xf0] }
 0x133   : > { %v11767_v18 = vld [vmem:[%s13911_s23 + $0x1a80] sm:$0xf]  ;;  %v11512_v28 = vor.u32 %v13261_v17, %v11511_v16  ;;  %6702 = vmatpush.bf16.msrb.mxu3 %v12312_v19  ;;  %v8860_v16 = vor.u32 %v12593_v63, %v8857_v1  ;;  %v9116_v17 = vor.u32 %v12657_v2, %v9113_v3  ;;  %v8569_v19 = vld [vmem:[%s13911_s23 + $0x1a0] sm:$0xf0] }
 0x134   : > { %v13325_v20 = vld [vmem:[%s13911_s23 + $0x1a9c] sm:$0xf0]  ;;  %v12633_v61 = vld [vmem:[%s13911_s23 + $0x504] sm:$0xf] }
 0x135   : > { %v12023_v23 = vld [vmem:[%s13911_s23 + $0x1c80] sm:$0xf]  ;;  %v11768_v29 = vor.u32 %v13325_v20, %v11767_v18  ;;  %6664 = vmatpush.bf16.msrb.mxu0 %v11512_v28  ;;  %v12521_v18 = vld [vmem:[%s13911_s23 + $0x184] sm:$0xf] }
 0x136   : > { %v13389_v24 = vld [vmem:[%s13911_s23 + $0x1c9c] sm:$0xf0]  ;;  %v12585_v20 = vld [vmem:[%s13911_s23 + $0x384] sm:$0xf] }
 0x137   : > { %v12279_v25 = vld [vmem:[%s13911_s23 + $0x1e80] sm:$0xf]  ;;  %v12024_v32 = vor.u32 %v13389_v24, %v12023_v23  ;;  %6677 = vmatpush.bf16.msrb.mxu1 %v11768_v29  ;;  %v9372_v23 = vor.u32 %v12721_v9, %v9369_v10  ;;  %v14257_v24 = vpack.c.b16 %v1347_v4, %v1347_v4  ;;  %v9081_v28 = vld [vmem:[%s13911_s23 + $0x5a0] sm:$0xf0]  ;;  %v14262_v29 = vpack.c.b16 %v1349_v11, %v1349_v11 }
 0x138   : > { %v13453_v27 = vld [vmem:[%s13911_s23 + $0x1e9c] sm:$0xf0]  ;;  %v9017_v62 = vld [vmem:[%s13911_s23 + $0x520] sm:$0xf0] }
 0x139   : > { %v11479_v33 = vld [vmem:[%s13911_s23 + $0x1840] sm:$0xf]  ;;  %v12280_v37 = vor.u32 %v13453_v27, %v12279_v25  ;;  %6690 = vmatpush.bf16.msrb.mxu2 %v12024_v32  ;;  %v8825_v25 = vld [vmem:[%s13911_s23 + $0x3a0] sm:$0xf0]  ;;  %v14264_v32 = vpack.c.b16 %v1348_v12, %v1348_v12  ;;  %v9020_v3 = vor.u32 %v12633_v61, %v9017_v62 }
 0x13a   : > { %v13253_v35 = vld [vmem:[%s13911_s23 + $0x185c] sm:$0xf0]  ;;  %v12649_v27 = vld [vmem:[%s13911_s23 + $0x584] sm:$0xf] }
 0x13b   : > { %v11735_v36 = vld [vmem:[%s13911_s23 + $0x1a40] sm:$0xf]  ;;  %v11480_v48 = vor.u32 %v13253_v35, %v11479_v33  ;;  %6703 = vmatpush.bf16.msrb.mxu3 %v12280_v37  ;;  %v12713_v33 = vld [vmem:[%s13911_s23 + $0x784] sm:$0xf]  ;;  %v8572_v37 = vor.u32 %v12521_v18, %v8569_v19 }
 0x13c   : > { %v13317_v38 = vld [vmem:[%s13911_s23 + $0x1a5c] sm:$0xf0]  ;;  %v9337_v35 = vld [vmem:[%s13911_s23 + $0x7a0] sm:$0xf0] }
 0x13d   : > { %v11991_v40 = vld [vmem:[%s13911_s23 + $0x1c40] sm:$0xf]  ;;  %v11736_v52 = vor.u32 %v13317_v38, %v11735_v36  ;;  %6665 = vmatpush.bf16.msrb.mxu0 %v11480_v48  ;;  %v14268_v36 = vpack.c.b16 %v1350_v15, %v1350_v15  ;;  %v8828_v38 = vor.u32 %v12585_v20, %v8825_v25  ;;  %v8793_v48 = vld [vmem:[%s13911_s23 + $0x360] sm:$0xf0] }
 0x13e   : > { %v13381_v41 = vld [vmem:[%s13911_s23 + $0x1c5c] sm:$0xf0]  ;;  %v12697_v63 = vld [vmem:[%s13911_s23 + $0x704] sm:$0xf] }
 0x13f   : > { %v12247_v44 = vld [vmem:[%s13911_s23 + $0x1e40] sm:$0xf]  ;;  %v11992_v53 = vor.u32 %v13381_v41, %v11991_v40  ;;  %6678 = vmatpush.bf16.msrb.mxu1 %v11736_v52  ;;  %v9084_v40 = vor.u32 %v12649_v27, %v9081_v28  ;;  %v12513_v41 = vld [vmem:[%s13911_s23 + $0x144] sm:$0xf] }
 0x140   : > { %v13445_v46 = vld [vmem:[%s13911_s23 + $0x1e5c] sm:$0xf0]  ;;  %v9305_v52 = vld [vmem:[%s13911_s23 + $0x760] sm:$0xf0] }
 0x141   : > { %v11447_v47 = vld [vmem:[%s13911_s23 + $0x1800] sm:$0xf]  ;;  %v12248_v57 = vor.u32 %v13445_v46, %v12247_v44  ;;  %6691 = vmatpush.bf16.msrb.mxu2 %v11992_v53  ;;  %v8537_v44 = vld [vmem:[%s13911_s23 + $0x160] sm:$0xf0] }
 0x142   : > { %v13245_v49 = vld [vmem:[%s13911_s23 + $0x181c] sm:$0xf0]  ;;  %v12577_v46 = vld [vmem:[%s13911_s23 + $0x344] sm:$0xf]  ;;  %v8540_v53 = vor.u32 %v12513_v41, %v8537_v44 }
 0x143   : > { %v11703_v50 = vld [vmem:[%s13911_s23 + $0x1a00] sm:$0xf]  ;;  %v11448_v0 = vor.u32 %v13245_v49, %v11447_v47  ;;  %6704 = vmatpush.bf16.msrb.mxu3 %v12248_v57  ;;  %v9340_v47 = vor.u32 %v12713_v33, %v9337_v35  ;;  %v12641_v49 = vld [vmem:[%s13911_s23 + $0x544] sm:$0xf] }
 0x144   : > { %v13309_v51 = vld [vmem:[%s13911_s23 + $0x1a1c] sm:$0xf0]  ;;  %v8505_v57 = vld [vmem:[%s13911_s23 + $0x120] sm:$0xf0] }
 0x145   : > { %v11959_v54 = vld [vmem:[%s13911_s23 + $0x1c00] sm:$0xf]  ;;  %v11704_v6 = vor.u32 %v13309_v51, %v11703_v50  ;;  %6666 = vmatpush.bf16.msrb.mxu0 %v11448_v0  ;;  %v9049_v50 = vld [vmem:[%s13911_s23 + $0x560] sm:$0xf0]  ;;  %v8508_v1 = vor.u32 %v12505_v56, %v8505_v57 }
 0x146   : > { %v13373_v55 = vld [vmem:[%s13911_s23 + $0x1c1c] sm:$0xf0]  ;;  %v12705_v51 = vld [vmem:[%s13911_s23 + $0x744] sm:$0xf] }
 0x147   : > { %v12215_v58 = vld [vmem:[%s13911_s23 + $0x1e00] sm:$0xf]  ;;  %v11960_v8 = vor.u32 %v13373_v55, %v11959_v54  ;;  %6679 = vmatpush.bf16.msrb.mxu1 %v11704_v6  ;;  %v8796_v54 = vor.u32 %v12577_v46, %v8793_v48  ;;  %v9052_v55 = vor.u32 %v12641_v49, %v9049_v50  ;;  %v9273_v0 = vld [vmem:[%s13911_s23 + $0x720] sm:$0xf0] }
 0x148   : > { %v13437_v59 = vld [vmem:[%s13911_s23 + $0x1e1c] sm:$0xf0]  ;;  %6667 = vmatmul.bf16.vlgmr.msrb.gmra.mxu0 %v14257_v24  ;;  %v12497_v4 = vld [vmem:[%s13911_s23 + $0xc4] sm:$0xf]  ;;  %v9276_v9 = vor.u32 %v12697_v63, %v9273_v0 }
 0x149   : > { %v12216_v13 = vor.u32 %v13437_v59, %v12215_v58  ;;  %6692 = vmatpush.bf16.msrb.mxu2 %v11960_v8  ;;  %6711 = vmatpush.bf16.msra.mxu0 %v8604_v14  ;;  %v12569_v58 = vld [vmem:[%s13911_s23 + $0x304] sm:$0xf]  ;;  %v9308_v59 = vor.u32 %v12705_v51, %v9305_v52 }
 0x14a   : > { %6680 = vmatmul.bf16.vlgmr.msrb.gmra.mxu1 %v14264_v32  ;;  %v8764_v2 = vor.u32 %v12569_v58, %v8761_v60  ;;  %v8473_v6 = vld [vmem:[%s13911_s23 + $0xe0] sm:$0xf0] }
 0x14b   : > { %6705 = vmatpush.bf16.msrb.mxu3 %v12216_v13  ;;  %6724 = vmatpush.bf16.msra.mxu1 %v8860_v16  ;;  %v12561_v8 = vld [vmem:[%s13911_s23 + $0x2c4] sm:$0xf]  ;;  %v8476_v15 = vor.u32 %v12497_v4, %v8473_v6 }
 0x14c   : > { %6693 = vmatmul.bf16.vlgmr.msrb.gmra.mxu2 %v14262_v29  ;;  %v8729_v10 = vld [vmem:[%s13911_s23 + $0x2e0] sm:$0xf0] }
 0x14d   : > { %6737 = vmatpush.bf16.msra.mxu2 %v9116_v17  ;;  %6712 = vmatpush.bf16.msra.mxu0 %v8572_v37  ;;  %v12625_v11 = vld [vmem:[%s13911_s23 + $0x4c4] sm:$0xf]  ;;  %v8732_v16 = vor.u32 %v12561_v8, %v8729_v10 }
 0x14e   : > { %6706 = vmatmul.bf16.vlgmr.msrb.gmra.mxu3 %v14268_v36  ;;  %v8985_v12 = vld [vmem:[%s13911_s23 + $0x4e0] sm:$0xf0] }
 0x14f   : > { %6750 = vmatpush.bf16.msra.mxu3 %v9372_v23  ;;  %6725 = vmatpush.bf16.msra.mxu1 %v8828_v38  ;;  %v12689_v13 = vld [vmem:[%s13911_s23 + $0x6c4] sm:$0xf]  ;;  %v8988_v17 = vor.u32 %v12625_v11, %v8985_v12 }
 0x150   : > { %v9241_v14 = vld [vmem:[%s13911_s23 + $0x6e0] sm:$0xf0] }
 0x151   : > { %6738 = vmatpush.bf16.msra.mxu2 %v9084_v40  ;;  %6713 = vmatpush.bf16.msra.mxu0 %v8540_v53  ;;  %v12489_v18 = vld [vmem:[%s13911_s23 + $0x84] sm:$0xf]  ;;  %v9244_v23 = vor.u32 %v12689_v13, %v9241_v14 }
 0x152   : > { %v8441_v19 = vld [vmem:[%s13911_s23 + $0xa0] sm:$0xf0] }
 0x153   : > { %6751 = vmatpush.bf16.msra.mxu3 %v9340_v47  ;;  %6726 = vmatpush.bf16.msra.mxu1 %v8796_v54  ;;  %v12553_v20 = vld [vmem:[%s13911_s23 + $0x284] sm:$0xf]  ;;  %v8444_v37 = vor.u32 %v12489_v18, %v8441_v19 }
 0x154   : > { %v8697_v25 = vld [vmem:[%s13911_s23 + $0x2a0] sm:$0xf0] }
 0x155   : > { %6739 = vmatpush.bf16.msra.mxu2 %v9052_v55  ;;  %6714 = vmatpush.bf16.msra.mxu0 %v8508_v1  ;;  %v12617_v27 = vld [vmem:[%s13911_s23 + $0x484] sm:$0xf]  ;;  %v8700_v38 = vor.u32 %v12553_v20, %v8697_v25 }
 0x156   : > { %v8953_v28 = vld [vmem:[%s13911_s23 + $0x4a0] sm:$0xf0] }
 0x157   : > { %6752 = vmatpush.bf16.msra.mxu3 %v9308_v59  ;;  %6727 = vmatpush.bf16.msra.mxu1 %v8764_v2  ;;  %v12681_v33 = vld [vmem:[%s13911_s23 + $0x684] sm:$0xf]  ;;  %v8956_v40 = vor.u32 %v12617_v27, %v8953_v28 }
 0x158   : > { %v9209_v35 = vld [vmem:[%s13911_s23 + $0x6a0] sm:$0xf0] }
 0x159   : > { %6740 = vmatpush.bf16.msra.mxu2 %v9020_v3  ;;  %6715 = vmatpush.bf16.msra.mxu0 %v8476_v15  ;;  %v12481_v41 = vld [vmem:[%s13911_s23 + $0x44] sm:$0xf]  ;;  %v9212_v47 = vor.u32 %v12681_v33, %v9209_v35 }
 0x15a   : > { %v8409_v44 = vld [vmem:[%s13911_s23 + $0x60] sm:$0xf0] }
 0x15b   : > { %6753 = vmatpush.bf16.msra.mxu3 %v9276_v9  ;;  %6728 = vmatpush.bf16.msra.mxu1 %v8732_v16  ;;  %v12545_v46 = vld [vmem:[%s13911_s23 + $0x244] sm:$0xf]  ;;  %v8412_v53 = vor.u32 %v12481_v41, %v8409_v44 }
 0x15c   : > { %v8665_v48 = vld [vmem:[%s13911_s23 + $0x260] sm:$0xf0] }
 0x15d   : > { %6741 = vmatpush.bf16.msra.mxu2 %v8988_v17  ;;  %v12609_v49 = vld [vmem:[%s13911_s23 + $0x444] sm:$0xf]  ;;  %6716 = vmatpush.bf16.msra.mxu0 %v8444_v37  ;;  %v8668_v56 = vor.u32 %v12545_v46, %v8665_v48 }
 0x15e   : > { %v8921_v50 = vld [vmem:[%s13911_s23 + $0x460] sm:$0xf0] }
 0x15f   : > { %6754 = vmatpush.bf16.msra.mxu3 %v9244_v23  ;;  %v12673_v51 = vld [vmem:[%s13911_s23 + $0x644] sm:$0xf]  ;;  %6729 = vmatpush.bf16.msra.mxu1 %v8700_v38  ;;  %v8924_v57 = vor.u32 %v12609_v49, %v8921_v50 }
 0x160   : > { %v9177_v52 = vld [vmem:[%s13911_s23 + $0x660] sm:$0xf0] }
 0x161   : > { %v12473_v54 = vld [vmem:[%s13911_s23 + $0x4] sm:$0xf]  ;;  %6742 = vmatpush.bf16.msra.mxu2 %v8956_v40  ;;  %v9180_v61 = vor.u32 %v12673_v51, %v9177_v52  ;;  %6717 = vmatpush.bf16.msra.mxu0 %v8412_v53 }
 0x162   : > { %v8377_v55 = vld [vmem:[%s13911_s23 + $0x20] sm:$0xf0] }
 0x163   : > { %v12537_v58 = vld [vmem:[%s13911_s23 + $0x204] sm:$0xf]  ;;  %6755 = vmatpush.bf16.msra.mxu3 %v9212_v47  ;;  %v8380_v4 = vor.u32 %v12473_v54, %v8377_v55  ;;  %6730 = vmatpush.bf16.msra.mxu1 %v8668_v56 }
 0x164   : > { %v8633_v59 = vld [vmem:[%s13911_s23 + $0x220] sm:$0xf0] }
 0x165   : > { %v12601_v60 = vld [vmem:[%s13911_s23 + $0x404] sm:$0xf]  ;;  %6743 = vmatpush.bf16.msra.mxu2 %v8924_v57  ;;  %v8636_v10 = vor.u32 %v12537_v58, %v8633_v59  ;;  %6718 = vmatpush.bf16.msra.mxu0 %v8380_v4 }
 0x166   : > { %v8889_v62 = vld [vmem:[%s13911_s23 + $0x420] sm:$0xf0] }
 0x167   : > { %v12665_v63 = vld [vmem:[%s13911_s23 + $0x604] sm:$0xf]  ;;  %v8892_v11 = vor.u32 %v12601_v60, %v8889_v62  ;;  %6756 = vmatpush.bf16.msra.mxu3 %v9180_v61  ;;  %6731 = vmatpush.bf16.msra.mxu1 %v8636_v10 }
 0x168   : > { %v9145_v0 = vld [vmem:[%s13911_s23 + $0x620] sm:$0xf0]  ;;  %6719 = vmatmul.bf16.vlgmr.msra.gmra.mxu0 %v14049_v21 }
 0x169   : > { %v12785_v1 = vld [vmem:[%s13911_s23 + $0x9c4] sm:$0xf]  ;;  %v9148_v14 = vor.u32 %v12665_v63, %v9145_v0  ;;  %6744 = vmatpush.bf16.msra.mxu2 %v8892_v11 }
 0x16a   : > { %v9625_v2 = vld [vmem:[%s13911_s23 + $0x9e0] sm:$0xf0]  ;;  %6732 = vmatmul.bf16.vlgmr.msra.gmra.mxu1 %v14052_v22 }
 0x16b   : > { %v12849_v3 = vld [vmem:[%s13911_s23 + $0xbc4] sm:$0xf]  ;;  %v9628_v15 = vor.u32 %v12785_v1, %v9625_v2  ;;  %6757 = vmatpush.bf16.msra.mxu3 %v9148_v14 }
 0x16c   : > { %v9881_v6 = vld [vmem:[%s13911_s23 + $0xbe0] sm:$0xf0]  ;;  %6745 = vmatmul.bf16.vlgmr.msra.gmra.mxu2 %v14035_v5 }
 0x16d   : > { %v12913_v8 = vld [vmem:[%s13911_s23 + $0xdc4] sm:$0xf]  ;;  %v9884_v16 = vor.u32 %v12849_v3, %v9881_v6  ;;  %6763 = vmatpush.bf16.msrb.mxu0 %v9628_v15 }
 0x16e   : > { %v10137_v9 = vld [vmem:[%s13911_s23 + $0xde0] sm:$0xf0]  ;;  %6758 = vmatmul.bf16.vlgmr.msra.gmra.mxu3 %v14038_v7 }
 0x16f   : > { %v12977_v12 = vld [vmem:[%s13911_s23 + $0xfc4] sm:$0xf]  ;;  %v10140_v17 = vor.u32 %v12913_v8, %v10137_v9  ;;  %6776 = vmatpush.bf16.msrb.mxu1 %v9884_v16 }
 0x170   : > { %v10393_v13 = vld [vmem:[%s13911_s23 + $0xfe0] sm:$0xf0] }
 0x171   : > { %v12777_v18 = vld [vmem:[%s13911_s23 + $0x984] sm:$0xf]  ;;  %v10396_v23 = vor.u32 %v12977_v12, %v10393_v13  ;;  %6789 = vmatpush.bf16.msrb.mxu2 %v10140_v17 }
 0x172   : > { %v9593_v19 = vld [vmem:[%s13911_s23 + $0x9a0] sm:$0xf0] }
 0x173   : > { %v12841_v20 = vld [vmem:[%s13911_s23 + $0xb84] sm:$0xf]  ;;  %v9596_v37 = vor.u32 %v12777_v18, %v9593_v19  ;;  %6802 = vmatpush.bf16.msrb.mxu3 %v10396_v23 }
 0x174   : > { %v9849_v25 = vld [vmem:[%s13911_s23 + $0xba0] sm:$0xf0] }
 0x175   : > { %v12905_v27 = vld [vmem:[%s13911_s23 + $0xd84] sm:$0xf]  ;;  %v9852_v38 = vor.u32 %v12841_v20, %v9849_v25  ;;  %6764 = vmatpush.bf16.msrb.mxu0 %v9596_v37  ;;  %v14374_v37 = vpop.f32.mrf.mxu0 }
 0x176   : > { %v10105_v28 = vld [vmem:[%s13911_s23 + $0xda0] sm:$0xf0] }
 0x177   : > { %v12969_v33 = vld [vmem:[%s13911_s23 + $0xf84] sm:$0xf]  ;;  %v10108_v40 = vor.u32 %v12905_v27, %v10105_v28  ;;  %6777 = vmatpush.bf16.msrb.mxu1 %v9852_v38 }
 0x178   : > { %v10361_v35 = vld [vmem:[%s13911_s23 + $0xfa0] sm:$0xf0] }
 0x179   : > { %v12769_v41 = vld [vmem:[%s13911_s23 + $0x944] sm:$0xf]  ;;  %v10364_v47 = vor.u32 %v12969_v33, %v10361_v35  ;;  %6790 = vmatpush.bf16.msrb.mxu2 %v10108_v40  ;;  %v14376_v40 = vpop.f32.mrf.mxu1 }
 0x17a   : > { %v9561_v44 = vld [vmem:[%s13911_s23 + $0x960] sm:$0xf0] }
 0x17b   : > { %v12833_v46 = vld [vmem:[%s13911_s23 + $0xb44] sm:$0xf]  ;;  %v9564_v53 = vor.u32 %v12769_v41, %v9561_v44  ;;  %6803 = vmatpush.bf16.msrb.mxu3 %v10364_v47 }
 0x17c   : > { %v9817_v48 = vld [vmem:[%s13911_s23 + $0xb60] sm:$0xf0] }
 0x17d   : > { %v12897_v49 = vld [vmem:[%s13911_s23 + $0xd44] sm:$0xf]  ;;  %v9820_v54 = vor.u32 %v12833_v46, %v9817_v48  ;;  %6765 = vmatpush.bf16.msrb.mxu0 %v9564_v53 }
 0x17e   : > { %v10073_v50 = vld [vmem:[%s13911_s23 + $0xd60] sm:$0xf0] }
 0x17f   : > { %v12961_v51 = vld [vmem:[%s13911_s23 + $0xf44] sm:$0xf]  ;;  %v10076_v55 = vor.u32 %v12897_v49, %v10073_v50  ;;  %6778 = vmatpush.bf16.msrb.mxu1 %v9820_v54  ;;  %v14381_v49 = vpop.f32.mrf.mxu2  ;;  %v14386_v54 = vpop.f32.mrf.mxu3 }
 0x180   : > { %v10329_v52 = vld [vmem:[%s13911_s23 + $0xf60] sm:$0xf0] }
 0x181   : > { %v12761_v56 = vld [vmem:[%s13911_s23 + $0x904] sm:$0xf]  ;;  %v10332_v59 = vor.u32 %v12961_v51, %v10329_v52  ;;  %6791 = vmatpush.bf16.msrb.mxu2 %v10076_v55 }
 0x182   : > { %v9529_v57 = vld [vmem:[%s13911_s23 + $0x920] sm:$0xf0] }
 0x183   : > { %v12825_v58 = vld [vmem:[%s13911_s23 + $0xb04] sm:$0xf]  ;;  %v9532_v1 = vor.u32 %v12761_v56, %v9529_v57  ;;  %6804 = vmatpush.bf16.msrb.mxu3 %v10332_v59 }
 0x184   : > { %v9785_v60 = vld [vmem:[%s13911_s23 + $0xb20] sm:$0xf0] }
 0x185   : > { %v12889_v61 = vld [vmem:[%s13911_s23 + $0xd04] sm:$0xf]  ;;  %v9788_v2 = vor.u32 %v12825_v58, %v9785_v60  ;;  %6766 = vmatpush.bf16.msrb.mxu0 %v9532_v1 }
 0x186   : > { %v10041_v62 = vld [vmem:[%s13911_s23 + $0xd20] sm:$0xf0] }
 0x187   : > { %v12953_v63 = vld [vmem:[%s13911_s23 + $0xf04] sm:$0xf]  ;;  %v10044_v3 = vor.u32 %v12889_v61, %v10041_v62  ;;  %6779 = vmatpush.bf16.msrb.mxu1 %v9788_v2 }
 0x188   : > { %v10297_v0 = vld [vmem:[%s13911_s23 + $0xf20] sm:$0xf0] }
 0x189   : > { %v12753_v4 = vld [vmem:[%s13911_s23 + $0x8c4] sm:$0xf]  ;;  %v10300_v9 = vor.u32 %v12953_v63, %v10297_v0  ;;  %6792 = vmatpush.bf16.msrb.mxu2 %v10044_v3 }
 0x18a   : > { %v9497_v6 = vld [vmem:[%s13911_s23 + $0x8e0] sm:$0xf0] }
 0x18b   : > { %v12817_v8 = vld [vmem:[%s13911_s23 + $0xac4] sm:$0xf]  ;;  %v9500_v15 = vor.u32 %v12753_v4, %v9497_v6  ;;  %6805 = vmatpush.bf16.msrb.mxu3 %v10300_v9 }
 0x18c   : > { %v9753_v10 = vld [vmem:[%s13911_s23 + $0xae0] sm:$0xf0] }
 0x18d   : > { %v12881_v11 = vld [vmem:[%s13911_s23 + $0xcc4] sm:$0xf]  ;;  %v9756_v16 = vor.u32 %v12817_v8, %v9753_v10  ;;  %6767 = vmatpush.bf16.msrb.mxu0 %v9500_v15  ;;  %v6514_v10 = vpop.f32.mrf.mxu0  ;;  %v6527_v15 = vpop.f32.mrf.mxu1 }
 0x18e   : > { %v10009_v12 = vld [vmem:[%s13911_s23 + $0xce0] sm:$0xf0] }
 0x18f   : > { %v12945_v13 = vld [vmem:[%s13911_s23 + $0xec4] sm:$0xf]  ;;  %v10012_v17 = vor.u32 %v12881_v11, %v10009_v12  ;;  %6780 = vmatpush.bf16.msrb.mxu1 %v9756_v16 }
 0x190   : > { %v10265_v14 = vld [vmem:[%s13911_s23 + $0xee0] sm:$0xf0] }
 0x191   : > { %v12745_v18 = vld [vmem:[%s13911_s23 + $0x884] sm:$0xf]  ;;  %v10268_v23 = vor.u32 %v12945_v13, %v10265_v14  ;;  %6793 = vmatpush.bf16.msrb.mxu2 %v10012_v17 }
 0x192   : > { %v9465_v19 = vld [vmem:[%s13911_s23 + $0x8a0] sm:$0xf0] }
 0x193   : > { %v12809_v20 = vld [vmem:[%s13911_s23 + $0xa84] sm:$0xf]  ;;  %v9468_v38 = vor.u32 %v12745_v18, %v9465_v19  ;;  %6806 = vmatpush.bf16.msrb.mxu3 %v10268_v23 }
 0x194   : > { %v9721_v25 = vld [vmem:[%s13911_s23 + $0xaa0] sm:$0xf0] }
 0x195   : > { %v12873_v27 = vld [vmem:[%s13911_s23 + $0xc84] sm:$0xf]  ;;  %v9724_v41 = vor.u32 %v12809_v20, %v9721_v25  ;;  %6768 = vmatpush.bf16.msrb.mxu0 %v9468_v38  ;;  %v6540_v20 = vpop.f32.mrf.mxu2 }
 0x196   : > { %v9977_v28 = vld [vmem:[%s13911_s23 + $0xca0] sm:$0xf0] }
 0x197   : > { %v12937_v33 = vld [vmem:[%s13911_s23 + $0xe84] sm:$0xf]  ;;  %v9980_v44 = vor.u32 %v12873_v27, %v9977_v28  ;;  %6781 = vmatpush.bf16.msrb.mxu1 %v9724_v41  ;;  %v6553_v27 = vpop.f32.mrf.mxu3 }
 0x198   : > { %v10233_v35 = vld [vmem:[%s13911_s23 + $0xea0] sm:$0xf0] }
 0x199   : > { %v12737_v46 = vld [vmem:[%s13911_s23 + $0x844] sm:$0xf]  ;;  %v10236_v50 = vor.u32 %v12937_v33, %v10233_v35  ;;  %6794 = vmatpush.bf16.msrb.mxu2 %v9980_v44 }
 0x19a   : > { %v9433_v47 = vld [vmem:[%s13911_s23 + $0x860] sm:$0xf0] }
 0x19b   : > { %v12801_v48 = vld [vmem:[%s13911_s23 + $0xa44] sm:$0xf]  ;;  %v9436_v57 = vor.u32 %v12737_v46, %v9433_v47  ;;  %6807 = vmatpush.bf16.msrb.mxu3 %v10236_v50 }
 0x19c   : > { %v9689_v51 = vld [vmem:[%s13911_s23 + $0xa60] sm:$0xf0] }
 0x19d   : > { %v12865_v52 = vld [vmem:[%s13911_s23 + $0xc44] sm:$0xf]  ;;  %v9692_v60 = vor.u32 %v12801_v48, %v9689_v51  ;;  %6769 = vmatpush.bf16.msrb.mxu0 %v9436_v57 }
 0x19e   : > { %v9945_v53 = vld [vmem:[%s13911_s23 + $0xc60] sm:$0xf0] }
 0x19f   : > { %v12929_v55 = vld [vmem:[%s13911_s23 + $0xe44] sm:$0xf]  ;;  %v9948_v61 = vor.u32 %v12865_v52, %v9945_v53  ;;  %6782 = vmatpush.bf16.msrb.mxu1 %v9692_v60 }
 0x1a0   : > { %v10201_v56 = vld [vmem:[%s13911_s23 + $0xe60] sm:$0xf0] }
 0x1a1   : > { %v12729_v58 = vld [vmem:[%s13911_s23 + $0x804] sm:$0xf]  ;;  %v10204_v1 = vor.u32 %v12929_v55, %v10201_v56  ;;  %6795 = vmatpush.bf16.msrb.mxu2 %v9948_v61 }
 0x1a2   : > { %v9401_v59 = vld [vmem:[%s13911_s23 + $0x820] sm:$0xf0] }
 0x1a3   : > { %v12793_v62 = vld [vmem:[%s13911_s23 + $0xa04] sm:$0xf]  ;;  %v9404_v11 = vor.u32 %v12729_v58, %v9401_v59  ;;  %6808 = vmatpush.bf16.msrb.mxu3 %v10204_v1 }
 0x1a4   : > { %v9657_v63 = vld [vmem:[%s13911_s23 + $0xa20] sm:$0xf0] }
 0x1a5   : > { %v12857_v0 = vld [vmem:[%s13911_s23 + $0xc04] sm:$0xf]  ;;  %v9660_v16 = vor.u32 %v12793_v62, %v9657_v63  ;;  %6770 = vmatpush.bf16.msrb.mxu0 %v9404_v11 }
 0x1a6   : > { %v9913_v2 = vld [vmem:[%s13911_s23 + $0xc20] sm:$0xf0] }
 0x1a7   : > { %v12921_v3 = vld [vmem:[%s13911_s23 + $0xe04] sm:$0xf]  ;;  %v9916_v17 = vor.u32 %v12857_v0, %v9913_v2  ;;  %6783 = vmatpush.bf16.msrb.mxu1 %v9660_v16  ;;  %v14434_v16 = vpop.f32.mrf.mxu0 }
 0x1a8   : > { %v10169_v4 = vld [vmem:[%s13911_s23 + $0xe20] sm:$0xf0]  ;;  %6771 = vmatmul.bf16.vlgmr.msrb.gmra.mxu0 %v14108_v42 }
 0x1a9   : > { %v13041_v6 = vld [vmem:[%s13911_s23 + $0x11c4] sm:$0xf]  ;;  %v10172_v23 = vor.u32 %v12921_v3, %v10169_v4  ;;  %6796 = vmatpush.bf16.msrb.mxu2 %v9916_v17 }
 0x1aa   : > { %v10649_v8 = vld [vmem:[%s13911_s23 + $0x11e0] sm:$0xf0]  ;;  %6784 = vmatmul.bf16.vlgmr.msrb.gmra.mxu1 %v14112_v45 }
 0x1ab   : > { %v13105_v9 = vld [vmem:[%s13911_s23 + $0x13c4] sm:$0xf]  ;;  %v10652_v25 = vor.u32 %v13041_v6, %v10649_v8  ;;  %6809 = vmatpush.bf16.msrb.mxu3 %v10172_v23 }
 0x1ac   : > { %v10905_v12 = vld [vmem:[%s13911_s23 + $0x13e0] sm:$0xf0]  ;;  %6797 = vmatmul.bf16.vlgmr.msrb.gmra.mxu2 %v14104_v39 }
 0x1ad   : > { %v13169_v13 = vld [vmem:[%s13911_s23 + $0x15c4] sm:$0xf]  ;;  %v10908_v28 = vor.u32 %v13105_v9, %v10905_v12  ;;  %6815 = vmatpush.bf16.msra.mxu0 %v10652_v25  ;;  %v14439_v25 = vpop.f32.mrf.mxu1 }
 0x1ae   : > { %v11161_v14 = vld [vmem:[%s13911_s23 + $0x15e0] sm:$0xf0]  ;;  %6810 = vmatmul.bf16.vlgmr.msrb.gmra.mxu3 %v14110_v43 }
 0x1af   : > { %v13233_v18 = vld [vmem:[%s13911_s23 + $0x17c4] sm:$0xf]  ;;  %v11164_v33 = vor.u32 %v13169_v13, %v11161_v14  ;;  %6828 = vmatpush.bf16.msra.mxu1 %v10908_v28 }
 0x1b0   : > { %v11417_v19 = vld [vmem:[%s13911_s23 + $0x17e0] sm:$0xf0] }
 0x1b1   : > { %v13033_v35 = vld [vmem:[%s13911_s23 + $0x1184] sm:$0xf]  ;;  %v11420_v44 = vor.u32 %v13233_v18, %v11417_v19  ;;  %6841 = vmatpush.bf16.msra.mxu2 %v11164_v33 }
 0x1b2   : > { %v10617_v38 = vld [vmem:[%s13911_s23 + $0x11a0] sm:$0xf0] }
 0x1b3   : > { %v13097_v41 = vld [vmem:[%s13911_s23 + $0x1384] sm:$0xf]  ;;  %v10620_v52 = vor.u32 %v13033_v35, %v10617_v38  ;;  %6854 = vmatpush.bf16.msra.mxu3 %v11420_v44 }
 0x1b4   : > { %v10873_v46 = vld [vmem:[%s13911_s23 + $0x13a0] sm:$0xf0] }
 0x1b5   : > { %v13161_v47 = vld [vmem:[%s13911_s23 + $0x1584] sm:$0xf]  ;;  %v10876_v53 = vor.u32 %v13097_v41, %v10873_v46  ;;  %6816 = vmatpush.bf16.msra.mxu0 %v10620_v52  ;;  %v14449_v52 = vpop.f32.mrf.mxu2 }
 0x1b6   : > { %v11129_v48 = vld [vmem:[%s13911_s23 + $0x15a0] sm:$0xf0] }
 0x1b7   : > { %v13225_v50 = vld [vmem:[%s13911_s23 + $0x1784] sm:$0xf]  ;;  %v11132_v55 = vor.u32 %v13161_v47, %v11129_v48  ;;  %6829 = vmatpush.bf16.msra.mxu1 %v10876_v53 }
 0x1b8   : > { %v11385_v51 = vld [vmem:[%s13911_s23 + $0x17a0] sm:$0xf0] }
 0x1b9   : > { %v13025_v56 = vld [vmem:[%s13911_s23 + $0x1144] sm:$0xf]  ;;  %v11388_v59 = vor.u32 %v13225_v50, %v11385_v51  ;;  %6842 = vmatpush.bf16.msra.mxu2 %v11132_v55 }
 0x1ba   : > { %v10585_v57 = vld [vmem:[%s13911_s23 + $0x1160] sm:$0xf0] }
 0x1bb   : > { %v13089_v58 = vld [vmem:[%s13911_s23 + $0x1344] sm:$0xf]  ;;  %v10588_v1 = vor.u32 %v13025_v56, %v10585_v57  ;;  %6855 = vmatpush.bf16.msra.mxu3 %v11388_v59 }
 0x1bc   : > { %v10841_v60 = vld [vmem:[%s13911_s23 + $0x1360] sm:$0xf0] }
 0x1bd   : > { %v13153_v61 = vld [vmem:[%s13911_s23 + $0x1544] sm:$0xf]  ;;  %v10844_v2 = vor.u32 %v13089_v58, %v10841_v60  ;;  %6817 = vmatpush.bf16.msra.mxu0 %v10588_v1  ;;  %v14454_v58 = vpop.f32.mrf.mxu3 }
 0x1be   : > { %v11097_v62 = vld [vmem:[%s13911_s23 + $0x1560] sm:$0xf0] }
 0x1bf   : > { %v13217_v63 = vld [vmem:[%s13911_s23 + $0x1744] sm:$0xf]  ;;  %v11100_v3 = vor.u32 %v13153_v61, %v11097_v62  ;;  %6830 = vmatpush.bf16.msra.mxu1 %v10844_v2  ;;  %v6566_v62 = vpop.f32.mrf.mxu0 }
 0x1c0   : > { %v11353_v0 = vld [vmem:[%s13911_s23 + $0x1760] sm:$0xf0] }
 0x1c1   : > { %v13017_v4 = vld [vmem:[%s13911_s23 + $0x1104] sm:$0xf]  ;;  %v11356_v9 = vor.u32 %v13217_v63, %v11353_v0  ;;  %6843 = vmatpush.bf16.msra.mxu2 %v11100_v3 }
 0x1c2   : > { %v10553_v6 = vld [vmem:[%s13911_s23 + $0x1120] sm:$0xf0] }
 0x1c3   : > { %v13081_v8 = vld [vmem:[%s13911_s23 + $0x1304] sm:$0xf]  ;;  %v10556_v15 = vor.u32 %v13017_v4, %v10553_v6  ;;  %6856 = vmatpush.bf16.msra.mxu3 %v11356_v9  ;;  %v6579_v4 = vpop.f32.mrf.mxu1 }
 0x1c4   : > { %v10809_v10 = vld [vmem:[%s13911_s23 + $0x1320] sm:$0xf0] }
 0x1c5   : > { %v13145_v11 = vld [vmem:[%s13911_s23 + $0x1504] sm:$0xf]  ;;  %v10812_v17 = vor.u32 %v13081_v8, %v10809_v10  ;;  %6818 = vmatpush.bf16.msra.mxu0 %v10556_v15 }
 0x1c6   : > { %v11065_v12 = vld [vmem:[%s13911_s23 + $0x1520] sm:$0xf0] }
 0x1c7   : > { %v13209_v13 = vld [vmem:[%s13911_s23 + $0x1704] sm:$0xf]  ;;  %v11068_v18 = vor.u32 %v13145_v11, %v11065_v12  ;;  %6831 = vmatpush.bf16.msra.mxu1 %v10812_v17 }
 0x1c8   : > { %v11321_v14 = vld [vmem:[%s13911_s23 + $0x1720] sm:$0xf0] }
 0x1c9   : > { %v13009_v19 = vld [vmem:[%s13911_s23 + $0x10c4] sm:$0xf]  ;;  %v11324_v27 = vor.u32 %v13209_v13, %v11321_v14  ;;  %6844 = vmatpush.bf16.msra.mxu2 %v11068_v18 }
 0x1ca   : > { %v10521_v20 = vld [vmem:[%s13911_s23 + $0x10e0] sm:$0xf0] }
 0x1cb   : > { %v13073_v23 = vld [vmem:[%s13911_s23 + $0x12c4] sm:$0xf]  ;;  %v10524_v44 = vor.u32 %v13009_v19, %v10521_v20  ;;  %6857 = vmatpush.bf16.msra.mxu3 %v11324_v27  ;;  %v6592_v27 = vpop.f32.mrf.mxu2 }
 0x1cc   : > { %v10777_v28 = vld [vmem:[%s13911_s23 + $0x12e0] sm:$0xf0] }
 0x1cd   : > { %v13137_v33 = vld [vmem:[%s13911_s23 + $0x14c4] sm:$0xf]  ;;  %v10780_v46 = vor.u32 %v13073_v23, %v10777_v28  ;;  %6819 = vmatpush.bf16.msra.mxu0 %v10524_v44 }
 0x1ce   : > { %v11033_v35 = vld [vmem:[%s13911_s23 + $0x14e0] sm:$0xf0] }
 0x1cf   : > { %v13201_v38 = vld [vmem:[%s13911_s23 + $0x16c4] sm:$0xf]  ;;  %v11036_v47 = vor.u32 %v13137_v33, %v11033_v35  ;;  %6832 = vmatpush.bf16.msra.mxu1 %v10780_v46 }
 0x1d0   : > { %v11289_v41 = vld [vmem:[%s13911_s23 + $0x16e0] sm:$0xf0] }
 0x1d1   : > { %v13001_v48 = vld [vmem:[%s13911_s23 + $0x1084] sm:$0xf]  ;;  %v11292_v53 = vor.u32 %v13201_v38, %v11289_v41  ;;  %6845 = vmatpush.bf16.msra.mxu2 %v11036_v47  ;;  %v6605_v41 = vpop.f32.mrf.mxu3 }
 0x1d2   : > { %v10489_v50 = vld [vmem:[%s13911_s23 + $0x10a0] sm:$0xf0] }
 0x1d3   : > { %v13065_v51 = vld [vmem:[%s13911_s23 + $0x1284] sm:$0xf]  ;;  %v10492_v61 = vor.u32 %v13001_v48, %v10489_v50  ;;  %6858 = vmatpush.bf16.msra.mxu3 %v11292_v53 }
 0x1d4   : > { %v10745_v55 = vld [vmem:[%s13911_s23 + $0x12a0] sm:$0xf0] }
 0x1d5   : > { %v13129_v56 = vld [vmem:[%s13911_s23 + $0x1484] sm:$0xf]  ;;  %v10748_v63 = vor.u32 %v13065_v51, %v10745_v55  ;;  %6820 = vmatpush.bf16.msra.mxu0 %v10492_v61 }
 0x1d6   : > { %v11001_v57 = vld [vmem:[%s13911_s23 + $0x14a0] sm:$0xf0] }
 0x1d7   : > { %v13193_v59 = vld [vmem:[%s13911_s23 + $0x1684] sm:$0xf]  ;;  %v11004_v0 = vor.u32 %v13129_v56, %v11001_v57  ;;  %6833 = vmatpush.bf16.msra.mxu1 %v10748_v63 }
 0x1d8   : > { %v11257_v60 = vld [vmem:[%s13911_s23 + $0x16a0] sm:$0xf0] }
 0x1d9   : > { %v12993_v1 = vld [vmem:[%s13911_s23 + $0x1044] sm:$0xf]  ;;  %v11260_v6 = vor.u32 %v13193_v59, %v11257_v60  ;;  %6846 = vmatpush.bf16.msra.mxu2 %v11004_v0 }
 0x1da   : > { %v10457_v2 = vld [vmem:[%s13911_s23 + $0x1060] sm:$0xf0] }
 0x1db   : > { %v13057_v3 = vld [vmem:[%s13911_s23 + $0x1244] sm:$0xf]  ;;  %v10460_v13 = vor.u32 %v12993_v1, %v10457_v2  ;;  %6859 = vmatpush.bf16.msra.mxu3 %v11260_v6 }
 0x1dc   : > { %v10713_v8 = vld [vmem:[%s13911_s23 + $0x1260] sm:$0xf0] }
 0x1dd   : > { %v13121_v9 = vld [vmem:[%s13911_s23 + $0x1444] sm:$0xf]  ;;  %v10716_v17 = vor.u32 %v13057_v3, %v10713_v8  ;;  %6821 = vmatpush.bf16.msra.mxu0 %v10460_v13 }
 0x1de   : > { %v10969_v10 = vld [vmem:[%s13911_s23 + $0x1460] sm:$0xf0] }
 0x1df   : > { %v13185_v11 = vld [vmem:[%s13911_s23 + $0x1644] sm:$0xf]  ;;  %v10972_v18 = vor.u32 %v13121_v9, %v10969_v10  ;;  %6834 = vmatpush.bf16.msra.mxu1 %v10716_v17 }
 0x1e0   : > { %v11225_v12 = vld [vmem:[%s13911_s23 + $0x1660] sm:$0xf0] }
 0x1e1   : > { %v12985_v14 = vld [vmem:[%s13911_s23 + $0x1004] sm:$0xf]  ;;  %v11228_v28 = vor.u32 %v13185_v11, %v11225_v12  ;;  %6847 = vmatpush.bf16.msra.mxu2 %v10972_v18  ;;  %v6526_v12 = vadd.f32 %v14376_v40, %v14374_v37 }
 0x1e2   : > { %v10425_v15 = vld [vmem:[%s13911_s23 + $0x1020] sm:$0xf0] }
 0x1e3   : > { %v13049_v19 = vld [vmem:[%s13911_s23 + $0x1204] sm:$0xf]  ;;  %v10428_v48 = vor.u32 %v12985_v14, %v10425_v15  ;;  %6860 = vmatpush.bf16.msra.mxu3 %v11228_v28 }
 0x1e4   : > { %v10681_v20 = vld [vmem:[%s13911_s23 + $0x1220] sm:$0xf0] }
 0x1e5   : > { %v13113_v23 = vld [vmem:[%s13911_s23 + $0x1404] sm:$0xf]  ;;  %v10684_v55 = vor.u32 %v13049_v19, %v10681_v20  ;;  %6822 = vmatpush.bf16.msra.mxu0 %v10428_v48 }
 0x1e6   : > { %v10937_v33 = vld [vmem:[%s13911_s23 + $0x1420] sm:$0xf0] }
 0x1e7   : > { %v13177_v35 = vld [vmem:[%s13911_s23 + $0x1604] sm:$0xf]  ;;  %v10940_v56 = vor.u32 %v13113_v23, %v10937_v33  ;;  %6835 = vmatpush.bf16.msra.mxu1 %v10684_v55  ;;  %v6539_v33 = vadd.f32 %v14381_v49, %v6526_v12 }
 0x1e8   : > { %v11193_v38 = vld [vmem:[%s13911_s23 + $0x1620] sm:$0xf0]  ;;  %6823 = vmatmul.bf16.vlgmr.msra.gmra.mxu0 %v14179_v26 }
 0x1e9   : > { %v13297_v44 = vld [vmem:[%s13911_s23 + $0x19c4] sm:$0xf]  ;;  %v11196_v60 = vor.u32 %v13177_v35, %v11193_v38  ;;  %6848 = vmatpush.bf16.msra.mxu2 %v10940_v56 }
 0x1ea   : > { %v11673_v46 = vld [vmem:[%s13911_s23 + $0x19e0] sm:$0xf0]  ;;  %6836 = vmatmul.bf16.vlgmr.msra.gmra.mxu1 %v14186_v31 }
 0x1eb   : > { %v13361_v47 = vld [vmem:[%s13911_s23 + $0x1bc4] sm:$0xf]  ;;  %v11676_v61 = vor.u32 %v13297_v44, %v11673_v46  ;;  %6861 = vmatpush.bf16.msra.mxu3 %v11196_v60 }
 0x1ec   : > { %v11929_v50 = vld [vmem:[%s13911_s23 + $0x1be0] sm:$0xf0]  ;;  %6849 = vmatmul.bf16.vlgmr.msra.gmra.mxu2 %v14184_v30 }
 0x1ed   : > { %v13425_v51 = vld [vmem:[%s13911_s23 + $0x1dc4] sm:$0xf]  ;;  %v11932_v62 = vor.u32 %v13361_v47, %v11929_v50  ;;  %6867 = vmatpush.bf16.msrb.mxu0 %v11676_v61 }
 0x1ee   : > { %v12185_v53 = vld [vmem:[%s13911_s23 + $0x1de0] sm:$0xf0]  ;;  %6862 = vmatmul.bf16.vlgmr.msra.gmra.mxu3 %v14190_v34 }
 0x1ef   : > { %v13489_v57 = vld [vmem:[%s13911_s23 + $0x1fc4] sm:$0xf]  ;;  %v12188_v63 = vor.u32 %v13425_v51, %v12185_v53  ;;  %6880 = vmatpush.bf16.msrb.mxu1 %v11932_v62  ;;  %v14511_v53 = vpop.f32.mrf.mxu0 }
 0x1f0   : > { %v12441_v59 = vld [vmem:[%s13911_s23 + $0x1fe0] sm:$0xf0] }
 0x1f1   : > { %v13289_v0 = vld [vmem:[%s13911_s23 + $0x1984] sm:$0xf]  ;;  %v12444_v3 = vor.u32 %v13489_v57, %v12441_v59  ;;  %6893 = vmatpush.bf16.msrb.mxu2 %v12188_v63  ;;  %v14515_v57 = vpop.f32.mrf.mxu1  ;;  %v6552_v59 = vadd.f32 %v14386_v54, %v6539_v33 }
 0x1f2   : > { %v11641_v1 = vld [vmem:[%s13911_s23 + $0x19a0] sm:$0xf0] }
 0x1f3   : > { %v13353_v2 = vld [vmem:[%s13911_s23 + $0x1b84] sm:$0xf]  ;;  %v11644_v11 = vor.u32 %v13289_v0, %v11641_v1  ;;  %6906 = vmatpush.bf16.msrb.mxu3 %v12444_v3 }
 0x1f4   : > { %v11897_v4 = vld [vmem:[%s13911_s23 + $0x1ba0] sm:$0xf0] }
 0x1f5   : > { %v13417_v6 = vld [vmem:[%s13911_s23 + $0x1d84] sm:$0xf]  ;;  %v11900_v13 = vor.u32 %v13353_v2, %v11897_v4  ;;  %6868 = vmatpush.bf16.msrb.mxu0 %v11644_v11 }
 0x1f6   : > { %v12153_v8 = vld [vmem:[%s13911_s23 + $0x1da0] sm:$0xf0] }
 0x1f7   : > { %v13481_v9 = vld [vmem:[%s13911_s23 + $0x1f84] sm:$0xf]  ;;  %v12156_v14 = vor.u32 %v13417_v6, %v12153_v8  ;;  %6881 = vmatpush.bf16.msrb.mxu1 %v11900_v13 }
 0x1f8   : > { %v12409_v10 = vld [vmem:[%s13911_s23 + $0x1fa0] sm:$0xf0] }
 0x1f9   : > { %v13281_v15 = vld [vmem:[%s13911_s23 + $0x1944] sm:$0xf]  ;;  %v12412_v19 = vor.u32 %v13481_v9, %v12409_v10  ;;  %6894 = vmatpush.bf16.msrb.mxu2 %v12156_v14  ;;  %v6565_v9 = vadd.f32 %v14434_v16, %v6552_v59 }
 0x1fa   : > { %v11609_v17 = vld [vmem:[%s13911_s23 + $0x1960] sm:$0xf0] }
 0x1fb   : > { %v13345_v18 = vld [vmem:[%s13911_s23 + $0x1b44] sm:$0xf]  ;;  %v11612_v28 = vor.u32 %v13281_v15, %v11609_v17  ;;  %6907 = vmatpush.bf16.msrb.mxu3 %v12412_v19  ;;  %v14530_v17 = vpop.f32.mrf.mxu2  ;;  %v6578_v33 = vadd.f32 %v14439_v25, %v6565_v9  ;;  %v8863_v9 = vld [vmem:[%s13911_s23 + $0x3c8] sm:$0xf] }
 0x1fc   : > { %v11865_v20 = vld [vmem:[%s13911_s23 + $0x1b60] sm:$0xf0] }
 0x1fd   : > { %v13409_v23 = vld [vmem:[%s13911_s23 + $0x1d44] sm:$0xf]  ;;  %v11868_v35 = vor.u32 %v13345_v18, %v11865_v20  ;;  %6869 = vmatpush.bf16.msrb.mxu0 %v11612_v28  ;;  %v6631_v28 = vpop.f32.mrf.mxu1 }
 0x1fe   : > { %v12121_v27 = vld [vmem:[%s13911_s23 + $0x1d60] sm:$0xf0] }
 0x1ff   : > { %v13473_v37 = vld [vmem:[%s13911_s23 + $0x1f44] sm:$0xf]  ;;  %v12124_v38 = vor.u32 %v13409_v23, %v12121_v27  ;;  %6882 = vmatpush.bf16.msrb.mxu1 %v11868_v35  ;;  %v14535_v23 = vpop.f32.mrf.mxu3 }
 0x200   : > { %v12377_v40 = vld [vmem:[%s13911_s23 + $0x1f60] sm:$0xf0] }
 0x201   : > { %v13273_v41 = vld [vmem:[%s13911_s23 + $0x1904] sm:$0xf]  ;;  %v12380_v47 = vor.u32 %v13473_v37, %v12377_v40  ;;  %6895 = vmatpush.bf16.msrb.mxu2 %v12124_v38  ;;  %v6618_v37 = vpop.f32.mrf.mxu0 }
 0x202   : > { %v11577_v44 = vld [vmem:[%s13911_s23 + $0x1920] sm:$0xf0] }
 0x203   : > { %v13337_v46 = vld [vmem:[%s13911_s23 + $0x1b04] sm:$0xf]  ;;  %v11580_v56 = vor.u32 %v13273_v41, %v11577_v44  ;;  %6908 = vmatpush.bf16.msrb.mxu3 %v12380_v47 }
 0x204   : > { %v11833_v48 = vld [vmem:[%s13911_s23 + $0x1b20] sm:$0xf0] }
 0x205   : > { %v13401_v50 = vld [vmem:[%s13911_s23 + $0x1d04] sm:$0xf]  ;;  %v11836_v60 = vor.u32 %v13337_v46, %v11833_v48  ;;  %6870 = vmatpush.bf16.msrb.mxu0 %v11580_v56 }
 0x206   : > { %v12089_v51 = vld [vmem:[%s13911_s23 + $0x1d20] sm:$0xf0] }
 0x207   : > { %v13465_v55 = vld [vmem:[%s13911_s23 + $0x1f04] sm:$0xf]  ;;  %v12092_v61 = vor.u32 %v13401_v50, %v12089_v51  ;;  %6883 = vmatpush.bf16.msrb.mxu1 %v11836_v60  ;;  %v6591_v60 = vadd.f32 %v14449_v52, %v6578_v33  ;;  %v8607_v52 = vld [vmem:[%s13911_s23 + $0x1c8] sm:$0xf] }
 0x208   : > { %v12345_v49 = vld [vmem:[%s13911_s23 + $0x1f20] sm:$0xf0] }
 0x209   : > { %v13265_v62 = vld [vmem:[%s13911_s23 + $0x18c4] sm:$0xf]  ;;  %v12348_v1 = vor.u32 %v13465_v55, %v12345_v49  ;;  %6896 = vmatpush.bf16.msrb.mxu2 %v12092_v61 }
 0x20a   : > { %v11545_v63 = vld [vmem:[%s13911_s23 + $0x18e0] sm:$0xf0] }
 0x20b   : > { %v13329_v0 = vld [vmem:[%s13911_s23 + $0x1ac4] sm:$0xf]  ;;  %v11548_v54 = vor.u32 %v13265_v62, %v11545_v63  ;;  %6909 = vmatpush.bf16.msrb.mxu3 %v12348_v1 }
 0x20c   : > { %v11801_v2 = vld [vmem:[%s13911_s23 + $0x1ae0] sm:$0xf0] }
 0x20d   : > { %v13393_v3 = vld [vmem:[%s13911_s23 + $0x1cc4] sm:$0xf]  ;;  %v11804_v10 = vor.u32 %v13329_v0, %v11801_v2  ;;  %6871 = vmatpush.bf16.msrb.mxu0 %v11548_v54  ;;  %v12534_v54 = vld [vmem:[%s13911_s23 + $0x1e4] sm:$0xf0] }
 0x20e   : > { %v12057_v4 = vld [vmem:[%s13911_s23 + $0x1ce0] sm:$0xf0]  ;;  %v8608_v37 = vor.u32 %v12534_v54, %v8607_v52  ;;  %v12574_v54 = vld [vmem:[%s13911_s23 + $0x324] sm:$0xf0] }
 0x20f   : > { %v13457_v6 = vld [vmem:[%s13911_s23 + $0x1ec4] sm:$0xf]  ;;  %v12060_v11 = vor.u32 %v13393_v3, %v12057_v4  ;;  %6884 = vmatpush.bf16.msrb.mxu1 %v11804_v10  ;;  %v6657_v10 = vpop.f32.mrf.mxu3 }
 0x210   : > { %v12313_v8 = vld [vmem:[%s13911_s23 + $0x1ee0] sm:$0xf0]  ;;  %v12638_v10 = vld [vmem:[%s13911_s23 + $0x524] sm:$0xf0] }
 0x211   : > { %v13257_v12 = vld [vmem:[%s13911_s23 + $0x1884] sm:$0xf]  ;;  %v12316_v15 = vor.u32 %v13457_v6, %v12313_v8  ;;  %6897 = vmatpush.bf16.msrb.mxu2 %v12060_v11  ;;  %v6644_v8 = vpop.f32.mrf.mxu2 }
 0x212   : > { %v11513_v13 = vld [vmem:[%s13911_s23 + $0x18a0] sm:$0xf0]  ;;  %v8767_v8 = vld [vmem:[%s13911_s23 + $0x308] sm:$0xf] }
 0x213   : > { %v13321_v14 = vld [vmem:[%s13911_s23 + $0x1a84] sm:$0xf]  ;;  %v11516_v40 = vor.u32 %v13257_v12, %v11513_v13  ;;  %6910 = vmatpush.bf16.msrb.mxu3 %v12316_v15  ;;  %v12598_v12 = vld [vmem:[%s13911_s23 + $0x3e4] sm:$0xf0]  ;;  %v6604_v15 = vadd.f32 %v14454_v58, %v6591_v60 }
 0x214   : > { %v11769_v18 = vld [vmem:[%s13911_s23 + $0x1aa0] sm:$0xf0]  ;;  %v9119_v13 = vld [vmem:[%s13911_s23 + $0x5c8] sm:$0xf]  ;;  %v8864_v28 = vor.u32 %v12598_v12, %v8863_v9  ;;  %v6668_v12 = vpop.f32.mrf.mxu0 }
 0x215   : > { %v13385_v19 = vld [vmem:[%s13911_s23 + $0x1c84] sm:$0xf]  ;;  %v11772_v35 = vor.u32 %v13321_v14, %v11769_v18  ;;  %6872 = vmatpush.bf16.msrb.mxu0 %v11516_v40  ;;  %v12662_v14 = vld [vmem:[%s13911_s23 + $0x5e4] sm:$0xf0]  ;;  %v6617_v40 = vadd.f32 %v14511_v53, %v6604_v15 }
 0x216   : > { %v12025_v20 = vld [vmem:[%s13911_s23 + $0x1ca0] sm:$0xf0]  ;;  %v9120_v33 = vor.u32 %v12662_v14, %v9119_v13  ;;  %v12526_v58 = vld [vmem:[%s13911_s23 + $0x1a4] sm:$0xf0] }
 0x217   : > { %v13449_v16 = vld [vmem:[%s13911_s23 + $0x1e84] sm:$0xf]  ;;  %v12028_v38 = vor.u32 %v13385_v19, %v12025_v20  ;;  %6885 = vmatpush.bf16.msrb.mxu1 %v11772_v35  ;;  %v9375_v20 = vld [vmem:[%s13911_s23 + $0x7c8] sm:$0xf] }
 0x218   : > { %v12281_v27 = vld [vmem:[%s13911_s23 + $0x1ea0] sm:$0xf0]  ;;  %v8575_v35 = vld [vmem:[%s13911_s23 + $0x188] sm:$0xf] }
 0x219   : > { %v13249_v41 = vld [vmem:[%s13911_s23 + $0x1844] sm:$0xf]  ;;  %v12284_v47 = vor.u32 %v13449_v16, %v12281_v27  ;;  %6898 = vmatpush.bf16.msrb.mxu2 %v12028_v38  ;;  %v12726_v16 = vld [vmem:[%s13911_s23 + $0x7e4] sm:$0xf0]  ;;  %v8576_v53 = vor.u32 %v12526_v58, %v8575_v35 }
 0x21a   : > { %v11481_v44 = vld [vmem:[%s13911_s23 + $0x1860] sm:$0xf0]  ;;  %v8831_v38 = vld [vmem:[%s13911_s23 + $0x388] sm:$0xf] }
 0x21b   : > { %v13313_v46 = vld [vmem:[%s13911_s23 + $0x1a44] sm:$0xf]  ;;  %v11484_v49 = vor.u32 %v13249_v41, %v11481_v44  ;;  %6911 = vmatpush.bf16.msrb.mxu3 %v12284_v47  ;;  %v9376_v41 = vor.u32 %v12726_v16, %v9375_v20  ;;  %v12590_v44 = vld [vmem:[%s13911_s23 + $0x3a4] sm:$0xf0]  ;;  %v8768_v20 = vor.u32 %v12574_v54, %v8767_v8 }
 0x21c   : > { %v11737_v48 = vld [vmem:[%s13911_s23 + $0x1a60] sm:$0xf0]  ;;  %v12654_v47 = vld [vmem:[%s13911_s23 + $0x5a4] sm:$0xf0] }
 0x21d   : > { %v13377_v50 = vld [vmem:[%s13911_s23 + $0x1c44] sm:$0xf]  ;;  %v11740_v61 = vor.u32 %v13313_v46, %v11737_v48  ;;  %6873 = vmatpush.bf16.msrb.mxu0 %v11484_v49  ;;  %v9087_v46 = vld [vmem:[%s13911_s23 + $0x588] sm:$0xf] }
 0x21e   : > { %v11993_v51 = vld [vmem:[%s13911_s23 + $0x1c60] sm:$0xf0]  ;;  %v9343_v48 = vld [vmem:[%s13911_s23 + $0x788] sm:$0xf] }
 0x21f   : > { %v13441_v55 = vld [vmem:[%s13911_s23 + $0x1e44] sm:$0xf]  ;;  %v11996_v62 = vor.u32 %v13377_v50, %v11993_v51  ;;  %6886 = vmatpush.bf16.msrb.mxu1 %v11740_v61  ;;  %v12718_v50 = vld [vmem:[%s13911_s23 + $0x7a4] sm:$0xf0]  ;;  %v6630_v51 = vadd.f32 %v14515_v57, %v6617_v40 }
 0x220   : > { %v12249_v25 = vld [vmem:[%s13911_s23 + $0x1e60] sm:$0xf0]  ;;  %v8543_v49 = vld [vmem:[%s13911_s23 + $0x148] sm:$0xf]  ;;  %v9344_v60 = vor.u32 %v12718_v50, %v9343_v48 }
 0x221   : > { %v13241_v56 = vld [vmem:[%s13911_s23 + $0x1804] sm:$0xf]  ;;  %v12252_v2 = vor.u32 %v13441_v55, %v12249_v25  ;;  %6899 = vmatpush.bf16.msrb.mxu2 %v11996_v62  ;;  %v8832_v55 = vor.u32 %v12590_v44, %v8831_v38  ;;  %v9088_v25 = vor.u32 %v12654_v47, %v9087_v46  ;;  %v12582_v61 = vld [vmem:[%s13911_s23 + $0x364] sm:$0xf0]  ;;  %v6643_v57 = vadd.f32 %v14530_v17, %v6630_v51 }
 0x222   : > { %v11449_v59 = vld [vmem:[%s13911_s23 + $0x1820] sm:$0xf0]  ;;  %v9055_v62 = vld [vmem:[%s13911_s23 + $0x548] sm:$0xf] }
 0x223   : > { %v13305_v63 = vld [vmem:[%s13911_s23 + $0x1a04] sm:$0xf]  ;;  %v11452_v11 = vor.u32 %v13241_v56, %v11449_v59  ;;  %6912 = vmatpush.bf16.msrb.mxu3 %v12252_v2  ;;  %v12518_v56 = vld [vmem:[%s13911_s23 + $0x164] sm:$0xf0] }
 0x224   : > { %v11705_v0 = vld [vmem:[%s13911_s23 + $0x1a20] sm:$0xf0]  ;;  %v8799_v59 = vld [vmem:[%s13911_s23 + $0x348] sm:$0xf]  ;;  %v8544_v2 = vor.u32 %v12518_v56, %v8543_v49 }
 0x225   : > { %v13369_v1 = vld [vmem:[%s13911_s23 + $0x1c04] sm:$0xf]  ;;  %v11708_v18 = vor.u32 %v13305_v63, %v11705_v0  ;;  %6874 = vmatpush.bf16.msrb.mxu0 %v11452_v11  ;;  %v12646_v63 = vld [vmem:[%s13911_s23 + $0x564] sm:$0xf0]  ;;  %v6656_v11 = vadd.f32 %v14535_v23, %v6643_v57 }
 0x226   : > { %v11961_v3 = vld [vmem:[%s13911_s23 + $0x1c20] sm:$0xf0]  ;;  %v9311_v0 = vld [vmem:[%s13911_s23 + $0x748] sm:$0xf] }
 0x227   : > { %v13433_v4 = vld [vmem:[%s13911_s23 + $0x1e04] sm:$0xf]  ;;  %v11964_v19 = vor.u32 %v13369_v1, %v11961_v3  ;;  %6887 = vmatpush.bf16.msrb.mxu1 %v11708_v18  ;;  %v12710_v1 = vld [vmem:[%s13911_s23 + $0x764] sm:$0xf0]  ;;  %v8800_v3 = vor.u32 %v12582_v61, %v8799_v59  ;;  %v6681_v18 = vpop.f32.mrf.mxu1 }
 0x228   : > { %v12217_v6 = vld [vmem:[%s13911_s23 + $0x1e20] sm:$0xf0]  ;;  %6875 = vmatmul.bf16.vlgmr.msrb.gmra.mxu0 %v14257_v24  ;;  %v8511_v17 = vld [vmem:[%s13911_s23 + $0x108] sm:$0xf]  ;;  %v9312_v52 = vor.u32 %v12710_v1, %v9311_v0 }
 0x229   : > { %v12220_v27 = vor.u32 %v13433_v4, %v12217_v6  ;;  %6900 = vmatpush.bf16.msrb.mxu2 %v11964_v19  ;;  %6919 = vmatpush.bf16.msra.mxu0 %v8608_v37  ;;  %v9056_v4 = vor.u32 %v12646_v63, %v9055_v62  ;;  %v12510_v6 = vld [vmem:[%s13911_s23 + $0x124] sm:$0xf0]  ;;  %v6669_v19 = vadd.f32 %v6668_v12, %v6656_v11  ;;  %v6670_v63 = vpop.f32.mrf.mxu0  ;;  %v287_v57 = vld [vmem:[%s13935_s11] sm:$0xff] }
 0x22a   : > { %6888 = vmatmul.bf16.vlgmr.msrb.gmra.mxu1 %v14264_v32  ;;  %v9023_v9 = vld [vmem:[%s13911_s23 + $0x508] sm:$0xf]  ;;  %v8512_v15 = vor.u32 %v12510_v6, %v8511_v17 }
 0x22b   : > { %6913 = vmatpush.bf16.msrb.mxu3 %v12220_v27  ;;  %6932 = vmatpush.bf16.msra.mxu1 %v8864_v28  ;;  %v9279_v13 = vld [vmem:[%s13911_s23 + $0x708] sm:$0xf]  ;;  %v9024_v16 = vor.u32 %v12638_v10, %v9023_v9  ;;  %v6682_v44 = vadd.f32 %v6681_v18, %v6669_v19 }
 0x22c   : > { %6901 = vmatmul.bf16.vlgmr.msrb.gmra.mxu2 %v14262_v29  ;;  %v12702_v14 = vld [vmem:[%s13911_s23 + $0x724] sm:$0xf0] }
 0x22d   : > { %6945 = vmatpush.bf16.msra.mxu2 %v9120_v33  ;;  %6920 = vmatpush.bf16.msra.mxu0 %v8576_v53  ;;  %v8479_v27 = vld [vmem:[%s13911_s23 + $0xc8] sm:$0xf]  ;;  %v9280_v40 = vor.u32 %v12702_v14, %v9279_v13 }
 0x22e   : > { %6914 = vmatmul.bf16.vlgmr.msrb.gmra.mxu3 %v14268_v36  ;;  %v12502_v37 = vld [vmem:[%s13911_s23 + $0xe4] sm:$0xf0] }
 0x22f   : > { %6958 = vmatpush.bf16.msra.mxu3 %v9376_v41  ;;  %6933 = vmatpush.bf16.msra.mxu1 %v8832_v55  ;;  %v8735_v23 = vld [vmem:[%s13911_s23 + $0x2c8] sm:$0xf]  ;;  %v8480_v41 = vor.u32 %v12502_v37, %v8479_v27  ;;  %v6694_v55 = vpop.f32.mrf.mxu2  ;;  %v6683_v1 = vpop.f32.mrf.mxu1 }
 0x230   : > { %v12566_v28 = vld [vmem:[%s13911_s23 + $0x2e4] sm:$0xf0]  ;;  %v6695_v59 = vadd.f32 %v6694_v55, %v6682_v44 }
 0x231   : > { %6946 = vmatpush.bf16.msra.mxu2 %v9088_v25  ;;  %6921 = vmatpush.bf16.msra.mxu0 %v8544_v2  ;;  %v8991_v33 = vld [vmem:[%s13911_s23 + $0x4c8] sm:$0xf]  ;;  %v8736_v46 = vor.u32 %v12566_v28, %v8735_v23 }
 0x232   : > { %v12630_v35 = vld [vmem:[%s13911_s23 + $0x4e4] sm:$0xf0] }
 0x233   : > { %6959 = vmatpush.bf16.msra.mxu3 %v9344_v60  ;;  %6934 = vmatpush.bf16.msra.mxu1 %v8800_v3  ;;  %v9247_v58 = vld [vmem:[%s13911_s23 + $0x6c8] sm:$0xf]  ;;  %v8992_v47 = vor.u32 %v12630_v35, %v8991_v33  ;;  %v6707_v60 = vpop.f32.mrf.mxu3 }
 0x234   : > { %v12694_v38 = vld [vmem:[%s13911_s23 + $0x6e4] sm:$0xf0]  ;;  %v6708_v2 = vadd.f32 %v6707_v60, %v6695_v59 }
 0x235   : > { %6947 = vmatpush.bf16.msra.mxu2 %v9056_v4  ;;  %6922 = vmatpush.bf16.msra.mxu0 %v8512_v15  ;;  %v8447_v48 = vld [vmem:[%s13911_s23 + $0x88] sm:$0xf]  ;;  %v9248_v51 = vor.u32 %v12694_v38, %v9247_v58 }
 0x236   : > { %v12494_v50 = vld [vmem:[%s13911_s23 + $0xa4] sm:$0xf0]  ;;  %v8167_v11 = vadd.f32 %v6708_v2, %v287_v57 }
 0x237   : > { %6960 = vmatpush.bf16.msra.mxu3 %v9312_v52  ;;  %6935 = vmatpush.bf16.msra.mxu1 %v8768_v20  ;;  %v8703_v53 = vld [vmem:[%s13911_s23 + $0x288] sm:$0xf]  ;;  %v8448_v0 = vor.u32 %v12494_v50, %v8447_v48  ;;  %v6696_v35 = vpop.f32.mrf.mxu2 }
 0x238   : > { %v12558_v25 = vld [vmem:[%s13911_s23 + $0x2a4] sm:$0xf0]  ;;  %8175 = vst [vmem:[%s13935_s11] sm:$0xff] %v8167_v11 }
 0x239   : > { %6948 = vmatpush.bf16.msra.mxu2 %v9024_v16  ;;  %v8959_v49 = vld [vmem:[%s13911_s23 + $0x488] sm:$0xf]  ;;  %6923 = vmatpush.bf16.msra.mxu0 %v8480_v41  ;;  %v8704_v3 = vor.u32 %v12558_v25, %v8703_v53 }
 0x23a   : > { %v12622_v56 = vld [vmem:[%s13911_s23 + $0x4a4] sm:$0xf0] }
 0x23b   : > { %6961 = vmatpush.bf16.msra.mxu3 %v9280_v40  ;;  %v9215_v61 = vld [vmem:[%s13911_s23 + $0x688] sm:$0xf]  ;;  %6936 = vmatpush.bf16.msra.mxu1 %v8736_v46  ;;  %v8960_v4 = vor.u32 %v12622_v56, %v8959_v49  ;;  %v6709_v44 = vpop.f32.mrf.mxu3 }
 0x23c   : > { %v12686_v62 = vld [vmem:[%s13911_s23 + $0x6a4] sm:$0xf0] }
 0x23d   : > { %6949 = vmatpush.bf16.msra.mxu2 %v8992_v47  ;;  %v8415_v17 = vld [vmem:[%s13911_s23 + $0x48] sm:$0xf]  ;;  %v9216_v52 = vor.u32 %v12686_v62, %v9215_v61  ;;  %6924 = vmatpush.bf16.msra.mxu0 %v8448_v0 }
 0x23e   : > { %v12486_v6 = vld [vmem:[%s13911_s23 + $0x64] sm:$0xf0] }
 0x23f   : > { %v8671_v8 = vld [vmem:[%s13911_s23 + $0x248] sm:$0xf]  ;;  %6962 = vmatpush.bf16.msra.mxu3 %v9248_v51  ;;  %v8416_v14 = vor.u32 %v12486_v6, %v8415_v17  ;;  %6937 = vmatpush.bf16.msra.mxu1 %v8704_v3 }
 0x240   : > { %v12550_v54 = vld [vmem:[%s13911_s23 + $0x264] sm:$0xf0] }
 0x241   : > { %v8927_v9 = vld [vmem:[%s13911_s23 + $0x448] sm:$0xf]  ;;  %6950 = vmatpush.bf16.msra.mxu2 %v8960_v4  ;;  %v8672_v19 = vor.u32 %v12550_v54, %v8671_v8  ;;  %6925 = vmatpush.bf16.msra.mxu0 %v8416_v14 }
 0x242   : > { %v12614_v10 = vld [vmem:[%s13911_s23 + $0x464] sm:$0xf0] }
 0x243   : > { %v9183_v12 = vld [vmem:[%s13911_s23 + $0x648] sm:$0xf]  ;;  %v8928_v20 = vor.u32 %v12614_v10, %v8927_v9  ;;  %6963 = vmatpush.bf16.msra.mxu3 %v9216_v52  ;;  %6938 = vmatpush.bf16.msra.mxu1 %v8672_v19 }
 0x244   : > { %v12678_v13 = vld [vmem:[%s13911_s23 + $0x664] sm:$0xf0] }
 0x245   : > { %v8383_v15 = vld [vmem:[%s13911_s23 + $0x8] sm:$0xf]  ;;  %v9184_v23 = vor.u32 %v12678_v13, %v9183_v12  ;;  %6951 = vmatpush.bf16.msra.mxu2 %v8928_v20 }
 0x246   : > { %v12478_v18 = vld [vmem:[%s13911_s23 + $0x24] sm:$0xf0] }
 0x247   : > { %v8639_v16 = vld [vmem:[%s13911_s23 + $0x208] sm:$0xf]  ;;  %v8384_v46 = vor.u32 %v12478_v18, %v8383_v15  ;;  %6964 = vmatpush.bf16.msra.mxu3 %v9184_v23 }
 0x248   : > { %v12542_v27 = vld [vmem:[%s13911_s23 + $0x224] sm:$0xf0] }
 0x249   : > { %v8895_v37 = vld [vmem:[%s13911_s23 + $0x408] sm:$0xf]  ;;  %v8640_v53 = vor.u32 %v12542_v27, %v8639_v16  ;;  %6926 = vmatpush.bf16.msra.mxu0 %v8384_v46 }
 0x24a   : > { %v12606_v40 = vld [vmem:[%s13911_s23 + $0x424] sm:$0xf0] }
 0x24b   : > { %v9151_v28 = vld [vmem:[%s13911_s23 + $0x608] sm:$0xf]  ;;  %v8896_v51 = vor.u32 %v12606_v40, %v8895_v37  ;;  %6939 = vmatpush.bf16.msra.mxu1 %v8640_v53  ;;  %v6733_v53 = vpop.f32.mrf.mxu1 }
 0x24c   : > { %v12670_v33 = vld [vmem:[%s13911_s23 + $0x624] sm:$0xf0]  ;;  %6927 = vmatmul.bf16.vlgmr.msra.gmra.mxu0 %v14049_v21 }
 0x24d   : > { %v9631_v58 = vld [vmem:[%s13911_s23 + $0x9c8] sm:$0xf]  ;;  %v9152_v49 = vor.u32 %v12670_v33, %v9151_v28  ;;  %6952 = vmatpush.bf16.msra.mxu2 %v8896_v51 }
 0x24e   : > { %v12790_v38 = vld [vmem:[%s13911_s23 + $0x9e4] sm:$0xf0]  ;;  %6940 = vmatmul.bf16.vlgmr.msra.gmra.mxu1 %v14052_v22 }
 0x24f   : > { %v9887_v41 = vld [vmem:[%s13911_s23 + $0xbc8] sm:$0xf]  ;;  %v9632_v56 = vor.u32 %v12790_v38, %v9631_v58  ;;  %6965 = vmatpush.bf16.msra.mxu3 %v9152_v49 }
 0x250   : > { %v12854_v47 = vld [vmem:[%s13911_s23 + $0xbe4] sm:$0xf0]  ;;  %6953 = vmatmul.bf16.vlgmr.msra.gmra.mxu2 %v14035_v5 }
 0x251   : > { %v10143_v48 = vld [vmem:[%s13911_s23 + $0xdc8] sm:$0xf]  ;;  %v9888_v59 = vor.u32 %v12854_v47, %v9887_v41  ;;  %6971 = vmatpush.bf16.msrb.mxu0 %v9632_v56  ;;  %v6720_v41 = vpop.f32.mrf.mxu0 }
 0x252   : > { %v12918_v50 = vld [vmem:[%s13911_s23 + $0xde4] sm:$0xf0]  ;;  %6966 = vmatmul.bf16.vlgmr.msra.gmra.mxu3 %v14038_v7  ;;  %v6734_v56 = vadd.f32 %v6733_v53, %v6720_v41 }
 0x253   : > { %v10399_v55 = vld [vmem:[%s13911_s23 + $0xfc8] sm:$0xf]  ;;  %v10144_v60 = vor.u32 %v12918_v50, %v10143_v48  ;;  %6984 = vmatpush.bf16.msrb.mxu1 %v9888_v59 }
 0x254   : > { %v12982_v25 = vld [vmem:[%s13911_s23 + $0xfe4] sm:$0xf0] }
 0x255   : > { %v9599_v61 = vld [vmem:[%s13911_s23 + $0x988] sm:$0xf]  ;;  %v10400_v57 = vor.u32 %v12982_v25, %v10399_v55  ;;  %6997 = vmatpush.bf16.msrb.mxu2 %v10144_v60 }
 0x256   : > { %v12782_v62 = vld [vmem:[%s13911_s23 + $0x9a4] sm:$0xf0] }
 0x257   : > { %v9855_v63 = vld [vmem:[%s13911_s23 + $0xb88] sm:$0xf]  ;;  %v9600_v17 = vor.u32 %v12782_v62, %v9599_v61  ;;  %7010 = vmatpush.bf16.msrb.mxu3 %v10400_v57 }
 0x258   : > { %v12846_v0 = vld [vmem:[%s13911_s23 + $0xba4] sm:$0xf0] }
 0x259   : > { %v10111_v1 = vld [vmem:[%s13911_s23 + $0xd88] sm:$0xf]  ;;  %v9856_v6 = vor.u32 %v12846_v0, %v9855_v63  ;;  %6972 = vmatpush.bf16.msrb.mxu0 %v9600_v17 }
 0x25a   : > { %v12910_v2 = vld [vmem:[%s13911_s23 + $0xda4] sm:$0xf0] }
 0x25b   : > { %v10367_v3 = vld [vmem:[%s13911_s23 + $0xf88] sm:$0xf]  ;;  %v10112_v8 = vor.u32 %v12910_v2, %v10111_v1  ;;  %6985 = vmatpush.bf16.msrb.mxu1 %v9856_v6  ;;  %v6746_v2 = vpop.f32.mrf.mxu2 }
 0x25c   : > { %v12974_v4 = vld [vmem:[%s13911_s23 + $0xfa4] sm:$0xf0] }
 0x25d   : > { %v9567_v52 = vld [vmem:[%s13911_s23 + $0x948] sm:$0xf]  ;;  %v10368_v10 = vor.u32 %v12974_v4, %v10367_v3  ;;  %6998 = vmatpush.bf16.msrb.mxu2 %v10112_v8  ;;  %v6747_v8 = vadd.f32 %v6746_v2, %v6734_v56 }
 0x25e   : > { %v12774_v54 = vld [vmem:[%s13911_s23 + $0x964] sm:$0xf0] }
 0x25f   : > { %v9823_v9 = vld [vmem:[%s13911_s23 + $0xb48] sm:$0xf]  ;;  %v9568_v18 = vor.u32 %v12774_v54, %v9567_v52  ;;  %7011 = vmatpush.bf16.msrb.mxu3 %v10368_v10  ;;  %v6759_v52 = vpop.f32.mrf.mxu3 }
 0x260   : > { %v12838_v11 = vld [vmem:[%s13911_s23 + $0xb64] sm:$0xf0] }
 0x261   : > { %v10079_v12 = vld [vmem:[%s13911_s23 + $0xd48] sm:$0xf]  ;;  %v9824_v19 = vor.u32 %v12838_v11, %v9823_v9  ;;  %6973 = vmatpush.bf16.msrb.mxu0 %v9568_v18  ;;  %v14684_v11 = vadd.f32 %v6759_v52, %v6747_v8 }
 0x262   : > { %v12902_v13 = vld [vmem:[%s13911_s23 + $0xd64] sm:$0xf0] }
 0x263   : > { %v10335_v14 = vld [vmem:[%s13911_s23 + $0xf48] sm:$0xf]  ;;  %v10080_v20 = vor.u32 %v12902_v13, %v10079_v12  ;;  %6986 = vmatpush.bf16.msrb.mxu1 %v9824_v19  ;;  %v6722_v12 = vpop.f32.mrf.mxu0 }
 0x264   : > { %v12966_v15 = vld [vmem:[%s13911_s23 + $0xf64] sm:$0xf0] }
 0x265   : > { %v9535_v16 = vld [vmem:[%s13911_s23 + $0x908] sm:$0xf]  ;;  %v10336_v23 = vor.u32 %v12966_v15, %v10335_v14  ;;  %6999 = vmatpush.bf16.msrb.mxu2 %v10080_v20  ;;  %v6735_v20 = vpop.f32.mrf.mxu1 }
 0x266   : > { %v12766_v27 = vld [vmem:[%s13911_s23 + $0x924] sm:$0xf0] }
 0x267   : > { %v9791_v37 = vld [vmem:[%s13911_s23 + $0xb08] sm:$0xf]  ;;  %v9536_v38 = vor.u32 %v12766_v27, %v9535_v16  ;;  %7012 = vmatpush.bf16.msrb.mxu3 %v10336_v23 }
 0x268   : > { %v12830_v40 = vld [vmem:[%s13911_s23 + $0xb24] sm:$0xf0] }
 0x269   : > { %v10047_v28 = vld [vmem:[%s13911_s23 + $0xd08] sm:$0xf]  ;;  %v9792_v44 = vor.u32 %v12830_v40, %v9791_v37  ;;  %6974 = vmatpush.bf16.msrb.mxu0 %v9536_v38 }
 0x26a   : > { %v12894_v33 = vld [vmem:[%s13911_s23 + $0xd24] sm:$0xf0] }
 0x26b   : > { %v10303_v35 = vld [vmem:[%s13911_s23 + $0xf08] sm:$0xf]  ;;  %v10048_v46 = vor.u32 %v12894_v33, %v10047_v28  ;;  %6987 = vmatpush.bf16.msrb.mxu1 %v9792_v44 }
 0x26c   : > { %v12958_v58 = vld [vmem:[%s13911_s23 + $0xf24] sm:$0xf0] }
 0x26d   : > { %v9503_v47 = vld [vmem:[%s13911_s23 + $0x8c8] sm:$0xf]  ;;  %v10304_v51 = vor.u32 %v12958_v58, %v10303_v35  ;;  %7000 = vmatpush.bf16.msrb.mxu2 %v10048_v46 }
 0x26e   : > { %v12758_v48 = vld [vmem:[%s13911_s23 + $0x8e4] sm:$0xf0] }
 0x26f   : > { %v9759_v50 = vld [vmem:[%s13911_s23 + $0xac8] sm:$0xf]  ;;  %v9504_v61 = vor.u32 %v12758_v48, %v9503_v47  ;;  %7013 = vmatpush.bf16.msrb.mxu3 %v10304_v51  ;;  %v6748_v48 = vpop.f32.mrf.mxu2 }
 0x270   : > { %v12822_v55 = vld [vmem:[%s13911_s23 + $0xae4] sm:$0xf0] }
 0x271   : > { %v10015_v25 = vld [vmem:[%s13911_s23 + $0xcc8] sm:$0xf]  ;;  %v9760_v62 = vor.u32 %v12822_v55, %v9759_v50  ;;  %6975 = vmatpush.bf16.msrb.mxu0 %v9504_v61 }
 0x272   : > { %v12886_v49 = vld [vmem:[%s13911_s23 + $0xce4] sm:$0xf0] }
 0x273   : > { %v10271_v59 = vld [vmem:[%s13911_s23 + $0xec8] sm:$0xf]  ;;  %v10016_v63 = vor.u32 %v12886_v49, %v10015_v25  ;;  %6988 = vmatpush.bf16.msrb.mxu1 %v9760_v62  ;;  %v6761_v25 = vpop.f32.mrf.mxu3 }
 0x274   : > { %v12950_v60 = vld [vmem:[%s13911_s23 + $0xee4] sm:$0xf0] }
 0x275   : > { %v9471_v57 = vld [vmem:[%s13911_s23 + $0x888] sm:$0xf]  ;;  %v10272_v3 = vor.u32 %v12950_v60, %v10271_v59  ;;  %7001 = vmatpush.bf16.msrb.mxu2 %v10016_v63 }
 0x276   : > { %v12750_v0 = vld [vmem:[%s13911_s23 + $0x8a4] sm:$0xf0] }
 0x277   : > { %v9727_v1 = vld [vmem:[%s13911_s23 + $0xa88] sm:$0xf]  ;;  %v9472_v10 = vor.u32 %v12750_v0, %v9471_v57  ;;  %7014 = vmatpush.bf16.msrb.mxu3 %v10272_v3 }
 0x278   : > { %v12814_v4 = vld [vmem:[%s13911_s23 + $0xaa4] sm:$0xf0] }
 0x279   : > { %v9983_v17 = vld [vmem:[%s13911_s23 + $0xc88] sm:$0xf]  ;;  %v9728_v13 = vor.u32 %v12814_v4, %v9727_v1  ;;  %6976 = vmatpush.bf16.msrb.mxu0 %v9472_v10 }
 0x27a   : > { %v12878_v6 = vld [vmem:[%s13911_s23 + $0xca4] sm:$0xf0] }
 0x27b   : > { %v10239_v54 = vld [vmem:[%s13911_s23 + $0xe88] sm:$0xf]  ;;  %v9984_v14 = vor.u32 %v12878_v6, %v9983_v17  ;;  %6989 = vmatpush.bf16.msrb.mxu1 %v9728_v13 }
 0x27c   : > { %v12942_v9 = vld [vmem:[%s13911_s23 + $0xea4] sm:$0xf0] }
 0x27d   : > { %v9439_v15 = vld [vmem:[%s13911_s23 + $0x848] sm:$0xf]  ;;  %v10240_v16 = vor.u32 %v12942_v9, %v10239_v54  ;;  %7002 = vmatpush.bf16.msrb.mxu2 %v9984_v14 }
 0x27e   : > { %v12742_v18 = vld [vmem:[%s13911_s23 + $0x864] sm:$0xf0] }
 0x27f   : > { %v9695_v19 = vld [vmem:[%s13911_s23 + $0xa48] sm:$0xf]  ;;  %v9440_v33 = vor.u32 %v12742_v18, %v9439_v15  ;;  %7015 = vmatpush.bf16.msrb.mxu3 %v10240_v16 }
 0x280   : > { %v12806_v27 = vld [vmem:[%s13911_s23 + $0xa64] sm:$0xf0] }
 0x281   : > { %v9951_v37 = vld [vmem:[%s13911_s23 + $0xc48] sm:$0xf]  ;;  %v9696_v38 = vor.u32 %v12806_v27, %v9695_v19  ;;  %6977 = vmatpush.bf16.msrb.mxu0 %v9440_v33 }
 0x282   : > { %v12870_v23 = vld [vmem:[%s13911_s23 + $0xc64] sm:$0xf0] }
 0x283   : > { %v10207_v40 = vld [vmem:[%s13911_s23 + $0xe48] sm:$0xf]  ;;  %v9952_v41 = vor.u32 %v12870_v23, %v9951_v37  ;;  %6990 = vmatpush.bf16.msrb.mxu1 %v9696_v38 }
 0x284   : > { %v12934_v28 = vld [vmem:[%s13911_s23 + $0xe64] sm:$0xf0] }
 0x285   : > { %v9407_v35 = vld [vmem:[%s13911_s23 + $0x808] sm:$0xf]  ;;  %v10208_v50 = vor.u32 %v12934_v28, %v10207_v40  ;;  %7003 = vmatpush.bf16.msrb.mxu2 %v9952_v41 }
 0x286   : > { %v12734_v58 = vld [vmem:[%s13911_s23 + $0x824] sm:$0xf0] }
 0x287   : > { %v9663_v44 = vld [vmem:[%s13911_s23 + $0xa08] sm:$0xf]  ;;  %v9408_v60 = vor.u32 %v12734_v58, %v9407_v35  ;;  %7016 = vmatpush.bf16.msrb.mxu3 %v10208_v50 }
 0x288   : > { %v12798_v46 = vld [vmem:[%s13911_s23 + $0xa24] sm:$0xf0] }
 0x289   : > { %v9919_v47 = vld [vmem:[%s13911_s23 + $0xc08] sm:$0xf]  ;;  %v9664_v57 = vor.u32 %v12798_v46, %v9663_v44  ;;  %6978 = vmatpush.bf16.msrb.mxu0 %v9408_v60 }
 0x28a   : > { %v12862_v53 = vld [vmem:[%s13911_s23 + $0xc24] sm:$0xf0] }
 0x28b   : > { %v10175_v51 = vld [vmem:[%s13911_s23 + $0xe08] sm:$0xf]  ;;  %v9920_v0 = vor.u32 %v12862_v53, %v9919_v47  ;;  %6991 = vmatpush.bf16.msrb.mxu1 %v9664_v57 }
 0x28c   : > { %v12926_v55 = vld [vmem:[%s13911_s23 + $0xe24] sm:$0xf0]  ;;  %6979 = vmatmul.bf16.vlgmr.msrb.gmra.mxu0 %v14108_v42 }
 0x28d   : > { %v10655_v49 = vld [vmem:[%s13911_s23 + $0x11c8] sm:$0xf]  ;;  %v10176_v3 = vor.u32 %v12926_v55, %v10175_v51  ;;  %7004 = vmatpush.bf16.msrb.mxu2 %v9920_v0  ;;  %v14743_v0 = vpop.f32.mrf.mxu1 }
 0x28e   : > { %v13046_v56 = vld [vmem:[%s13911_s23 + $0x11e4] sm:$0xf0]  ;;  %6992 = vmatmul.bf16.vlgmr.msrb.gmra.mxu1 %v14112_v45 }
 0x28f   : > { %v10911_v59 = vld [vmem:[%s13911_s23 + $0x13c8] sm:$0xf]  ;;  %v10656_v4 = vor.u32 %v13046_v56, %v10655_v49  ;;  %7017 = vmatpush.bf16.msrb.mxu3 %v10176_v3 }
 0x290   : > { %v13110_v61 = vld [vmem:[%s13911_s23 + $0x13e4] sm:$0xf0]  ;;  %7005 = vmatmul.bf16.vlgmr.msrb.gmra.mxu2 %v14104_v39 }
 0x291   : > { %v11167_v62 = vld [vmem:[%s13911_s23 + $0x15c8] sm:$0xf]  ;;  %v10912_v17 = vor.u32 %v13110_v61, %v10911_v59  ;;  %7023 = vmatpush.bf16.msra.mxu0 %v10656_v4  ;;  %v14738_v59 = vpop.f32.mrf.mxu0 }
 0x292   : > { %v13174_v63 = vld [vmem:[%s13911_s23 + $0x15e4] sm:$0xf0]  ;;  %7018 = vmatmul.bf16.vlgmr.msrb.gmra.mxu3 %v14110_v43 }
 0x293   : > { %v11423_v1 = vld [vmem:[%s13911_s23 + $0x17c8] sm:$0xf]  ;;  %v11168_v6 = vor.u32 %v13174_v63, %v11167_v62  ;;  %7036 = vmatpush.bf16.msra.mxu1 %v10912_v17 }
 0x294   : > { %v13238_v2 = vld [vmem:[%s13911_s23 + $0x17e4] sm:$0xf0] }
 0x295   : > { %v10623_v8 = vld [vmem:[%s13911_s23 + $0x1188] sm:$0xf]  ;;  %v11424_v9 = vor.u32 %v13238_v2, %v11423_v1  ;;  %7049 = vmatpush.bf16.msra.mxu2 %v11168_v6 }
 0x296   : > { %v13038_v52 = vld [vmem:[%s13911_s23 + $0x11a4] sm:$0xf0] }
 0x297   : > { %v10879_v54 = vld [vmem:[%s13911_s23 + $0x1388] sm:$0xf]  ;;  %v10624_v18 = vor.u32 %v13038_v52, %v10623_v8  ;;  %7062 = vmatpush.bf16.msra.mxu3 %v11424_v9 }
 0x298   : > { %v13102_v10 = vld [vmem:[%s13911_s23 + $0x13a4] sm:$0xf0] }
 0x299   : > { %v11135_v12 = vld [vmem:[%s13911_s23 + $0x1588] sm:$0xf]  ;;  %v10880_v19 = vor.u32 %v13102_v10, %v10879_v54  ;;  %7024 = vmatpush.bf16.msra.mxu0 %v10624_v18 }
 0x29a   : > { %v13166_v13 = vld [vmem:[%s13911_s23 + $0x15a4] sm:$0xf0] }
 0x29b   : > { %v11391_v14 = vld [vmem:[%s13911_s23 + $0x1788] sm:$0xf]  ;;  %v11136_v20 = vor.u32 %v13166_v13, %v11135_v12  ;;  %7037 = vmatpush.bf16.msra.mxu1 %v10880_v19  ;;  %v14753_v13 = vpop.f32.mrf.mxu2 }
 0x29c   : > { %v13230_v15 = vld [vmem:[%s13911_s23 + $0x17a4] sm:$0xf0] }
 0x29d   : > { %v10591_v16 = vld [vmem:[%s13911_s23 + $0x1148] sm:$0xf]  ;;  %v11392_v23 = vor.u32 %v13230_v15, %v11391_v14  ;;  %7050 = vmatpush.bf16.msra.mxu2 %v11136_v20  ;;  %v14758_v20 = vpop.f32.mrf.mxu3 }
 0x29e   : > { %v13030_v27 = vld [vmem:[%s13911_s23 + $0x1164] sm:$0xf0] }
 0x29f   : > { %v10847_v37 = vld [vmem:[%s13911_s23 + $0x1348] sm:$0xf]  ;;  %v10592_v38 = vor.u32 %v13030_v27, %v10591_v16  ;;  %7063 = vmatpush.bf16.msra.mxu3 %v11392_v23  ;;  %v6774_v23 = vpop.f32.mrf.mxu0 }
 0x2a0   : > { %v13094_v40 = vld [vmem:[%s13911_s23 + $0x1364] sm:$0xf0] }
 0x2a1   : > { %v11103_v28 = vld [vmem:[%s13911_s23 + $0x1548] sm:$0xf]  ;;  %v10848_v41 = vor.u32 %v13094_v40, %v10847_v37  ;;  %7025 = vmatpush.bf16.msra.mxu0 %v10592_v38  ;;  %v6787_v38 = vpop.f32.mrf.mxu1 }
 0x2a2   : > { %v13158_v33 = vld [vmem:[%s13911_s23 + $0x1564] sm:$0xf0] }
 0x2a3   : > { %v11359_v35 = vld [vmem:[%s13911_s23 + $0x1748] sm:$0xf]  ;;  %v11104_v44 = vor.u32 %v13158_v33, %v11103_v28  ;;  %7038 = vmatpush.bf16.msra.mxu1 %v10848_v41 }
 0x2a4   : > { %v13222_v58 = vld [vmem:[%s13911_s23 + $0x1764] sm:$0xf0] }
 0x2a5   : > { %v10559_v46 = vld [vmem:[%s13911_s23 + $0x1108] sm:$0xf]  ;;  %v11360_v50 = vor.u32 %v13222_v58, %v11359_v35  ;;  %7051 = vmatpush.bf16.msra.mxu2 %v11104_v44 }
 0x2a6   : > { %v13022_v47 = vld [vmem:[%s13911_s23 + $0x1124] sm:$0xf0] }
 0x2a7   : > { %v10815_v48 = vld [vmem:[%s13911_s23 + $0x1308] sm:$0xf]  ;;  %v10560_v56 = vor.u32 %v13022_v47, %v10559_v46  ;;  %7064 = vmatpush.bf16.msra.mxu3 %v11360_v50 }
 0x2a8   : > { %v13086_v53 = vld [vmem:[%s13911_s23 + $0x1324] sm:$0xf0] }
 0x2a9   : > { %v11071_v51 = vld [vmem:[%s13911_s23 + $0x1508] sm:$0xf]  ;;  %v10816_v60 = vor.u32 %v13086_v53, %v10815_v48  ;;  %7026 = vmatpush.bf16.msra.mxu0 %v10560_v56 }
 0x2aa   : > { %v13150_v55 = vld [vmem:[%s13911_s23 + $0x1524] sm:$0xf0] }
 0x2ab   : > { %v11327_v25 = vld [vmem:[%s13911_s23 + $0x1708] sm:$0xf]  ;;  %v11072_v61 = vor.u32 %v13150_v55, %v11071_v51  ;;  %7039 = vmatpush.bf16.msra.mxu1 %v10816_v60 }
 0x2ac   : > { %v13214_v49 = vld [vmem:[%s13911_s23 + $0x1724] sm:$0xf0] }
 0x2ad   : > { %v10527_v62 = vld [vmem:[%s13911_s23 + $0x10c8] sm:$0xf]  ;;  %v11328_v1 = vor.u32 %v13214_v49, %v11327_v25  ;;  %7052 = vmatpush.bf16.msra.mxu2 %v11072_v61 }
 0x2ae   : > { %v13014_v63 = vld [vmem:[%s13911_s23 + $0x10e4] sm:$0xf0] }
 0x2af   : > { %v10783_v57 = vld [vmem:[%s13911_s23 + $0x12c8] sm:$0xf]  ;;  %v10528_v8 = vor.u32 %v13014_v63, %v10527_v62  ;;  %7065 = vmatpush.bf16.msra.mxu3 %v11328_v1  ;;  %v6800_v62 = vpop.f32.mrf.mxu2 }
 0x2b0   : > { %v13078_v2 = vld [vmem:[%s13911_s23 + $0x12e4] sm:$0xf0] }
 0x2b1   : > { %v11039_v3 = vld [vmem:[%s13911_s23 + $0x14c8] sm:$0xf]  ;;  %v10784_v52 = vor.u32 %v13078_v2, %v10783_v57  ;;  %7027 = vmatpush.bf16.msra.mxu0 %v10528_v8 }
 0x2b2   : > { %v13142_v4 = vld [vmem:[%s13911_s23 + $0x14e4] sm:$0xf0] }
 0x2b3   : > { %v11295_v17 = vld [vmem:[%s13911_s23 + $0x16c8] sm:$0xf]  ;;  %v11040_v54 = vor.u32 %v13142_v4, %v11039_v3  ;;  %7040 = vmatpush.bf16.msra.mxu1 %v10784_v52  ;;  %v6813_v3 = vpop.f32.mrf.mxu3 }
 0x2b4   : > { %v13206_v6 = vld [vmem:[%s13911_s23 + $0x16e4] sm:$0xf0] }
 0x2b5   : > { %v10495_v9 = vld [vmem:[%s13911_s23 + $0x1088] sm:$0xf]  ;;  %v11296_v14 = vor.u32 %v13206_v6, %v11295_v17  ;;  %7053 = vmatpush.bf16.msra.mxu2 %v11040_v54 }
 0x2b6   : > { %v13006_v10 = vld [vmem:[%s13911_s23 + $0x10a4] sm:$0xf0] }
 0x2b7   : > { %v10751_v12 = vld [vmem:[%s13911_s23 + $0x1288] sm:$0xf]  ;;  %v10496_v37 = vor.u32 %v13006_v10, %v10495_v9  ;;  %7066 = vmatpush.bf16.msra.mxu3 %v11296_v14 }
 0x2b8   : > { %v13070_v15 = vld [vmem:[%s13911_s23 + $0x12a4] sm:$0xf0] }
 0x2b9   : > { %v11007_v18 = vld [vmem:[%s13911_s23 + $0x1488] sm:$0xf]  ;;  %v10752_v40 = vor.u32 %v13070_v15, %v10751_v12  ;;  %7028 = vmatpush.bf16.msra.mxu0 %v10496_v37 }
 0x2ba   : > { %v13134_v19 = vld [vmem:[%s13911_s23 + $0x14a4] sm:$0xf0] }
 0x2bb   : > { %v11263_v16 = vld [vmem:[%s13911_s23 + $0x1688] sm:$0xf]  ;;  %v11008_v28 = vor.u32 %v13134_v19, %v11007_v18  ;;  %7041 = vmatpush.bf16.msra.mxu1 %v10752_v40 }
 0x2bc   : > { %v13198_v27 = vld [vmem:[%s13911_s23 + $0x16a4] sm:$0xf0] }
 0x2bd   : > { %v10463_v33 = vld [vmem:[%s13911_s23 + $0x1048] sm:$0xf]  ;;  %v11264_v41 = vor.u32 %v13198_v27, %v11263_v16  ;;  %7054 = vmatpush.bf16.msra.mxu2 %v11008_v28 }
 0x2be   : > { %v12998_v35 = vld [vmem:[%s13911_s23 + $0x1064] sm:$0xf0] }
 0x2bf   : > { %v10719_v58 = vld [vmem:[%s13911_s23 + $0x1248] sm:$0xf]  ;;  %v10464_v53 = vor.u32 %v12998_v35, %v10463_v33  ;;  %7067 = vmatpush.bf16.msra.mxu3 %v11264_v41 }
 0x2c0   : > { %v13062_v44 = vld [vmem:[%s13911_s23 + $0x1264] sm:$0xf0] }
 0x2c1   : > { %v10975_v46 = vld [vmem:[%s13911_s23 + $0x1448] sm:$0xf]  ;;  %v10720_v25 = vor.u32 %v13062_v44, %v10719_v58  ;;  %7029 = vmatpush.bf16.msra.mxu0 %v10464_v53 }
 0x2c2   : > { %v13126_v47 = vld [vmem:[%s13911_s23 + $0x1464] sm:$0xf0] }
 0x2c3   : > { %v11231_v48 = vld [vmem:[%s13911_s23 + $0x1648] sm:$0xf]  ;;  %v10976_v49 = vor.u32 %v13126_v47, %v10975_v46  ;;  %7042 = vmatpush.bf16.msra.mxu1 %v10720_v25 }
 0x2c4   : > { %v13190_v50 = vld [vmem:[%s13911_s23 + $0x1664] sm:$0xf0] }
 0x2c5   : > { %v10431_v51 = vld [vmem:[%s13911_s23 + $0x1008] sm:$0xf]  ;;  %v11232_v63 = vor.u32 %v13190_v50, %v11231_v48  ;;  %7055 = vmatpush.bf16.msra.mxu2 %v10976_v49 }
 0x2c6   : > { %v12990_v55 = vld [vmem:[%s13911_s23 + $0x1024] sm:$0xf0] }
 0x2c7   : > { %v10687_v56 = vld [vmem:[%s13911_s23 + $0x1208] sm:$0xf]  ;;  %v10432_v8 = vor.u32 %v12990_v55, %v10431_v51  ;;  %7068 = vmatpush.bf16.msra.mxu3 %v11232_v63 }
 0x2c8   : > { %v13054_v60 = vld [vmem:[%s13911_s23 + $0x1224] sm:$0xf0] }
 0x2c9   : > { %v10943_v61 = vld [vmem:[%s13911_s23 + $0x1408] sm:$0xf]  ;;  %v10688_v10 = vor.u32 %v13054_v60, %v10687_v56  ;;  %7030 = vmatpush.bf16.msra.mxu0 %v10432_v8  ;;  %v14812_v8 = vpop.f32.mrf.mxu0 }
 0x2ca   : > { %v13118_v57 = vld [vmem:[%s13911_s23 + $0x1424] sm:$0xf0] }
 0x2cb   : > { %v11199_v1 = vld [vmem:[%s13911_s23 + $0x1608] sm:$0xf]  ;;  %v10944_v12 = vor.u32 %v13118_v57, %v10943_v61  ;;  %7043 = vmatpush.bf16.msra.mxu1 %v10688_v10  ;;  %v14816_v10 = vpop.f32.mrf.mxu1 }
 0x2cc   : > { %v13182_v2 = vld [vmem:[%s13911_s23 + $0x1624] sm:$0xf0]  ;;  %7031 = vmatmul.bf16.vlgmr.msra.gmra.mxu0 %v14179_v26 }
 0x2cd   : > { %v11679_v4 = vld [vmem:[%s13911_s23 + $0x19c8] sm:$0xf]  ;;  %v11200_v18 = vor.u32 %v13182_v2, %v11199_v1  ;;  %7056 = vmatpush.bf16.msra.mxu2 %v10944_v12 }
 0x2ce   : > { %v13302_v17 = vld [vmem:[%s13911_s23 + $0x19e4] sm:$0xf0]  ;;  %7044 = vmatmul.bf16.vlgmr.msra.gmra.mxu1 %v14186_v31 }
 0x2cf   : > { %v11935_v6 = vld [vmem:[%s13911_s23 + $0x1bc8] sm:$0xf]  ;;  %v11680_v19 = vor.u32 %v13302_v17, %v11679_v4  ;;  %7069 = vmatpush.bf16.msra.mxu3 %v11200_v18 }
 0x2d0   : > { %v13366_v52 = vld [vmem:[%s13911_s23 + $0x1be4] sm:$0xf0]  ;;  %7057 = vmatmul.bf16.vlgmr.msra.gmra.mxu2 %v14184_v30 }
 0x2d1   : > { %v12191_v54 = vld [vmem:[%s13911_s23 + $0x1dc8] sm:$0xf]  ;;  %v11936_v16 = vor.u32 %v13366_v52, %v11935_v6  ;;  %7075 = vmatpush.bf16.msrb.mxu0 %v11680_v19 }
 0x2d2   : > { %v13430_v9 = vld [vmem:[%s13911_s23 + $0x1de4] sm:$0xf0]  ;;  %7070 = vmatmul.bf16.vlgmr.msra.gmra.mxu3 %v14190_v34 }
 0x2d3   : > { %v12447_v14 = vld [vmem:[%s13911_s23 + $0x1fc8] sm:$0xf]  ;;  %v12192_v27 = vor.u32 %v13430_v9, %v12191_v54  ;;  %7088 = vmatpush.bf16.msrb.mxu1 %v11936_v16 }
 0x2d4   : > { %v13494_v15 = vld [vmem:[%s13911_s23 + $0x1fe4] sm:$0xf0] }
 0x2d5   : > { %v11647_v37 = vld [vmem:[%s13911_s23 + $0x1988] sm:$0xf]  ;;  %v12448_v28 = vor.u32 %v13494_v15, %v12447_v14  ;;  %7101 = vmatpush.bf16.msrb.mxu2 %v12192_v27 }
 0x2d6   : > { %v13294_v23 = vld [vmem:[%s13911_s23 + $0x19a4] sm:$0xf0] }
 0x2d7   : > { %v11903_v40 = vld [vmem:[%s13911_s23 + $0x1b88] sm:$0xf]  ;;  %v11648_v44 = vor.u32 %v13294_v23, %v11647_v37  ;;  %7114 = vmatpush.bf16.msrb.mxu3 %v12448_v28 }
 0x2d8   : > { %v13358_v33 = vld [vmem:[%s13911_s23 + $0x1ba4] sm:$0xf0] }
 0x2d9   : > { %v12159_v35 = vld [vmem:[%s13911_s23 + $0x1d88] sm:$0xf]  ;;  %v11904_v46 = vor.u32 %v13358_v33, %v11903_v40  ;;  %7076 = vmatpush.bf16.msrb.mxu0 %v11648_v44 }
 0x2da   : > { %v13422_v58 = vld [vmem:[%s13911_s23 + $0x1da4] sm:$0xf0] }
 0x2db   : > { %v12415_v38 = vld [vmem:[%s13911_s23 + $0x1f88] sm:$0xf]  ;;  %v12160_v47 = vor.u32 %v13422_v58, %v12159_v35  ;;  %7089 = vmatpush.bf16.msrb.mxu1 %v11904_v46  ;;  %v6773_v35 = vadd.f32 %v14738_v59, %v14684_v11 }
 0x2dc   : > { %v13486_v41 = vld [vmem:[%s13911_s23 + $0x1fa4] sm:$0xf0] }
 0x2dd   : > { %v11615_v48 = vld [vmem:[%s13911_s23 + $0x1948] sm:$0xf]  ;;  %v12416_v51 = vor.u32 %v13486_v41, %v12415_v38  ;;  %7102 = vmatpush.bf16.msrb.mxu2 %v12160_v47 }
 0x2de   : > { %v13286_v50 = vld [vmem:[%s13911_s23 + $0x1964] sm:$0xf0] }
 0x2df   : > { %v11871_v53 = vld [vmem:[%s13911_s23 + $0x1b48] sm:$0xf]  ;;  %v11616_v61 = vor.u32 %v13286_v50, %v11615_v48  ;;  %7115 = vmatpush.bf16.msrb.mxu3 %v12416_v51  ;;  %v14831_v48 = vpop.f32.mrf.mxu2 }
 0x2e0   : > { %v13350_v55 = vld [vmem:[%s13911_s23 + $0x1b64] sm:$0xf0] }
 0x2e1   : > { %v12127_v25 = vld [vmem:[%s13911_s23 + $0x1d48] sm:$0xf]  ;;  %v11872_v62 = vor.u32 %v13350_v55, %v11871_v53  ;;  %7077 = vmatpush.bf16.msrb.mxu0 %v11616_v61  ;;  %v14836_v55 = vpop.f32.mrf.mxu3 }
 0x2e2   : > { %v13414_v49 = vld [vmem:[%s13911_s23 + $0x1d64] sm:$0xf0] }
 0x2e3   : > { %v12383_v56 = vld [vmem:[%s13911_s23 + $0x1f48] sm:$0xf]  ;;  %v12128_v63 = vor.u32 %v13414_v49, %v12127_v25  ;;  %7090 = vmatpush.bf16.msrb.mxu1 %v11872_v62  ;;  %v6826_v25 = vpop.f32.mrf.mxu0 }
 0x2e4   : > { %v13478_v60 = vld [vmem:[%s13911_s23 + $0x1f64] sm:$0xf0] }
 0x2e5   : > { %v11583_v57 = vld [vmem:[%s13911_s23 + $0x1908] sm:$0xf]  ;;  %v12384_v3 = vor.u32 %v13478_v60, %v12383_v56  ;;  %7103 = vmatpush.bf16.msrb.mxu2 %v12128_v63  ;;  %v6839_v56 = vpop.f32.mrf.mxu1  ;;  %v6786_v60 = vadd.f32 %v14743_v0, %v6773_v35  ;;  %v12594_v35 = vld [vmem:[%s13911_s23 + $0x3cc] sm:$0xf] }
 0x2e6   : > { %v13278_v1 = vld [vmem:[%s13911_s23 + $0x1924] sm:$0xf0] }
 0x2e7   : > { %v11839_v2 = vld [vmem:[%s13911_s23 + $0x1b08] sm:$0xf]  ;;  %v11584_v9 = vor.u32 %v13278_v1, %v11583_v57  ;;  %7116 = vmatpush.bf16.msrb.mxu3 %v12384_v3 }
 0x2e8   : > { %v13342_v4 = vld [vmem:[%s13911_s23 + $0x1b24] sm:$0xf0] }
 0x2e9   : > { %v12095_v17 = vld [vmem:[%s13911_s23 + $0x1d08] sm:$0xf]  ;;  %v11840_v12 = vor.u32 %v13342_v4, %v11839_v2  ;;  %7078 = vmatpush.bf16.msrb.mxu0 %v11584_v9 }
 0x2ea   : > { %v13406_v6 = vld [vmem:[%s13911_s23 + $0x1d24] sm:$0xf0] }
 0x2eb   : > { %v12351_v52 = vld [vmem:[%s13911_s23 + $0x1f08] sm:$0xf]  ;;  %v12096_v14 = vor.u32 %v13406_v6, %v12095_v17  ;;  %7091 = vmatpush.bf16.msrb.mxu1 %v11840_v12  ;;  %v6799_v12 = vadd.f32 %v14753_v13, %v6786_v60  ;;  %v12530_v13 = vld [vmem:[%s13911_s23 + $0x1cc] sm:$0xf] }
 0x2ec   : > { %v13470_v54 = vld [vmem:[%s13911_s23 + $0x1f24] sm:$0xf0] }
 0x2ed   : > { %v11551_v15 = vld [vmem:[%s13911_s23 + $0x18c8] sm:$0xf]  ;;  %v12352_v16 = vor.u32 %v13470_v54, %v12351_v52  ;;  %7104 = vmatpush.bf16.msrb.mxu2 %v12096_v14 }
 0x2ee   : > { %v13270_v18 = vld [vmem:[%s13911_s23 + $0x18e4] sm:$0xf0] }
 0x2ef   : > { %v11807_v19 = vld [vmem:[%s13911_s23 + $0x1ac8] sm:$0xf]  ;;  %v11552_v33 = vor.u32 %v13270_v18, %v11551_v15  ;;  %7117 = vmatpush.bf16.msrb.mxu3 %v12352_v16 }
 0x2f0   : > { %v13334_v27 = vld [vmem:[%s13911_s23 + $0x1ae4] sm:$0xf0] }
 0x2f1   : > { %v12063_v37 = vld [vmem:[%s13911_s23 + $0x1cc8] sm:$0xf]  ;;  %v11808_v58 = vor.u32 %v13334_v27, %v11807_v19  ;;  %7079 = vmatpush.bf16.msrb.mxu0 %v11552_v33  ;;  %v8609_v33 = vld [vmem:[%s13911_s23 + $0x1e8] sm:$0xf0] }
 0x2f2   : > { %v13398_v23 = vld [vmem:[%s13911_s23 + $0x1ce4] sm:$0xf0]  ;;  %v8612_v25 = vor.u32 %v12530_v13, %v8609_v33  ;;  %v8769_v33 = vld [vmem:[%s13911_s23 + $0x328] sm:$0xf0] }
 0x2f3   : > { %v12319_v40 = vld [vmem:[%s13911_s23 + $0x1ec8] sm:$0xf]  ;;  %v12064_v38 = vor.u32 %v13398_v23, %v12063_v37  ;;  %7092 = vmatpush.bf16.msrb.mxu1 %v11808_v58  ;;  %v6865_v58 = vpop.f32.mrf.mxu3 }
 0x2f4   : > { %v13462_v28 = vld [vmem:[%s13911_s23 + $0x1ee4] sm:$0xf0]  ;;  %v9025_v58 = vld [vmem:[%s13911_s23 + $0x528] sm:$0xf0] }
 0x2f5   : > { %v11519_v41 = vld [vmem:[%s13911_s23 + $0x1888] sm:$0xf]  ;;  %v12320_v47 = vor.u32 %v13462_v28, %v12319_v40  ;;  %7105 = vmatpush.bf16.msrb.mxu2 %v12064_v38  ;;  %v6852_v28 = vpop.f32.mrf.mxu2 }
 0x2f6   : > { %v13262_v44 = vld [vmem:[%s13911_s23 + $0x18a4] sm:$0xf0]  ;;  %v12570_v28 = vld [vmem:[%s13911_s23 + $0x30c] sm:$0xf] }
 0x2f7   : > { %v11775_v46 = vld [vmem:[%s13911_s23 + $0x1a88] sm:$0xf]  ;;  %v11520_v49 = vor.u32 %v13262_v44, %v11519_v41  ;;  %7118 = vmatpush.bf16.msrb.mxu3 %v12320_v47  ;;  %v8865_v41 = vld [vmem:[%s13911_s23 + $0x3e8] sm:$0xf0]  ;;  %v6812_v47 = vadd.f32 %v14758_v20, %v6799_v12 }
 0x2f8   : > { %v13326_v50 = vld [vmem:[%s13911_s23 + $0x1aa4] sm:$0xf0]  ;;  %v12658_v44 = vld [vmem:[%s13911_s23 + $0x5cc] sm:$0xf]  ;;  %v8868_v56 = vor.u32 %v12594_v35, %v8865_v41  ;;  %v6876_v41 = vpop.f32.mrf.mxu0 }
 0x2f9   : > { %v12031_v53 = vld [vmem:[%s13911_s23 + $0x1c88] sm:$0xf]  ;;  %v11776_v61 = vor.u32 %v13326_v50, %v11775_v46  ;;  %7080 = vmatpush.bf16.msrb.mxu0 %v11520_v49  ;;  %v9121_v46 = vld [vmem:[%s13911_s23 + $0x5e8] sm:$0xf0]  ;;  %v6825_v49 = vadd.f32 %v14812_v8, %v6812_v47 }
 0x2fa   : > { %v13390_v51 = vld [vmem:[%s13911_s23 + $0x1ca4] sm:$0xf0]  ;;  %v9124_v60 = vor.u32 %v12658_v44, %v9121_v46  ;;  %v8577_v20 = vld [vmem:[%s13911_s23 + $0x1a8] sm:$0xf0] }
 0x2fb   : > { %v12287_v11 = vld [vmem:[%s13911_s23 + $0x1e88] sm:$0xf]  ;;  %v12032_v62 = vor.u32 %v13390_v51, %v12031_v53  ;;  %7093 = vmatpush.bf16.msrb.mxu1 %v11776_v61  ;;  %v12722_v51 = vld [vmem:[%s13911_s23 + $0x7cc] sm:$0xf] }
 0x2fc   : > { %v13454_v59 = vld [vmem:[%s13911_s23 + $0x1ea4] sm:$0xf0]  ;;  %v12522_v61 = vld [vmem:[%s13911_s23 + $0x18c] sm:$0xf] }
 0x2fd   : > { %v11487_v63 = vld [vmem:[%s13911_s23 + $0x1848] sm:$0xf]  ;;  %v12288_v2 = vor.u32 %v13454_v59, %v12287_v11  ;;  %7106 = vmatpush.bf16.msrb.mxu2 %v12032_v62  ;;  %v9377_v11 = vld [vmem:[%s13911_s23 + $0x7e8] sm:$0xf0]  ;;  %v8580_v8 = vor.u32 %v12522_v61, %v8577_v20 }
 0x2fe   : > { %v13254_v57 = vld [vmem:[%s13911_s23 + $0x1864] sm:$0xf0]  ;;  %v12586_v62 = vld [vmem:[%s13911_s23 + $0x38c] sm:$0xf] }
 0x2ff   : > { %v11743_v1 = vld [vmem:[%s13911_s23 + $0x1a48] sm:$0xf]  ;;  %v11488_v52 = vor.u32 %v13254_v57, %v11487_v63  ;;  %7119 = vmatpush.bf16.msrb.mxu3 %v12288_v2  ;;  %v9380_v63 = vor.u32 %v12722_v51, %v9377_v11  ;;  %v8833_v57 = vld [vmem:[%s13911_s23 + $0x3a8] sm:$0xf0]  ;;  %v8772_v51 = vor.u32 %v12570_v28, %v8769_v33 }
 0x300   : > { %v13318_v3 = vld [vmem:[%s13911_s23 + $0x1a64] sm:$0xf0]  ;;  %v9089_v2 = vld [vmem:[%s13911_s23 + $0x5a8] sm:$0xf0] }
 0x301   : > { %v11999_v4 = vld [vmem:[%s13911_s23 + $0x1c48] sm:$0xf]  ;;  %v11744_v14 = vor.u32 %v13318_v3, %v11743_v1  ;;  %7081 = vmatpush.bf16.msrb.mxu0 %v11488_v52  ;;  %v12650_v1 = vld [vmem:[%s13911_s23 + $0x58c] sm:$0xf] }
 0x302   : > { %v13382_v17 = vld [vmem:[%s13911_s23 + $0x1c64] sm:$0xf0]  ;;  %v12714_v3 = vld [vmem:[%s13911_s23 + $0x78c] sm:$0xf] }
 0x303   : > { %v12255_v6 = vld [vmem:[%s13911_s23 + $0x1e48] sm:$0xf]  ;;  %v12000_v15 = vor.u32 %v13382_v17, %v11999_v4  ;;  %7094 = vmatpush.bf16.msrb.mxu1 %v11744_v14  ;;  %v9345_v4 = vld [vmem:[%s13911_s23 + $0x7a8] sm:$0xf0]  ;;  %v6838_v17 = vadd.f32 %v14816_v10, %v6825_v49 }
 0x304   : > { %v13446_v0 = vld [vmem:[%s13911_s23 + $0x1e64] sm:$0xf0]  ;;  %v12514_v52 = vld [vmem:[%s13911_s23 + $0x14c] sm:$0xf]  ;;  %v9348_v12 = vor.u32 %v12714_v3, %v9345_v4 }
 0x305   : > { %v11455_v54 = vld [vmem:[%s13911_s23 + $0x1808] sm:$0xf]  ;;  %v12256_v27 = vor.u32 %v13446_v0, %v12255_v6  ;;  %7107 = vmatpush.bf16.msrb.mxu2 %v12000_v15  ;;  %v8836_v6 = vor.u32 %v12586_v62, %v8833_v57  ;;  %v9092_v0 = vor.u32 %v12650_v1, %v9089_v2  ;;  %v8801_v14 = vld [vmem:[%s13911_s23 + $0x368] sm:$0xf0]  ;;  %v6851_v10 = vadd.f32 %v14831_v48, %v6838_v17 }
 0x306   : > { %v13246_v9 = vld [vmem:[%s13911_s23 + $0x1824] sm:$0xf0]  ;;  %v12642_v15 = vld [vmem:[%s13911_s23 + $0x54c] sm:$0xf] }
 0x307   : > { %v11711_v18 = vld [vmem:[%s13911_s23 + $0x1a08] sm:$0xf]  ;;  %v11456_v38 = vor.u32 %v13246_v9, %v11455_v54  ;;  %7120 = vmatpush.bf16.msrb.mxu3 %v12256_v27  ;;  %v8545_v54 = vld [vmem:[%s13911_s23 + $0x168] sm:$0xf0] }
 0x308   : > { %v13310_v19 = vld [vmem:[%s13911_s23 + $0x1a24] sm:$0xf0]  ;;  %v12578_v9 = vld [vmem:[%s13911_s23 + $0x34c] sm:$0xf]  ;;  %v8548_v27 = vor.u32 %v12514_v52, %v8545_v54 }
 0x309   : > { %v11967_v16 = vld [vmem:[%s13911_s23 + $0x1c08] sm:$0xf]  ;;  %v11712_v50 = vor.u32 %v13310_v19, %v11711_v18  ;;  %7082 = vmatpush.bf16.msrb.mxu0 %v11456_v38  ;;  %v9057_v18 = vld [vmem:[%s13911_s23 + $0x568] sm:$0xf0]  ;;  %v6864_v38 = vadd.f32 %v14836_v55, %v6851_v10 }
 0x30a   : > { %v13374_v37 = vld [vmem:[%s13911_s23 + $0x1c24] sm:$0xf0]  ;;  %v12706_v19 = vld [vmem:[%s13911_s23 + $0x74c] sm:$0xf] }
 0x30b   : > { %v12223_v23 = vld [vmem:[%s13911_s23 + $0x1e08] sm:$0xf]  ;;  %v11968_v53 = vor.u32 %v13374_v37, %v11967_v16  ;;  %7095 = vmatpush.bf16.msrb.mxu1 %v11712_v50  ;;  %v9313_v16 = vld [vmem:[%s13911_s23 + $0x768] sm:$0xf0]  ;;  %v8804_v37 = vor.u32 %v12578_v9, %v8801_v14  ;;  %v6889_v50 = vpop.f32.mrf.mxu1 }
 0x30c   : > { %v13438_v40 = vld [vmem:[%s13911_s23 + $0x1e24] sm:$0xf0]  ;;  %7083 = vmatmul.bf16.vlgmr.msrb.gmra.mxu0 %v14257_v24  ;;  %v12506_v48 = vld [vmem:[%s13911_s23 + $0x10c] sm:$0xf]  ;;  %v9316_v13 = vor.u32 %v12706_v19, %v9313_v16 }
 0x30d   : > { %v12224_v59 = vor.u32 %v13438_v40, %v12223_v23  ;;  %7108 = vmatpush.bf16.msrb.mxu2 %v11968_v53  ;;  %7127 = vmatpush.bf16.msra.mxu0 %v8612_v25  ;;  %v9060_v23 = vor.u32 %v12642_v15, %v9057_v18  ;;  %v8513_v40 = vld [vmem:[%s13911_s23 + $0x128] sm:$0xf0]  ;;  %v6877_v53 = vadd.f32 %v6876_v41, %v6864_v38  ;;  %v6878_v18 = vpop.f32.mrf.mxu0 }
 0x30e   : > { %7096 = vmatmul.bf16.vlgmr.msrb.gmra.mxu1 %v14264_v32  ;;  %v12634_v35 = vld [vmem:[%s13911_s23 + $0x50c] sm:$0xf]  ;;  %v8516_v47 = vor.u32 %v12506_v48, %v8513_v40 }
 0x30f   : > { %7121 = vmatpush.bf16.msrb.mxu3 %v12224_v59  ;;  %7140 = vmatpush.bf16.msra.mxu1 %v8868_v56  ;;  %v12698_v44 = vld [vmem:[%s13911_s23 + $0x70c] sm:$0xf]  ;;  %v9028_v11 = vor.u32 %v12634_v35, %v9025_v58  ;;  %v6890_v57 = vadd.f32 %v6889_v50, %v6877_v53 }
 0x310   : > { %7109 = vmatmul.bf16.vlgmr.msrb.gmra.mxu2 %v14262_v29  ;;  %v9281_v46 = vld [vmem:[%s13911_s23 + $0x728] sm:$0xf0] }
 0x311   : > { %7153 = vmatpush.bf16.msra.mxu2 %v9124_v60  ;;  %7128 = vmatpush.bf16.msra.mxu0 %v8580_v8  ;;  %v12498_v59 = vld [vmem:[%s13911_s23 + $0xcc] sm:$0xf]  ;;  %v9284_v49 = vor.u32 %v12698_v44, %v9281_v46 }
 0x312   : > { %7122 = vmatmul.bf16.vlgmr.msrb.gmra.mxu3 %v14268_v36  ;;  %v8481_v25 = vld [vmem:[%s13911_s23 + $0xe8] sm:$0xf0] }
 0x313   : > { %7166 = vmatpush.bf16.msra.mxu3 %v9380_v63  ;;  %7141 = vmatpush.bf16.msra.mxu1 %v8836_v6  ;;  %v12562_v55 = vld [vmem:[%s13911_s23 + $0x2cc] sm:$0xf]  ;;  %v8484_v63 = vor.u32 %v12498_v59, %v8481_v25  ;;  %v6902_v6 = vpop.f32.mrf.mxu2  ;;  %v6891_v16 = vpop.f32.mrf.mxu1 }
 0x314   : > { %v8737_v56 = vld [vmem:[%s13911_s23 + $0x2e8] sm:$0xf0]  ;;  %v6903_v9 = vadd.f32 %v6902_v6, %v6890_v57 }
 0x315   : > { %7154 = vmatpush.bf16.msra.mxu2 %v9092_v0  ;;  %7129 = vmatpush.bf16.msra.mxu0 %v8548_v27  ;;  %v12626_v60 = vld [vmem:[%s13911_s23 + $0x4cc] sm:$0xf]  ;;  %v8740_v1 = vor.u32 %v12562_v55, %v8737_v56 }
 0x316   : > { %v8993_v61 = vld [vmem:[%s13911_s23 + $0x4e8] sm:$0xf0] }
 0x317   : > { %7167 = vmatpush.bf16.msra.mxu3 %v9348_v12  ;;  %7142 = vmatpush.bf16.msra.mxu1 %v8804_v37  ;;  %v12690_v20 = vld [vmem:[%s13911_s23 + $0x6cc] sm:$0xf]  ;;  %v8996_v2 = vor.u32 %v12626_v60, %v8993_v61  ;;  %v6915_v12 = vpop.f32.mrf.mxu3 }
 0x318   : > { %v9249_v62 = vld [vmem:[%s13911_s23 + $0x6e8] sm:$0xf0]  ;;  %v6916_v27 = vadd.f32 %v6915_v12, %v6903_v9 }
 0x319   : > { %7155 = vmatpush.bf16.msra.mxu2 %v9060_v23  ;;  %7130 = vmatpush.bf16.msra.mxu0 %v8516_v47  ;;  %v12490_v3 = vld [vmem:[%s13911_s23 + $0x8c] sm:$0xf]  ;;  %v9252_v17 = vor.u32 %v12690_v20, %v9249_v62 }
 0x31a   : > { %v8449_v4 = vld [vmem:[%s13911_s23 + $0xa8] sm:$0xf0] }
 0x31b   : > { %7168 = vmatpush.bf16.msra.mxu3 %v9316_v13  ;;  %7143 = vmatpush.bf16.msra.mxu1 %v8772_v51  ;;  %v12554_v8 = vld [vmem:[%s13911_s23 + $0x28c] sm:$0xf]  ;;  %v8452_v19 = vor.u32 %v12490_v3, %v8449_v4  ;;  %v6904_v61 = vpop.f32.mrf.mxu2 }
 0x31c   : > { %v8705_v0 = vld [vmem:[%s13911_s23 + $0x2a8] sm:$0xf0] }
 0x31d   : > { %7156 = vmatpush.bf16.msra.mxu2 %v9028_v11  ;;  %v12618_v52 = vld [vmem:[%s13911_s23 + $0x48c] sm:$0xf]  ;;  %7131 = vmatpush.bf16.msra.mxu0 %v8484_v63  ;;  %v8708_v37 = vor.u32 %v12554_v8, %v8705_v0 }
 0x31e   : > { %v8961_v54 = vld [vmem:[%s13911_s23 + $0x4a8] sm:$0xf0] }
 0x31f   : > { %7169 = vmatpush.bf16.msra.mxu3 %v9284_v49  ;;  %v12682_v14 = vld [vmem:[%s13911_s23 + $0x68c] sm:$0xf]  ;;  %7144 = vmatpush.bf16.msra.mxu1 %v8740_v1  ;;  %v8964_v23 = vor.u32 %v12618_v52, %v8961_v54  ;;  %v6917_v57 = vpop.f32.mrf.mxu3 }
 0x320   : > { %v9217_v15 = vld [vmem:[%s13911_s23 + $0x6a8] sm:$0xf0] }
 0x321   : > { %v288_v10 = vld [vmem:[%s13935_s11 + $0x8] sm:$0xff]  ;;  %7157 = vmatpush.bf16.msra.mxu2 %v8996_v2  ;;  %v9220_v13 = vor.u32 %v12682_v14, %v9217_v15  ;;  %7132 = vmatpush.bf16.msra.mxu0 %v8452_v19 }
 0x322   : > { %v12482_v48 = vld [vmem:[%s13911_s23 + $0x4c] sm:$0xf]  ;;  %v8168_v38 = vadd.f32 %v6916_v27, %v288_v10 }
 0x323   : > { %v8417_v40 = vld [vmem:[%s13911_s23 + $0x68] sm:$0xf0]  ;;  %7170 = vmatpush.bf16.msra.mxu3 %v9252_v17  ;;  %7145 = vmatpush.bf16.msra.mxu1 %v8708_v37 }
 0x324   : > { %v12546_v28 = vld [vmem:[%s13911_s23 + $0x24c] sm:$0xf]  ;;  %v8420_v46 = vor.u32 %v12482_v48, %v8417_v40  ;;  %8176 = vst [vmem:[%s13935_s11 + $0x8] sm:$0xff] %v8168_v38 }
 0x325   : > { %v8673_v33 = vld [vmem:[%s13911_s23 + $0x268] sm:$0xf0]  ;;  %7158 = vmatpush.bf16.msra.mxu2 %v8964_v23 }
 0x326   : > { %v12610_v35 = vld [vmem:[%s13911_s23 + $0x44c] sm:$0xf]  ;;  %v8676_v51 = vor.u32 %v12546_v28, %v8673_v33  ;;  %7133 = vmatpush.bf16.msra.mxu0 %v8420_v46 }
 0x327   : > { %v8929_v58 = vld [vmem:[%s13911_s23 + $0x468] sm:$0xf0]  ;;  %7171 = vmatpush.bf16.msra.mxu3 %v9220_v13 }
 0x328   : > { %v12674_v41 = vld [vmem:[%s13911_s23 + $0x64c] sm:$0xf]  ;;  %v8932_v11 = vor.u32 %v12610_v35, %v8929_v58  ;;  %7146 = vmatpush.bf16.msra.mxu1 %v8676_v51 }
 0x329   : > { %v9185_v44 = vld [vmem:[%s13911_s23 + $0x668] sm:$0xf0] }
 0x32a   : > { %v12474_v47 = vld [vmem:[%s13911_s23 + $0xc] sm:$0xf]  ;;  %v9188_v55 = vor.u32 %v12674_v41, %v9185_v44  ;;  %7159 = vmatpush.bf16.msra.mxu2 %v8932_v11 }
 0x32b   : > { %v8385_v50 = vld [vmem:[%s13911_s23 + $0x28] sm:$0xf0] }
 0x32c   : > { %v12538_v53 = vld [vmem:[%s13911_s23 + $0x20c] sm:$0xf]  ;;  %v8388_v1 = vor.u32 %v12474_v47, %v8385_v50  ;;  %7172 = vmatpush.bf16.msra.mxu3 %v9188_v55 }
 0x32d   : > { %v8641_v59 = vld [vmem:[%s13911_s23 + $0x228] sm:$0xf0] }
 0x32e   : > { %v12602_v25 = vld [vmem:[%s13911_s23 + $0x40c] sm:$0xf]  ;;  %v8644_v8 = vor.u32 %v12538_v53, %v8641_v59  ;;  %7134 = vmatpush.bf16.msra.mxu0 %v8388_v1 }
 0x32f   : > { %v8897_v49 = vld [vmem:[%s13911_s23 + $0x428] sm:$0xf0] }
 0x330   : > { %v12666_v56 = vld [vmem:[%s13911_s23 + $0x60c] sm:$0xf]  ;;  %v8900_v17 = vor.u32 %v12602_v25, %v8897_v49  ;;  %7147 = vmatpush.bf16.msra.mxu1 %v8644_v8  ;;  %v6941_v8 = vpop.f32.mrf.mxu1 }
 0x331   : > { %v9153_v60 = vld [vmem:[%s13911_s23 + $0x628] sm:$0xf0]  ;;  %7135 = vmatmul.bf16.vlgmr.msra.gmra.mxu0 %v14049_v21 }
 0x332   : > { %v12786_v20 = vld [vmem:[%s13911_s23 + $0x9cc] sm:$0xf]  ;;  %v9156_v52 = vor.u32 %v12666_v56, %v9153_v60  ;;  %7160 = vmatpush.bf16.msra.mxu2 %v8900_v17 }
 0x333   : > { %v9633_v62 = vld [vmem:[%s13911_s23 + $0x9e8] sm:$0xf0]  ;;  %7148 = vmatmul.bf16.vlgmr.msra.gmra.mxu1 %v14052_v22 }
 0x334   : > { %v12850_v63 = vld [vmem:[%s13911_s23 + $0xbcc] sm:$0xf]  ;;  %v9636_v54 = vor.u32 %v12786_v20, %v9633_v62  ;;  %7173 = vmatpush.bf16.msra.mxu3 %v9156_v52 }
 0x335   : > { %v9889_v2 = vld [vmem:[%s13911_s23 + $0xbe8] sm:$0xf0]  ;;  %7161 = vmatmul.bf16.vlgmr.msra.gmra.mxu2 %v14035_v5 }
 0x336   : > { %v12914_v3 = vld [vmem:[%s13911_s23 + $0xdcc] sm:$0xf]  ;;  %v9892_v9 = vor.u32 %v12850_v63, %v9889_v2  ;;  %7179 = vmatpush.bf16.msrb.mxu0 %v9636_v54  ;;  %v6928_v63 = vpop.f32.mrf.mxu0 }
 0x337   : > { %v10145_v4 = vld [vmem:[%s13911_s23 + $0xde8] sm:$0xf0]  ;;  %7174 = vmatmul.bf16.vlgmr.msra.gmra.mxu3 %v14038_v7  ;;  %v6942_v54 = vadd.f32 %v6941_v8, %v6928_v63 }
 0x338   : > { %v12978_v6 = vld [vmem:[%s13911_s23 + $0xfcc] sm:$0xf]  ;;  %v10148_v12 = vor.u32 %v12914_v3, %v10145_v4  ;;  %7192 = vmatpush.bf16.msrb.mxu1 %v9892_v9 }
 0x339   : > { %v10401_v0 = vld [vmem:[%s13911_s23 + $0xfe8] sm:$0xf0] }
 0x33a   : > { %v12778_v14 = vld [vmem:[%s13911_s23 + $0x98c] sm:$0xf]  ;;  %v10404_v10 = vor.u32 %v12978_v6, %v10401_v0  ;;  %7205 = vmatpush.bf16.msrb.mxu2 %v10148_v12 }
 0x33b   : > { %v9601_v15 = vld [vmem:[%s13911_s23 + $0x9a8] sm:$0xf0] }
 0x33c   : > { %v12842_v18 = vld [vmem:[%s13911_s23 + $0xb8c] sm:$0xf]  ;;  %v9604_v48 = vor.u32 %v12778_v14, %v9601_v15  ;;  %7218 = vmatpush.bf16.msrb.mxu3 %v10404_v10 }
 0x33d   : > { %v9857_v19 = vld [vmem:[%s13911_s23 + $0xba8] sm:$0xf0] }
 0x33e   : > { %v12906_v16 = vld [vmem:[%s13911_s23 + $0xd8c] sm:$0xf]  ;;  %v9860_v40 = vor.u32 %v12842_v18, %v9857_v19  ;;  %7180 = vmatpush.bf16.msrb.mxu0 %v9604_v48 }
 0x33f   : > { %v10113_v27 = vld [vmem:[%s13911_s23 + $0xda8] sm:$0xf0] }
 0x340   : > { %v12970_v37 = vld [vmem:[%s13911_s23 + $0xf8c] sm:$0xf]  ;;  %v10116_v28 = vor.u32 %v12906_v16, %v10113_v27  ;;  %7193 = vmatpush.bf16.msrb.mxu1 %v9860_v40  ;;  %v6954_v27 = vpop.f32.mrf.mxu2 }
 0x341   : > { %v10369_v23 = vld [vmem:[%s13911_s23 + $0xfa8] sm:$0xf0] }
 0x342   : > { %v12770_v13 = vld [vmem:[%s13911_s23 + $0x94c] sm:$0xf]  ;;  %v10372_v58 = vor.u32 %v12970_v37, %v10369_v23  ;;  %7206 = vmatpush.bf16.msrb.mxu2 %v10116_v28  ;;  %v6955_v28 = vadd.f32 %v6954_v27, %v6942_v54 }
 0x343   : > { %v9569_v33 = vld [vmem:[%s13911_s23 + $0x968] sm:$0xf0] }
 0x344   : > { %v12834_v35 = vld [vmem:[%s13911_s23 + $0xb4c] sm:$0xf]  ;;  %v9572_v50 = vor.u32 %v12770_v13, %v9569_v33  ;;  %7219 = vmatpush.bf16.msrb.mxu3 %v10372_v58  ;;  %v6967_v13 = vpop.f32.mrf.mxu3 }
 0x345   : > { %v9825_v38 = vld [vmem:[%s13911_s23 + $0xb68] sm:$0xf0] }
 0x346   : > { %v12898_v41 = vld [vmem:[%s13911_s23 + $0xd4c] sm:$0xf]  ;;  %v9828_v53 = vor.u32 %v12834_v35, %v9825_v38  ;;  %7181 = vmatpush.bf16.msrb.mxu0 %v9572_v50  ;;  %v14985_v38 = vadd.f32 %v6967_v13, %v6955_v28 }
 0x347   : > { %v10081_v44 = vld [vmem:[%s13911_s23 + $0xd68] sm:$0xf0] }
 0x348   : > { %v12962_v46 = vld [vmem:[%s13911_s23 + $0xf4c] sm:$0xf]  ;;  %v10084_v51 = vor.u32 %v12898_v41, %v10081_v44  ;;  %7194 = vmatpush.bf16.msrb.mxu1 %v9828_v53  ;;  %v6930_v41 = vpop.f32.mrf.mxu0 }
 0x349   : > { %v10337_v47 = vld [vmem:[%s13911_s23 + $0xf68] sm:$0xf0] }
 0x34a   : > { %v12762_v11 = vld [vmem:[%s13911_s23 + $0x90c] sm:$0xf]  ;;  %v10340_v55 = vor.u32 %v12962_v46, %v10337_v47  ;;  %7207 = vmatpush.bf16.msrb.mxu2 %v10084_v51  ;;  %v6943_v51 = vpop.f32.mrf.mxu1 }
 0x34b   : > { %v9537_v59 = vld [vmem:[%s13911_s23 + $0x928] sm:$0xf0] }
 0x34c   : > { %v12826_v25 = vld [vmem:[%s13911_s23 + $0xb0c] sm:$0xf]  ;;  %v9540_v62 = vor.u32 %v12762_v11, %v9537_v59  ;;  %7220 = vmatpush.bf16.msrb.mxu3 %v10340_v55 }
 0x34d   : > { %v9793_v49 = vld [vmem:[%s13911_s23 + $0xb28] sm:$0xf0] }
 0x34e   : > { %v12890_v56 = vld [vmem:[%s13911_s23 + $0xd0c] sm:$0xf]  ;;  %v9796_v57 = vor.u32 %v12826_v25, %v9793_v49  ;;  %7182 = vmatpush.bf16.msrb.mxu0 %v9540_v62 }
 0x34f   : > { %v10049_v60 = vld [vmem:[%s13911_s23 + $0xd28] sm:$0xf0] }
 0x350   : > { %v12954_v61 = vld [vmem:[%s13911_s23 + $0xf0c] sm:$0xf]  ;;  %v10052_v1 = vor.u32 %v12890_v56, %v10049_v60  ;;  %7195 = vmatpush.bf16.msrb.mxu1 %v9796_v57 }
 0x351   : > { %v10305_v20 = vld [vmem:[%s13911_s23 + $0xf28] sm:$0xf0] }
 0x352   : > { %v12754_v2 = vld [vmem:[%s13911_s23 + $0x8cc] sm:$0xf]  ;;  %v10308_v17 = vor.u32 %v12954_v61, %v10305_v20  ;;  %7208 = vmatpush.bf16.msrb.mxu2 %v10052_v1 }
 0x353   : > { %v9505_v3 = vld [vmem:[%s13911_s23 + $0x8e8] sm:$0xf0] }
 0x354   : > { %v12818_v4 = vld [vmem:[%s13911_s23 + $0xacc] sm:$0xf]  ;;  %v9508_v14 = vor.u32 %v12754_v2, %v9505_v3  ;;  %7221 = vmatpush.bf16.msrb.mxu3 %v10308_v17  ;;  %v6956_v3 = vpop.f32.mrf.mxu2 }
 0x355   : > { %v9761_v6 = vld [vmem:[%s13911_s23 + $0xae8] sm:$0xf0] }
 0x356   : > { %v12882_v0 = vld [vmem:[%s13911_s23 + $0xccc] sm:$0xf]  ;;  %v9764_v15 = vor.u32 %v12818_v4, %v9761_v6  ;;  %7183 = vmatpush.bf16.msrb.mxu0 %v9508_v14 }
 0x357   : > { %v10017_v52 = vld [vmem:[%s13911_s23 + $0xce8] sm:$0xf0] }
 0x358   : > { %v12946_v9 = vld [vmem:[%s13911_s23 + $0xecc] sm:$0xf]  ;;  %v10020_v18 = vor.u32 %v12882_v0, %v10017_v52  ;;  %7196 = vmatpush.bf16.msrb.mxu1 %v9764_v15  ;;  %v6969_v0 = vpop.f32.mrf.mxu3 }
 0x359   : > { %v10273_v12 = vld [vmem:[%s13911_s23 + $0xee8] sm:$0xf0] }
 0x35a   : > { %v12746_v10 = vld [vmem:[%s13911_s23 + $0x88c] sm:$0xf]  ;;  %v10276_v37 = vor.u32 %v12946_v9, %v10273_v12  ;;  %7209 = vmatpush.bf16.msrb.mxu2 %v10020_v18 }
 0x35b   : > { %v9473_v19 = vld [vmem:[%s13911_s23 + $0x8a8] sm:$0xf0] }
 0x35c   : > { %v12810_v16 = vld [vmem:[%s13911_s23 + $0xa8c] sm:$0xf]  ;;  %v9476_v58 = vor.u32 %v12746_v10, %v9473_v19  ;;  %7222 = vmatpush.bf16.msrb.mxu3 %v10276_v37 }
 0x35d   : > { %v9729_v23 = vld [vmem:[%s13911_s23 + $0xaa8] sm:$0xf0] }
 0x35e   : > { %v12874_v48 = vld [vmem:[%s13911_s23 + $0xc8c] sm:$0xf]  ;;  %v9732_v44 = vor.u32 %v12810_v16, %v9729_v23  ;;  %7184 = vmatpush.bf16.msrb.mxu0 %v9476_v58 }
 0x35f   : > { %v9985_v40 = vld [vmem:[%s13911_s23 + $0xca8] sm:$0xf0] }
 0x360   : > { %v12938_v33 = vld [vmem:[%s13911_s23 + $0xe8c] sm:$0xf]  ;;  %v9988_v46 = vor.u32 %v12874_v48, %v9985_v40  ;;  %7197 = vmatpush.bf16.msrb.mxu1 %v9732_v44 }
 0x361   : > { %v10241_v35 = vld [vmem:[%s13911_s23 + $0xea8] sm:$0xf0] }
 0x362   : > { %v12738_v47 = vld [vmem:[%s13911_s23 + $0x84c] sm:$0xf]  ;;  %v10244_v11 = vor.u32 %v12938_v33, %v10241_v35  ;;  %7210 = vmatpush.bf16.msrb.mxu2 %v9988_v46 }
 0x363   : > { %v9441_v50 = vld [vmem:[%s13911_s23 + $0x868] sm:$0xf0] }
 0x364   : > { %v12802_v53 = vld [vmem:[%s13911_s23 + $0xa4c] sm:$0xf]  ;;  %v9444_v60 = vor.u32 %v12738_v47, %v9441_v50  ;;  %7223 = vmatpush.bf16.msrb.mxu3 %v10244_v11 }
 0x365   : > { %v9697_v59 = vld [vmem:[%s13911_s23 + $0xa68] sm:$0xf0] }
 0x366   : > { %v12866_v25 = vld [vmem:[%s13911_s23 + $0xc4c] sm:$0xf]  ;;  %v9700_v62 = vor.u32 %v12802_v53, %v9697_v59  ;;  %7185 = vmatpush.bf16.msrb.mxu0 %v9444_v60 }
 0x367   : > { %v9953_v55 = vld [vmem:[%s13911_s23 + $0xc68] sm:$0xf0] }
 0x368   : > { %v12930_v49 = vld [vmem:[%s13911_s23 + $0xe4c] sm:$0xf]  ;;  %v9956_v63 = vor.u32 %v12866_v25, %v9953_v55  ;;  %7198 = vmatpush.bf16.msrb.mxu1 %v9700_v62 }
 0x369   : > { %v10209_v56 = vld [vmem:[%s13911_s23 + $0xe68] sm:$0xf0] }
 0x36a   : > { %v12730_v61 = vld [vmem:[%s13911_s23 + $0x80c] sm:$0xf]  ;;  %v10212_v4 = vor.u32 %v12930_v49, %v10209_v56  ;;  %7211 = vmatpush.bf16.msrb.mxu2 %v9956_v63 }
 0x36b   : > { %v9409_v20 = vld [vmem:[%s13911_s23 + $0x828] sm:$0xf0] }
 0x36c   : > { %v12794_v57 = vld [vmem:[%s13911_s23 + $0xa0c] sm:$0xf]  ;;  %v9412_v12 = vor.u32 %v12730_v61, %v9409_v20  ;;  %7224 = vmatpush.bf16.msrb.mxu3 %v10212_v4 }
 0x36d   : > { %v9665_v1 = vld [vmem:[%s13911_s23 + $0xa28] sm:$0xf0] }
 0x36e   : > { %v12858_v2 = vld [vmem:[%s13911_s23 + $0xc0c] sm:$0xf]  ;;  %v9668_v10 = vor.u32 %v12794_v57, %v9665_v1  ;;  %7186 = vmatpush.bf16.msrb.mxu0 %v9412_v12 }
 0x36f   : > { %v9921_v8 = vld [vmem:[%s13911_s23 + $0xc28] sm:$0xf0] }
 0x370   : > { %v12922_v17 = vld [vmem:[%s13911_s23 + $0xe0c] sm:$0xf]  ;;  %v9924_v19 = vor.u32 %v12858_v2, %v9921_v8  ;;  %7199 = vmatpush.bf16.msrb.mxu1 %v9668_v10 }
 0x371   : > { %v10177_v6 = vld [vmem:[%s13911_s23 + $0xe28] sm:$0xf0]  ;;  %7187 = vmatmul.bf16.vlgmr.msrb.gmra.mxu0 %v14108_v42 }
 0x372   : > { %v13042_v52 = vld [vmem:[%s13911_s23 + $0x11cc] sm:$0xf]  ;;  %v10180_v37 = vor.u32 %v12922_v17, %v10177_v6  ;;  %7212 = vmatpush.bf16.msrb.mxu2 %v9924_v19  ;;  %v15044_v19 = vpop.f32.mrf.mxu1 }
 0x373   : > { %v10657_v54 = vld [vmem:[%s13911_s23 + $0x11e8] sm:$0xf0]  ;;  %7200 = vmatmul.bf16.vlgmr.msrb.gmra.mxu1 %v14112_v45 }
 0x374   : > { %v13106_v9 = vld [vmem:[%s13911_s23 + $0x13cc] sm:$0xf]  ;;  %v10660_v23 = vor.u32 %v13042_v52, %v10657_v54  ;;  %7225 = vmatpush.bf16.msrb.mxu3 %v10180_v37 }
 0x375   : > { %v10913_v14 = vld [vmem:[%s13911_s23 + $0x13e8] sm:$0xf0]  ;;  %7213 = vmatmul.bf16.vlgmr.msrb.gmra.mxu2 %v14104_v39 }
 0x376   : > { %v13170_v15 = vld [vmem:[%s13911_s23 + $0x15cc] sm:$0xf]  ;;  %v10916_v48 = vor.u32 %v13106_v9, %v10913_v14  ;;  %7231 = vmatpush.bf16.msra.mxu0 %v10660_v23  ;;  %v15039_v9 = vpop.f32.mrf.mxu0 }
 0x377   : > { %v11169_v18 = vld [vmem:[%s13911_s23 + $0x15e8] sm:$0xf0]  ;;  %7226 = vmatmul.bf16.vlgmr.msrb.gmra.mxu3 %v14110_v43 }
 0x378   : > { %v13234_v16 = vld [vmem:[%s13911_s23 + $0x17cc] sm:$0xf]  ;;  %v11172_v40 = vor.u32 %v13170_v15, %v11169_v18  ;;  %7244 = vmatpush.bf16.msra.mxu1 %v10916_v48 }
 0x379   : > { %v11425_v27 = vld [vmem:[%s13911_s23 + $0x17e8] sm:$0xf0] }
 0x37a   : > { %v13034_v28 = vld [vmem:[%s13911_s23 + $0x118c] sm:$0xf]  ;;  %v11428_v35 = vor.u32 %v13234_v16, %v11425_v27  ;;  %7257 = vmatpush.bf16.msra.mxu2 %v11172_v40 }
 0x37b   : > { %v10625_v13 = vld [vmem:[%s13911_s23 + $0x11a8] sm:$0xf0] }
 0x37c   : > { %v13098_v33 = vld [vmem:[%s13911_s23 + $0x138c] sm:$0xf]  ;;  %v10628_v50 = vor.u32 %v13034_v28, %v10625_v13  ;;  %7270 = vmatpush.bf16.msra.mxu3 %v11428_v35 }
 0x37d   : > { %v10881_v58 = vld [vmem:[%s13911_s23 + $0x13a8] sm:$0xf0] }
 0x37e   : > { %v13162_v41 = vld [vmem:[%s13911_s23 + $0x158c] sm:$0xf]  ;;  %v10884_v53 = vor.u32 %v13098_v33, %v10881_v58  ;;  %7232 = vmatpush.bf16.msra.mxu0 %v10628_v50 }
 0x37f   : > { %v11137_v44 = vld [vmem:[%s13911_s23 + $0x15a8] sm:$0xf0] }
 0x380   : > { %v13226_v46 = vld [vmem:[%s13911_s23 + $0x178c] sm:$0xf]  ;;  %v11140_v51 = vor.u32 %v13162_v41, %v11137_v44  ;;  %7245 = vmatpush.bf16.msra.mxu1 %v10884_v53  ;;  %v15054_v44 = vpop.f32.mrf.mxu2 }
 0x381   : > { %v11393_v47 = vld [vmem:[%s13911_s23 + $0x17a8] sm:$0xf0] }
 0x382   : > { %v13026_v11 = vld [vmem:[%s13911_s23 + $0x114c] sm:$0xf]  ;;  %v11396_v55 = vor.u32 %v13226_v46, %v11393_v47  ;;  %7258 = vmatpush.bf16.msra.mxu2 %v11140_v51  ;;  %v15059_v51 = vpop.f32.mrf.mxu3 }
 0x383   : > { %v10593_v59 = vld [vmem:[%s13911_s23 + $0x1168] sm:$0xf0] }
 0x384   : > { %v13090_v25 = vld [vmem:[%s13911_s23 + $0x134c] sm:$0xf]  ;;  %v10596_v62 = vor.u32 %v13026_v11, %v10593_v59  ;;  %7271 = vmatpush.bf16.msra.mxu3 %v11396_v55  ;;  %v6982_v55 = vpop.f32.mrf.mxu0 }
 0x385   : > { %v10849_v49 = vld [vmem:[%s13911_s23 + $0x1368] sm:$0xf0] }
 0x386   : > { %v13154_v56 = vld [vmem:[%s13911_s23 + $0x154c] sm:$0xf]  ;;  %v10852_v63 = vor.u32 %v13090_v25, %v10849_v49  ;;  %7233 = vmatpush.bf16.msra.mxu0 %v10596_v62  ;;  %v6995_v62 = vpop.f32.mrf.mxu1 }
 0x387   : > { %v11105_v60 = vld [vmem:[%s13911_s23 + $0x1568] sm:$0xf0] }
 0x388   : > { %v13218_v61 = vld [vmem:[%s13911_s23 + $0x174c] sm:$0xf]  ;;  %v11108_v57 = vor.u32 %v13154_v56, %v11105_v60  ;;  %7246 = vmatpush.bf16.msra.mxu1 %v10852_v63 }
 0x389   : > { %v11361_v20 = vld [vmem:[%s13911_s23 + $0x1768] sm:$0xf0] }
 0x38a   : > { %v13018_v1 = vld [vmem:[%s13911_s23 + $0x110c] sm:$0xf]  ;;  %v11364_v4 = vor.u32 %v13218_v61, %v11361_v20  ;;  %7259 = vmatpush.bf16.msra.mxu2 %v11108_v57 }
 0x38b   : > { %v10561_v2 = vld [vmem:[%s13911_s23 + $0x1128] sm:$0xf0] }
 0x38c   : > { %v13082_v3 = vld [vmem:[%s13911_s23 + $0x130c] sm:$0xf]  ;;  %v10564_v54 = vor.u32 %v13018_v1, %v10561_v2  ;;  %7272 = vmatpush.bf16.msra.mxu3 %v11364_v4 }
 0x38d   : > { %v10817_v8 = vld [vmem:[%s13911_s23 + $0x1328] sm:$0xf0] }
 0x38e   : > { %v13146_v17 = vld [vmem:[%s13911_s23 + $0x150c] sm:$0xf]  ;;  %v10820_v12 = vor.u32 %v13082_v3, %v10817_v8  ;;  %7234 = vmatpush.bf16.msra.mxu0 %v10564_v54 }
 0x38f   : > { %v11073_v6 = vld [vmem:[%s13911_s23 + $0x1528] sm:$0xf0] }
 0x390   : > { %v13210_v0 = vld [vmem:[%s13911_s23 + $0x170c] sm:$0xf]  ;;  %v11076_v14 = vor.u32 %v13146_v17, %v11073_v6  ;;  %7247 = vmatpush.bf16.msra.mxu1 %v10820_v12 }
 0x391   : > { %v11329_v52 = vld [vmem:[%s13911_s23 + $0x1728] sm:$0xf0] }
 0x392   : > { %v13010_v15 = vld [vmem:[%s13911_s23 + $0x10cc] sm:$0xf]  ;;  %v11332_v16 = vor.u32 %v13210_v0, %v11329_v52  ;;  %7260 = vmatpush.bf16.msra.mxu2 %v11076_v14 }
 0x393   : > { %v10529_v18 = vld [vmem:[%s13911_s23 + $0x10e8] sm:$0xf0] }
 0x394   : > { %v13074_v10 = vld [vmem:[%s13911_s23 + $0x12cc] sm:$0xf]  ;;  %v10532_v28 = vor.u32 %v13010_v15, %v10529_v18  ;;  %7273 = vmatpush.bf16.msra.mxu3 %v11332_v16  ;;  %v7008_v15 = vpop.f32.mrf.mxu2 }
 0x395   : > { %v10785_v27 = vld [vmem:[%s13911_s23 + $0x12e8] sm:$0xf0] }
 0x396   : > { %v13138_v37 = vld [vmem:[%s13911_s23 + $0x14cc] sm:$0xf]  ;;  %v10788_v13 = vor.u32 %v13074_v10, %v10785_v27  ;;  %7235 = vmatpush.bf16.msra.mxu0 %v10532_v28 }
 0x397   : > { %v11041_v23 = vld [vmem:[%s13911_s23 + $0x14e8] sm:$0xf0] }
 0x398   : > { %v13202_v48 = vld [vmem:[%s13911_s23 + $0x16cc] sm:$0xf]  ;;  %v11044_v33 = vor.u32 %v13138_v37, %v11041_v23  ;;  %7248 = vmatpush.bf16.msra.mxu1 %v10788_v13  ;;  %v7021_v37 = vpop.f32.mrf.mxu3 }
 0x399   : > { %v11297_v40 = vld [vmem:[%s13911_s23 + $0x16e8] sm:$0xf0] }
 0x39a   : > { %v13002_v35 = vld [vmem:[%s13911_s23 + $0x108c] sm:$0xf]  ;;  %v11300_v46 = vor.u32 %v13202_v48, %v11297_v40  ;;  %7261 = vmatpush.bf16.msra.mxu2 %v11044_v33 }
 0x39b   : > { %v10497_v58 = vld [vmem:[%s13911_s23 + $0x10a8] sm:$0xf0] }
 0x39c   : > { %v13066_v41 = vld [vmem:[%s13911_s23 + $0x128c] sm:$0xf]  ;;  %v10500_v25 = vor.u32 %v13002_v35, %v10497_v58  ;;  %7274 = vmatpush.bf16.msra.mxu3 %v11300_v46 }
 0x39d   : > { %v10753_v47 = vld [vmem:[%s13911_s23 + $0x12a8] sm:$0xf0] }
 0x39e   : > { %v13130_v50 = vld [vmem:[%s13911_s23 + $0x148c] sm:$0xf]  ;;  %v10756_v49 = vor.u32 %v13066_v41, %v10753_v47  ;;  %7236 = vmatpush.bf16.msra.mxu0 %v10500_v25 }
 0x39f   : > { %v11009_v53 = vld [vmem:[%s13911_s23 + $0x14a8] sm:$0xf0] }
 0x3a0   : > { %v13194_v11 = vld [vmem:[%s13911_s23 + $0x168c] sm:$0xf]  ;;  %v11012_v56 = vor.u32 %v13130_v50, %v11009_v53  ;;  %7249 = vmatpush.bf16.msra.mxu1 %v10756_v49 }
 0x3a1   : > { %v11265_v59 = vld [vmem:[%s13911_s23 + $0x16a8] sm:$0xf0] }
 0x3a2   : > { %v12994_v60 = vld [vmem:[%s13911_s23 + $0x104c] sm:$0xf]  ;;  %v11268_v63 = vor.u32 %v13194_v11, %v11265_v59  ;;  %7262 = vmatpush.bf16.msra.mxu2 %v11012_v56 }
 0x3a3   : > { %v10465_v61 = vld [vmem:[%s13911_s23 + $0x1068] sm:$0xf0] }
 0x3a4   : > { %v13058_v20 = vld [vmem:[%s13911_s23 + $0x124c] sm:$0xf]  ;;  %v10468_v8 = vor.u32 %v12994_v60, %v10465_v61  ;;  %7275 = vmatpush.bf16.msra.mxu3 %v11268_v63 }
 0x3a5   : > { %v10721_v57 = vld [vmem:[%s13911_s23 + $0x1268] sm:$0xf0] }
 0x3a6   : > { %v13122_v1 = vld [vmem:[%s13911_s23 + $0x144c] sm:$0xf]  ;;  %v10724_v0 = vor.u32 %v13058_v20, %v10721_v57  ;;  %7237 = vmatpush.bf16.msra.mxu0 %v10468_v8 }
 0x3a7   : > { %v10977_v2 = vld [vmem:[%s13911_s23 + $0x1468] sm:$0xf0] }
 0x3a8   : > { %v13186_v3 = vld [vmem:[%s13911_s23 + $0x164c] sm:$0xf]  ;;  %v10980_v52 = vor.u32 %v13122_v1, %v10977_v2  ;;  %7250 = vmatpush.bf16.msra.mxu1 %v10724_v0 }
 0x3a9   : > { %v11233_v4 = vld [vmem:[%s13911_s23 + $0x1668] sm:$0xf0] }
 0x3aa   : > { %v12986_v17 = vld [vmem:[%s13911_s23 + $0x100c] sm:$0xf]  ;;  %v11236_v18 = vor.u32 %v13186_v3, %v11233_v4  ;;  %7263 = vmatpush.bf16.msra.mxu2 %v10980_v52 }
 0x3ab   : > { %v10433_v6 = vld [vmem:[%s13911_s23 + $0x1028] sm:$0xf0] }
 0x3ac   : > { %v13050_v54 = vld [vmem:[%s13911_s23 + $0x120c] sm:$0xf]  ;;  %v10436_v28 = vor.u32 %v12986_v17, %v10433_v6  ;;  %7276 = vmatpush.bf16.msra.mxu3 %v11236_v18 }
 0x3ad   : > { %v10689_v12 = vld [vmem:[%s13911_s23 + $0x1228] sm:$0xf0] }
 0x3ae   : > { %v13114_v14 = vld [vmem:[%s13911_s23 + $0x140c] sm:$0xf]  ;;  %v10692_v58 = vor.u32 %v13050_v54, %v10689_v12  ;;  %7238 = vmatpush.bf16.msra.mxu0 %v10436_v28  ;;  %v15113_v28 = vpop.f32.mrf.mxu0 }
 0x3af   : > { %v10945_v10 = vld [vmem:[%s13911_s23 + $0x1428] sm:$0xf0] }
 0x3b0   : > { %v13178_v16 = vld [vmem:[%s13911_s23 + $0x160c] sm:$0xf]  ;;  %v10948_v41 = vor.u32 %v13114_v14, %v10945_v10  ;;  %7251 = vmatpush.bf16.msra.mxu1 %v10692_v58  ;;  %v15117_v58 = vpop.f32.mrf.mxu1 }
 0x3b1   : > { %v11201_v27 = vld [vmem:[%s13911_s23 + $0x1628] sm:$0xf0]  ;;  %7239 = vmatmul.bf16.vlgmr.msra.gmra.mxu0 %v14179_v26 }
 0x3b2   : > { %v13298_v23 = vld [vmem:[%s13911_s23 + $0x19cc] sm:$0xf]  ;;  %v11204_v50 = vor.u32 %v13178_v16, %v11201_v27  ;;  %7264 = vmatpush.bf16.msra.mxu2 %v10948_v41 }
 0x3b3   : > { %v11681_v48 = vld [vmem:[%s13911_s23 + $0x19e8] sm:$0xf0]  ;;  %7252 = vmatmul.bf16.vlgmr.msra.gmra.mxu1 %v14186_v31 }
 0x3b4   : > { %v13362_v40 = vld [vmem:[%s13911_s23 + $0x1bcc] sm:$0xf]  ;;  %v11684_v53 = vor.u32 %v13298_v23, %v11681_v48  ;;  %7277 = vmatpush.bf16.msra.mxu3 %v11204_v50 }
 0x3b5   : > { %v11937_v13 = vld [vmem:[%s13911_s23 + $0x1be8] sm:$0xf0]  ;;  %7265 = vmatmul.bf16.vlgmr.msra.gmra.mxu2 %v14184_v30 }
 0x3b6   : > { %v13426_v33 = vld [vmem:[%s13911_s23 + $0x1dcc] sm:$0xf]  ;;  %v11940_v11 = vor.u32 %v13362_v40, %v11937_v13  ;;  %7283 = vmatpush.bf16.msrb.mxu0 %v11684_v53 }
 0x3b7   : > { %v12193_v35 = vld [vmem:[%s13911_s23 + $0x1de8] sm:$0xf0]  ;;  %7278 = vmatmul.bf16.vlgmr.msra.gmra.mxu3 %v14190_v34 }
 0x3b8   : > { %v13490_v46 = vld [vmem:[%s13911_s23 + $0x1fcc] sm:$0xf]  ;;  %v12196_v59 = vor.u32 %v13426_v33, %v12193_v35  ;;  %7296 = vmatpush.bf16.msrb.mxu1 %v11940_v11 }
 0x3b9   : > { %v12449_v47 = vld [vmem:[%s13911_s23 + $0x1fe8] sm:$0xf0] }
 0x3ba   : > { %v13290_v25 = vld [vmem:[%s13911_s23 + $0x198c] sm:$0xf]  ;;  %v12452_v56 = vor.u32 %v13490_v46, %v12449_v47  ;;  %7309 = vmatpush.bf16.msrb.mxu2 %v12196_v59 }
 0x3bb   : > { %v11649_v55 = vld [vmem:[%s13911_s23 + $0x19a8] sm:$0xf0] }
 0x3bc   : > { %v13354_v49 = vld [vmem:[%s13911_s23 + $0x1b8c] sm:$0xf]  ;;  %v11652_v57 = vor.u32 %v13290_v25, %v11649_v55  ;;  %7322 = vmatpush.bf16.msrb.mxu3 %v12452_v56 }
 0x3bd   : > { %v11905_v60 = vld [vmem:[%s13911_s23 + $0x1ba8] sm:$0xf0] }
 0x3be   : > { %v13418_v61 = vld [vmem:[%s13911_s23 + $0x1d8c] sm:$0xf]  ;;  %v11908_v1 = vor.u32 %v13354_v49, %v11905_v60  ;;  %7284 = vmatpush.bf16.msrb.mxu0 %v11652_v57 }
 0x3bf   : > { %v12161_v20 = vld [vmem:[%s13911_s23 + $0x1da8] sm:$0xf0] }
 0x3c0   : > { %v13482_v62 = vld [vmem:[%s13911_s23 + $0x1f8c] sm:$0xf]  ;;  %v12164_v2 = vor.u32 %v13418_v61, %v12161_v20  ;;  %7297 = vmatpush.bf16.msrb.mxu1 %v11908_v1  ;;  %v6981_v61 = vadd.f32 %v15039_v9, %v14985_v38 }
 0x3c1   : > { %v12417_v63 = vld [vmem:[%s13911_s23 + $0x1fa8] sm:$0xf0] }
 0x3c2   : > { %v13282_v3 = vld [vmem:[%s13911_s23 + $0x194c] sm:$0xf]  ;;  %v12420_v17 = vor.u32 %v13482_v62, %v12417_v63  ;;  %7310 = vmatpush.bf16.msrb.mxu2 %v12164_v2 }
 0x3c3   : > { %v11617_v4 = vld [vmem:[%s13911_s23 + $0x1968] sm:$0xf0] }
 0x3c4   : > { %v13346_v8 = vld [vmem:[%s13911_s23 + $0x1b4c] sm:$0xf]  ;;  %v11620_v14 = vor.u32 %v13282_v3, %v11617_v4  ;;  %7323 = vmatpush.bf16.msrb.mxu3 %v12420_v17  ;;  %v15132_v3 = vpop.f32.mrf.mxu2 }
 0x3c5   : > { %v11873_v6 = vld [vmem:[%s13911_s23 + $0x1b68] sm:$0xf0] }
 0x3c6   : > { %v13410_v0 = vld [vmem:[%s13911_s23 + $0x1d4c] sm:$0xf]  ;;  %v11876_v15 = vor.u32 %v13346_v8, %v11873_v6  ;;  %7285 = vmatpush.bf16.msrb.mxu0 %v11620_v14  ;;  %v15137_v6 = vpop.f32.mrf.mxu3 }
 0x3c7   : > { %v12129_v52 = vld [vmem:[%s13911_s23 + $0x1d68] sm:$0xf0] }
 0x3c8   : > { %v13474_v54 = vld [vmem:[%s13911_s23 + $0x1f4c] sm:$0xf]  ;;  %v12132_v18 = vor.u32 %v13410_v0, %v12129_v52  ;;  %7298 = vmatpush.bf16.msrb.mxu1 %v11876_v15  ;;  %v7034_v0 = vpop.f32.mrf.mxu0 }
 0x3c9   : > { %v12385_v12 = vld [vmem:[%s13911_s23 + $0x1f68] sm:$0xf0] }
 0x3ca   : > { %v13274_v10 = vld [vmem:[%s13911_s23 + $0x190c] sm:$0xf]  ;;  %v12388_v37 = vor.u32 %v13474_v54, %v12385_v12  ;;  %7311 = vmatpush.bf16.msrb.mxu2 %v12132_v18  ;;  %v7047_v54 = vpop.f32.mrf.mxu1  ;;  %v6994_v12 = vadd.f32 %v15044_v19, %v6981_v61  ;;  %v8871_v61 = vld [vmem:[%s13911_s23 + $0x3d0] sm:$0xf] }
 0x3cb   : > { %v11585_v16 = vld [vmem:[%s13911_s23 + $0x1928] sm:$0xf0] }
 0x3cc   : > { %v13338_v27 = vld [vmem:[%s13911_s23 + $0x1b0c] sm:$0xf]  ;;  %v11588_v35 = vor.u32 %v13274_v10, %v11585_v16  ;;  %7324 = vmatpush.bf16.msrb.mxu3 %v12388_v37 }
 0x3cd   : > { %v11841_v23 = vld [vmem:[%s13911_s23 + $0x1b28] sm:$0xf0] }
 0x3ce   : > { %v13402_v48 = vld [vmem:[%s13911_s23 + $0x1d0c] sm:$0xf]  ;;  %v11844_v41 = vor.u32 %v13338_v27, %v11841_v23  ;;  %7286 = vmatpush.bf16.msrb.mxu0 %v11588_v35 }
 0x3cf   : > { %v12097_v40 = vld [vmem:[%s13911_s23 + $0x1d28] sm:$0xf0] }
 0x3d0   : > { %v13466_v13 = vld [vmem:[%s13911_s23 + $0x1f0c] sm:$0xf]  ;;  %v12100_v46 = vor.u32 %v13402_v48, %v12097_v40  ;;  %7299 = vmatpush.bf16.msrb.mxu1 %v11844_v41  ;;  %v7007_v41 = vadd.f32 %v15054_v44, %v6994_v12  ;;  %v8615_v44 = vld [vmem:[%s13911_s23 + $0x1d0] sm:$0xf] }
 0x3d1   : > { %v12353_v33 = vld [vmem:[%s13911_s23 + $0x1f28] sm:$0xf0] }
 0x3d2   : > { %v13266_v47 = vld [vmem:[%s13911_s23 + $0x18cc] sm:$0xf]  ;;  %v12356_v11 = vor.u32 %v13466_v13, %v12353_v33  ;;  %7312 = vmatpush.bf16.msrb.mxu2 %v12100_v46 }
 0x3d3   : > { %v11553_v50 = vld [vmem:[%s13911_s23 + $0x18e8] sm:$0xf0] }
 0x3d4   : > { %v13330_v53 = vld [vmem:[%s13911_s23 + $0x1acc] sm:$0xf]  ;;  %v11556_v60 = vor.u32 %v13266_v47, %v11553_v50  ;;  %7325 = vmatpush.bf16.msrb.mxu3 %v12356_v11 }
 0x3d5   : > { %v11809_v59 = vld [vmem:[%s13911_s23 + $0x1ae8] sm:$0xf0] }
 0x3d6   : > { %v13394_v25 = vld [vmem:[%s13911_s23 + $0x1ccc] sm:$0xf]  ;;  %v11812_v20 = vor.u32 %v13330_v53, %v11809_v59  ;;  %7287 = vmatpush.bf16.msrb.mxu0 %v11556_v60  ;;  %v12535_v60 = vld [vmem:[%s13911_s23 + $0x1ec] sm:$0xf0] }
 0x3d7   : > { %v12065_v55 = vld [vmem:[%s13911_s23 + $0x1ce8] sm:$0xf0]  ;;  %v8616_v0 = vor.u32 %v12535_v60, %v8615_v44  ;;  %v12575_v60 = vld [vmem:[%s13911_s23 + $0x32c] sm:$0xf0] }
 0x3d8   : > { %v13458_v49 = vld [vmem:[%s13911_s23 + $0x1ecc] sm:$0xf]  ;;  %v12068_v62 = vor.u32 %v13394_v25, %v12065_v55  ;;  %7300 = vmatpush.bf16.msrb.mxu1 %v11812_v20  ;;  %v7073_v20 = vpop.f32.mrf.mxu3 }
 0x3d9   : > { %v12321_v56 = vld [vmem:[%s13911_s23 + $0x1ee8] sm:$0xf0]  ;;  %v12639_v20 = vld [vmem:[%s13911_s23 + $0x52c] sm:$0xf0] }
 0x3da   : > { %v13258_v63 = vld [vmem:[%s13911_s23 + $0x188c] sm:$0xf]  ;;  %v12324_v2 = vor.u32 %v13458_v49, %v12321_v56  ;;  %7313 = vmatpush.bf16.msrb.mxu2 %v12068_v62  ;;  %v7060_v56 = vpop.f32.mrf.mxu2 }
 0x3db   : > { %v11521_v57 = vld [vmem:[%s13911_s23 + $0x18a8] sm:$0xf0]  ;;  %v8775_v56 = vld [vmem:[%s13911_s23 + $0x310] sm:$0xf] }
 0x3dc   : > { %v13322_v1 = vld [vmem:[%s13911_s23 + $0x1a8c] sm:$0xf]  ;;  %v11524_v52 = vor.u32 %v13258_v63, %v11521_v57  ;;  %7326 = vmatpush.bf16.msrb.mxu3 %v12324_v2  ;;  %v12599_v63 = vld [vmem:[%s13911_s23 + $0x3ec] sm:$0xf0]  ;;  %v7020_v2 = vadd.f32 %v15059_v51, %v7007_v41 }
 0x3dd   : > { %v11777_v4 = vld [vmem:[%s13911_s23 + $0x1aa8] sm:$0xf0]  ;;  %v9127_v57 = vld [vmem:[%s13911_s23 + $0x5d0] sm:$0xf]  ;;  %v8872_v54 = vor.u32 %v12599_v63, %v8871_v61  ;;  %v7084_v63 = vpop.f32.mrf.mxu0 }
 0x3de   : > { %v13386_v8 = vld [vmem:[%s13911_s23 + $0x1c8c] sm:$0xf]  ;;  %v11780_v14 = vor.u32 %v13322_v1, %v11777_v4  ;;  %7288 = vmatpush.bf16.msrb.mxu0 %v11524_v52  ;;  %v12663_v1 = vld [vmem:[%s13911_s23 + $0x5ec] sm:$0xf0]  ;;  %v7033_v52 = vadd.f32 %v15113_v28, %v7020_v2 }
 0x3df   : > { %v12033_v17 = vld [vmem:[%s13911_s23 + $0x1ca8] sm:$0xf0]  ;;  %v9128_v12 = vor.u32 %v12663_v1, %v9127_v57  ;;  %v12527_v51 = vld [vmem:[%s13911_s23 + $0x1ac] sm:$0xf0] }
 0x3e0   : > { %v13450_v38 = vld [vmem:[%s13911_s23 + $0x1e8c] sm:$0xf]  ;;  %v12036_v15 = vor.u32 %v13386_v8, %v12033_v17  ;;  %7301 = vmatpush.bf16.msrb.mxu1 %v11780_v14  ;;  %v9383_v17 = vld [vmem:[%s13911_s23 + $0x7d0] sm:$0xf] }
 0x3e1   : > { %v12289_v9 = vld [vmem:[%s13911_s23 + $0x1ea8] sm:$0xf0]  ;;  %v8583_v14 = vld [vmem:[%s13911_s23 + $0x190] sm:$0xf] }
 0x3e2   : > { %v13250_v18 = vld [vmem:[%s13911_s23 + $0x184c] sm:$0xf]  ;;  %v12292_v27 = vor.u32 %v13450_v38, %v12289_v9  ;;  %7314 = vmatpush.bf16.msrb.mxu2 %v12036_v15  ;;  %v12727_v38 = vld [vmem:[%s13911_s23 + $0x7ec] sm:$0xf0]  ;;  %v8584_v28 = vor.u32 %v12527_v51, %v8583_v14 }
 0x3e3   : > { %v11489_v10 = vld [vmem:[%s13911_s23 + $0x1868] sm:$0xf0]  ;;  %v8839_v15 = vld [vmem:[%s13911_s23 + $0x390] sm:$0xf] }
 0x3e4   : > { %v13314_v16 = vld [vmem:[%s13911_s23 + $0x1a4c] sm:$0xf]  ;;  %v11492_v13 = vor.u32 %v13250_v18, %v11489_v10  ;;  %7327 = vmatpush.bf16.msrb.mxu3 %v12292_v27  ;;  %v9384_v18 = vor.u32 %v12727_v38, %v9383_v17  ;;  %v12591_v10 = vld [vmem:[%s13911_s23 + $0x3ac] sm:$0xf0]  ;;  %v8776_v17 = vor.u32 %v12575_v60, %v8775_v56 }
 0x3e5   : > { %v11745_v37 = vld [vmem:[%s13911_s23 + $0x1a68] sm:$0xf0]  ;;  %v12655_v27 = vld [vmem:[%s13911_s23 + $0x5ac] sm:$0xf0] }
 0x3e6   : > { %v13378_v23 = vld [vmem:[%s13911_s23 + $0x1c4c] sm:$0xf]  ;;  %v11748_v46 = vor.u32 %v13314_v16, %v11745_v37  ;;  %7289 = vmatpush.bf16.msrb.mxu0 %v11492_v13  ;;  %v9095_v16 = vld [vmem:[%s13911_s23 + $0x590] sm:$0xf] }
 0x3e7   : > { %v12001_v48 = vld [vmem:[%s13911_s23 + $0x1c68] sm:$0xf0]  ;;  %v9351_v37 = vld [vmem:[%s13911_s23 + $0x790] sm:$0xf] }
 0x3e8   : > { %v13442_v40 = vld [vmem:[%s13911_s23 + $0x1e4c] sm:$0xf]  ;;  %v12004_v47 = vor.u32 %v13378_v23, %v12001_v48  ;;  %7302 = vmatpush.bf16.msrb.mxu1 %v11748_v46  ;;  %v12719_v23 = vld [vmem:[%s13911_s23 + $0x7ac] sm:$0xf0]  ;;  %v7046_v48 = vadd.f32 %v15117_v58, %v7033_v52 }
 0x3e9   : > { %v12257_v19 = vld [vmem:[%s13911_s23 + $0x1e68] sm:$0xf0]  ;;  %v8551_v13 = vld [vmem:[%s13911_s23 + $0x150] sm:$0xf]  ;;  %v9352_v41 = vor.u32 %v12719_v23, %v9351_v37 }
 0x3ea   : > { %v13242_v33 = vld [vmem:[%s13911_s23 + $0x180c] sm:$0xf]  ;;  %v12260_v59 = vor.u32 %v13442_v40, %v12257_v19  ;;  %7315 = vmatpush.bf16.msrb.mxu2 %v12004_v47  ;;  %v8840_v40 = vor.u32 %v12591_v10, %v8839_v15  ;;  %v9096_v19 = vor.u32 %v12655_v27, %v9095_v16  ;;  %v12583_v46 = vld [vmem:[%s13911_s23 + $0x36c] sm:$0xf0]  ;;  %v7059_v58 = vadd.f32 %v15132_v3, %v7046_v48 }
 0x3eb   : > { %v11457_v35 = vld [vmem:[%s13911_s23 + $0x1828] sm:$0xf0]  ;;  %v9063_v47 = vld [vmem:[%s13911_s23 + $0x550] sm:$0xf] }
 0x3ec   : > { %v13306_v50 = vld [vmem:[%s13911_s23 + $0x1a0c] sm:$0xf]  ;;  %v11460_v62 = vor.u32 %v13242_v33, %v11457_v35  ;;  %7328 = vmatpush.bf16.msrb.mxu3 %v12260_v59  ;;  %v12519_v33 = vld [vmem:[%s13911_s23 + $0x16c] sm:$0xf0] }
 0x3ed   : > { %v11713_v53 = vld [vmem:[%s13911_s23 + $0x1a28] sm:$0xf0]  ;;  %v8807_v35 = vld [vmem:[%s13911_s23 + $0x350] sm:$0xf]  ;;  %v8552_v59 = vor.u32 %v12519_v33, %v8551_v13 }
 0x3ee   : > { %v13370_v11 = vld [vmem:[%s13911_s23 + $0x1c0c] sm:$0xf]  ;;  %v11716_v4 = vor.u32 %v13306_v50, %v11713_v53  ;;  %7290 = vmatpush.bf16.msrb.mxu0 %v11460_v62  ;;  %v12647_v50 = vld [vmem:[%s13911_s23 + $0x56c] sm:$0xf0]  ;;  %v7072_v62 = vadd.f32 %v15137_v6, %v7059_v58 }
 0x3ef   : > { %v11969_v25 = vld [vmem:[%s13911_s23 + $0x1c28] sm:$0xf0]  ;;  %v9319_v53 = vld [vmem:[%s13911_s23 + $0x750] sm:$0xf] }
 0x3f0   : > { %v13434_v55 = vld [vmem:[%s13911_s23 + $0x1e0c] sm:$0xf]  ;;  %v11972_v8 = vor.u32 %v13370_v11, %v11969_v25  ;;  %7303 = vmatpush.bf16.msrb.mxu1 %v11716_v4  ;;  %v12711_v11 = vld [vmem:[%s13911_s23 + $0x76c] sm:$0xf0]  ;;  %v8808_v25 = vor.u32 %v12583_v46, %v8807_v35  ;;  %v7097_v4 = vpop.f32.mrf.mxu1 }
 0x3f1   : > { %v12225_v49 = vld [vmem:[%s13911_s23 + $0x1e28] sm:$0xf0]  ;;  %7291 = vmatmul.bf16.vlgmr.msrb.gmra.mxu0 %v14257_v24  ;;  %v8519_v3 = vld [vmem:[%s13911_s23 + $0x110] sm:$0xf]  ;;  %v9320_v44 = vor.u32 %v12711_v11, %v9319_v53 }
 0x3f2   : > { %v12228_v9 = vor.u32 %v13434_v55, %v12225_v49  ;;  %7316 = vmatpush.bf16.msrb.mxu2 %v11972_v8  ;;  %7335 = vmatpush.bf16.msra.mxu0 %v8616_v0  ;;  %v9064_v55 = vor.u32 %v12647_v50, %v9063_v47  ;;  %v12511_v49 = vld [vmem:[%s13911_s23 + $0x12c] sm:$0xf0]  ;;  %v7085_v8 = vadd.f32 %v7084_v63, %v7072_v62  ;;  %v7086_v50 = vpop.f32.mrf.mxu0 }
 0x3f3   : > { %7304 = vmatmul.bf16.vlgmr.msrb.gmra.mxu1 %v14264_v32  ;;  %v9031_v61 = vld [vmem:[%s13911_s23 + $0x510] sm:$0xf]  ;;  %v8520_v2 = vor.u32 %v12511_v49, %v8519_v3 }
 0x3f4   : > { %7329 = vmatpush.bf16.msrb.mxu3 %v12228_v9  ;;  %7348 = vmatpush.bf16.msra.mxu1 %v8872_v54  ;;  %v9287_v57 = vld [vmem:[%s13911_s23 + $0x710] sm:$0xf]  ;;  %v9032_v38 = vor.u32 %v12639_v20, %v9031_v61  ;;  %v7098_v10 = vadd.f32 %v7097_v4, %v7085_v8 }
 0x3f5   : > { %7317 = vmatmul.bf16.vlgmr.msrb.gmra.mxu2 %v14262_v29  ;;  %v12703_v1 = vld [vmem:[%s13911_s23 + $0x72c] sm:$0xf0] }
 0x3f6   : > { %7361 = vmatpush.bf16.msra.mxu2 %v9128_v12  ;;  %7336 = vmatpush.bf16.msra.mxu0 %v8584_v28  ;;  %v8487_v9 = vld [vmem:[%s13911_s23 + $0xd0] sm:$0xf]  ;;  %v9288_v52 = vor.u32 %v12703_v1, %v9287_v57 }
 0x3f7   : > { %7330 = vmatmul.bf16.vlgmr.msrb.gmra.mxu3 %v14268_v36  ;;  %v12503_v0 = vld [vmem:[%s13911_s23 + $0xec] sm:$0xf0] }
 0x3f8   : > { %7374 = vmatpush.bf16.msra.mxu3 %v9384_v18  ;;  %7349 = vmatpush.bf16.msra.mxu1 %v8840_v40  ;;  %v8743_v6 = vld [vmem:[%s13911_s23 + $0x2d0] sm:$0xf]  ;;  %v8488_v18 = vor.u32 %v12503_v0, %v8487_v9  ;;  %v7110_v40 = vpop.f32.mrf.mxu2  ;;  %v7099_v11 = vpop.f32.mrf.mxu1 }
 0x3f9   : > { %v12567_v54 = vld [vmem:[%s13911_s23 + $0x2ec] sm:$0xf0]  ;;  %v7111_v35 = vadd.f32 %v7110_v40, %v7098_v10 }
 0x3fa   : > { %7362 = vmatpush.bf16.msra.mxu2 %v9096_v19  ;;  %7337 = vmatpush.bf16.msra.mxu0 %v8552_v59  ;;  %v8999_v12 = vld [vmem:[%s13911_s23 + $0x4d0] sm:$0xf]  ;;  %v8744_v16 = vor.u32 %v12567_v54, %v8743_v6 }
 0x3fb   : > { %v12631_v14 = vld [vmem:[%s13911_s23 + $0x4ec] sm:$0xf0] }
 0x3fc   : > { %7375 = vmatpush.bf16.msra.mxu3 %v9352_v41  ;;  %7350 = vmatpush.bf16.msra.mxu1 %v8808_v25  ;;  %v9255_v51 = vld [vmem:[%s13911_s23 + $0x6d0] sm:$0xf]  ;;  %v9000_v27 = vor.u32 %v12631_v14, %v8999_v12  ;;  %v7123_v41 = vpop.f32.mrf.mxu3 }
 0x3fd   : > { %v12695_v15 = vld [vmem:[%s13911_s23 + $0x6ec] sm:$0xf0]  ;;  %v7124_v59 = vadd.f32 %v7123_v41, %v7111_v35 }
 0x3fe   : > { %7363 = vmatpush.bf16.msra.mxu2 %v9064_v55  ;;  %7338 = vmatpush.bf16.msra.mxu0 %v8520_v2  ;;  %v8455_v37 = vld [vmem:[%s13911_s23 + $0x90] sm:$0xf]  ;;  %v9256_v48 = vor.u32 %v12695_v15, %v9255_v51 }
 0x3ff   : > { %v12495_v23 = vld [vmem:[%s13911_s23 + $0xac] sm:$0xf0] }
 0x400   : > { %7376 = vmatpush.bf16.msra.mxu3 %v9320_v44  ;;  %7351 = vmatpush.bf16.msra.mxu1 %v8776_v17  ;;  %v8711_v28 = vld [vmem:[%s13911_s23 + $0x290] sm:$0xf]  ;;  %v8456_v53 = vor.u32 %v12495_v23, %v8455_v37  ;;  %v7112_v14 = vpop.f32.mrf.mxu2 }
 0x401   : > { %v12559_v19 = vld [vmem:[%s13911_s23 + $0x2ac] sm:$0xf0] }
 0x402   : > { %7364 = vmatpush.bf16.msra.mxu2 %v9032_v38  ;;  %v8967_v13 = vld [vmem:[%s13911_s23 + $0x490] sm:$0xf]  ;;  %7339 = vmatpush.bf16.msra.mxu0 %v8488_v18  ;;  %v8712_v25 = vor.u32 %v12559_v19, %v8711_v28 }
 0x403   : > { %v12623_v33 = vld [vmem:[%s13911_s23 + $0x4ac] sm:$0xf0] }
 0x404   : > { %7377 = vmatpush.bf16.msra.mxu3 %v9288_v52  ;;  %v9223_v46 = vld [vmem:[%s13911_s23 + $0x690] sm:$0xf]  ;;  %7352 = vmatpush.bf16.msra.mxu1 %v8744_v16  ;;  %v8968_v55 = vor.u32 %v12623_v33, %v8967_v13  ;;  %v7125_v10 = vpop.f32.mrf.mxu3 }
 0x405   : > { %v12687_v47 = vld [vmem:[%s13911_s23 + $0x6ac] sm:$0xf0] }
 0x406   : > { %v289_v58 = vld [vmem:[%s13935_s11 + $0x10] sm:$0xff]  ;;  %7365 = vmatpush.bf16.msra.mxu2 %v9000_v27  ;;  %v9224_v44 = vor.u32 %v12687_v47, %v9223_v46  ;;  %7340 = vmatpush.bf16.msra.mxu0 %v8456_v53 }
 0x407   : > { %v8423_v3 = vld [vmem:[%s13911_s23 + $0x50] sm:$0xf]  ;;  %v8169_v62 = vadd.f32 %v7124_v59, %v289_v58 }
 0x408   : > { %v12487_v49 = vld [vmem:[%s13911_s23 + $0x6c] sm:$0xf0]  ;;  %7378 = vmatpush.bf16.msra.mxu3 %v9256_v48  ;;  %7353 = vmatpush.bf16.msra.mxu1 %v8712_v25 }
 0x409   : > { %v8679_v56 = vld [vmem:[%s13911_s23 + $0x250] sm:$0xf]  ;;  %v8424_v1 = vor.u32 %v12487_v49, %v8423_v3  ;;  %8177 = vst [vmem:[%s13935_s11 + $0x10] sm:$0xff] %v8169_v62 }
 0x40a   : > { %v12551_v60 = vld [vmem:[%s13911_s23 + $0x26c] sm:$0xf0]  ;;  %7366 = vmatpush.bf16.msra.mxu2 %v8968_v55 }
 0x40b   : > { %v8935_v61 = vld [vmem:[%s13911_s23 + $0x450] sm:$0xf]  ;;  %v8680_v17 = vor.u32 %v12551_v60, %v8679_v56  ;;  %7341 = vmatpush.bf16.msra.mxu0 %v8424_v1 }
 0x40c   : > { %v12615_v20 = vld [vmem:[%s13911_s23 + $0x46c] sm:$0xf0]  ;;  %7379 = vmatpush.bf16.msra.mxu3 %v9224_v44 }
 0x40d   : > { %v9191_v63 = vld [vmem:[%s13911_s23 + $0x650] sm:$0xf]  ;;  %v8936_v38 = vor.u32 %v12615_v20, %v8935_v61  ;;  %7354 = vmatpush.bf16.msra.mxu1 %v8680_v17 }
 0x40e   : > { %v12679_v57 = vld [vmem:[%s13911_s23 + $0x66c] sm:$0xf0] }
 0x40f   : > { %v8391_v2 = vld [vmem:[%s13911_s23 + $0x10] sm:$0xf]  ;;  %v9192_v6 = vor.u32 %v12679_v57, %v9191_v63  ;;  %7367 = vmatpush.bf16.msra.mxu2 %v8936_v38 }
 0x410   : > { %v12479_v4 = vld [vmem:[%s13911_s23 + $0x2c] sm:$0xf0] }
 0x411   : > { %v8647_v8 = vld [vmem:[%s13911_s23 + $0x210] sm:$0xf]  ;;  %v8392_v16 = vor.u32 %v12479_v4, %v8391_v2  ;;  %7380 = vmatpush.bf16.msra.mxu3 %v9192_v6 }
 0x412   : > { %v12543_v9 = vld [vmem:[%s13911_s23 + $0x22c] sm:$0xf0] }
 0x413   : > { %v8903_v0 = vld [vmem:[%s13911_s23 + $0x410] sm:$0xf]  ;;  %v8648_v28 = vor.u32 %v12543_v9, %v8647_v8  ;;  %7342 = vmatpush.bf16.msra.mxu0 %v8392_v16 }
 0x414   : > { %v12607_v52 = vld [vmem:[%s13911_s23 + $0x42c] sm:$0xf0] }
 0x415   : > { %v9159_v54 = vld [vmem:[%s13911_s23 + $0x610] sm:$0xf]  ;;  %v8904_v48 = vor.u32 %v12607_v52, %v8903_v0  ;;  %7355 = vmatpush.bf16.msra.mxu1 %v8648_v28  ;;  %v7149_v28 = vpop.f32.mrf.mxu1 }
 0x416   : > { %v12671_v12 = vld [vmem:[%s13911_s23 + $0x62c] sm:$0xf0]  ;;  %7343 = vmatmul.bf16.vlgmr.msra.gmra.mxu0 %v14049_v21 }
 0x417   : > { %v9639_v51 = vld [vmem:[%s13911_s23 + $0x9d0] sm:$0xf]  ;;  %v9160_v13 = vor.u32 %v12671_v12, %v9159_v54  ;;  %7368 = vmatpush.bf16.msra.mxu2 %v8904_v48 }
 0x418   : > { %v12791_v15 = vld [vmem:[%s13911_s23 + $0x9ec] sm:$0xf0]  ;;  %7356 = vmatmul.bf16.vlgmr.msra.gmra.mxu1 %v14052_v22 }
 0x419   : > { %v9895_v18 = vld [vmem:[%s13911_s23 + $0xbd0] sm:$0xf]  ;;  %v9640_v33 = vor.u32 %v12791_v15, %v9639_v51  ;;  %7381 = vmatpush.bf16.msra.mxu3 %v9160_v13 }
 0x41a   : > { %v12855_v27 = vld [vmem:[%s13911_s23 + $0xbec] sm:$0xf0]  ;;  %7369 = vmatmul.bf16.vlgmr.msra.gmra.mxu2 %v14035_v5 }
 0x41b   : > { %v10151_v37 = vld [vmem:[%s13911_s23 + $0xdd0] sm:$0xf]  ;;  %v9896_v35 = vor.u32 %v12855_v27, %v9895_v18  ;;  %7387 = vmatpush.bf16.msrb.mxu0 %v9640_v33  ;;  %v7136_v18 = vpop.f32.mrf.mxu0 }
 0x41c   : > { %v12919_v23 = vld [vmem:[%s13911_s23 + $0xdec] sm:$0xf0]  ;;  %7382 = vmatmul.bf16.vlgmr.msra.gmra.mxu3 %v14038_v7  ;;  %v7150_v33 = vadd.f32 %v7149_v28, %v7136_v18 }
 0x41d   : > { %v10407_v40 = vld [vmem:[%s13911_s23 + $0xfd0] sm:$0xf]  ;;  %v10152_v41 = vor.u32 %v12919_v23, %v10151_v37  ;;  %7400 = vmatpush.bf16.msrb.mxu1 %v9896_v35 }
 0x41e   : > { %v12983_v19 = vld [vmem:[%s13911_s23 + $0xfec] sm:$0xf0] }
 0x41f   : > { %v9607_v46 = vld [vmem:[%s13911_s23 + $0x990] sm:$0xf]  ;;  %v10408_v58 = vor.u32 %v12983_v19, %v10407_v40  ;;  %7413 = vmatpush.bf16.msrb.mxu2 %v10152_v41 }
 0x420   : > { %v12783_v47 = vld [vmem:[%s13911_s23 + $0x9ac] sm:$0xf0] }
 0x421   : > { %v9863_v50 = vld [vmem:[%s13911_s23 + $0xb90] sm:$0xf]  ;;  %v9608_v3 = vor.u32 %v12783_v47, %v9607_v46  ;;  %7426 = vmatpush.bf16.msrb.mxu3 %v10408_v58 }
 0x422   : > { %v12847_v53 = vld [vmem:[%s13911_s23 + $0xbac] sm:$0xf0] }
 0x423   : > { %v10119_v11 = vld [vmem:[%s13911_s23 + $0xd90] sm:$0xf]  ;;  %v9864_v49 = vor.u32 %v12847_v53, %v9863_v50  ;;  %7388 = vmatpush.bf16.msrb.mxu0 %v9608_v3 }
 0x424   : > { %v12911_v59 = vld [vmem:[%s13911_s23 + $0xdac] sm:$0xf0] }
 0x425   : > { %v10375_v25 = vld [vmem:[%s13911_s23 + $0xf90] sm:$0xf]  ;;  %v10120_v56 = vor.u32 %v12911_v59, %v10119_v11  ;;  %7401 = vmatpush.bf16.msrb.mxu1 %v9864_v49  ;;  %v7162_v59 = vpop.f32.mrf.mxu2 }
 0x426   : > { %v12975_v55 = vld [vmem:[%s13911_s23 + $0xfac] sm:$0xf0] }
 0x427   : > { %v9575_v44 = vld [vmem:[%s13911_s23 + $0x950] sm:$0xf]  ;;  %v10376_v20 = vor.u32 %v12975_v55, %v10375_v25  ;;  %7414 = vmatpush.bf16.msrb.mxu2 %v10120_v56  ;;  %v7163_v56 = vadd.f32 %v7162_v59, %v7150_v33 }
 0x428   : > { %v12775_v60 = vld [vmem:[%s13911_s23 + $0x96c] sm:$0xf0] }
 0x429   : > { %v9831_v61 = vld [vmem:[%s13911_s23 + $0xb50] sm:$0xf]  ;;  %v9576_v4 = vor.u32 %v12775_v60, %v9575_v44  ;;  %7427 = vmatpush.bf16.msrb.mxu3 %v10376_v20  ;;  %v7175_v44 = vpop.f32.mrf.mxu3 }
 0x42a   : > { %v12839_v62 = vld [vmem:[%s13911_s23 + $0xb6c] sm:$0xf0] }
 0x42b   : > { %v10087_v63 = vld [vmem:[%s13911_s23 + $0xd50] sm:$0xf]  ;;  %v9832_v8 = vor.u32 %v12839_v62, %v9831_v61  ;;  %7389 = vmatpush.bf16.msrb.mxu0 %v9576_v4  ;;  %v15286_v62 = vadd.f32 %v7175_v44, %v7163_v56 }
 0x42c   : > { %v12903_v57 = vld [vmem:[%s13911_s23 + $0xd6c] sm:$0xf0] }
 0x42d   : > { %v10343_v1 = vld [vmem:[%s13911_s23 + $0xf50] sm:$0xf]  ;;  %v10088_v17 = vor.u32 %v12903_v57, %v10087_v63  ;;  %7402 = vmatpush.bf16.msrb.mxu1 %v9832_v8  ;;  %v7138_v63 = vpop.f32.mrf.mxu0 }
 0x42e   : > { %v12967_v2 = vld [vmem:[%s13911_s23 + $0xf6c] sm:$0xf0] }
 0x42f   : > { %v9543_v38 = vld [vmem:[%s13911_s23 + $0x910] sm:$0xf]  ;;  %v10344_v6 = vor.u32 %v12967_v2, %v10343_v1  ;;  %7415 = vmatpush.bf16.msrb.mxu2 %v10088_v17  ;;  %v7151_v17 = vpop.f32.mrf.mxu1 }
 0x430   : > { %v12767_v9 = vld [vmem:[%s13911_s23 + $0x92c] sm:$0xf0] }
 0x431   : > { %v9799_v0 = vld [vmem:[%s13911_s23 + $0xb10] sm:$0xf]  ;;  %v9544_v15 = vor.u32 %v12767_v9, %v9543_v38  ;;  %7428 = vmatpush.bf16.msrb.mxu3 %v10344_v6 }
 0x432   : > { %v12831_v52 = vld [vmem:[%s13911_s23 + $0xb2c] sm:$0xf0] }
 0x433   : > { %v10055_v54 = vld [vmem:[%s13911_s23 + $0xd10] sm:$0xf]  ;;  %v9800_v10 = vor.u32 %v12831_v52, %v9799_v0  ;;  %7390 = vmatpush.bf16.msrb.mxu0 %v9544_v15 }
 0x434   : > { %v12895_v12 = vld [vmem:[%s13911_s23 + $0xd2c] sm:$0xf0] }
 0x435   : > { %v10311_v14 = vld [vmem:[%s13911_s23 + $0xf10] sm:$0xf]  ;;  %v10056_v16 = vor.u32 %v12895_v12, %v10055_v54  ;;  %7403 = vmatpush.bf16.msrb.mxu1 %v9800_v10 }
 0x436   : > { %v12959_v51 = vld [vmem:[%s13911_s23 + $0xf2c] sm:$0xf0] }
 0x437   : > { %v9511_v27 = vld [vmem:[%s13911_s23 + $0x8d0] sm:$0xf]  ;;  %v10312_v48 = vor.u32 %v12959_v51, %v10311_v14  ;;  %7416 = vmatpush.bf16.msrb.mxu2 %v10056_v16 }
 0x438   : > { %v12759_v37 = vld [vmem:[%s13911_s23 + $0x8ec] sm:$0xf0] }
 0x439   : > { %v9767_v23 = vld [vmem:[%s13911_s23 + $0xad0] sm:$0xf]  ;;  %v9512_v46 = vor.u32 %v12759_v37, %v9511_v27  ;;  %7429 = vmatpush.bf16.msrb.mxu3 %v10312_v48  ;;  %v7164_v37 = vpop.f32.mrf.mxu2 }
 0x43a   : > { %v12823_v40 = vld [vmem:[%s13911_s23 + $0xaec] sm:$0xf0] }
 0x43b   : > { %v10023_v19 = vld [vmem:[%s13911_s23 + $0xcd0] sm:$0xf]  ;;  %v9768_v47 = vor.u32 %v12823_v40, %v9767_v23  ;;  %7391 = vmatpush.bf16.msrb.mxu0 %v9512_v46 }
 0x43c   : > { %v12887_v13 = vld [vmem:[%s13911_s23 + $0xcec] sm:$0xf0] }
 0x43d   : > { %v10279_v35 = vld [vmem:[%s13911_s23 + $0xed0] sm:$0xf]  ;;  %v10024_v50 = vor.u32 %v12887_v13, %v10023_v19  ;;  %7404 = vmatpush.bf16.msrb.mxu1 %v9768_v47  ;;  %v7177_v19 = vpop.f32.mrf.mxu3 }
 0x43e   : > { %v12951_v41 = vld [vmem:[%s13911_s23 + $0xeec] sm:$0xf0] }
 0x43f   : > { %v9479_v58 = vld [vmem:[%s13911_s23 + $0x890] sm:$0xf]  ;;  %v10280_v25 = vor.u32 %v12951_v41, %v10279_v35  ;;  %7417 = vmatpush.bf16.msrb.mxu2 %v10024_v50 }
 0x440   : > { %v12751_v53 = vld [vmem:[%s13911_s23 + $0x8ac] sm:$0xf0] }
 0x441   : > { %v9735_v11 = vld [vmem:[%s13911_s23 + $0xa90] sm:$0xf]  ;;  %v9480_v20 = vor.u32 %v12751_v53, %v9479_v58  ;;  %7430 = vmatpush.bf16.msrb.mxu3 %v10280_v25 }
 0x442   : > { %v12815_v55 = vld [vmem:[%s13911_s23 + $0xaac] sm:$0xf0] }
 0x443   : > { %v9991_v3 = vld [vmem:[%s13911_s23 + $0xc90] sm:$0xf]  ;;  %v9736_v57 = vor.u32 %v12815_v55, %v9735_v11  ;;  %7392 = vmatpush.bf16.msrb.mxu0 %v9480_v20 }
 0x444   : > { %v12879_v49 = vld [vmem:[%s13911_s23 + $0xcac] sm:$0xf0] }
 0x445   : > { %v10247_v60 = vld [vmem:[%s13911_s23 + $0xe90] sm:$0xf]  ;;  %v9992_v1 = vor.u32 %v12879_v49, %v9991_v3  ;;  %7405 = vmatpush.bf16.msrb.mxu1 %v9736_v57 }
 0x446   : > { %v12943_v61 = vld [vmem:[%s13911_s23 + $0xeac] sm:$0xf0] }
 0x447   : > { %v9447_v2 = vld [vmem:[%s13911_s23 + $0x850] sm:$0xf]  ;;  %v10248_v38 = vor.u32 %v12943_v61, %v10247_v60  ;;  %7418 = vmatpush.bf16.msrb.mxu2 %v9992_v1 }
 0x448   : > { %v12743_v4 = vld [vmem:[%s13911_s23 + $0x86c] sm:$0xf0] }
 0x449   : > { %v9703_v8 = vld [vmem:[%s13911_s23 + $0xa50] sm:$0xf]  ;;  %v9448_v12 = vor.u32 %v12743_v4, %v9447_v2  ;;  %7431 = vmatpush.bf16.msrb.mxu3 %v10248_v38 }
 0x44a   : > { %v12807_v9 = vld [vmem:[%s13911_s23 + $0xa6c] sm:$0xf0] }
 0x44b   : > { %v9959_v0 = vld [vmem:[%s13911_s23 + $0xc50] sm:$0xf]  ;;  %v9704_v15 = vor.u32 %v12807_v9, %v9703_v8  ;;  %7393 = vmatpush.bf16.msrb.mxu0 %v9448_v12 }
 0x44c   : > { %v12871_v6 = vld [vmem:[%s13911_s23 + $0xc6c] sm:$0xf0] }
 0x44d   : > { %v10215_v52 = vld [vmem:[%s13911_s23 + $0xe50] sm:$0xf]  ;;  %v9960_v18 = vor.u32 %v12871_v6, %v9959_v0  ;;  %7406 = vmatpush.bf16.msrb.mxu1 %v9704_v15 }
 0x44e   : > { %v12935_v54 = vld [vmem:[%s13911_s23 + $0xe6c] sm:$0xf0] }
 0x44f   : > { %v9415_v14 = vld [vmem:[%s13911_s23 + $0x810] sm:$0xf]  ;;  %v10216_v23 = vor.u32 %v12935_v54, %v10215_v52  ;;  %7419 = vmatpush.bf16.msrb.mxu2 %v9960_v18 }
 0x450   : > { %v12735_v51 = vld [vmem:[%s13911_s23 + $0x82c] sm:$0xf0] }
 0x451   : > { %v9671_v10 = vld [vmem:[%s13911_s23 + $0xa10] sm:$0xf]  ;;  %v9416_v41 = vor.u32 %v12735_v51, %v9415_v14  ;;  %7432 = vmatpush.bf16.msrb.mxu3 %v10216_v23 }
 0x452   : > { %v12799_v16 = vld [vmem:[%s13911_s23 + $0xa2c] sm:$0xf0] }
 0x453   : > { %v9927_v27 = vld [vmem:[%s13911_s23 + $0xc10] sm:$0xf]  ;;  %v9672_v58 = vor.u32 %v12799_v16, %v9671_v10  ;;  %7394 = vmatpush.bf16.msrb.mxu0 %v9416_v41 }
 0x454   : > { %v12863_v28 = vld [vmem:[%s13911_s23 + $0xc2c] sm:$0xf0] }
 0x455   : > { %v10183_v48 = vld [vmem:[%s13911_s23 + $0xe10] sm:$0xf]  ;;  %v9928_v53 = vor.u32 %v12863_v28, %v9927_v27  ;;  %7407 = vmatpush.bf16.msrb.mxu1 %v9672_v58 }
 0x456   : > { %v12927_v40 = vld [vmem:[%s13911_s23 + $0xe2c] sm:$0xf0]  ;;  %7395 = vmatmul.bf16.vlgmr.msrb.gmra.mxu0 %v14108_v42 }
 0x457   : > { %v10663_v13 = vld [vmem:[%s13911_s23 + $0x11d0] sm:$0xf]  ;;  %v10184_v25 = vor.u32 %v12927_v40, %v10183_v48  ;;  %7420 = vmatpush.bf16.msrb.mxu2 %v9928_v53  ;;  %v15345_v53 = vpop.f32.mrf.mxu1 }
 0x458   : > { %v13047_v33 = vld [vmem:[%s13911_s23 + $0x11ec] sm:$0xf0]  ;;  %7408 = vmatmul.bf16.vlgmr.msrb.gmra.mxu1 %v14112_v45 }
 0x459   : > { %v10919_v35 = vld [vmem:[%s13911_s23 + $0x13d0] sm:$0xf]  ;;  %v10664_v55 = vor.u32 %v13047_v33, %v10663_v13  ;;  %7433 = vmatpush.bf16.msrb.mxu3 %v10184_v25 }
 0x45a   : > { %v13111_v46 = vld [vmem:[%s13911_s23 + $0x13ec] sm:$0xf0]  ;;  %7421 = vmatmul.bf16.vlgmr.msrb.gmra.mxu2 %v14104_v39 }
 0x45b   : > { %v11175_v47 = vld [vmem:[%s13911_s23 + $0x15d0] sm:$0xf]  ;;  %v10920_v3 = vor.u32 %v13111_v46, %v10919_v35  ;;  %7439 = vmatpush.bf16.msra.mxu0 %v10664_v55  ;;  %v15340_v35 = vpop.f32.mrf.mxu0 }
 0x45c   : > { %v13175_v50 = vld [vmem:[%s13911_s23 + $0x15ec] sm:$0xf0]  ;;  %7434 = vmatmul.bf16.vlgmr.msrb.gmra.mxu3 %v14110_v43 }
 0x45d   : > { %v11431_v11 = vld [vmem:[%s13911_s23 + $0x17d0] sm:$0xf]  ;;  %v11176_v49 = vor.u32 %v13175_v50, %v11175_v47  ;;  %7452 = vmatpush.bf16.msra.mxu1 %v10920_v3 }
 0x45e   : > { %v13239_v59 = vld [vmem:[%s13911_s23 + $0x17ec] sm:$0xf0] }
 0x45f   : > { %v10631_v56 = vld [vmem:[%s13911_s23 + $0x1190] sm:$0xf]  ;;  %v11432_v61 = vor.u32 %v13239_v59, %v11431_v11  ;;  %7465 = vmatpush.bf16.msra.mxu2 %v11176_v49 }
 0x460   : > { %v13039_v44 = vld [vmem:[%s13911_s23 + $0x11ac] sm:$0xf0] }
 0x461   : > { %v10887_v60 = vld [vmem:[%s13911_s23 + $0x1390] sm:$0xf]  ;;  %v10632_v4 = vor.u32 %v13039_v44, %v10631_v56  ;;  %7478 = vmatpush.bf16.msra.mxu3 %v11432_v61 }
 0x462   : > { %v13103_v20 = vld [vmem:[%s13911_s23 + $0x13ac] sm:$0xf0] }
 0x463   : > { %v11143_v63 = vld [vmem:[%s13911_s23 + $0x1590] sm:$0xf]  ;;  %v10888_v8 = vor.u32 %v13103_v20, %v10887_v60  ;;  %7440 = vmatpush.bf16.msra.mxu0 %v10632_v4 }
 0x464   : > { %v13167_v57 = vld [vmem:[%s13911_s23 + $0x15ac] sm:$0xf0] }
 0x465   : > { %v11399_v1 = vld [vmem:[%s13911_s23 + $0x1790] sm:$0xf]  ;;  %v11144_v17 = vor.u32 %v13167_v57, %v11143_v63  ;;  %7453 = vmatpush.bf16.msra.mxu1 %v10888_v8  ;;  %v15355_v57 = vpop.f32.mrf.mxu2 }
 0x466   : > { %v13231_v2 = vld [vmem:[%s13911_s23 + $0x17ac] sm:$0xf0] }
 0x467   : > { %v10599_v38 = vld [vmem:[%s13911_s23 + $0x1150] sm:$0xf]  ;;  %v11400_v6 = vor.u32 %v13231_v2, %v11399_v1  ;;  %7466 = vmatpush.bf16.msra.mxu2 %v11144_v17  ;;  %v15360_v17 = vpop.f32.mrf.mxu3 }
 0x468   : > { %v13031_v9 = vld [vmem:[%s13911_s23 + $0x116c] sm:$0xf0] }
 0x469   : > { %v10855_v0 = vld [vmem:[%s13911_s23 + $0x1350] sm:$0xf]  ;;  %v10600_v15 = vor.u32 %v13031_v9, %v10599_v38  ;;  %7479 = vmatpush.bf16.msra.mxu3 %v11400_v6  ;;  %v7190_v6 = vpop.f32.mrf.mxu0 }
 0x46a   : > { %v13095_v52 = vld [vmem:[%s13911_s23 + $0x136c] sm:$0xf0] }
 0x46b   : > { %v11111_v54 = vld [vmem:[%s13911_s23 + $0x1550] sm:$0xf]  ;;  %v10856_v18 = vor.u32 %v13095_v52, %v10855_v0  ;;  %7441 = vmatpush.bf16.msra.mxu0 %v10600_v15  ;;  %v7203_v15 = vpop.f32.mrf.mxu1 }
 0x46c   : > { %v13159_v12 = vld [vmem:[%s13911_s23 + $0x156c] sm:$0xf0] }
 0x46d   : > { %v11367_v14 = vld [vmem:[%s13911_s23 + $0x1750] sm:$0xf]  ;;  %v11112_v10 = vor.u32 %v13159_v12, %v11111_v54  ;;  %7454 = vmatpush.bf16.msra.mxu1 %v10856_v18 }
 0x46e   : > { %v13223_v51 = vld [vmem:[%s13911_s23 + $0x176c] sm:$0xf0] }
 0x46f   : > { %v10567_v16 = vld [vmem:[%s13911_s23 + $0x1110] sm:$0xf]  ;;  %v11368_v23 = vor.u32 %v13223_v51, %v11367_v14  ;;  %7467 = vmatpush.bf16.msra.mxu2 %v11112_v10 }
 0x470   : > { %v13023_v27 = vld [vmem:[%s13911_s23 + $0x112c] sm:$0xf0] }
 0x471   : > { %v10823_v37 = vld [vmem:[%s13911_s23 + $0x1310] sm:$0xf]  ;;  %v10568_v33 = vor.u32 %v13023_v27, %v10567_v16  ;;  %7480 = vmatpush.bf16.msra.mxu3 %v11368_v23 }
 0x472   : > { %v13087_v28 = vld [vmem:[%s13911_s23 + $0x132c] sm:$0xf0] }
 0x473   : > { %v11079_v48 = vld [vmem:[%s13911_s23 + $0x1510] sm:$0xf]  ;;  %v10824_v41 = vor.u32 %v13087_v28, %v10823_v37  ;;  %7442 = vmatpush.bf16.msra.mxu0 %v10568_v33 }
 0x474   : > { %v13151_v40 = vld [vmem:[%s13911_s23 + $0x152c] sm:$0xf0] }
 0x475   : > { %v11335_v19 = vld [vmem:[%s13911_s23 + $0x1710] sm:$0xf]  ;;  %v11080_v46 = vor.u32 %v13151_v40, %v11079_v48  ;;  %7455 = vmatpush.bf16.msra.mxu1 %v10824_v41 }
 0x476   : > { %v13215_v13 = vld [vmem:[%s13911_s23 + $0x172c] sm:$0xf0] }
 0x477   : > { %v10535_v47 = vld [vmem:[%s13911_s23 + $0x10d0] sm:$0xf]  ;;  %v11336_v11 = vor.u32 %v13215_v13, %v11335_v19  ;;  %7468 = vmatpush.bf16.msra.mxu2 %v11080_v46 }
 0x478   : > { %v13015_v50 = vld [vmem:[%s13911_s23 + $0x10ec] sm:$0xf0] }
 0x479   : > { %v10791_v58 = vld [vmem:[%s13911_s23 + $0x12d0] sm:$0xf]  ;;  %v10536_v56 = vor.u32 %v13015_v50, %v10535_v47  ;;  %7481 = vmatpush.bf16.msra.mxu3 %v11336_v11  ;;  %v7216_v47 = vpop.f32.mrf.mxu2 }
 0x47a   : > { %v13079_v59 = vld [vmem:[%s13911_s23 + $0x12ec] sm:$0xf0] }
 0x47b   : > { %v11047_v25 = vld [vmem:[%s13911_s23 + $0x14d0] sm:$0xf]  ;;  %v10792_v44 = vor.u32 %v13079_v59, %v10791_v58  ;;  %7443 = vmatpush.bf16.msra.mxu0 %v10536_v56 }
 0x47c   : > { %v13143_v55 = vld [vmem:[%s13911_s23 + $0x14ec] sm:$0xf0] }
 0x47d   : > { %v11303_v3 = vld [vmem:[%s13911_s23 + $0x16d0] sm:$0xf]  ;;  %v11048_v60 = vor.u32 %v13143_v55, %v11047_v25  ;;  %7456 = vmatpush.bf16.msra.mxu1 %v10792_v44  ;;  %v7229_v25 = vpop.f32.mrf.mxu3 }
 0x47e   : > { %v13207_v49 = vld [vmem:[%s13911_s23 + $0x16ec] sm:$0xf0] }
 0x47f   : > { %v10503_v61 = vld [vmem:[%s13911_s23 + $0x1090] sm:$0xf]  ;;  %v11304_v1 = vor.u32 %v13207_v49, %v11303_v3  ;;  %7469 = vmatpush.bf16.msra.mxu2 %v11048_v60 }
 0x480   : > { %v13007_v20 = vld [vmem:[%s13911_s23 + $0x10ac] sm:$0xf0] }
 0x481   : > { %v10759_v63 = vld [vmem:[%s13911_s23 + $0x1290] sm:$0xf]  ;;  %v10504_v0 = vor.u32 %v13007_v20, %v10503_v61  ;;  %7482 = vmatpush.bf16.msra.mxu3 %v11304_v1 }
 0x482   : > { %v13071_v2 = vld [vmem:[%s13911_s23 + $0x12ac] sm:$0xf0] }
 0x483   : > { %v11015_v4 = vld [vmem:[%s13911_s23 + $0x1490] sm:$0xf]  ;;  %v10760_v52 = vor.u32 %v13071_v2, %v10759_v63  ;;  %7444 = vmatpush.bf16.msra.mxu0 %v10504_v0 }
 0x484   : > { %v13135_v8 = vld [vmem:[%s13911_s23 + $0x14ac] sm:$0xf0] }
 0x485   : > { %v11271_v38 = vld [vmem:[%s13911_s23 + $0x1690] sm:$0xf]  ;;  %v11016_v54 = vor.u32 %v13135_v8, %v11015_v4  ;;  %7457 = vmatpush.bf16.msra.mxu1 %v10760_v52 }
 0x486   : > { %v13199_v9 = vld [vmem:[%s13911_s23 + $0x16ac] sm:$0xf0] }
 0x487   : > { %v10471_v12 = vld [vmem:[%s13911_s23 + $0x1050] sm:$0xf]  ;;  %v11272_v18 = vor.u32 %v13199_v9, %v11271_v38  ;;  %7470 = vmatpush.bf16.msra.mxu2 %v11016_v54 }
 0x488   : > { %v12999_v14 = vld [vmem:[%s13911_s23 + $0x106c] sm:$0xf0] }
 0x489   : > { %v10727_v51 = vld [vmem:[%s13911_s23 + $0x1250] sm:$0xf]  ;;  %v10472_v28 = vor.u32 %v12999_v14, %v10471_v12  ;;  %7483 = vmatpush.bf16.msra.mxu3 %v11272_v18 }
 0x48a   : > { %v13063_v10 = vld [vmem:[%s13911_s23 + $0x126c] sm:$0xf0] }
 0x48b   : > { %v10983_v16 = vld [vmem:[%s13911_s23 + $0x1450] sm:$0xf]  ;;  %v10728_v19 = vor.u32 %v13063_v10, %v10727_v51  ;;  %7445 = vmatpush.bf16.msra.mxu0 %v10472_v28 }
 0x48c   : > { %v13127_v27 = vld [vmem:[%s13911_s23 + $0x146c] sm:$0xf0] }
 0x48d   : > { %v11239_v37 = vld [vmem:[%s13911_s23 + $0x1650] sm:$0xf]  ;;  %v10984_v13 = vor.u32 %v13127_v27, %v10983_v16  ;;  %7458 = vmatpush.bf16.msra.mxu1 %v10728_v19 }
 0x48e   : > { %v13191_v23 = vld [vmem:[%s13911_s23 + $0x166c] sm:$0xf0] }
 0x48f   : > { %v10439_v48 = vld [vmem:[%s13911_s23 + $0x1010] sm:$0xf]  ;;  %v11240_v50 = vor.u32 %v13191_v23, %v11239_v37  ;;  %7471 = vmatpush.bf16.msra.mxu2 %v10984_v13 }
 0x490   : > { %v12991_v40 = vld [vmem:[%s13911_s23 + $0x102c] sm:$0xf0] }
 0x491   : > { %v10695_v33 = vld [vmem:[%s13911_s23 + $0x1210] sm:$0xf]  ;;  %v10440_v56 = vor.u32 %v12991_v40, %v10439_v48  ;;  %7484 = vmatpush.bf16.msra.mxu3 %v11240_v50 }
 0x492   : > { %v13055_v41 = vld [vmem:[%s13911_s23 + $0x122c] sm:$0xf0] }
 0x493   : > { %v10951_v46 = vld [vmem:[%s13911_s23 + $0x1410] sm:$0xf]  ;;  %v10696_v20 = vor.u32 %v13055_v41, %v10695_v33  ;;  %7446 = vmatpush.bf16.msra.mxu0 %v10440_v56  ;;  %v15414_v56 = vpop.f32.mrf.mxu0 }
 0x494   : > { %v13119_v58 = vld [vmem:[%s13911_s23 + $0x142c] sm:$0xf0] }
 0x495   : > { %v11207_v11 = vld [vmem:[%s13911_s23 + $0x1610] sm:$0xf]  ;;  %v10952_v63 = vor.u32 %v13119_v58, %v10951_v46  ;;  %7459 = vmatpush.bf16.msra.mxu1 %v10696_v20  ;;  %v15418_v20 = vpop.f32.mrf.mxu1 }
 0x496   : > { %v13183_v59 = vld [vmem:[%s13911_s23 + $0x162c] sm:$0xf0]  ;;  %7447 = vmatmul.bf16.vlgmr.msra.gmra.mxu0 %v14179_v26 }
 0x497   : > { %v11687_v55 = vld [vmem:[%s13911_s23 + $0x19d0] sm:$0xf]  ;;  %v11208_v4 = vor.u32 %v13183_v59, %v11207_v11  ;;  %7472 = vmatpush.bf16.msra.mxu2 %v10952_v63 }
 0x498   : > { %v13303_v3 = vld [vmem:[%s13911_s23 + $0x19ec] sm:$0xf0]  ;;  %7460 = vmatmul.bf16.vlgmr.msra.gmra.mxu1 %v14186_v31 }
 0x499   : > { %v11943_v49 = vld [vmem:[%s13911_s23 + $0x1bd0] sm:$0xf]  ;;  %v11688_v8 = vor.u32 %v13303_v3, %v11687_v55  ;;  %7485 = vmatpush.bf16.msra.mxu3 %v11208_v4 }
 0x49a   : > { %v13367_v44 = vld [vmem:[%s13911_s23 + $0x1bec] sm:$0xf0]  ;;  %7473 = vmatmul.bf16.vlgmr.msra.gmra.mxu2 %v14184_v30 }
 0x49b   : > { %v12199_v60 = vld [vmem:[%s13911_s23 + $0x1dd0] sm:$0xf]  ;;  %v11944_v38 = vor.u32 %v13367_v44, %v11943_v49  ;;  %7491 = vmatpush.bf16.msrb.mxu0 %v11688_v8 }
 0x49c   : > { %v13431_v61 = vld [vmem:[%s13911_s23 + $0x1dec] sm:$0xf0]  ;;  %7486 = vmatmul.bf16.vlgmr.msra.gmra.mxu3 %v14190_v34 }
 0x49d   : > { %v12455_v1 = vld [vmem:[%s13911_s23 + $0x1fd0] sm:$0xf]  ;;  %v12200_v9 = vor.u32 %v13431_v61, %v12199_v60  ;;  %7504 = vmatpush.bf16.msrb.mxu1 %v11944_v38 }
 0x49e   : > { %v13495_v2 = vld [vmem:[%s13911_s23 + $0x1fec] sm:$0xf0] }
 0x49f   : > { %v11655_v0 = vld [vmem:[%s13911_s23 + $0x1990] sm:$0xf]  ;;  %v12456_v54 = vor.u32 %v13495_v2, %v12455_v1  ;;  %7517 = vmatpush.bf16.msrb.mxu2 %v12200_v9 }
 0x4a0   : > { %v13295_v6 = vld [vmem:[%s13911_s23 + $0x19ac] sm:$0xf0] }
 0x4a1   : > { %v11911_v52 = vld [vmem:[%s13911_s23 + $0x1b90] sm:$0xf]  ;;  %v11656_v10 = vor.u32 %v13295_v6, %v11655_v0  ;;  %7530 = vmatpush.bf16.msrb.mxu3 %v12456_v54 }
 0x4a2   : > { %v13359_v12 = vld [vmem:[%s13911_s23 + $0x1bac] sm:$0xf0] }
 0x4a3   : > { %v12167_v14 = vld [vmem:[%s13911_s23 + $0x1d90] sm:$0xf]  ;;  %v11912_v16 = vor.u32 %v13359_v12, %v11911_v52  ;;  %7492 = vmatpush.bf16.msrb.mxu0 %v11656_v10 }
 0x4a4   : > { %v13423_v51 = vld [vmem:[%s13911_s23 + $0x1dac] sm:$0xf0] }
 0x4a5   : > { %v12423_v15 = vld [vmem:[%s13911_s23 + $0x1f90] sm:$0xf]  ;;  %v12168_v27 = vor.u32 %v13423_v51, %v12167_v14  ;;  %7505 = vmatpush.bf16.msrb.mxu1 %v11912_v16  ;;  %v7189_v14 = vadd.f32 %v15340_v35, %v15286_v62 }
 0x4a6   : > { %v13487_v18 = vld [vmem:[%s13911_s23 + $0x1fac] sm:$0xf0] }
 0x4a7   : > { %v11623_v37 = vld [vmem:[%s13911_s23 + $0x1950] sm:$0xf]  ;;  %v12424_v48 = vor.u32 %v13487_v18, %v12423_v15  ;;  %7518 = vmatpush.bf16.msrb.mxu2 %v12168_v27 }
 0x4a8   : > { %v13287_v23 = vld [vmem:[%s13911_s23 + $0x196c] sm:$0xf0] }
 0x4a9   : > { %v11879_v28 = vld [vmem:[%s13911_s23 + $0x1b50] sm:$0xf]  ;;  %v11624_v46 = vor.u32 %v13287_v23, %v11623_v37  ;;  %7531 = vmatpush.bf16.msrb.mxu3 %v12424_v48  ;;  %v15433_v37 = vpop.f32.mrf.mxu2 }
 0x4aa   : > { %v13351_v40 = vld [vmem:[%s13911_s23 + $0x1b6c] sm:$0xf0] }
 0x4ab   : > { %v12135_v19 = vld [vmem:[%s13911_s23 + $0x1d50] sm:$0xf]  ;;  %v11880_v47 = vor.u32 %v13351_v40, %v11879_v28  ;;  %7493 = vmatpush.bf16.msrb.mxu0 %v11624_v46  ;;  %v15438_v40 = vpop.f32.mrf.mxu3 }
 0x4ac   : > { %v13415_v13 = vld [vmem:[%s13911_s23 + $0x1d6c] sm:$0xf0] }
 0x4ad   : > { %v12391_v33 = vld [vmem:[%s13911_s23 + $0x1f50] sm:$0xf]  ;;  %v12136_v50 = vor.u32 %v13415_v13, %v12135_v19  ;;  %7506 = vmatpush.bf16.msrb.mxu1 %v11880_v47  ;;  %v7242_v19 = vpop.f32.mrf.mxu0 }
 0x4ae   : > { %v13479_v41 = vld [vmem:[%s13911_s23 + $0x1f6c] sm:$0xf0] }
 0x4af   : > { %v11591_v58 = vld [vmem:[%s13911_s23 + $0x1910] sm:$0xf]  ;;  %v12392_v25 = vor.u32 %v13479_v41, %v12391_v33  ;;  %7519 = vmatpush.bf16.msrb.mxu2 %v12136_v50  ;;  %v7255_v33 = vpop.f32.mrf.mxu1  ;;  %v7202_v41 = vadd.f32 %v15345_v53, %v7189_v14  ;;  %v12595_v14 = vld [vmem:[%s13911_s23 + $0x3d4] sm:$0xf] }
 0x4b0   : > { %v13279_v11 = vld [vmem:[%s13911_s23 + $0x192c] sm:$0xf0] }
 0x4b1   : > { %v11847_v59 = vld [vmem:[%s13911_s23 + $0x1b10] sm:$0xf]  ;;  %v11592_v61 = vor.u32 %v13279_v11, %v11591_v58  ;;  %7532 = vmatpush.bf16.msrb.mxu3 %v12392_v25 }
 0x4b2   : > { %v13343_v55 = vld [vmem:[%s13911_s23 + $0x1b2c] sm:$0xf0] }
 0x4b3   : > { %v12103_v3 = vld [vmem:[%s13911_s23 + $0x1d10] sm:$0xf]  ;;  %v11848_v63 = vor.u32 %v13343_v55, %v11847_v59  ;;  %7494 = vmatpush.bf16.msrb.mxu0 %v11592_v61 }
 0x4b4   : > { %v13407_v49 = vld [vmem:[%s13911_s23 + $0x1d2c] sm:$0xf0] }
 0x4b5   : > { %v12359_v44 = vld [vmem:[%s13911_s23 + $0x1f10] sm:$0xf]  ;;  %v12104_v1 = vor.u32 %v13407_v49, %v12103_v3  ;;  %7507 = vmatpush.bf16.msrb.mxu1 %v11848_v63  ;;  %v7215_v63 = vadd.f32 %v15355_v57, %v7202_v41  ;;  %v12531_v57 = vld [vmem:[%s13911_s23 + $0x1d4] sm:$0xf] }
 0x4b6   : > { %v13471_v60 = vld [vmem:[%s13911_s23 + $0x1f2c] sm:$0xf0] }
 0x4b7   : > { %v11559_v2 = vld [vmem:[%s13911_s23 + $0x18d0] sm:$0xf]  ;;  %v12360_v38 = vor.u32 %v13471_v60, %v12359_v44  ;;  %7520 = vmatpush.bf16.msrb.mxu2 %v12104_v1 }
 0x4b8   : > { %v13271_v4 = vld [vmem:[%s13911_s23 + $0x18ec] sm:$0xf0] }
 0x4b9   : > { %v11815_v8 = vld [vmem:[%s13911_s23 + $0x1ad0] sm:$0xf]  ;;  %v11560_v12 = vor.u32 %v13271_v4, %v11559_v2  ;;  %7533 = vmatpush.bf16.msrb.mxu3 %v12360_v38 }
 0x4ba   : > { %v13335_v9 = vld [vmem:[%s13911_s23 + $0x1aec] sm:$0xf0] }
 0x4bb   : > { %v12071_v0 = vld [vmem:[%s13911_s23 + $0x1cd0] sm:$0xf]  ;;  %v11816_v51 = vor.u32 %v13335_v9, %v11815_v8  ;;  %7495 = vmatpush.bf16.msrb.mxu0 %v11560_v12  ;;  %v8617_v12 = vld [vmem:[%s13911_s23 + $0x1f0] sm:$0xf0] }
 0x4bc   : > { %v13399_v6 = vld [vmem:[%s13911_s23 + $0x1cec] sm:$0xf0]  ;;  %v8620_v19 = vor.u32 %v12531_v57, %v8617_v12  ;;  %v8777_v12 = vld [vmem:[%s13911_s23 + $0x330] sm:$0xf0] }
 0x4bd   : > { %v12327_v52 = vld [vmem:[%s13911_s23 + $0x1ed0] sm:$0xf]  ;;  %v12072_v15 = vor.u32 %v13399_v6, %v12071_v0  ;;  %7508 = vmatpush.bf16.msrb.mxu1 %v11816_v51  ;;  %v7281_v51 = vpop.f32.mrf.mxu3 }
 0x4be   : > { %v13463_v54 = vld [vmem:[%s13911_s23 + $0x1eec] sm:$0xf0]  ;;  %v9033_v51 = vld [vmem:[%s13911_s23 + $0x530] sm:$0xf0] }
 0x4bf   : > { %v11527_v18 = vld [vmem:[%s13911_s23 + $0x1890] sm:$0xf]  ;;  %v12328_v27 = vor.u32 %v13463_v54, %v12327_v52  ;;  %7521 = vmatpush.bf16.msrb.mxu2 %v12072_v15  ;;  %v7268_v54 = vpop.f32.mrf.mxu2 }
 0x4c0   : > { %v13263_v10 = vld [vmem:[%s13911_s23 + $0x18ac] sm:$0xf0]  ;;  %v12571_v54 = vld [vmem:[%s13911_s23 + $0x314] sm:$0xf] }
 0x4c1   : > { %v11783_v16 = vld [vmem:[%s13911_s23 + $0x1a90] sm:$0xf]  ;;  %v11528_v13 = vor.u32 %v13263_v10, %v11527_v18  ;;  %7534 = vmatpush.bf16.msrb.mxu3 %v12328_v27  ;;  %v8873_v18 = vld [vmem:[%s13911_s23 + $0x3f0] sm:$0xf0]  ;;  %v7228_v27 = vadd.f32 %v15360_v17, %v7215_v63 }
 0x4c2   : > { %v13327_v23 = vld [vmem:[%s13911_s23 + $0x1aac] sm:$0xf0]  ;;  %v12659_v10 = vld [vmem:[%s13911_s23 + $0x5d4] sm:$0xf]  ;;  %v8876_v33 = vor.u32 %v12595_v14, %v8873_v18  ;;  %v7292_v18 = vpop.f32.mrf.mxu0 }
 0x4c3   : > { %v12039_v28 = vld [vmem:[%s13911_s23 + $0x1c90] sm:$0xf]  ;;  %v11784_v46 = vor.u32 %v13327_v23, %v11783_v16  ;;  %7496 = vmatpush.bf16.msrb.mxu0 %v11528_v13  ;;  %v9129_v16 = vld [vmem:[%s13911_s23 + $0x5f0] sm:$0xf0]  ;;  %v7241_v13 = vadd.f32 %v15414_v56, %v7228_v27 }
 0x4c4   : > { %v13391_v48 = vld [vmem:[%s13911_s23 + $0x1cac] sm:$0xf0]  ;;  %v9132_v41 = vor.u32 %v12659_v10, %v9129_v16  ;;  %v8585_v17 = vld [vmem:[%s13911_s23 + $0x1b0] sm:$0xf0] }
 0x4c5   : > { %v12295_v62 = vld [vmem:[%s13911_s23 + $0x1e90] sm:$0xf]  ;;  %v12040_v47 = vor.u32 %v13391_v48, %v12039_v28  ;;  %7509 = vmatpush.bf16.msrb.mxu1 %v11784_v46  ;;  %v12723_v48 = vld [vmem:[%s13911_s23 + $0x7d4] sm:$0xf] }
 0x4c6   : > { %v13455_v35 = vld [vmem:[%s13911_s23 + $0x1eac] sm:$0xf0]  ;;  %v12523_v46 = vld [vmem:[%s13911_s23 + $0x194] sm:$0xf] }
 0x4c7   : > { %v11495_v50 = vld [vmem:[%s13911_s23 + $0x1850] sm:$0xf]  ;;  %v12296_v59 = vor.u32 %v13455_v35, %v12295_v62  ;;  %7522 = vmatpush.bf16.msrb.mxu2 %v12040_v47  ;;  %v9385_v62 = vld [vmem:[%s13911_s23 + $0x7f0] sm:$0xf0]  ;;  %v8588_v56 = vor.u32 %v12523_v46, %v8585_v17 }
 0x4c8   : > { %v13255_v58 = vld [vmem:[%s13911_s23 + $0x186c] sm:$0xf0]  ;;  %v12587_v47 = vld [vmem:[%s13911_s23 + $0x394] sm:$0xf] }
 0x4c9   : > { %v11751_v11 = vld [vmem:[%s13911_s23 + $0x1a50] sm:$0xf]  ;;  %v11496_v44 = vor.u32 %v13255_v58, %v11495_v50  ;;  %7535 = vmatpush.bf16.msrb.mxu3 %v12296_v59  ;;  %v9388_v50 = vor.u32 %v12723_v48, %v9385_v62  ;;  %v8841_v58 = vld [vmem:[%s13911_s23 + $0x3b0] sm:$0xf0]  ;;  %v8780_v48 = vor.u32 %v12571_v54, %v8777_v12 }
 0x4ca   : > { %v13319_v25 = vld [vmem:[%s13911_s23 + $0x1a6c] sm:$0xf0]  ;;  %v9097_v59 = vld [vmem:[%s13911_s23 + $0x5b0] sm:$0xf0] }
 0x4cb   : > { %v12007_v55 = vld [vmem:[%s13911_s23 + $0x1c50] sm:$0xf]  ;;  %v11752_v1 = vor.u32 %v13319_v25, %v11751_v11  ;;  %7497 = vmatpush.bf16.msrb.mxu0 %v11496_v44  ;;  %v12651_v11 = vld [vmem:[%s13911_s23 + $0x594] sm:$0xf] }
 0x4cc   : > { %v13383_v3 = vld [vmem:[%s13911_s23 + $0x1c6c] sm:$0xf0]  ;;  %v12715_v25 = vld [vmem:[%s13911_s23 + $0x794] sm:$0xf] }
 0x4cd   : > { %v12263_v49 = vld [vmem:[%s13911_s23 + $0x1e50] sm:$0xf]  ;;  %v12008_v2 = vor.u32 %v13383_v3, %v12007_v55  ;;  %7510 = vmatpush.bf16.msrb.mxu1 %v11752_v1  ;;  %v9353_v55 = vld [vmem:[%s13911_s23 + $0x7b0] sm:$0xf0]  ;;  %v7254_v3 = vadd.f32 %v15418_v20, %v7241_v13 }
 0x4ce   : > { %v13447_v53 = vld [vmem:[%s13911_s23 + $0x1e6c] sm:$0xf0]  ;;  %v12515_v44 = vld [vmem:[%s13911_s23 + $0x154] sm:$0xf]  ;;  %v9356_v63 = vor.u32 %v12715_v25, %v9353_v55 }
 0x4cf   : > { %v11463_v60 = vld [vmem:[%s13911_s23 + $0x1810] sm:$0xf]  ;;  %v12264_v9 = vor.u32 %v13447_v53, %v12263_v49  ;;  %7523 = vmatpush.bf16.msrb.mxu2 %v12008_v2  ;;  %v8844_v49 = vor.u32 %v12587_v47, %v8841_v58  ;;  %v9100_v53 = vor.u32 %v12651_v11, %v9097_v59  ;;  %v8809_v1 = vld [vmem:[%s13911_s23 + $0x370] sm:$0xf0]  ;;  %v7267_v20 = vadd.f32 %v15433_v37, %v7254_v3 }
 0x4d0   : > { %v13247_v61 = vld [vmem:[%s13911_s23 + $0x182c] sm:$0xf0]  ;;  %v12643_v2 = vld [vmem:[%s13911_s23 + $0x554] sm:$0xf] }
 0x4d1   : > { %v11719_v4 = vld [vmem:[%s13911_s23 + $0x1a10] sm:$0xf]  ;;  %v11464_v15 = vor.u32 %v13247_v61, %v11463_v60  ;;  %7536 = vmatpush.bf16.msrb.mxu3 %v12264_v9  ;;  %v8553_v60 = vld [vmem:[%s13911_s23 + $0x170] sm:$0xf0] }
 0x4d2   : > { %v13311_v8 = vld [vmem:[%s13911_s23 + $0x1a2c] sm:$0xf0]  ;;  %v12579_v61 = vld [vmem:[%s13911_s23 + $0x354] sm:$0xf]  ;;  %v8556_v9 = vor.u32 %v12515_v44, %v8553_v60 }
 0x4d3   : > { %v11975_v38 = vld [vmem:[%s13911_s23 + $0x1c10] sm:$0xf]  ;;  %v11720_v23 = vor.u32 %v13311_v8, %v11719_v4  ;;  %7498 = vmatpush.bf16.msrb.mxu0 %v11464_v15  ;;  %v9065_v4 = vld [vmem:[%s13911_s23 + $0x570] sm:$0xf0]  ;;  %v7280_v15 = vadd.f32 %v15438_v40, %v7267_v20  ;;  %v290_v20 = vld [vmem:[%s13935_s11 + $0x18] sm:$0xff] }
 0x4d4   : > { %v13375_v0 = vld [vmem:[%s13911_s23 + $0x1c2c] sm:$0xf0]  ;;  %v12707_v8 = vld [vmem:[%s13911_s23 + $0x754] sm:$0xf] }
 0x4d5   : > { %v12231_v6 = vld [vmem:[%s13911_s23 + $0x1e10] sm:$0xf]  ;;  %v11976_v28 = vor.u32 %v13375_v0, %v11975_v38  ;;  %7511 = vmatpush.bf16.msrb.mxu1 %v11720_v23  ;;  %v9321_v38 = vld [vmem:[%s13911_s23 + $0x770] sm:$0xf0]  ;;  %v8812_v0 = vor.u32 %v12579_v61, %v8809_v1  ;;  %v7305_v23 = vpop.f32.mrf.mxu1 }
 0x4d6   : > { %v13439_v52 = vld [vmem:[%s13911_s23 + $0x1e2c] sm:$0xf0]  ;;  %7499 = vmatmul.bf16.vlgmr.msrb.gmra.mxu0 %v14257_v24  ;;  %v12507_v37 = vld [vmem:[%s13911_s23 + $0x114] sm:$0xf]  ;;  %v9324_v57 = vor.u32 %v12707_v8, %v9321_v38 }
 0x4d7   : > { %v12232_v35 = vor.u32 %v13439_v52, %v12231_v6  ;;  %7524 = vmatpush.bf16.msrb.mxu2 %v11976_v28  ;;  %7543 = vmatpush.bf16.msra.mxu0 %v8620_v19  ;;  %v9068_v6 = vor.u32 %v12643_v2, %v9065_v4  ;;  %v8521_v52 = vld [vmem:[%s13911_s23 + $0x130] sm:$0xf0]  ;;  %v7293_v28 = vadd.f32 %v7292_v18, %v7280_v15  ;;  %v7294_v4 = vpop.f32.mrf.mxu0 }
 0x4d8   : > { %7512 = vmatmul.bf16.vlgmr.msrb.gmra.mxu1 %v14264_v32  ;;  %v12635_v14 = vld [vmem:[%s13911_s23 + $0x514] sm:$0xf]  ;;  %v8524_v27 = vor.u32 %v12507_v37, %v8521_v52 }
 0x4d9   : > { %7537 = vmatpush.bf16.msrb.mxu3 %v12232_v35  ;;  %7556 = vmatpush.bf16.msra.mxu1 %v8876_v33  ;;  %v12699_v10 = vld [vmem:[%s13911_s23 + $0x714] sm:$0xf]  ;;  %v9036_v62 = vor.u32 %v12635_v14, %v9033_v51  ;;  %v7306_v58 = vadd.f32 %v7305_v23, %v7293_v28 }
 0x4da   : > { %7525 = vmatmul.bf16.vlgmr.msrb.gmra.mxu2 %v14262_v29  ;;  %v9289_v16 = vld [vmem:[%s13911_s23 + $0x730] sm:$0xf0] }
 0x4db   : > { %7569 = vmatpush.bf16.msra.mxu2 %v9132_v41  ;;  %7544 = vmatpush.bf16.msra.mxu0 %v8588_v56  ;;  %v12499_v35 = vld [vmem:[%s13911_s23 + $0xd4] sm:$0xf]  ;;  %v9292_v13 = vor.u32 %v12699_v10, %v9289_v16 }
 0x4dc   : > { %7538 = vmatmul.bf16.vlgmr.msrb.gmra.mxu3 %v14268_v36  ;;  %v8489_v19 = vld [vmem:[%s13911_s23 + $0xf0] sm:$0xf0] }
 0x4dd   : > { %7582 = vmatpush.bf16.msra.mxu3 %v9388_v50  ;;  %7557 = vmatpush.bf16.msra.mxu1 %v8844_v49  ;;  %v12563_v40 = vld [vmem:[%s13911_s23 + $0x2d4] sm:$0xf]  ;;  %v8492_v50 = vor.u32 %v12499_v35, %v8489_v19  ;;  %v7318_v49 = vpop.f32.mrf.mxu2  ;;  %v7307_v38 = vpop.f32.mrf.mxu1 }
 0x4de   : > { %v8745_v33 = vld [vmem:[%s13911_s23 + $0x2f0] sm:$0xf0]  ;;  %v7319_v61 = vadd.f32 %v7318_v49, %v7306_v58 }
 0x4df   : > { %7570 = vmatpush.bf16.msra.mxu2 %v9100_v53  ;;  %7545 = vmatpush.bf16.msra.mxu0 %v8556_v9  ;;  %v12627_v41 = vld [vmem:[%s13911_s23 + $0x4d4] sm:$0xf]  ;;  %v8748_v11 = vor.u32 %v12563_v40, %v8745_v33 }
 0x4e0   : > { %v9001_v46 = vld [vmem:[%s13911_s23 + $0x4f0] sm:$0xf0] }
 0x4e1   : > { %7583 = vmatpush.bf16.msra.mxu3 %v9356_v63  ;;  %7558 = vmatpush.bf16.msra.mxu1 %v8812_v0  ;;  %v12691_v17 = vld [vmem:[%s13911_s23 + $0x6d4] sm:$0xf]  ;;  %v9004_v59 = vor.u32 %v12627_v41, %v9001_v46  ;;  %v7331_v63 = vpop.f32.mrf.mxu3 }
 0x4e2   : > { %v9257_v47 = vld [vmem:[%s13911_s23 + $0x6f0] sm:$0xf0]  ;;  %v7332_v9 = vadd.f32 %v7331_v63, %v7319_v61 }
 0x4e3   : > { %7571 = vmatpush.bf16.msra.mxu2 %v9068_v6  ;;  %7546 = vmatpush.bf16.msra.mxu0 %v8524_v27  ;;  %v12491_v25 = vld [vmem:[%s13911_s23 + $0x94] sm:$0xf]  ;;  %v9260_v3 = vor.u32 %v12691_v17, %v9257_v47 }
 0x4e4   : > { %v8457_v55 = vld [vmem:[%s13911_s23 + $0xb0] sm:$0xf0]  ;;  %v8170_v15 = vadd.f32 %v7332_v9, %v290_v20 }
 0x4e5   : > { %7584 = vmatpush.bf16.msra.mxu3 %v9324_v57  ;;  %7559 = vmatpush.bf16.msra.mxu1 %v8780_v48  ;;  %v12555_v56 = vld [vmem:[%s13911_s23 + $0x294] sm:$0xf]  ;;  %v8460_v8 = vor.u32 %v12491_v25, %v8457_v55  ;;  %v7320_v46 = vpop.f32.mrf.mxu2 }
 0x4e6   : > { %v8713_v53 = vld [vmem:[%s13911_s23 + $0x2b0] sm:$0xf0]  ;;  %8178 = vst [vmem:[%s13935_s11 + $0x18] sm:$0xff] %v8170_v15 }
 0x4e7   : > { %7572 = vmatpush.bf16.msra.mxu2 %v9036_v62  ;;  %v12619_v44 = vld [vmem:[%s13911_s23 + $0x494] sm:$0xf]  ;;  %7547 = vmatpush.bf16.msra.mxu0 %v8492_v50  ;;  %v8716_v0 = vor.u32 %v12555_v56, %v8713_v53 }
 0x4e8   : > { %v8969_v60 = vld [vmem:[%s13911_s23 + $0x4b0] sm:$0xf0] }
 0x4e9   : > { %7585 = vmatpush.bf16.msra.mxu3 %v9292_v13  ;;  %v12683_v1 = vld [vmem:[%s13911_s23 + $0x694] sm:$0xf]  ;;  %7560 = vmatpush.bf16.msra.mxu1 %v8748_v11  ;;  %v8972_v6 = vor.u32 %v12619_v44, %v8969_v60  ;;  %v7333_v58 = vpop.f32.mrf.mxu3 }
 0x4ea   : > { %v9225_v2 = vld [vmem:[%s13911_s23 + $0x6b0] sm:$0xf0] }
 0x4eb   : > { %7573 = vmatpush.bf16.msra.mxu2 %v9004_v59  ;;  %v12483_v37 = vld [vmem:[%s13911_s23 + $0x54] sm:$0xf]  ;;  %v9228_v57 = vor.u32 %v12683_v1, %v9225_v2  ;;  %7548 = vmatpush.bf16.msra.mxu0 %v8460_v8 }
 0x4ec   : > { %v8425_v52 = vld [vmem:[%s13911_s23 + $0x70] sm:$0xf0] }
 0x4ed   : > { %v12547_v54 = vld [vmem:[%s13911_s23 + $0x254] sm:$0xf]  ;;  %7586 = vmatpush.bf16.msra.mxu3 %v9260_v3  ;;  %v8428_v16 = vor.u32 %v12483_v37, %v8425_v52  ;;  %7561 = vmatpush.bf16.msra.mxu1 %v8716_v0 }
 0x4ee   : > { %v8681_v12 = vld [vmem:[%s13911_s23 + $0x270] sm:$0xf0] }
 0x4ef   : > { %v12611_v14 = vld [vmem:[%s13911_s23 + $0x454] sm:$0xf]  ;;  %7574 = vmatpush.bf16.msra.mxu2 %v8972_v6  ;;  %v8684_v48 = vor.u32 %v12547_v54, %v8681_v12  ;;  %7549 = vmatpush.bf16.msra.mxu0 %v8428_v16 }
 0x4f0   : > { %v8937_v51 = vld [vmem:[%s13911_s23 + $0x470] sm:$0xf0] }
 0x4f1   : > { %v12675_v18 = vld [vmem:[%s13911_s23 + $0x654] sm:$0xf]  ;;  %v8940_v62 = vor.u32 %v12611_v14, %v8937_v51  ;;  %7587 = vmatpush.bf16.msra.mxu3 %v9228_v57  ;;  %7562 = vmatpush.bf16.msra.mxu1 %v8684_v48 }
 0x4f2   : > { %v9193_v10 = vld [vmem:[%s13911_s23 + $0x670] sm:$0xf0] }
 0x4f3   : > { %v12475_v27 = vld [vmem:[%s13911_s23 + $0x14] sm:$0xf]  ;;  %v9196_v40 = vor.u32 %v12675_v18, %v9193_v10  ;;  %7575 = vmatpush.bf16.msra.mxu2 %v8940_v62 }
 0x4f4   : > { %v8393_v23 = vld [vmem:[%s13911_s23 + $0x30] sm:$0xf0] }
 0x4f5   : > { %v12539_v28 = vld [vmem:[%s13911_s23 + $0x214] sm:$0xf]  ;;  %v8396_v11 = vor.u32 %v12475_v27, %v8393_v23  ;;  %7588 = vmatpush.bf16.msra.mxu3 %v9196_v40 }
 0x4f6   : > { %v8649_v35 = vld [vmem:[%s13911_s23 + $0x230] sm:$0xf0] }
 0x4f7   : > { %v12603_v19 = vld [vmem:[%s13911_s23 + $0x414] sm:$0xf]  ;;  %v8652_v56 = vor.u32 %v12539_v28, %v8649_v35  ;;  %7550 = vmatpush.bf16.msra.mxu0 %v8396_v11 }
 0x4f8   : > { %v8905_v13 = vld [vmem:[%s13911_s23 + $0x430] sm:$0xf0] }
 0x4f9   : > { %v12667_v33 = vld [vmem:[%s13911_s23 + $0x614] sm:$0xf]  ;;  %v8908_v3 = vor.u32 %v12603_v19, %v8905_v13  ;;  %7563 = vmatpush.bf16.msra.mxu1 %v8652_v56  ;;  %v7357_v56 = vpop.f32.mrf.mxu1 }
 0x4fa   : > { %v9161_v41 = vld [vmem:[%s13911_s23 + $0x630] sm:$0xf0]  ;;  %7551 = vmatmul.bf16.vlgmr.msra.gmra.mxu0 %v14049_v21 }
 0x4fb   : > { %v12787_v17 = vld [vmem:[%s13911_s23 + $0x9d4] sm:$0xf]  ;;  %v9164_v44 = vor.u32 %v12667_v33, %v9161_v41  ;;  %7576 = vmatpush.bf16.msra.mxu2 %v8908_v3 }
 0x4fc   : > { %v9641_v47 = vld [vmem:[%s13911_s23 + $0x9f0] sm:$0xf0]  ;;  %7564 = vmatmul.bf16.vlgmr.msra.gmra.mxu1 %v14052_v22 }
 0x4fd   : > { %v12851_v50 = vld [vmem:[%s13911_s23 + $0xbd4] sm:$0xf]  ;;  %v9644_v60 = vor.u32 %v12787_v17, %v9641_v47  ;;  %7589 = vmatpush.bf16.msra.mxu3 %v9164_v44 }
 0x4fe   : > { %v9897_v59 = vld [vmem:[%s13911_s23 + $0xbf0] sm:$0xf0]  ;;  %7577 = vmatmul.bf16.vlgmr.msra.gmra.mxu2 %v14035_v5 }
 0x4ff   : > { %v12915_v25 = vld [vmem:[%s13911_s23 + $0xdd4] sm:$0xf]  ;;  %v9900_v61 = vor.u32 %v12851_v50, %v9897_v59  ;;  %7595 = vmatpush.bf16.msrb.mxu0 %v9644_v60  ;;  %v7344_v50 = vpop.f32.mrf.mxu0 }
 0x500   : > { %v10153_v55 = vld [vmem:[%s13911_s23 + $0xdf0] sm:$0xf0]  ;;  %7590 = vmatmul.bf16.vlgmr.msra.gmra.mxu3 %v14038_v7  ;;  %v7358_v60 = vadd.f32 %v7357_v56, %v7344_v50 }
 0x501   : > { %v12979_v49 = vld [vmem:[%s13911_s23 + $0xfd4] sm:$0xf]  ;;  %v10156_v63 = vor.u32 %v12915_v25, %v10153_v55  ;;  %7608 = vmatpush.bf16.msrb.mxu1 %v9900_v61 }
 0x502   : > { %v10409_v53 = vld [vmem:[%s13911_s23 + $0xff0] sm:$0xf0] }
 0x503   : > { %v12779_v1 = vld [vmem:[%s13911_s23 + $0x994] sm:$0xf]  ;;  %v10412_v20 = vor.u32 %v12979_v49, %v10409_v53  ;;  %7621 = vmatpush.bf16.msrb.mxu2 %v10156_v63 }
 0x504   : > { %v9609_v2 = vld [vmem:[%s13911_s23 + $0x9b0] sm:$0xf0] }
 0x505   : > { %v12843_v4 = vld [vmem:[%s13911_s23 + $0xb94] sm:$0xf]  ;;  %v9612_v37 = vor.u32 %v12779_v1, %v9609_v2  ;;  %7634 = vmatpush.bf16.msrb.mxu3 %v10412_v20 }
 0x506   : > { %v9865_v8 = vld [vmem:[%s13911_s23 + $0xbb0] sm:$0xf0] }
 0x507   : > { %v12907_v38 = vld [vmem:[%s13911_s23 + $0xd94] sm:$0xf]  ;;  %v9868_v52 = vor.u32 %v12843_v4, %v9865_v8  ;;  %7596 = vmatpush.bf16.msrb.mxu0 %v9612_v37 }
 0x508   : > { %v10121_v9 = vld [vmem:[%s13911_s23 + $0xdb0] sm:$0xf0] }
 0x509   : > { %v12971_v0 = vld [vmem:[%s13911_s23 + $0xf94] sm:$0xf]  ;;  %v10124_v54 = vor.u32 %v12907_v38, %v10121_v9  ;;  %7609 = vmatpush.bf16.msrb.mxu1 %v9868_v52  ;;  %v7370_v9 = vpop.f32.mrf.mxu2 }
 0x50a   : > { %v10377_v6 = vld [vmem:[%s13911_s23 + $0xfb0] sm:$0xf0] }
 0x50b   : > { %v12771_v57 = vld [vmem:[%s13911_s23 + $0x954] sm:$0xf]  ;;  %v10380_v51 = vor.u32 %v12971_v0, %v10377_v6  ;;  %7622 = vmatpush.bf16.msrb.mxu2 %v10124_v54  ;;  %v7371_v54 = vadd.f32 %v7370_v9, %v7358_v60 }
 0x50c   : > { %v9577_v12 = vld [vmem:[%s13911_s23 + $0x970] sm:$0xf0] }
 0x50d   : > { %v12835_v14 = vld [vmem:[%s13911_s23 + $0xb54] sm:$0xf]  ;;  %v9580_v23 = vor.u32 %v12771_v57, %v9577_v12  ;;  %7635 = vmatpush.bf16.msrb.mxu3 %v10380_v51  ;;  %v7383_v57 = vpop.f32.mrf.mxu3 }
 0x50e   : > { %v9833_v15 = vld [vmem:[%s13911_s23 + $0xb70] sm:$0xf0] }
 0x50f   : > { %v12899_v18 = vld [vmem:[%s13911_s23 + $0xd54] sm:$0xf]  ;;  %v9836_v28 = vor.u32 %v12835_v14, %v9833_v15  ;;  %7597 = vmatpush.bf16.msrb.mxu0 %v9580_v23  ;;  %v15587_v15 = vadd.f32 %v7383_v57, %v7371_v54 }
 0x510   : > { %v10089_v10 = vld [vmem:[%s13911_s23 + $0xd70] sm:$0xf0] }
 0x511   : > { %v12963_v16 = vld [vmem:[%s13911_s23 + $0xf54] sm:$0xf]  ;;  %v10092_v48 = vor.u32 %v12899_v18, %v10089_v10  ;;  %7610 = vmatpush.bf16.msrb.mxu1 %v9836_v28  ;;  %v7346_v18 = vpop.f32.mrf.mxu0 }
 0x512   : > { %v10345_v27 = vld [vmem:[%s13911_s23 + $0xf70] sm:$0xf0] }
 0x513   : > { %v12763_v62 = vld [vmem:[%s13911_s23 + $0x914] sm:$0xf]  ;;  %v10348_v40 = vor.u32 %v12963_v16, %v10345_v27  ;;  %7623 = vmatpush.bf16.msrb.mxu2 %v10092_v48  ;;  %v7359_v48 = vpop.f32.mrf.mxu1 }
 0x514   : > { %v9545_v35 = vld [vmem:[%s13911_s23 + $0x930] sm:$0xf0] }
 0x515   : > { %v12827_v19 = vld [vmem:[%s13911_s23 + $0xb14] sm:$0xf]  ;;  %v9548_v47 = vor.u32 %v12763_v62, %v9545_v35  ;;  %7636 = vmatpush.bf16.msrb.mxu3 %v10348_v40 }
 0x516   : > { %v9801_v13 = vld [vmem:[%s13911_s23 + $0xb30] sm:$0xf0] }
 0x517   : > { %v12891_v33 = vld [vmem:[%s13911_s23 + $0xd14] sm:$0xf]  ;;  %v9804_v58 = vor.u32 %v12827_v19, %v9801_v13  ;;  %7598 = vmatpush.bf16.msrb.mxu0 %v9548_v47 }
 0x518   : > { %v10057_v41 = vld [vmem:[%s13911_s23 + $0xd30] sm:$0xf0] }
 0x519   : > { %v12955_v46 = vld [vmem:[%s13911_s23 + $0xf14] sm:$0xf]  ;;  %v10060_v11 = vor.u32 %v12891_v33, %v10057_v41  ;;  %7611 = vmatpush.bf16.msrb.mxu1 %v9804_v58 }
 0x51a   : > { %v10313_v17 = vld [vmem:[%s13911_s23 + $0xf30] sm:$0xf0] }
 0x51b   : > { %v12755_v59 = vld [vmem:[%s13911_s23 + $0x8d4] sm:$0xf]  ;;  %v10316_v3 = vor.u32 %v12955_v46, %v10313_v17  ;;  %7624 = vmatpush.bf16.msrb.mxu2 %v10060_v11 }
 0x51c   : > { %v9513_v25 = vld [vmem:[%s13911_s23 + $0x8f0] sm:$0xf0] }
 0x51d   : > { %v12819_v55 = vld [vmem:[%s13911_s23 + $0xad4] sm:$0xf]  ;;  %v9516_v1 = vor.u32 %v12755_v59, %v9513_v25  ;;  %7637 = vmatpush.bf16.msrb.mxu3 %v10316_v3  ;;  %v7372_v25 = vpop.f32.mrf.mxu2 }
 0x51e   : > { %v9769_v49 = vld [vmem:[%s13911_s23 + $0xaf0] sm:$0xf0] }
 0x51f   : > { %v12883_v53 = vld [vmem:[%s13911_s23 + $0xcd4] sm:$0xf]  ;;  %v9772_v2 = vor.u32 %v12819_v55, %v9769_v49  ;;  %7599 = vmatpush.bf16.msrb.mxu0 %v9516_v1 }
 0x520   : > { %v10025_v44 = vld [vmem:[%s13911_s23 + $0xcf0] sm:$0xf0] }
 0x521   : > { %v12947_v61 = vld [vmem:[%s13911_s23 + $0xed4] sm:$0xf]  ;;  %v10028_v4 = vor.u32 %v12883_v53, %v10025_v44  ;;  %7612 = vmatpush.bf16.msrb.mxu1 %v9772_v2  ;;  %v7385_v53 = vpop.f32.mrf.mxu3 }
 0x522   : > { %v10281_v63 = vld [vmem:[%s13911_s23 + $0xef0] sm:$0xf0] }
 0x523   : > { %v12747_v20 = vld [vmem:[%s13911_s23 + $0x894] sm:$0xf]  ;;  %v10284_v0 = vor.u32 %v12947_v61, %v10281_v63  ;;  %7625 = vmatpush.bf16.msrb.mxu2 %v10028_v4 }
 0x524   : > { %v9481_v8 = vld [vmem:[%s13911_s23 + $0x8b0] sm:$0xf0] }
 0x525   : > { %v12811_v38 = vld [vmem:[%s13911_s23 + $0xa94] sm:$0xf]  ;;  %v9484_v51 = vor.u32 %v12747_v20, %v9481_v8  ;;  %7638 = vmatpush.bf16.msrb.mxu3 %v10284_v0 }
 0x526   : > { %v9737_v6 = vld [vmem:[%s13911_s23 + $0xab0] sm:$0xf0] }
 0x527   : > { %v12875_v37 = vld [vmem:[%s13911_s23 + $0xc94] sm:$0xf]  ;;  %v9740_v10 = vor.u32 %v12811_v38, %v9737_v6  ;;  %7600 = vmatpush.bf16.msrb.mxu0 %v9484_v51 }
 0x528   : > { %v9993_v52 = vld [vmem:[%s13911_s23 + $0xcb0] sm:$0xf0] }
 0x529   : > { %v12939_v12 = vld [vmem:[%s13911_s23 + $0xe94] sm:$0xf]  ;;  %v9996_v16 = vor.u32 %v12875_v37, %v9993_v52  ;;  %7613 = vmatpush.bf16.msrb.mxu1 %v9740_v10 }
 0x52a   : > { %v10249_v14 = vld [vmem:[%s13911_s23 + $0xeb0] sm:$0xf0] }
 0x52b   : > { %v12739_v27 = vld [vmem:[%s13911_s23 + $0x854] sm:$0xf]  ;;  %v10252_v62 = vor.u32 %v12939_v12, %v10249_v14  ;;  %7626 = vmatpush.bf16.msrb.mxu2 %v9996_v16 }
 0x52c   : > { %v9449_v23 = vld [vmem:[%s13911_s23 + $0x870] sm:$0xf0] }
 0x52d   : > { %v12803_v28 = vld [vmem:[%s13911_s23 + $0xa54] sm:$0xf]  ;;  %v9452_v41 = vor.u32 %v12739_v27, %v9449_v23  ;;  %7639 = vmatpush.bf16.msrb.mxu3 %v10252_v62 }
 0x52e   : > { %v9705_v35 = vld [vmem:[%s13911_s23 + $0xa70] sm:$0xf0] }
 0x52f   : > { %v12867_v19 = vld [vmem:[%s13911_s23 + $0xc54] sm:$0xf]  ;;  %v9708_v47 = vor.u32 %v12803_v28, %v9705_v35  ;;  %7601 = vmatpush.bf16.msrb.mxu0 %v9452_v41 }
 0x530   : > { %v9961_v40 = vld [vmem:[%s13911_s23 + $0xc70] sm:$0xf0] }
 0x531   : > { %v12931_v13 = vld [vmem:[%s13911_s23 + $0xe54] sm:$0xf]  ;;  %v9964_v50 = vor.u32 %v12867_v19, %v9961_v40  ;;  %7614 = vmatpush.bf16.msrb.mxu1 %v9708_v47 }
 0x532   : > { %v10217_v33 = vld [vmem:[%s13911_s23 + $0xe70] sm:$0xf0] }
 0x533   : > { %v12731_v46 = vld [vmem:[%s13911_s23 + $0x814] sm:$0xf]  ;;  %v10220_v55 = vor.u32 %v12931_v13, %v10217_v33  ;;  %7627 = vmatpush.bf16.msrb.mxu2 %v9964_v50 }
 0x534   : > { %v9417_v17 = vld [vmem:[%s13911_s23 + $0x830] sm:$0xf0] }
 0x535   : > { %v12795_v58 = vld [vmem:[%s13911_s23 + $0xa14] sm:$0xf]  ;;  %v9420_v63 = vor.u32 %v12731_v46, %v9417_v17  ;;  %7640 = vmatpush.bf16.msrb.mxu3 %v10220_v55 }
 0x536   : > { %v9673_v11 = vld [vmem:[%s13911_s23 + $0xa30] sm:$0xf0] }
 0x537   : > { %v12859_v59 = vld [vmem:[%s13911_s23 + $0xc14] sm:$0xf]  ;;  %v9676_v20 = vor.u32 %v12795_v58, %v9673_v11  ;;  %7602 = vmatpush.bf16.msrb.mxu0 %v9420_v63 }
 0x538   : > { %v9929_v56 = vld [vmem:[%s13911_s23 + $0xc30] sm:$0xf0] }
 0x539   : > { %v12923_v3 = vld [vmem:[%s13911_s23 + $0xe14] sm:$0xf]  ;;  %v9932_v8 = vor.u32 %v12859_v59, %v9929_v56  ;;  %7615 = vmatpush.bf16.msrb.mxu1 %v9676_v20 }
 0x53a   : > { %v10185_v49 = vld [vmem:[%s13911_s23 + $0xe30] sm:$0xf0]  ;;  %7603 = vmatmul.bf16.vlgmr.msrb.gmra.mxu0 %v14108_v42 }
 0x53b   : > { %v13043_v44 = vld [vmem:[%s13911_s23 + $0x11d4] sm:$0xf]  ;;  %v10188_v0 = vor.u32 %v12923_v3, %v10185_v49  ;;  %7628 = vmatpush.bf16.msrb.mxu2 %v9932_v8  ;;  %v15646_v8 = vpop.f32.mrf.mxu1 }
 0x53c   : > { %v10665_v60 = vld [vmem:[%s13911_s23 + $0x11f0] sm:$0xf0]  ;;  %7616 = vmatmul.bf16.vlgmr.msrb.gmra.mxu1 %v14112_v45 }
 0x53d   : > { %v13107_v61 = vld [vmem:[%s13911_s23 + $0x13d4] sm:$0xf]  ;;  %v10668_v6 = vor.u32 %v13043_v44, %v10665_v60  ;;  %7641 = vmatpush.bf16.msrb.mxu3 %v10188_v0 }
 0x53e   : > { %v10921_v1 = vld [vmem:[%s13911_s23 + $0x13f0] sm:$0xf0]  ;;  %7629 = vmatmul.bf16.vlgmr.msrb.gmra.mxu2 %v14104_v39 }
 0x53f   : > { %v13171_v2 = vld [vmem:[%s13911_s23 + $0x15d4] sm:$0xf]  ;;  %v10924_v37 = vor.u32 %v13107_v61, %v10921_v1  ;;  %7647 = vmatpush.bf16.msra.mxu0 %v10668_v6  ;;  %v15641_v61 = vpop.f32.mrf.mxu0 }
 0x540   : > { %v11177_v4 = vld [vmem:[%s13911_s23 + $0x15f0] sm:$0xf0]  ;;  %7642 = vmatmul.bf16.vlgmr.msrb.gmra.mxu3 %v14110_v43 }
 0x541   : > { %v13235_v38 = vld [vmem:[%s13911_s23 + $0x17d4] sm:$0xf]  ;;  %v11180_v52 = vor.u32 %v13171_v2, %v11177_v4  ;;  %7660 = vmatpush.bf16.msra.mxu1 %v10924_v37 }
 0x542   : > { %v11433_v9 = vld [vmem:[%s13911_s23 + $0x17f0] sm:$0xf0] }
 0x543   : > { %v13035_v54 = vld [vmem:[%s13911_s23 + $0x1194] sm:$0xf]  ;;  %v11436_v14 = vor.u32 %v13235_v38, %v11433_v9  ;;  %7673 = vmatpush.bf16.msra.mxu2 %v11180_v52 }
 0x544   : > { %v10633_v57 = vld [vmem:[%s13911_s23 + $0x11b0] sm:$0xf0] }
 0x545   : > { %v13099_v12 = vld [vmem:[%s13911_s23 + $0x1394] sm:$0xf]  ;;  %v10636_v23 = vor.u32 %v13035_v54, %v10633_v57  ;;  %7686 = vmatpush.bf16.msra.mxu3 %v11436_v14 }
 0x546   : > { %v10889_v51 = vld [vmem:[%s13911_s23 + $0x13b0] sm:$0xf0] }
 0x547   : > { %v13163_v18 = vld [vmem:[%s13911_s23 + $0x1594] sm:$0xf]  ;;  %v10892_v28 = vor.u32 %v13099_v12, %v10889_v51  ;;  %7648 = vmatpush.bf16.msra.mxu0 %v10636_v23 }
 0x548   : > { %v11145_v10 = vld [vmem:[%s13911_s23 + $0x15b0] sm:$0xf0] }
 0x549   : > { %v13227_v16 = vld [vmem:[%s13911_s23 + $0x1794] sm:$0xf]  ;;  %v11148_v48 = vor.u32 %v13163_v18, %v11145_v10  ;;  %7661 = vmatpush.bf16.msra.mxu1 %v10892_v28  ;;  %v15656_v10 = vpop.f32.mrf.mxu2 }
 0x54a   : > { %v11401_v27 = vld [vmem:[%s13911_s23 + $0x17b0] sm:$0xf0] }
 0x54b   : > { %v13027_v62 = vld [vmem:[%s13911_s23 + $0x1154] sm:$0xf]  ;;  %v11404_v40 = vor.u32 %v13227_v16, %v11401_v27  ;;  %7674 = vmatpush.bf16.msra.mxu2 %v11148_v48  ;;  %v15661_v48 = vpop.f32.mrf.mxu3 }
 0x54c   : > { %v10601_v35 = vld [vmem:[%s13911_s23 + $0x1170] sm:$0xf0] }
 0x54d   : > { %v13091_v19 = vld [vmem:[%s13911_s23 + $0x1354] sm:$0xf]  ;;  %v10604_v47 = vor.u32 %v13027_v62, %v10601_v35  ;;  %7687 = vmatpush.bf16.msra.mxu3 %v11404_v40  ;;  %v7398_v40 = vpop.f32.mrf.mxu0 }
 0x54e   : > { %v10857_v13 = vld [vmem:[%s13911_s23 + $0x1370] sm:$0xf0] }
 0x54f   : > { %v13155_v33 = vld [vmem:[%s13911_s23 + $0x1554] sm:$0xf]  ;;  %v10860_v50 = vor.u32 %v13091_v19, %v10857_v13  ;;  %7649 = vmatpush.bf16.msra.mxu0 %v10604_v47  ;;  %v7411_v47 = vpop.f32.mrf.mxu1 }
 0x550   : > { %v11113_v41 = vld [vmem:[%s13911_s23 + $0x1570] sm:$0xf0] }
 0x551   : > { %v13219_v46 = vld [vmem:[%s13911_s23 + $0x1754] sm:$0xf]  ;;  %v11116_v58 = vor.u32 %v13155_v33, %v11113_v41  ;;  %7662 = vmatpush.bf16.msra.mxu1 %v10860_v50 }
 0x552   : > { %v11369_v17 = vld [vmem:[%s13911_s23 + $0x1770] sm:$0xf0] }
 0x553   : > { %v13019_v11 = vld [vmem:[%s13911_s23 + $0x1114] sm:$0xf]  ;;  %v11372_v55 = vor.u32 %v13219_v46, %v11369_v17  ;;  %7675 = vmatpush.bf16.msra.mxu2 %v11116_v58 }
 0x554   : > { %v10569_v59 = vld [vmem:[%s13911_s23 + $0x1130] sm:$0xf0] }
 0x555   : > { %v13083_v25 = vld [vmem:[%s13911_s23 + $0x1314] sm:$0xf]  ;;  %v10572_v60 = vor.u32 %v13019_v11, %v10569_v59  ;;  %7688 = vmatpush.bf16.msra.mxu3 %v11372_v55 }
 0x556   : > { %v10825_v56 = vld [vmem:[%s13911_s23 + $0x1330] sm:$0xf0] }
 0x557   : > { %v13147_v3 = vld [vmem:[%s13911_s23 + $0x1514] sm:$0xf]  ;;  %v10828_v63 = vor.u32 %v13083_v25, %v10825_v56  ;;  %7650 = vmatpush.bf16.msra.mxu0 %v10572_v60 }
 0x558   : > { %v11081_v49 = vld [vmem:[%s13911_s23 + $0x1530] sm:$0xf0] }
 0x559   : > { %v13211_v53 = vld [vmem:[%s13911_s23 + $0x1714] sm:$0xf]  ;;  %v11084_v1 = vor.u32 %v13147_v3, %v11081_v49  ;;  %7663 = vmatpush.bf16.msra.mxu1 %v10828_v63 }
 0x55a   : > { %v11337_v44 = vld [vmem:[%s13911_s23 + $0x1730] sm:$0xf0] }
 0x55b   : > { %v13011_v2 = vld [vmem:[%s13911_s23 + $0x10d4] sm:$0xf]  ;;  %v11340_v38 = vor.u32 %v13211_v53, %v11337_v44  ;;  %7676 = vmatpush.bf16.msra.mxu2 %v11084_v1 }
 0x55c   : > { %v10537_v4 = vld [vmem:[%s13911_s23 + $0x10f0] sm:$0xf0] }
 0x55d   : > { %v13075_v20 = vld [vmem:[%s13911_s23 + $0x12d4] sm:$0xf]  ;;  %v10540_v54 = vor.u32 %v13011_v2, %v10537_v4  ;;  %7689 = vmatpush.bf16.msra.mxu3 %v11340_v38  ;;  %v7424_v2 = vpop.f32.mrf.mxu2 }
 0x55e   : > { %v10793_v9 = vld [vmem:[%s13911_s23 + $0x12f0] sm:$0xf0] }
 0x55f   : > { %v13139_v0 = vld [vmem:[%s13911_s23 + $0x14d4] sm:$0xf]  ;;  %v10796_v57 = vor.u32 %v13075_v20, %v10793_v9  ;;  %7651 = vmatpush.bf16.msra.mxu0 %v10540_v54 }
 0x560   : > { %v11049_v6 = vld [vmem:[%s13911_s23 + $0x14f0] sm:$0xf0] }
 0x561   : > { %v13203_v37 = vld [vmem:[%s13911_s23 + $0x16d4] sm:$0xf]  ;;  %v11052_v12 = vor.u32 %v13139_v0, %v11049_v6  ;;  %7664 = vmatpush.bf16.msra.mxu1 %v10796_v57  ;;  %v7437_v0 = vpop.f32.mrf.mxu3 }
 0x562   : > { %v11305_v52 = vld [vmem:[%s13911_s23 + $0x16f0] sm:$0xf0] }
 0x563   : > { %v13003_v14 = vld [vmem:[%s13911_s23 + $0x1094] sm:$0xf]  ;;  %v11308_v16 = vor.u32 %v13203_v37, %v11305_v52  ;;  %7677 = vmatpush.bf16.msra.mxu2 %v11052_v12 }
 0x564   : > { %v10505_v51 = vld [vmem:[%s13911_s23 + $0x10b0] sm:$0xf0] }
 0x565   : > { %v13067_v18 = vld [vmem:[%s13911_s23 + $0x1294] sm:$0xf]  ;;  %v10508_v19 = vor.u32 %v13003_v14, %v10505_v51  ;;  %7690 = vmatpush.bf16.msra.mxu3 %v11308_v16 }
 0x566   : > { %v10761_v27 = vld [vmem:[%s13911_s23 + $0x12b0] sm:$0xf0] }
 0x567   : > { %v13131_v23 = vld [vmem:[%s13911_s23 + $0x1494] sm:$0xf]  ;;  %v10764_v13 = vor.u32 %v13067_v18, %v10761_v27  ;;  %7652 = vmatpush.bf16.msra.mxu0 %v10508_v19 }
 0x568   : > { %v11017_v28 = vld [vmem:[%s13911_s23 + $0x14b0] sm:$0xf0] }
 0x569   : > { %v13195_v62 = vld [vmem:[%s13911_s23 + $0x1694] sm:$0xf]  ;;  %v11020_v33 = vor.u32 %v13131_v23, %v11017_v28  ;;  %7665 = vmatpush.bf16.msra.mxu1 %v10764_v13 }
 0x56a   : > { %v11273_v35 = vld [vmem:[%s13911_s23 + $0x16b0] sm:$0xf0] }
 0x56b   : > { %v12995_v41 = vld [vmem:[%s13911_s23 + $0x1054] sm:$0xf]  ;;  %v11276_v50 = vor.u32 %v13195_v62, %v11273_v35  ;;  %7678 = vmatpush.bf16.msra.mxu2 %v11020_v33 }
 0x56c   : > { %v10473_v46 = vld [vmem:[%s13911_s23 + $0x1070] sm:$0xf0] }
 0x56d   : > { %v13059_v17 = vld [vmem:[%s13911_s23 + $0x1254] sm:$0xf]  ;;  %v10476_v56 = vor.u32 %v12995_v41, %v10473_v46  ;;  %7691 = vmatpush.bf16.msra.mxu3 %v11276_v50 }
 0x56e   : > { %v10729_v58 = vld [vmem:[%s13911_s23 + $0x1270] sm:$0xf0] }
 0x56f   : > { %v13123_v11 = vld [vmem:[%s13911_s23 + $0x1454] sm:$0xf]  ;;  %v10732_v53 = vor.u32 %v13059_v17, %v10729_v58  ;;  %7653 = vmatpush.bf16.msra.mxu0 %v10476_v56 }
 0x570   : > { %v10985_v59 = vld [vmem:[%s13911_s23 + $0x1470] sm:$0xf0] }
 0x571   : > { %v13187_v25 = vld [vmem:[%s13911_s23 + $0x1654] sm:$0xf]  ;;  %v10988_v44 = vor.u32 %v13123_v11, %v10985_v59  ;;  %7666 = vmatpush.bf16.msra.mxu1 %v10732_v53 }
 0x572   : > { %v11241_v55 = vld [vmem:[%s13911_s23 + $0x1670] sm:$0xf0] }
 0x573   : > { %v12987_v3 = vld [vmem:[%s13911_s23 + $0x1014] sm:$0xf]  ;;  %v11244_v4 = vor.u32 %v13187_v25, %v11241_v55  ;;  %7679 = vmatpush.bf16.msra.mxu2 %v10988_v44 }
 0x574   : > { %v10441_v49 = vld [vmem:[%s13911_s23 + $0x1030] sm:$0xf0] }
 0x575   : > { %v13051_v60 = vld [vmem:[%s13911_s23 + $0x1214] sm:$0xf]  ;;  %v10444_v54 = vor.u32 %v12987_v3, %v10441_v49  ;;  %7692 = vmatpush.bf16.msra.mxu3 %v11244_v4 }
 0x576   : > { %v10697_v63 = vld [vmem:[%s13911_s23 + $0x1230] sm:$0xf0] }
 0x577   : > { %v13115_v1 = vld [vmem:[%s13911_s23 + $0x1414] sm:$0xf]  ;;  %v10700_v51 = vor.u32 %v13051_v60, %v10697_v63  ;;  %7654 = vmatpush.bf16.msra.mxu0 %v10444_v54  ;;  %v15715_v54 = vpop.f32.mrf.mxu0 }
 0x578   : > { %v10953_v20 = vld [vmem:[%s13911_s23 + $0x1430] sm:$0xf0] }
 0x579   : > { %v13179_v38 = vld [vmem:[%s13911_s23 + $0x1614] sm:$0xf]  ;;  %v10956_v18 = vor.u32 %v13115_v1, %v10953_v20  ;;  %7667 = vmatpush.bf16.msra.mxu1 %v10700_v51  ;;  %v15719_v51 = vpop.f32.mrf.mxu1 }
 0x57a   : > { %v11209_v9 = vld [vmem:[%s13911_s23 + $0x1630] sm:$0xf0]  ;;  %7655 = vmatmul.bf16.vlgmr.msra.gmra.mxu0 %v14179_v26 }
 0x57b   : > { %v13299_v6 = vld [vmem:[%s13911_s23 + $0x19d4] sm:$0xf]  ;;  %v11212_v23 = vor.u32 %v13179_v38, %v11209_v9  ;;  %7680 = vmatpush.bf16.msra.mxu2 %v10956_v18 }
 0x57c   : > { %v11689_v37 = vld [vmem:[%s13911_s23 + $0x19f0] sm:$0xf0]  ;;  %7668 = vmatmul.bf16.vlgmr.msra.gmra.mxu1 %v14186_v31 }
 0x57d   : > { %v13363_v52 = vld [vmem:[%s13911_s23 + $0x1bd4] sm:$0xf]  ;;  %v11692_v28 = vor.u32 %v13299_v6, %v11689_v37  ;;  %7693 = vmatpush.bf16.msra.mxu3 %v11212_v23 }
 0x57e   : > { %v11945_v57 = vld [vmem:[%s13911_s23 + $0x1bf0] sm:$0xf0]  ;;  %7681 = vmatmul.bf16.vlgmr.msra.gmra.mxu2 %v14184_v30 }
 0x57f   : > { %v13427_v12 = vld [vmem:[%s13911_s23 + $0x1dd4] sm:$0xf]  ;;  %v11948_v62 = vor.u32 %v13363_v52, %v11945_v57  ;;  %7699 = vmatpush.bf16.msrb.mxu0 %v11692_v28 }
 0x580   : > { %v12201_v14 = vld [vmem:[%s13911_s23 + $0x1df0] sm:$0xf0]  ;;  %7694 = vmatmul.bf16.vlgmr.msra.gmra.mxu3 %v14190_v34 }
 0x581   : > { %v13491_v16 = vld [vmem:[%s13911_s23 + $0x1fd4] sm:$0xf]  ;;  %v12204_v35 = vor.u32 %v13427_v12, %v12201_v14  ;;  %7712 = vmatpush.bf16.msrb.mxu1 %v11948_v62 }
 0x582   : > { %v12457_v27 = vld [vmem:[%s13911_s23 + $0x1ff0] sm:$0xf0] }
 0x583   : > { %v13291_v19 = vld [vmem:[%s13911_s23 + $0x1994] sm:$0xf]  ;;  %v12460_v33 = vor.u32 %v13491_v16, %v12457_v27  ;;  %7725 = vmatpush.bf16.msrb.mxu2 %v12204_v35 }
 0x584   : > { %v11657_v40 = vld [vmem:[%s13911_s23 + $0x19b0] sm:$0xf0] }
 0x585   : > { %v13355_v13 = vld [vmem:[%s13911_s23 + $0x1b94] sm:$0xf]  ;;  %v11660_v58 = vor.u32 %v13291_v19, %v11657_v40  ;;  %7738 = vmatpush.bf16.msrb.mxu3 %v12460_v33 }
 0x586   : > { %v11913_v41 = vld [vmem:[%s13911_s23 + $0x1bb0] sm:$0xf0] }
 0x587   : > { %v13419_v46 = vld [vmem:[%s13911_s23 + $0x1d94] sm:$0xf]  ;;  %v11916_v11 = vor.u32 %v13355_v13, %v11913_v41  ;;  %7700 = vmatpush.bf16.msrb.mxu0 %v11660_v58 }
 0x588   : > { %v12169_v17 = vld [vmem:[%s13911_s23 + $0x1db0] sm:$0xf0] }
 0x589   : > { %v13483_v47 = vld [vmem:[%s13911_s23 + $0x1f94] sm:$0xf]  ;;  %v12172_v59 = vor.u32 %v13419_v46, %v12169_v17  ;;  %7713 = vmatpush.bf16.msrb.mxu1 %v11916_v11  ;;  %v7397_v46 = vadd.f32 %v15641_v61, %v15587_v15 }
 0x58a   : > { %v12425_v50 = vld [vmem:[%s13911_s23 + $0x1fb0] sm:$0xf0] }
 0x58b   : > { %v13283_v25 = vld [vmem:[%s13911_s23 + $0x1954] sm:$0xf]  ;;  %v12428_v3 = vor.u32 %v13483_v47, %v12425_v50  ;;  %7726 = vmatpush.bf16.msrb.mxu2 %v12172_v59 }
 0x58c   : > { %v11625_v55 = vld [vmem:[%s13911_s23 + $0x1970] sm:$0xf0] }
 0x58d   : > { %v13347_v56 = vld [vmem:[%s13911_s23 + $0x1b54] sm:$0xf]  ;;  %v11628_v1 = vor.u32 %v13283_v25, %v11625_v55  ;;  %7739 = vmatpush.bf16.msrb.mxu3 %v12428_v3  ;;  %v15734_v25 = vpop.f32.mrf.mxu2 }
 0x58e   : > { %v11881_v49 = vld [vmem:[%s13911_s23 + $0x1b70] sm:$0xf0] }
 0x58f   : > { %v13411_v53 = vld [vmem:[%s13911_s23 + $0x1d54] sm:$0xf]  ;;  %v11884_v2 = vor.u32 %v13347_v56, %v11881_v49  ;;  %7701 = vmatpush.bf16.msrb.mxu0 %v11628_v1  ;;  %v15739_v49 = vpop.f32.mrf.mxu3 }
 0x590   : > { %v12137_v44 = vld [vmem:[%s13911_s23 + $0x1d70] sm:$0xf0] }
 0x591   : > { %v13475_v60 = vld [vmem:[%s13911_s23 + $0x1f54] sm:$0xf]  ;;  %v12140_v4 = vor.u32 %v13411_v53, %v12137_v44  ;;  %7714 = vmatpush.bf16.msrb.mxu1 %v11884_v2  ;;  %v7450_v53 = vpop.f32.mrf.mxu0 }
 0x592   : > { %v12393_v63 = vld [vmem:[%s13911_s23 + $0x1f70] sm:$0xf0] }
 0x593   : > { %v13275_v20 = vld [vmem:[%s13911_s23 + $0x1914] sm:$0xf]  ;;  %v12396_v0 = vor.u32 %v13475_v60, %v12393_v63  ;;  %7727 = vmatpush.bf16.msrb.mxu2 %v12140_v4  ;;  %v7463_v60 = vpop.f32.mrf.mxu1  ;;  %v7410_v63 = vadd.f32 %v15646_v8, %v7397_v46  ;;  %v8879_v46 = vld [vmem:[%s13911_s23 + $0x3d8] sm:$0xf] }
 0x594   : > { %v11593_v38 = vld [vmem:[%s13911_s23 + $0x1930] sm:$0xf0] }
 0x595   : > { %v13339_v9 = vld [vmem:[%s13911_s23 + $0x1b14] sm:$0xf]  ;;  %v11596_v14 = vor.u32 %v13275_v20, %v11593_v38  ;;  %7740 = vmatpush.bf16.msrb.mxu3 %v12396_v0 }
 0x596   : > { %v11849_v6 = vld [vmem:[%s13911_s23 + $0x1b30] sm:$0xf0] }
 0x597   : > { %v13403_v37 = vld [vmem:[%s13911_s23 + $0x1d14] sm:$0xf]  ;;  %v11852_v18 = vor.u32 %v13339_v9, %v11849_v6  ;;  %7702 = vmatpush.bf16.msrb.mxu0 %v11596_v14 }
 0x598   : > { %v12105_v52 = vld [vmem:[%s13911_s23 + $0x1d30] sm:$0xf0] }
 0x599   : > { %v13467_v57 = vld [vmem:[%s13911_s23 + $0x1f14] sm:$0xf]  ;;  %v12108_v16 = vor.u32 %v13403_v37, %v12105_v52  ;;  %7715 = vmatpush.bf16.msrb.mxu1 %v11852_v18  ;;  %v7423_v18 = vadd.f32 %v15656_v10, %v7410_v63  ;;  %v8623_v10 = vld [vmem:[%s13911_s23 + $0x1d8] sm:$0xf] }
 0x59a   : > { %v12361_v12 = vld [vmem:[%s13911_s23 + $0x1f30] sm:$0xf0] }
 0x59b   : > { %v13267_v27 = vld [vmem:[%s13911_s23 + $0x18d4] sm:$0xf]  ;;  %v12364_v62 = vor.u32 %v13467_v57, %v12361_v12  ;;  %7728 = vmatpush.bf16.msrb.mxu2 %v12108_v16 }
 0x59c   : > { %v11561_v23 = vld [vmem:[%s13911_s23 + $0x18f0] sm:$0xf0] }
 0x59d   : > { %v13331_v28 = vld [vmem:[%s13911_s23 + $0x1ad4] sm:$0xf]  ;;  %v11564_v41 = vor.u32 %v13267_v27, %v11561_v23  ;;  %7741 = vmatpush.bf16.msrb.mxu3 %v12364_v62 }
 0x59e   : > { %v11817_v35 = vld [vmem:[%s13911_s23 + $0x1af0] sm:$0xf0] }
 0x59f   : > { %v13395_v19 = vld [vmem:[%s13911_s23 + $0x1cd4] sm:$0xf]  ;;  %v11820_v17 = vor.u32 %v13331_v28, %v11817_v35  ;;  %7703 = vmatpush.bf16.msrb.mxu0 %v11564_v41  ;;  %v12536_v41 = vld [vmem:[%s13911_s23 + $0x1f4] sm:$0xf0] }
 0x5a0   : > { %v12073_v40 = vld [vmem:[%s13911_s23 + $0x1cf0] sm:$0xf0]  ;;  %v8624_v53 = vor.u32 %v12536_v41, %v8623_v10  ;;  %v12576_v41 = vld [vmem:[%s13911_s23 + $0x334] sm:$0xf0] }
 0x5a1   : > { %v13459_v13 = vld [vmem:[%s13911_s23 + $0x1ed4] sm:$0xf]  ;;  %v12076_v47 = vor.u32 %v13395_v19, %v12073_v40  ;;  %7716 = vmatpush.bf16.msrb.mxu1 %v11820_v17  ;;  %v7489_v17 = vpop.f32.mrf.mxu3 }
 0x5a2   : > { %v12329_v33 = vld [vmem:[%s13911_s23 + $0x1ef0] sm:$0xf0]  ;;  %v12640_v17 = vld [vmem:[%s13911_s23 + $0x534] sm:$0xf0] }
 0x5a3   : > { %v13259_v50 = vld [vmem:[%s13911_s23 + $0x1894] sm:$0xf]  ;;  %v12332_v59 = vor.u32 %v13459_v13, %v12329_v33  ;;  %7729 = vmatpush.bf16.msrb.mxu2 %v12076_v47  ;;  %v7476_v33 = vpop.f32.mrf.mxu2 }
 0x5a4   : > { %v11529_v58 = vld [vmem:[%s13911_s23 + $0x18b0] sm:$0xf0]  ;;  %v8783_v33 = vld [vmem:[%s13911_s23 + $0x318] sm:$0xf] }
 0x5a5   : > { %v13323_v11 = vld [vmem:[%s13911_s23 + $0x1a94] sm:$0xf]  ;;  %v11532_v44 = vor.u32 %v13259_v50, %v11529_v58  ;;  %7742 = vmatpush.bf16.msrb.mxu3 %v12332_v59  ;;  %v12600_v50 = vld [vmem:[%s13911_s23 + $0x3f4] sm:$0xf0]  ;;  %v7436_v59 = vadd.f32 %v15661_v48, %v7423_v18 }
 0x5a6   : > { %v11785_v55 = vld [vmem:[%s13911_s23 + $0x1ab0] sm:$0xf0]  ;;  %v9135_v58 = vld [vmem:[%s13911_s23 + $0x5d8] sm:$0xf]  ;;  %v8880_v60 = vor.u32 %v12600_v50, %v8879_v46  ;;  %v7500_v50 = vpop.f32.mrf.mxu0 }
 0x5a7   : > { %v13387_v56 = vld [vmem:[%s13911_s23 + $0x1c94] sm:$0xf]  ;;  %v11788_v1 = vor.u32 %v13323_v11, %v11785_v55  ;;  %7704 = vmatpush.bf16.msrb.mxu0 %v11532_v44  ;;  %v12664_v11 = vld [vmem:[%s13911_s23 + $0x5f4] sm:$0xf0]  ;;  %v7449_v44 = vadd.f32 %v15715_v54, %v7436_v59 }
 0x5a8   : > { %v12041_v3 = vld [vmem:[%s13911_s23 + $0x1cb0] sm:$0xf0]  ;;  %v9136_v63 = vor.u32 %v12664_v11, %v9135_v58  ;;  %v12528_v48 = vld [vmem:[%s13911_s23 + $0x1b4] sm:$0xf0] }
 0x5a9   : > { %v13451_v15 = vld [vmem:[%s13911_s23 + $0x1e94] sm:$0xf]  ;;  %v12044_v2 = vor.u32 %v13387_v56, %v12041_v3  ;;  %7717 = vmatpush.bf16.msrb.mxu1 %v11788_v1  ;;  %v9391_v3 = vld [vmem:[%s13911_s23 + $0x7d8] sm:$0xf] }
 0x5aa   : > { %v12297_v61 = vld [vmem:[%s13911_s23 + $0x1eb0] sm:$0xf0]  ;;  %v8591_v1 = vld [vmem:[%s13911_s23 + $0x198] sm:$0xf] }
 0x5ab   : > { %v13251_v4 = vld [vmem:[%s13911_s23 + $0x1854] sm:$0xf]  ;;  %v12300_v9 = vor.u32 %v13451_v15, %v12297_v61  ;;  %7730 = vmatpush.bf16.msrb.mxu2 %v12044_v2  ;;  %v12728_v15 = vld [vmem:[%s13911_s23 + $0x7f4] sm:$0xf0]  ;;  %v8592_v54 = vor.u32 %v12528_v48, %v8591_v1 }
 0x5ac   : > { %v11497_v20 = vld [vmem:[%s13911_s23 + $0x1870] sm:$0xf0]  ;;  %v8847_v2 = vld [vmem:[%s13911_s23 + $0x398] sm:$0xf] }
 0x5ad   : > { %v13315_v38 = vld [vmem:[%s13911_s23 + $0x1a54] sm:$0xf]  ;;  %v11500_v57 = vor.u32 %v13251_v4, %v11497_v20  ;;  %7743 = vmatpush.bf16.msrb.mxu3 %v12300_v9  ;;  %v9392_v4 = vor.u32 %v12728_v15, %v9391_v3  ;;  %v12592_v20 = vld [vmem:[%s13911_s23 + $0x3b4] sm:$0xf0]  ;;  %v8784_v3 = vor.u32 %v12576_v41, %v8783_v33 }
 0x5ae   : > { %v11753_v0 = vld [vmem:[%s13911_s23 + $0x1a70] sm:$0xf0]  ;;  %v12656_v9 = vld [vmem:[%s13911_s23 + $0x5b4] sm:$0xf0] }
 0x5af   : > { %v13379_v6 = vld [vmem:[%s13911_s23 + $0x1c54] sm:$0xf]  ;;  %v11756_v16 = vor.u32 %v13315_v38, %v11753_v0  ;;  %7705 = vmatpush.bf16.msrb.mxu0 %v11500_v57  ;;  %v9103_v38 = vld [vmem:[%s13911_s23 + $0x598] sm:$0xf] }
 0x5b0   : > { %v12009_v37 = vld [vmem:[%s13911_s23 + $0x1c70] sm:$0xf0]  ;;  %v9359_v0 = vld [vmem:[%s13911_s23 + $0x798] sm:$0xf] }
 0x5b1   : > { %v13443_v52 = vld [vmem:[%s13911_s23 + $0x1e54] sm:$0xf]  ;;  %v12012_v27 = vor.u32 %v13379_v6, %v12009_v37  ;;  %7718 = vmatpush.bf16.msrb.mxu1 %v11756_v16  ;;  %v12720_v6 = vld [vmem:[%s13911_s23 + $0x7b4] sm:$0xf0]  ;;  %v7462_v37 = vadd.f32 %v15719_v51, %v7449_v44 }
 0x5b2   : > { %v12265_v8 = vld [vmem:[%s13911_s23 + $0x1e70] sm:$0xf0]  ;;  %v8559_v57 = vld [vmem:[%s13911_s23 + $0x158] sm:$0xf]  ;;  %v9360_v18 = vor.u32 %v12720_v6, %v9359_v0 }
 0x5b3   : > { %v13243_v12 = vld [vmem:[%s13911_s23 + $0x1814] sm:$0xf]  ;;  %v12268_v35 = vor.u32 %v13443_v52, %v12265_v8  ;;  %7731 = vmatpush.bf16.msrb.mxu2 %v12012_v27  ;;  %v8848_v52 = vor.u32 %v12592_v20, %v8847_v2  ;;  %v9104_v8 = vor.u32 %v12656_v9, %v9103_v38  ;;  %v12584_v16 = vld [vmem:[%s13911_s23 + $0x374] sm:$0xf0]  ;;  %v7475_v51 = vadd.f32 %v15734_v25, %v7462_v37 }
 0x5b4   : > { %v11465_v14 = vld [vmem:[%s13911_s23 + $0x1830] sm:$0xf0]  ;;  %v9071_v27 = vld [vmem:[%s13911_s23 + $0x558] sm:$0xf] }
 0x5b5   : > { %v13307_v23 = vld [vmem:[%s13911_s23 + $0x1a14] sm:$0xf]  ;;  %v11468_v47 = vor.u32 %v13243_v12, %v11465_v14  ;;  %7744 = vmatpush.bf16.msrb.mxu3 %v12268_v35  ;;  %v12520_v12 = vld [vmem:[%s13911_s23 + $0x174] sm:$0xf0] }
 0x5b6   : > { %v11721_v28 = vld [vmem:[%s13911_s23 + $0x1a30] sm:$0xf0]  ;;  %v8815_v14 = vld [vmem:[%s13911_s23 + $0x358] sm:$0xf]  ;;  %v8560_v35 = vor.u32 %v12520_v12, %v8559_v57 }
 0x5b7   : > { %v13371_v62 = vld [vmem:[%s13911_s23 + $0x1c14] sm:$0xf]  ;;  %v11724_v55 = vor.u32 %v13307_v23, %v11721_v28  ;;  %7706 = vmatpush.bf16.msrb.mxu0 %v11468_v47  ;;  %v12648_v23 = vld [vmem:[%s13911_s23 + $0x574] sm:$0xf0]  ;;  %v7488_v47 = vadd.f32 %v15739_v49, %v7475_v51  ;;  %v291_v51 = vld [vmem:[%s13935_s11 + $0x20] sm:$0xff] }
 0x5b8   : > { %v11977_v19 = vld [vmem:[%s13911_s23 + $0x1c30] sm:$0xf0]  ;;  %v9327_v28 = vld [vmem:[%s13911_s23 + $0x758] sm:$0xf] }
 0x5b9   : > { %v13435_v40 = vld [vmem:[%s13911_s23 + $0x1e14] sm:$0xf]  ;;  %v11980_v56 = vor.u32 %v13371_v62, %v11977_v19  ;;  %7719 = vmatpush.bf16.msrb.mxu1 %v11724_v55  ;;  %v12712_v62 = vld [vmem:[%s13911_s23 + $0x774] sm:$0xf0]  ;;  %v8816_v19 = vor.u32 %v12584_v16, %v8815_v14  ;;  %v7513_v55 = vpop.f32.mrf.mxu1 }
 0x5ba   : > { %v12233_v13 = vld [vmem:[%s13911_s23 + $0x1e30] sm:$0xf0]  ;;  %7707 = vmatmul.bf16.vlgmr.msrb.gmra.mxu0 %v14257_v24  ;;  %v8527_v25 = vld [vmem:[%s13911_s23 + $0x118] sm:$0xf]  ;;  %v9328_v10 = vor.u32 %v12712_v62, %v9327_v28 }
 0x5bb   : > { %v12236_v61 = vor.u32 %v13435_v40, %v12233_v13  ;;  %7732 = vmatpush.bf16.msrb.mxu2 %v11980_v56  ;;  %7751 = vmatpush.bf16.msra.mxu0 %v8624_v53  ;;  %v9072_v40 = vor.u32 %v12648_v23, %v9071_v27  ;;  %v12512_v13 = vld [vmem:[%s13911_s23 + $0x134] sm:$0xf0]  ;;  %v7501_v56 = vadd.f32 %v7500_v50, %v7488_v47  ;;  %v7502_v23 = vpop.f32.mrf.mxu0 }
 0x5bc   : > { %7720 = vmatmul.bf16.vlgmr.msrb.gmra.mxu1 %v14264_v32  ;;  %v9039_v46 = vld [vmem:[%s13911_s23 + $0x518] sm:$0xf]  ;;  %v8528_v59 = vor.u32 %v12512_v13, %v8527_v25 }
 0x5bd   : > { %7745 = vmatpush.bf16.msrb.mxu3 %v12236_v61  ;;  %7764 = vmatpush.bf16.msra.mxu1 %v8880_v60  ;;  %v9295_v58 = vld [vmem:[%s13911_s23 + $0x718] sm:$0xf]  ;;  %v9040_v15 = vor.u32 %v12640_v17, %v9039_v46  ;;  %v7514_v20 = vadd.f32 %v7513_v55, %v7501_v56 }
 0x5be   : > { %7733 = vmatmul.bf16.vlgmr.msrb.gmra.mxu2 %v14262_v29  ;;  %v12704_v11 = vld [vmem:[%s13911_s23 + $0x734] sm:$0xf0] }
 0x5bf   : > { %7777 = vmatpush.bf16.msra.mxu2 %v9136_v63  ;;  %7752 = vmatpush.bf16.msra.mxu0 %v8592_v54  ;;  %v8495_v61 = vld [vmem:[%s13911_s23 + $0xd8] sm:$0xf]  ;;  %v9296_v44 = vor.u32 %v12704_v11, %v9295_v58 }
 0x5c0   : > { %7746 = vmatmul.bf16.vlgmr.msrb.gmra.mxu3 %v14268_v36  ;;  %v12504_v53 = vld [vmem:[%s13911_s23 + $0xf4] sm:$0xf0] }
 0x5c1   : > { %7790 = vmatpush.bf16.msra.mxu3 %v9392_v4  ;;  %7765 = vmatpush.bf16.msra.mxu1 %v8848_v52  ;;  %v8751_v49 = vld [vmem:[%s13911_s23 + $0x2d8] sm:$0xf]  ;;  %v8496_v4 = vor.u32 %v12504_v53, %v8495_v61  ;;  %v7526_v52 = vpop.f32.mrf.mxu2  ;;  %v7515_v62 = vpop.f32.mrf.mxu1 }
 0x5c2   : > { %v12568_v60 = vld [vmem:[%s13911_s23 + $0x2f4] sm:$0xf0]  ;;  %v7527_v14 = vadd.f32 %v7526_v52, %v7514_v20 }
 0x5c3   : > { %7778 = vmatpush.bf16.msra.mxu2 %v9104_v8  ;;  %7753 = vmatpush.bf16.msra.mxu0 %v8560_v35  ;;  %v9007_v63 = vld [vmem:[%s13911_s23 + $0x4d8] sm:$0xf]  ;;  %v8752_v38 = vor.u32 %v12568_v60, %v8751_v49 }
 0x5c4   : > { %v12632_v1 = vld [vmem:[%s13911_s23 + $0x4f4] sm:$0xf0] }
 0x5c5   : > { %7791 = vmatpush.bf16.msra.mxu3 %v9360_v18  ;;  %7766 = vmatpush.bf16.msra.mxu1 %v8816_v19  ;;  %v9263_v48 = vld [vmem:[%s13911_s23 + $0x6d8] sm:$0xf]  ;;  %v9008_v9 = vor.u32 %v12632_v1, %v9007_v63  ;;  %v7539_v18 = vpop.f32.mrf.mxu3 }
 0x5c6   : > { %v12696_v2 = vld [vmem:[%s13911_s23 + $0x6f4] sm:$0xf0]  ;;  %v7540_v35 = vadd.f32 %v7539_v18, %v7527_v14 }
 0x5c7   : > { %7779 = vmatpush.bf16.msra.mxu2 %v9072_v40  ;;  %7754 = vmatpush.bf16.msra.mxu0 %v8528_v59  ;;  %v8463_v0 = vld [vmem:[%s13911_s23 + $0x98] sm:$0xf]  ;;  %v9264_v37 = vor.u32 %v12696_v2, %v9263_v48 }
 0x5c8   : > { %v12496_v6 = vld [vmem:[%s13911_s23 + $0xb4] sm:$0xf0]  ;;  %v8171_v47 = vadd.f32 %v7540_v35, %v291_v51 }
 0x5c9   : > { %7792 = vmatpush.bf16.msra.mxu3 %v9328_v10  ;;  %7767 = vmatpush.bf16.msra.mxu1 %v8784_v3  ;;  %v8719_v54 = vld [vmem:[%s13911_s23 + $0x298] sm:$0xf]  ;;  %v8464_v28 = vor.u32 %v12496_v6, %v8463_v0  ;;  %v7528_v1 = vpop.f32.mrf.mxu2 }
 0x5ca   : > { %v12560_v8 = vld [vmem:[%s13911_s23 + $0x2b4] sm:$0xf0]  ;;  %8179 = vst [vmem:[%s13935_s11 + $0x20] sm:$0xff] %v8171_v47 }
 0x5cb   : > { %7780 = vmatpush.bf16.msra.mxu2 %v9040_v15  ;;  %v8975_v57 = vld [vmem:[%s13911_s23 + $0x498] sm:$0xf]  ;;  %7755 = vmatpush.bf16.msra.mxu0 %v8496_v4  ;;  %v8720_v19 = vor.u32 %v12560_v8, %v8719_v54 }
 0x5cc   : > { %v12624_v12 = vld [vmem:[%s13911_s23 + $0x4b4] sm:$0xf0] }
 0x5cd   : > { %7793 = vmatpush.bf16.msra.mxu3 %v9296_v44  ;;  %v9231_v16 = vld [vmem:[%s13911_s23 + $0x698] sm:$0xf]  ;;  %7768 = vmatpush.bf16.msra.mxu1 %v8752_v38  ;;  %v8976_v40 = vor.u32 %v12624_v12, %v8975_v57  ;;  %v7541_v20 = vpop.f32.mrf.mxu3 }
 0x5ce   : > { %v12688_v27 = vld [vmem:[%s13911_s23 + $0x6b4] sm:$0xf0] }
 0x5cf   : > { %7781 = vmatpush.bf16.msra.mxu2 %v9008_v9  ;;  %v8431_v25 = vld [vmem:[%s13911_s23 + $0x58] sm:$0xf]  ;;  %v9232_v10 = vor.u32 %v12688_v27, %v9231_v16  ;;  %7756 = vmatpush.bf16.msra.mxu0 %v8464_v28 }
 0x5d0   : > { %v12488_v13 = vld [vmem:[%s13911_s23 + $0x74] sm:$0xf0] }
 0x5d1   : > { %v8687_v33 = vld [vmem:[%s13911_s23 + $0x258] sm:$0xf]  ;;  %7794 = vmatpush.bf16.msra.mxu3 %v9264_v37  ;;  %v8432_v11 = vor.u32 %v12488_v13, %v8431_v25  ;;  %7769 = vmatpush.bf16.msra.mxu1 %v8720_v19 }
 0x5d2   : > { %v12552_v41 = vld [vmem:[%s13911_s23 + $0x274] sm:$0xf0] }
 0x5d3   : > { %v8943_v46 = vld [vmem:[%s13911_s23 + $0x458] sm:$0xf]  ;;  %7782 = vmatpush.bf16.msra.mxu2 %v8976_v40  ;;  %v8688_v3 = vor.u32 %v12552_v41, %v8687_v33  ;;  %7757 = vmatpush.bf16.msra.mxu0 %v8432_v11 }
 0x5d4   : > { %v12616_v17 = vld [vmem:[%s13911_s23 + $0x474] sm:$0xf0] }
 0x5d5   : > { %v9199_v50 = vld [vmem:[%s13911_s23 + $0x658] sm:$0xf]  ;;  %v8944_v15 = vor.u32 %v12616_v17, %v8943_v46  ;;  %7795 = vmatpush.bf16.msra.mxu3 %v9232_v10  ;;  %7770 = vmatpush.bf16.msra.mxu1 %v8688_v3 }
 0x5d6   : > { %v12680_v58 = vld [vmem:[%s13911_s23 + $0x674] sm:$0xf0] }
 0x5d7   : > { %v8399_v59 = vld [vmem:[%s13911_s23 + $0x18] sm:$0xf]  ;;  %v9200_v49 = vor.u32 %v12680_v58, %v9199_v50  ;;  %7783 = vmatpush.bf16.msra.mxu2 %v8944_v15 }
 0x5d8   : > { %v12480_v55 = vld [vmem:[%s13911_s23 + $0x34] sm:$0xf0] }
 0x5d9   : > { %v8655_v56 = vld [vmem:[%s13911_s23 + $0x218] sm:$0xf]  ;;  %v8400_v38 = vor.u32 %v12480_v55, %v8399_v59  ;;  %7796 = vmatpush.bf16.msra.mxu3 %v9200_v49 }
 0x5da   : > { %v12544_v61 = vld [vmem:[%s13911_s23 + $0x234] sm:$0xf0] }
 0x5db   : > { %v8911_v53 = vld [vmem:[%s13911_s23 + $0x418] sm:$0xf]  ;;  %v8656_v54 = vor.u32 %v12544_v61, %v8655_v56  ;;  %7758 = vmatpush.bf16.msra.mxu0 %v8400_v38 }
 0x5dc   : > { %v12608_v44 = vld [vmem:[%s13911_s23 + $0x434] sm:$0xf0] }
 0x5dd   : > { %v9167_v60 = vld [vmem:[%s13911_s23 + $0x618] sm:$0xf]  ;;  %v8912_v37 = vor.u32 %v12608_v44, %v8911_v53  ;;  %7771 = vmatpush.bf16.msra.mxu1 %v8656_v54  ;;  %v7565_v54 = vpop.f32.mrf.mxu1 }
 0x5de   : > { %v12672_v63 = vld [vmem:[%s13911_s23 + $0x634] sm:$0xf0]  ;;  %7759 = vmatmul.bf16.vlgmr.msra.gmra.mxu0 %v14049_v21 }
 0x5df   : > { %v9647_v48 = vld [vmem:[%s13911_s23 + $0x9d8] sm:$0xf]  ;;  %v9168_v57 = vor.u32 %v12672_v63, %v9167_v60  ;;  %7784 = vmatpush.bf16.msra.mxu2 %v8912_v37 }
 0x5e0   : > { %v12792_v2 = vld [vmem:[%s13911_s23 + $0x9f4] sm:$0xf0]  ;;  %7772 = vmatmul.bf16.vlgmr.msra.gmra.mxu1 %v14052_v22 }
 0x5e1   : > { %v9903_v4 = vld [vmem:[%s13911_s23 + $0xbd8] sm:$0xf]  ;;  %v9648_v12 = vor.u32 %v12792_v2, %v9647_v48  ;;  %7797 = vmatpush.bf16.msra.mxu3 %v9168_v57 }
 0x5e2   : > { %v12856_v9 = vld [vmem:[%s13911_s23 + $0xbf4] sm:$0xf0]  ;;  %7785 = vmatmul.bf16.vlgmr.msra.gmra.mxu2 %v14035_v5 }
 0x5e3   : > { %v10159_v0 = vld [vmem:[%s13911_s23 + $0xdd8] sm:$0xf]  ;;  %v9904_v14 = vor.u32 %v12856_v9, %v9903_v4  ;;  %7803 = vmatpush.bf16.msrb.mxu0 %v9648_v12  ;;  %v7552_v4 = vpop.f32.mrf.mxu0 }
 0x5e4   : > { %v12920_v6 = vld [vmem:[%s13911_s23 + $0xdf4] sm:$0xf0]  ;;  %7798 = vmatmul.bf16.vlgmr.msra.gmra.mxu3 %v14038_v7  ;;  %v7566_v12 = vadd.f32 %v7565_v54, %v7552_v4 }
 0x5e5   : > { %v10415_v52 = vld [vmem:[%s13911_s23 + $0xfd8] sm:$0xf]  ;;  %v10160_v18 = vor.u32 %v12920_v6, %v10159_v0  ;;  %7816 = vmatpush.bf16.msrb.mxu1 %v9904_v14 }
 0x5e6   : > { %v12984_v8 = vld [vmem:[%s13911_s23 + $0xff4] sm:$0xf0] }
 0x5e7   : > { %v9615_v16 = vld [vmem:[%s13911_s23 + $0x998] sm:$0xf]  ;;  %v10416_v51 = vor.u32 %v12984_v8, %v10415_v52  ;;  %7829 = vmatpush.bf16.msrb.mxu2 %v10160_v18 }
 0x5e8   : > { %v12784_v27 = vld [vmem:[%s13911_s23 + $0x9b4] sm:$0xf0] }
 0x5e9   : > { %v9871_v23 = vld [vmem:[%s13911_s23 + $0xb98] sm:$0xf]  ;;  %v9616_v25 = vor.u32 %v12784_v27, %v9615_v16  ;;  %7842 = vmatpush.bf16.msrb.mxu3 %v10416_v51 }
 0x5ea   : > { %v12848_v28 = vld [vmem:[%s13911_s23 + $0xbb4] sm:$0xf0] }
 0x5eb   : > { %v10127_v62 = vld [vmem:[%s13911_s23 + $0xd98] sm:$0xf]  ;;  %v9872_v13 = vor.u32 %v12848_v28, %v9871_v23  ;;  %7804 = vmatpush.bf16.msrb.mxu0 %v9616_v25 }
 0x5ec   : > { %v12912_v35 = vld [vmem:[%s13911_s23 + $0xdb4] sm:$0xf0] }
 0x5ed   : > { %v10383_v19 = vld [vmem:[%s13911_s23 + $0xf98] sm:$0xf]  ;;  %v10128_v33 = vor.u32 %v12912_v35, %v10127_v62  ;;  %7817 = vmatpush.bf16.msrb.mxu1 %v9872_v13  ;;  %v7578_v35 = vpop.f32.mrf.mxu2 }
 0x5ee   : > { %v12976_v40 = vld [vmem:[%s13911_s23 + $0xfb4] sm:$0xf0] }
 0x5ef   : > { %v9583_v10 = vld [vmem:[%s13911_s23 + $0x958] sm:$0xf]  ;;  %v10384_v17 = vor.u32 %v12976_v40, %v10383_v19  ;;  %7830 = vmatpush.bf16.msrb.mxu2 %v10128_v33  ;;  %v7579_v33 = vadd.f32 %v7578_v35, %v7566_v12 }
 0x5f0   : > { %v12776_v41 = vld [vmem:[%s13911_s23 + $0x974] sm:$0xf0] }
 0x5f1   : > { %v9839_v46 = vld [vmem:[%s13911_s23 + $0xb58] sm:$0xf]  ;;  %v9584_v55 = vor.u32 %v12776_v41, %v9583_v10  ;;  %7843 = vmatpush.bf16.msrb.mxu3 %v10384_v17  ;;  %v7591_v10 = vpop.f32.mrf.mxu3 }
 0x5f2   : > { %v12840_v47 = vld [vmem:[%s13911_s23 + $0xb74] sm:$0xf0] }
 0x5f3   : > { %v10095_v50 = vld [vmem:[%s13911_s23 + $0xd58] sm:$0xf]  ;;  %v9840_v56 = vor.u32 %v12840_v47, %v9839_v46  ;;  %7805 = vmatpush.bf16.msrb.mxu0 %v9584_v55  ;;  %v15888_v47 = vadd.f32 %v7591_v10, %v7579_v33 }
 0x5f4   : > { %v12904_v58 = vld [vmem:[%s13911_s23 + $0xd74] sm:$0xf0] }
 0x5f5   : > { %v10351_v11 = vld [vmem:[%s13911_s23 + $0xf58] sm:$0xf]  ;;  %v10096_v3 = vor.u32 %v12904_v58, %v10095_v50  ;;  %7818 = vmatpush.bf16.msrb.mxu1 %v9840_v56  ;;  %v7554_v50 = vpop.f32.mrf.mxu0 }
 0x5f6   : > { %v12968_v59 = vld [vmem:[%s13911_s23 + $0xf74] sm:$0xf0] }
 0x5f7   : > { %v9551_v15 = vld [vmem:[%s13911_s23 + $0x918] sm:$0xf]  ;;  %v10352_v49 = vor.u32 %v12968_v59, %v10351_v11  ;;  %7831 = vmatpush.bf16.msrb.mxu2 %v10096_v3  ;;  %v7567_v3 = vpop.f32.mrf.mxu1 }
 0x5f8   : > { %v12768_v61 = vld [vmem:[%s13911_s23 + $0x934] sm:$0xf0] }
 0x5f9   : > { %v9807_v53 = vld [vmem:[%s13911_s23 + $0xb18] sm:$0xf]  ;;  %v9552_v2 = vor.u32 %v12768_v61, %v9551_v15  ;;  %7844 = vmatpush.bf16.msrb.mxu3 %v10352_v49 }
 0x5fa   : > { %v12832_v44 = vld [vmem:[%s13911_s23 + $0xb34] sm:$0xf0] }
 0x5fb   : > { %v10063_v60 = vld [vmem:[%s13911_s23 + $0xd18] sm:$0xf]  ;;  %v9808_v20 = vor.u32 %v12832_v44, %v9807_v53  ;;  %7806 = vmatpush.bf16.msrb.mxu0 %v9552_v2 }
 0x5fc   : > { %v12896_v63 = vld [vmem:[%s13911_s23 + $0xd34] sm:$0xf0] }
 0x5fd   : > { %v10319_v1 = vld [vmem:[%s13911_s23 + $0xf18] sm:$0xf]  ;;  %v10064_v38 = vor.u32 %v12896_v63, %v10063_v60  ;;  %7819 = vmatpush.bf16.msrb.mxu1 %v9808_v20 }
 0x5fe   : > { %v12960_v48 = vld [vmem:[%s13911_s23 + $0xf34] sm:$0xf0] }
 0x5ff   : > { %v9519_v9 = vld [vmem:[%s13911_s23 + $0x8d8] sm:$0xf]  ;;  %v10320_v37 = vor.u32 %v12960_v48, %v10319_v1  ;;  %7832 = vmatpush.bf16.msrb.mxu2 %v10064_v38 }
 0x600   : > { %v12760_v0 = vld [vmem:[%s13911_s23 + $0x8f4] sm:$0xf0] }
 0x601   : > { %v9775_v6 = vld [vmem:[%s13911_s23 + $0xad8] sm:$0xf]  ;;  %v9520_v16 = vor.u32 %v12760_v0, %v9519_v9  ;;  %7845 = vmatpush.bf16.msrb.mxu3 %v10320_v37  ;;  %v7580_v0 = vpop.f32.mrf.mxu2 }
 0x602   : > { %v12824_v52 = vld [vmem:[%s13911_s23 + $0xaf4] sm:$0xf0] }
 0x603   : > { %v10031_v8 = vld [vmem:[%s13911_s23 + $0xcd8] sm:$0xf]  ;;  %v9776_v27 = vor.u32 %v12824_v52, %v9775_v6  ;;  %7807 = vmatpush.bf16.msrb.mxu0 %v9520_v16 }
 0x604   : > { %v12888_v57 = vld [vmem:[%s13911_s23 + $0xcf4] sm:$0xf0] }
 0x605   : > { %v10287_v14 = vld [vmem:[%s13911_s23 + $0xed8] sm:$0xf]  ;;  %v10032_v23 = vor.u32 %v12888_v57, %v10031_v8  ;;  %7820 = vmatpush.bf16.msrb.mxu1 %v9776_v27  ;;  %v7593_v8 = vpop.f32.mrf.mxu3 }
 0x606   : > { %v12952_v18 = vld [vmem:[%s13911_s23 + $0xef4] sm:$0xf0] }
 0x607   : > { %v9487_v51 = vld [vmem:[%s13911_s23 + $0x898] sm:$0xf]  ;;  %v10288_v19 = vor.u32 %v12952_v18, %v10287_v14  ;;  %7833 = vmatpush.bf16.msrb.mxu2 %v10032_v23 }
 0x608   : > { %v12752_v28 = vld [vmem:[%s13911_s23 + $0x8b4] sm:$0xf0] }
 0x609   : > { %v9743_v62 = vld [vmem:[%s13911_s23 + $0xa98] sm:$0xf]  ;;  %v9488_v17 = vor.u32 %v12752_v28, %v9487_v51  ;;  %7846 = vmatpush.bf16.msrb.mxu3 %v10288_v19 }
 0x60a   : > { %v12816_v40 = vld [vmem:[%s13911_s23 + $0xab4] sm:$0xf0] }
 0x60b   : > { %v9999_v25 = vld [vmem:[%s13911_s23 + $0xc98] sm:$0xf]  ;;  %v9744_v58 = vor.u32 %v12816_v40, %v9743_v62  ;;  %7808 = vmatpush.bf16.msrb.mxu0 %v9488_v17 }
 0x60c   : > { %v12880_v13 = vld [vmem:[%s13911_s23 + $0xcb4] sm:$0xf0] }
 0x60d   : > { %v10255_v41 = vld [vmem:[%s13911_s23 + $0xe98] sm:$0xf]  ;;  %v10000_v11 = vor.u32 %v12880_v13, %v9999_v25  ;;  %7821 = vmatpush.bf16.msrb.mxu1 %v9744_v58 }
 0x60e   : > { %v12944_v46 = vld [vmem:[%s13911_s23 + $0xeb4] sm:$0xf0] }
 0x60f   : > { %v9455_v59 = vld [vmem:[%s13911_s23 + $0x858] sm:$0xf]  ;;  %v10256_v15 = vor.u32 %v12944_v46, %v10255_v41  ;;  %7834 = vmatpush.bf16.msrb.mxu2 %v10000_v11 }
 0x610   : > { %v12744_v55 = vld [vmem:[%s13911_s23 + $0x874] sm:$0xf0] }
 0x611   : > { %v9711_v56 = vld [vmem:[%s13911_s23 + $0xa58] sm:$0xf]  ;;  %v9456_v63 = vor.u32 %v12744_v55, %v9455_v59  ;;  %7847 = vmatpush.bf16.msrb.mxu3 %v10256_v15 }
 0x612   : > { %v12808_v61 = vld [vmem:[%s13911_s23 + $0xa74] sm:$0xf0] }
 0x613   : > { %v9967_v53 = vld [vmem:[%s13911_s23 + $0xc58] sm:$0xf]  ;;  %v9712_v2 = vor.u32 %v12808_v61, %v9711_v56  ;;  %7809 = vmatpush.bf16.msrb.mxu0 %v9456_v63 }
 0x614   : > { %v12872_v49 = vld [vmem:[%s13911_s23 + $0xc74] sm:$0xf0] }
 0x615   : > { %v10223_v44 = vld [vmem:[%s13911_s23 + $0xe58] sm:$0xf]  ;;  %v9968_v4 = vor.u32 %v12872_v49, %v9967_v53  ;;  %7822 = vmatpush.bf16.msrb.mxu1 %v9712_v2 }
 0x616   : > { %v12936_v60 = vld [vmem:[%s13911_s23 + $0xe74] sm:$0xf0] }
 0x617   : > { %v9423_v1 = vld [vmem:[%s13911_s23 + $0x818] sm:$0xf]  ;;  %v10224_v6 = vor.u32 %v12936_v60, %v10223_v44  ;;  %7835 = vmatpush.bf16.msrb.mxu2 %v9968_v4 }
 0x618   : > { %v12736_v48 = vld [vmem:[%s13911_s23 + $0x834] sm:$0xf0] }
 0x619   : > { %v9679_v20 = vld [vmem:[%s13911_s23 + $0xa18] sm:$0xf]  ;;  %v9424_v18 = vor.u32 %v12736_v48, %v9423_v1  ;;  %7848 = vmatpush.bf16.msrb.mxu3 %v10224_v6 }
 0x61a   : > { %v12800_v38 = vld [vmem:[%s13911_s23 + $0xa34] sm:$0xf0] }
 0x61b   : > { %v9935_v9 = vld [vmem:[%s13911_s23 + $0xc18] sm:$0xf]  ;;  %v9680_v51 = vor.u32 %v12800_v38, %v9679_v20  ;;  %7810 = vmatpush.bf16.msrb.mxu0 %v9424_v18 }
 0x61c   : > { %v12864_v54 = vld [vmem:[%s13911_s23 + $0xc34] sm:$0xf0] }
 0x61d   : > { %v10191_v37 = vld [vmem:[%s13911_s23 + $0xe18] sm:$0xf]  ;;  %v9936_v28 = vor.u32 %v12864_v54, %v9935_v9  ;;  %7823 = vmatpush.bf16.msrb.mxu1 %v9680_v51 }
 0x61e   : > { %v12928_v52 = vld [vmem:[%s13911_s23 + $0xe34] sm:$0xf0]  ;;  %7811 = vmatmul.bf16.vlgmr.msrb.gmra.mxu0 %v14108_v42 }
 0x61f   : > { %v10671_v57 = vld [vmem:[%s13911_s23 + $0x11d8] sm:$0xf]  ;;  %v10192_v19 = vor.u32 %v12928_v52, %v10191_v37  ;;  %7836 = vmatpush.bf16.msrb.mxu2 %v9936_v28  ;;  %v15947_v28 = vpop.f32.mrf.mxu1 }
 0x620   : > { %v13048_v12 = vld [vmem:[%s13911_s23 + $0x11f4] sm:$0xf0]  ;;  %7824 = vmatmul.bf16.vlgmr.msrb.gmra.mxu1 %v14112_v45 }
 0x621   : > { %v10927_v14 = vld [vmem:[%s13911_s23 + $0x13d8] sm:$0xf]  ;;  %v10672_v40 = vor.u32 %v13048_v12, %v10671_v57  ;;  %7849 = vmatpush.bf16.msrb.mxu3 %v10192_v19 }
 0x622   : > { %v13112_v16 = vld [vmem:[%s13911_s23 + $0x13f4] sm:$0xf0]  ;;  %7837 = vmatmul.bf16.vlgmr.msrb.gmra.mxu2 %v14104_v39 }
 0x623   : > { %v11183_v27 = vld [vmem:[%s13911_s23 + $0x15d8] sm:$0xf]  ;;  %v10928_v25 = vor.u32 %v13112_v16, %v10927_v14  ;;  %7855 = vmatpush.bf16.msra.mxu0 %v10672_v40  ;;  %v15942_v14 = vpop.f32.mrf.mxu0 }
 0x624   : > { %v13176_v23 = vld [vmem:[%s13911_s23 + $0x15f4] sm:$0xf0]  ;;  %7850 = vmatmul.bf16.vlgmr.msrb.gmra.mxu3 %v14110_v43 }
 0x625   : > { %v11439_v62 = vld [vmem:[%s13911_s23 + $0x17d8] sm:$0xf]  ;;  %v11184_v13 = vor.u32 %v13176_v23, %v11183_v27  ;;  %7868 = vmatpush.bf16.msra.mxu1 %v10928_v25 }
 0x626   : > { %v13240_v35 = vld [vmem:[%s13911_s23 + $0x17f4] sm:$0xf0] }
 0x627   : > { %v10639_v33 = vld [vmem:[%s13911_s23 + $0x1198] sm:$0xf]  ;;  %v11440_v46 = vor.u32 %v13240_v35, %v11439_v62  ;;  %7881 = vmatpush.bf16.msra.mxu2 %v11184_v13 }
 0x628   : > { %v13040_v10 = vld [vmem:[%s13911_s23 + $0x11b4] sm:$0xf0] }
 0x629   : > { %v10895_v41 = vld [vmem:[%s13911_s23 + $0x1398] sm:$0xf]  ;;  %v10640_v55 = vor.u32 %v13040_v10, %v10639_v33  ;;  %7894 = vmatpush.bf16.msra.mxu3 %v11440_v46 }
 0x62a   : > { %v13104_v17 = vld [vmem:[%s13911_s23 + $0x13b4] sm:$0xf0] }
 0x62b   : > { %v11151_v50 = vld [vmem:[%s13911_s23 + $0x1598] sm:$0xf]  ;;  %v10896_v56 = vor.u32 %v13104_v17, %v10895_v41  ;;  %7856 = vmatpush.bf16.msra.mxu0 %v10640_v55 }
 0x62c   : > { %v13168_v58 = vld [vmem:[%s13911_s23 + $0x15b4] sm:$0xf0] }
 0x62d   : > { %v11407_v11 = vld [vmem:[%s13911_s23 + $0x1798] sm:$0xf]  ;;  %v11152_v3 = vor.u32 %v13168_v58, %v11151_v50  ;;  %7869 = vmatpush.bf16.msra.mxu1 %v10896_v56  ;;  %v15957_v58 = vpop.f32.mrf.mxu2 }
 0x62e   : > { %v13232_v59 = vld [vmem:[%s13911_s23 + $0x17b4] sm:$0xf0] }
 0x62f   : > { %v10607_v15 = vld [vmem:[%s13911_s23 + $0x1158] sm:$0xf]  ;;  %v11408_v49 = vor.u32 %v13232_v59, %v11407_v11  ;;  %7882 = vmatpush.bf16.msra.mxu2 %v11152_v3  ;;  %v15962_v3 = vpop.f32.mrf.mxu3 }
 0x630   : > { %v13032_v61 = vld [vmem:[%s13911_s23 + $0x1174] sm:$0xf0] }
 0x631   : > { %v10863_v53 = vld [vmem:[%s13911_s23 + $0x1358] sm:$0xf]  ;;  %v10608_v2 = vor.u32 %v13032_v61, %v10607_v15  ;;  %7895 = vmatpush.bf16.msra.mxu3 %v11408_v49  ;;  %v7606_v49 = vpop.f32.mrf.mxu0 }
 0x632   : > { %v13096_v44 = vld [vmem:[%s13911_s23 + $0x1374] sm:$0xf0] }
 0x633   : > { %v11119_v60 = vld [vmem:[%s13911_s23 + $0x1558] sm:$0xf]  ;;  %v10864_v4 = vor.u32 %v13096_v44, %v10863_v53  ;;  %7857 = vmatpush.bf16.msra.mxu0 %v10608_v2  ;;  %v7619_v2 = vpop.f32.mrf.mxu1 }
 0x634   : > { %v13160_v63 = vld [vmem:[%s13911_s23 + $0x1574] sm:$0xf0] }
 0x635   : > { %v11375_v1 = vld [vmem:[%s13911_s23 + $0x1758] sm:$0xf]  ;;  %v11120_v20 = vor.u32 %v13160_v63, %v11119_v60  ;;  %7870 = vmatpush.bf16.msra.mxu1 %v10864_v4 }
 0x636   : > { %v13224_v48 = vld [vmem:[%s13911_s23 + $0x1774] sm:$0xf0] }
 0x637   : > { %v10575_v38 = vld [vmem:[%s13911_s23 + $0x1118] sm:$0xf]  ;;  %v11376_v6 = vor.u32 %v13224_v48, %v11375_v1  ;;  %7883 = vmatpush.bf16.msra.mxu2 %v11120_v20 }
 0x638   : > { %v13024_v9 = vld [vmem:[%s13911_s23 + $0x1134] sm:$0xf0] }
 0x639   : > { %v10831_v0 = vld [vmem:[%s13911_s23 + $0x1318] sm:$0xf]  ;;  %v10576_v12 = vor.u32 %v13024_v9, %v10575_v38  ;;  %7896 = vmatpush.bf16.msra.mxu3 %v11376_v6 }
 0x63a   : > { %v13088_v54 = vld [vmem:[%s13911_s23 + $0x1334] sm:$0xf0] }
 0x63b   : > { %v11087_v37 = vld [vmem:[%s13911_s23 + $0x1518] sm:$0xf]  ;;  %v10832_v18 = vor.u32 %v13088_v54, %v10831_v0  ;;  %7858 = vmatpush.bf16.msra.mxu0 %v10576_v12 }
 0x63c   : > { %v13152_v52 = vld [vmem:[%s13911_s23 + $0x1534] sm:$0xf0] }
 0x63d   : > { %v11343_v8 = vld [vmem:[%s13911_s23 + $0x1718] sm:$0xf]  ;;  %v11088_v16 = vor.u32 %v13152_v52, %v11087_v37  ;;  %7871 = vmatpush.bf16.msra.mxu1 %v10832_v18 }
 0x63e   : > { %v13216_v57 = vld [vmem:[%s13911_s23 + $0x1734] sm:$0xf0] }
 0x63f   : > { %v10543_v27 = vld [vmem:[%s13911_s23 + $0x10d8] sm:$0xf]  ;;  %v11344_v62 = vor.u32 %v13216_v57, %v11343_v8  ;;  %7884 = vmatpush.bf16.msra.mxu2 %v11088_v16 }
 0x640   : > { %v13016_v23 = vld [vmem:[%s13911_s23 + $0x10f4] sm:$0xf0] }
 0x641   : > { %v10799_v51 = vld [vmem:[%s13911_s23 + $0x12d8] sm:$0xf]  ;;  %v10544_v33 = vor.u32 %v13016_v23, %v10543_v27  ;;  %7897 = vmatpush.bf16.msra.mxu3 %v11344_v62  ;;  %v7632_v27 = vpop.f32.mrf.mxu2 }
 0x642   : > { %v13080_v35 = vld [vmem:[%s13911_s23 + $0x12f4] sm:$0xf0] }
 0x643   : > { %v11055_v19 = vld [vmem:[%s13911_s23 + $0x14d8] sm:$0xf]  ;;  %v10800_v10 = vor.u32 %v13080_v35, %v10799_v51  ;;  %7859 = vmatpush.bf16.msra.mxu0 %v10544_v33 }
 0x644   : > { %v13144_v40 = vld [vmem:[%s13911_s23 + $0x14f4] sm:$0xf0] }
 0x645   : > { %v11311_v25 = vld [vmem:[%s13911_s23 + $0x16d8] sm:$0xf]  ;;  %v11056_v41 = vor.u32 %v13144_v40, %v11055_v19  ;;  %7872 = vmatpush.bf16.msra.mxu1 %v10800_v10  ;;  %v7645_v19 = vpop.f32.mrf.mxu3 }
 0x646   : > { %v13208_v13 = vld [vmem:[%s13911_s23 + $0x16f4] sm:$0xf0] }
 0x647   : > { %v10511_v46 = vld [vmem:[%s13911_s23 + $0x1098] sm:$0xf]  ;;  %v11312_v11 = vor.u32 %v13208_v13, %v11311_v25  ;;  %7885 = vmatpush.bf16.msra.mxu2 %v11056_v41 }
 0x648   : > { %v13008_v17 = vld [vmem:[%s13911_s23 + $0x10b4] sm:$0xf0] }
 0x649   : > { %v10767_v50 = vld [vmem:[%s13911_s23 + $0x1298] sm:$0xf]  ;;  %v10512_v53 = vor.u32 %v13008_v17, %v10511_v46  ;;  %7898 = vmatpush.bf16.msra.mxu3 %v11312_v11 }
 0x64a   : > { %v13072_v59 = vld [vmem:[%s13911_s23 + $0x12b4] sm:$0xf0] }
 0x64b   : > { %v11023_v55 = vld [vmem:[%s13911_s23 + $0x1498] sm:$0xf]  ;;  %v10768_v44 = vor.u32 %v13072_v59, %v10767_v50  ;;  %7860 = vmatpush.bf16.msra.mxu0 %v10512_v53 }
 0x64c   : > { %v13136_v56 = vld [vmem:[%s13911_s23 + $0x14b4] sm:$0xf0] }
 0x64d   : > { %v11279_v15 = vld [vmem:[%s13911_s23 + $0x1698] sm:$0xf]  ;;  %v11024_v60 = vor.u32 %v13136_v56, %v11023_v55  ;;  %7873 = vmatpush.bf16.msra.mxu1 %v10768_v44 }
 0x64e   : > { %v13200_v61 = vld [vmem:[%s13911_s23 + $0x16b4] sm:$0xf0] }
 0x64f   : > { %v10479_v63 = vld [vmem:[%s13911_s23 + $0x1058] sm:$0xf]  ;;  %v11280_v4 = vor.u32 %v13200_v61, %v11279_v15  ;;  %7886 = vmatpush.bf16.msra.mxu2 %v11024_v60 }
 0x650   : > { %v13000_v1 = vld [vmem:[%s13911_s23 + $0x1074] sm:$0xf0] }
 0x651   : > { %v10735_v48 = vld [vmem:[%s13911_s23 + $0x1258] sm:$0xf]  ;;  %v10480_v54 = vor.u32 %v13000_v1, %v10479_v63  ;;  %7899 = vmatpush.bf16.msra.mxu3 %v11280_v4 }
 0x652   : > { %v13064_v20 = vld [vmem:[%s13911_s23 + $0x1274] sm:$0xf0] }
 0x653   : > { %v10991_v38 = vld [vmem:[%s13911_s23 + $0x1458] sm:$0xf]  ;;  %v10736_v8 = vor.u32 %v13064_v20, %v10735_v48  ;;  %7861 = vmatpush.bf16.msra.mxu0 %v10480_v54 }
 0x654   : > { %v13128_v9 = vld [vmem:[%s13911_s23 + $0x1474] sm:$0xf0] }
 0x655   : > { %v11247_v0 = vld [vmem:[%s13911_s23 + $0x1658] sm:$0xf]  ;;  %v10992_v57 = vor.u32 %v13128_v9, %v10991_v38  ;;  %7874 = vmatpush.bf16.msra.mxu1 %v10736_v8 }
 0x656   : > { %v13192_v6 = vld [vmem:[%s13911_s23 + $0x1674] sm:$0xf0] }
 0x657   : > { %v10447_v37 = vld [vmem:[%s13911_s23 + $0x1018] sm:$0xf]  ;;  %v11248_v23 = vor.u32 %v13192_v6, %v11247_v0  ;;  %7887 = vmatpush.bf16.msra.mxu2 %v10992_v57 }
 0x658   : > { %v12992_v52 = vld [vmem:[%s13911_s23 + $0x1034] sm:$0xf0] }
 0x659   : > { %v10703_v12 = vld [vmem:[%s13911_s23 + $0x1218] sm:$0xf]  ;;  %v10448_v33 = vor.u32 %v12992_v52, %v10447_v37  ;;  %7900 = vmatpush.bf16.msra.mxu3 %v11248_v23 }
 0x65a   : > { %v13056_v18 = vld [vmem:[%s13911_s23 + $0x1234] sm:$0xf0] }
 0x65b   : > { %v10959_v16 = vld [vmem:[%s13911_s23 + $0x1418] sm:$0xf]  ;;  %v10704_v17 = vor.u32 %v13056_v18, %v10703_v12  ;;  %7862 = vmatpush.bf16.msra.mxu0 %v10448_v33  ;;  %v16016_v33 = vpop.f32.mrf.mxu0 }
 0x65c   : > { %v13120_v51 = vld [vmem:[%s13911_s23 + $0x1434] sm:$0xf0] }
 0x65d   : > { %v11215_v62 = vld [vmem:[%s13911_s23 + $0x1618] sm:$0xf]  ;;  %v10960_v50 = vor.u32 %v13120_v51, %v10959_v16  ;;  %7875 = vmatpush.bf16.msra.mxu1 %v10704_v17  ;;  %v16020_v17 = vpop.f32.mrf.mxu1 }
 0x65e   : > { %v13184_v35 = vld [vmem:[%s13911_s23 + $0x1634] sm:$0xf0]  ;;  %7863 = vmatmul.bf16.vlgmr.msra.gmra.mxu0 %v14179_v26 }
 0x65f   : > { %v11695_v40 = vld [vmem:[%s13911_s23 + $0x19d8] sm:$0xf]  ;;  %v11216_v55 = vor.u32 %v13184_v35, %v11215_v62  ;;  %7888 = vmatpush.bf16.msra.mxu2 %v10960_v50 }
 0x660   : > { %v13304_v25 = vld [vmem:[%s13911_s23 + $0x19f4] sm:$0xf0]  ;;  %7876 = vmatmul.bf16.vlgmr.msra.gmra.mxu1 %v14186_v31 }
 0x661   : > { %v11951_v13 = vld [vmem:[%s13911_s23 + $0x1bd8] sm:$0xf]  ;;  %v11696_v56 = vor.u32 %v13304_v25, %v11695_v40  ;;  %7901 = vmatpush.bf16.msra.mxu3 %v11216_v55 }
 0x662   : > { %v13368_v10 = vld [vmem:[%s13911_s23 + $0x1bf4] sm:$0xf0]  ;;  %7889 = vmatmul.bf16.vlgmr.msra.gmra.mxu2 %v14184_v30 }
 0x663   : > { %v12207_v41 = vld [vmem:[%s13911_s23 + $0x1dd8] sm:$0xf]  ;;  %v11952_v15 = vor.u32 %v13368_v10, %v11951_v13  ;;  %7907 = vmatpush.bf16.msrb.mxu0 %v11696_v56 }
 0x664   : > { %v13432_v46 = vld [vmem:[%s13911_s23 + $0x1df4] sm:$0xf0]  ;;  %7902 = vmatmul.bf16.vlgmr.msra.gmra.mxu3 %v14190_v34 }
 0x665   : > { %v12463_v11 = vld [vmem:[%s13911_s23 + $0x1fd8] sm:$0xf]  ;;  %v12208_v61 = vor.u32 %v13432_v46, %v12207_v41  ;;  %7920 = vmatpush.bf16.msrb.mxu1 %v11952_v15 }
 0x666   : > { %v13496_v59 = vld [vmem:[%s13911_s23 + $0x1ff4] sm:$0xf0] }
 0x667   : > { %v11663_v53 = vld [vmem:[%s13911_s23 + $0x1998] sm:$0xf]  ;;  %v12464_v60 = vor.u32 %v13496_v59, %v12463_v11  ;;  %7933 = vmatpush.bf16.msrb.mxu2 %v12208_v61 }
 0x668   : > { %v13296_v49 = vld [vmem:[%s13911_s23 + $0x19b4] sm:$0xf0] }
 0x669   : > { %v11919_v44 = vld [vmem:[%s13911_s23 + $0x1b98] sm:$0xf]  ;;  %v11664_v20 = vor.u32 %v13296_v49, %v11663_v53  ;;  %7946 = vmatpush.bf16.msrb.mxu3 %v12464_v60 }
 0x66a   : > { %v13360_v63 = vld [vmem:[%s13911_s23 + $0x1bb4] sm:$0xf0] }
 0x66b   : > { %v12175_v1 = vld [vmem:[%s13911_s23 + $0x1d98] sm:$0xf]  ;;  %v11920_v38 = vor.u32 %v13360_v63, %v11919_v44  ;;  %7908 = vmatpush.bf16.msrb.mxu0 %v11664_v20 }
 0x66c   : > { %v13424_v48 = vld [vmem:[%s13911_s23 + $0x1db4] sm:$0xf0] }
 0x66d   : > { %v12431_v2 = vld [vmem:[%s13911_s23 + $0x1f98] sm:$0xf]  ;;  %v12176_v9 = vor.u32 %v13424_v48, %v12175_v1  ;;  %7921 = vmatpush.bf16.msrb.mxu1 %v11920_v38  ;;  %v7605_v1 = vadd.f32 %v15942_v14, %v15888_v47 }
 0x66e   : > { %v13488_v4 = vld [vmem:[%s13911_s23 + $0x1fb4] sm:$0xf0] }
 0x66f   : > { %v11631_v0 = vld [vmem:[%s13911_s23 + $0x1958] sm:$0xf]  ;;  %v12432_v37 = vor.u32 %v13488_v4, %v12431_v2  ;;  %7934 = vmatpush.bf16.msrb.mxu2 %v12176_v9 }
 0x670   : > { %v13288_v6 = vld [vmem:[%s13911_s23 + $0x1974] sm:$0xf0] }
 0x671   : > { %v11887_v54 = vld [vmem:[%s13911_s23 + $0x1b58] sm:$0xf]  ;;  %v11632_v16 = vor.u32 %v13288_v6, %v11631_v0  ;;  %7947 = vmatpush.bf16.msrb.mxu3 %v12432_v37  ;;  %v16035_v0 = vpop.f32.mrf.mxu2 }
 0x672   : > { %v13352_v52 = vld [vmem:[%s13911_s23 + $0x1b74] sm:$0xf0] }
 0x673   : > { %v12143_v8 = vld [vmem:[%s13911_s23 + $0x1d58] sm:$0xf]  ;;  %v11888_v27 = vor.u32 %v13352_v52, %v11887_v54  ;;  %7909 = vmatpush.bf16.msrb.mxu0 %v11632_v16  ;;  %v16040_v52 = vpop.f32.mrf.mxu3 }
 0x674   : > { %v13416_v57 = vld [vmem:[%s13911_s23 + $0x1d74] sm:$0xf0] }
 0x675   : > { %v12399_v12 = vld [vmem:[%s13911_s23 + $0x1f58] sm:$0xf]  ;;  %v12144_v23 = vor.u32 %v13416_v57, %v12143_v8  ;;  %7922 = vmatpush.bf16.msrb.mxu1 %v11888_v27  ;;  %v7658_v8 = vpop.f32.mrf.mxu0 }
 0x676   : > { %v13480_v18 = vld [vmem:[%s13911_s23 + $0x1f74] sm:$0xf0] }
 0x677   : > { %v11599_v51 = vld [vmem:[%s13911_s23 + $0x1918] sm:$0xf]  ;;  %v12400_v19 = vor.u32 %v13480_v18, %v12399_v12  ;;  %7935 = vmatpush.bf16.msrb.mxu2 %v12144_v23  ;;  %v7671_v12 = vpop.f32.mrf.mxu1  ;;  %v7618_v18 = vadd.f32 %v15947_v28, %v7605_v1  ;;  %v12596_v1 = vld [vmem:[%s13911_s23 + $0x3dc] sm:$0xf] }
 0x678   : > { %v13280_v62 = vld [vmem:[%s13911_s23 + $0x1934] sm:$0xf0] }
 0x679   : > { %v11855_v35 = vld [vmem:[%s13911_s23 + $0x1b18] sm:$0xf]  ;;  %v11600_v46 = vor.u32 %v13280_v62, %v11599_v51  ;;  %7948 = vmatpush.bf16.msrb.mxu3 %v12400_v19 }
 0x67a   : > { %v13344_v40 = vld [vmem:[%s13911_s23 + $0x1b34] sm:$0xf0] }
 0x67b   : > { %v12111_v25 = vld [vmem:[%s13911_s23 + $0x1d18] sm:$0xf]  ;;  %v11856_v50 = vor.u32 %v13344_v40, %v11855_v35  ;;  %7910 = vmatpush.bf16.msrb.mxu0 %v11600_v46 }
 0x67c   : > { %v13408_v13 = vld [vmem:[%s13911_s23 + $0x1d34] sm:$0xf0] }
 0x67d   : > { %v12367_v10 = vld [vmem:[%s13911_s23 + $0x1f18] sm:$0xf]  ;;  %v12112_v11 = vor.u32 %v13408_v13, %v12111_v25  ;;  %7923 = vmatpush.bf16.msrb.mxu1 %v11856_v50  ;;  %v7631_v50 = vadd.f32 %v15957_v58, %v7618_v18  ;;  %v12532_v58 = vld [vmem:[%s13911_s23 + $0x1dc] sm:$0xf] }
 0x67e   : > { %v13472_v41 = vld [vmem:[%s13911_s23 + $0x1f34] sm:$0xf0] }
 0x67f   : > { %v11567_v59 = vld [vmem:[%s13911_s23 + $0x18d8] sm:$0xf]  ;;  %v12368_v15 = vor.u32 %v13472_v41, %v12367_v10  ;;  %7936 = vmatpush.bf16.msrb.mxu2 %v12112_v11 }
 0x680   : > { %v13272_v55 = vld [vmem:[%s13911_s23 + $0x18f4] sm:$0xf0] }
 0x681   : > { %v11823_v56 = vld [vmem:[%s13911_s23 + $0x1ad8] sm:$0xf]  ;;  %v11568_v63 = vor.u32 %v13272_v55, %v11567_v59  ;;  %7949 = vmatpush.bf16.msrb.mxu3 %v12368_v15 }
 0x682   : > { %v13336_v61 = vld [vmem:[%s13911_s23 + $0x1af4] sm:$0xf0] }
 0x683   : > { %v12079_v53 = vld [vmem:[%s13911_s23 + $0x1cd8] sm:$0xf]  ;;  %v11824_v48 = vor.u32 %v13336_v61, %v11823_v56  ;;  %7911 = vmatpush.bf16.msrb.mxu0 %v11568_v63  ;;  %v8625_v63 = vld [vmem:[%s13911_s23 + $0x1f8] sm:$0xf0] }
 0x684   : > { %v13400_v49 = vld [vmem:[%s13911_s23 + $0x1cf4] sm:$0xf0]  ;;  %v8628_v8 = vor.u32 %v12532_v58, %v8625_v63  ;;  %v8785_v63 = vld [vmem:[%s13911_s23 + $0x338] sm:$0xf0] }
 0x685   : > { %v12335_v44 = vld [vmem:[%s13911_s23 + $0x1ed8] sm:$0xf]  ;;  %v12080_v2 = vor.u32 %v13400_v49, %v12079_v53  ;;  %7924 = vmatpush.bf16.msrb.mxu1 %v11824_v48  ;;  %v7697_v48 = vpop.f32.mrf.mxu3 }
 0x686   : > { %v13464_v60 = vld [vmem:[%s13911_s23 + $0x1ef4] sm:$0xf0]  ;;  %v9041_v48 = vld [vmem:[%s13911_s23 + $0x538] sm:$0xf0] }
 0x687   : > { %v11535_v4 = vld [vmem:[%s13911_s23 + $0x1898] sm:$0xf]  ;;  %v12336_v9 = vor.u32 %v13464_v60, %v12335_v44  ;;  %7937 = vmatpush.bf16.msrb.mxu2 %v12080_v2  ;;  %v7684_v60 = vpop.f32.mrf.mxu2 }
 0x688   : > { %v13264_v20 = vld [vmem:[%s13911_s23 + $0x18b4] sm:$0xf0]  ;;  %v12572_v60 = vld [vmem:[%s13911_s23 + $0x31c] sm:$0xf] }
 0x689   : > { %v11791_v38 = vld [vmem:[%s13911_s23 + $0x1a98] sm:$0xf]  ;;  %v11536_v57 = vor.u32 %v13264_v20, %v11535_v4  ;;  %7950 = vmatpush.bf16.msrb.mxu3 %v12336_v9  ;;  %v8881_v4 = vld [vmem:[%s13911_s23 + $0x3f8] sm:$0xf0]  ;;  %v7644_v9 = vadd.f32 %v15962_v3, %v7631_v50 }
 0x68a   : > { %v13328_v6 = vld [vmem:[%s13911_s23 + $0x1ab4] sm:$0xf0]  ;;  %v12660_v20 = vld [vmem:[%s13911_s23 + $0x5dc] sm:$0xf]  ;;  %v8884_v12 = vor.u32 %v12596_v1, %v8881_v4  ;;  %v7708_v4 = vpop.f32.mrf.mxu0 }
 0x68b   : > { %v12047_v54 = vld [vmem:[%s13911_s23 + $0x1c98] sm:$0xf]  ;;  %v11792_v16 = vor.u32 %v13328_v6, %v11791_v38  ;;  %7912 = vmatpush.bf16.msrb.mxu0 %v11536_v57  ;;  %v9137_v38 = vld [vmem:[%s13911_s23 + $0x5f8] sm:$0xf0]  ;;  %v7657_v57 = vadd.f32 %v16016_v33, %v7644_v9 }
 0x68c   : > { %v13392_v37 = vld [vmem:[%s13911_s23 + $0x1cb4] sm:$0xf0]  ;;  %v9140_v18 = vor.u32 %v12660_v20, %v9137_v38  ;;  %v8593_v3 = vld [vmem:[%s13911_s23 + $0x1b8] sm:$0xf0] }
 0x68d   : > { %v12303_v47 = vld [vmem:[%s13911_s23 + $0x1e98] sm:$0xf]  ;;  %v12048_v27 = vor.u32 %v13392_v37, %v12047_v54  ;;  %7925 = vmatpush.bf16.msrb.mxu1 %v11792_v16  ;;  %v12724_v37 = vld [vmem:[%s13911_s23 + $0x7dc] sm:$0xf] }
 0x68e   : > { %v13456_v14 = vld [vmem:[%s13911_s23 + $0x1eb4] sm:$0xf0]  ;;  %v12524_v16 = vld [vmem:[%s13911_s23 + $0x19c] sm:$0xf] }
 0x68f   : > { %v11503_v23 = vld [vmem:[%s13911_s23 + $0x1858] sm:$0xf]  ;;  %v12304_v35 = vor.u32 %v13456_v14, %v12303_v47  ;;  %7938 = vmatpush.bf16.msrb.mxu2 %v12048_v27  ;;  %v9393_v47 = vld [vmem:[%s13911_s23 + $0x7f8] sm:$0xf0]  ;;  %v8596_v33 = vor.u32 %v12524_v16, %v8593_v3 }
 0x690   : > { %v13256_v51 = vld [vmem:[%s13911_s23 + $0x1874] sm:$0xf0]  ;;  %v12588_v27 = vld [vmem:[%s13911_s23 + $0x39c] sm:$0xf] }
 0x691   : > { %v11759_v62 = vld [vmem:[%s13911_s23 + $0x1a58] sm:$0xf]  ;;  %v11504_v10 = vor.u32 %v13256_v51, %v11503_v23  ;;  %7951 = vmatpush.bf16.msrb.mxu3 %v12304_v35  ;;  %v9396_v23 = vor.u32 %v12724_v37, %v9393_v47  ;;  %v8849_v51 = vld [vmem:[%s13911_s23 + $0x3b8] sm:$0xf0]  ;;  %v8788_v37 = vor.u32 %v12572_v60, %v8785_v63 }
 0x692   : > { %v13320_v19 = vld [vmem:[%s13911_s23 + $0x1a74] sm:$0xf0]  ;;  %v9105_v35 = vld [vmem:[%s13911_s23 + $0x5b8] sm:$0xf0] }
 0x693   : > { %v12015_v40 = vld [vmem:[%s13911_s23 + $0x1c58] sm:$0xf]  ;;  %v11760_v11 = vor.u32 %v13320_v19, %v11759_v62  ;;  %7913 = vmatpush.bf16.msrb.mxu0 %v11504_v10  ;;  %v12652_v62 = vld [vmem:[%s13911_s23 + $0x59c] sm:$0xf] }
 0x694   : > { %v13384_v25 = vld [vmem:[%s13911_s23 + $0x1c74] sm:$0xf0]  ;;  %v12716_v19 = vld [vmem:[%s13911_s23 + $0x79c] sm:$0xf] }
 0x695   : > { %v12271_v13 = vld [vmem:[%s13911_s23 + $0x1e58] sm:$0xf]  ;;  %v12016_v59 = vor.u32 %v13384_v25, %v12015_v40  ;;  %7926 = vmatpush.bf16.msrb.mxu1 %v11760_v11  ;;  %v9361_v40 = vld [vmem:[%s13911_s23 + $0x7b8] sm:$0xf0]  ;;  %v7670_v25 = vadd.f32 %v16020_v17, %v7657_v57 }
 0x696   : > { %v13448_v28 = vld [vmem:[%s13911_s23 + $0x1e74] sm:$0xf0]  ;;  %v12516_v10 = vld [vmem:[%s13911_s23 + $0x15c] sm:$0xf]  ;;  %v9364_v50 = vor.u32 %v12716_v19, %v9361_v40 }
 0x697   : > { %v11471_v41 = vld [vmem:[%s13911_s23 + $0x1818] sm:$0xf]  ;;  %v12272_v61 = vor.u32 %v13448_v28, %v12271_v13  ;;  %7939 = vmatpush.bf16.msrb.mxu2 %v12016_v59  ;;  %v8852_v13 = vor.u32 %v12588_v27, %v8849_v51  ;;  %v9108_v28 = vor.u32 %v12652_v62, %v9105_v35  ;;  %v8817_v11 = vld [vmem:[%s13911_s23 + $0x378] sm:$0xf0]  ;;  %v7683_v17 = vadd.f32 %v16035_v0, %v7670_v25 }
 0x698   : > { %v13248_v46 = vld [vmem:[%s13911_s23 + $0x1834] sm:$0xf0]  ;;  %v12644_v59 = vld [vmem:[%s13911_s23 + $0x55c] sm:$0xf] }
 0x699   : > { %v11727_v55 = vld [vmem:[%s13911_s23 + $0x1a18] sm:$0xf]  ;;  %v11472_v2 = vor.u32 %v13248_v46, %v11471_v41  ;;  %7952 = vmatpush.bf16.msrb.mxu3 %v12272_v61  ;;  %v8561_v41 = vld [vmem:[%s13911_s23 + $0x178] sm:$0xf0] }
 0x69a   : > { %v13312_v56 = vld [vmem:[%s13911_s23 + $0x1a34] sm:$0xf0]  ;;  %v12580_v46 = vld [vmem:[%s13911_s23 + $0x35c] sm:$0xf]  ;;  %v8564_v61 = vor.u32 %v12516_v10, %v8561_v41 }
 0x69b   : > { %v11983_v15 = vld [vmem:[%s13911_s23 + $0x1c18] sm:$0xf]  ;;  %v11728_v6 = vor.u32 %v13312_v56, %v11727_v55  ;;  %7914 = vmatpush.bf16.msrb.mxu0 %v11472_v2  ;;  %v9073_v55 = vld [vmem:[%s13911_s23 + $0x578] sm:$0xf0]  ;;  %v7696_v2 = vadd.f32 %v16040_v52, %v7683_v17  ;;  %v292_v17 = vld [vmem:[%s13935_s11 + $0x28] sm:$0xff] }
 0x69c   : > { %v13376_v53 = vld [vmem:[%s13911_s23 + $0x1c34] sm:$0xf0]  ;;  %v12708_v56 = vld [vmem:[%s13911_s23 + $0x75c] sm:$0xf] }
 0x69d   : > { %v12239_v49 = vld [vmem:[%s13911_s23 + $0x1e18] sm:$0xf]  ;;  %v11984_v54 = vor.u32 %v13376_v53, %v11983_v15  ;;  %7927 = vmatpush.bf16.msrb.mxu1 %v11728_v6  ;;  %v9329_v15 = vld [vmem:[%s13911_s23 + $0x778] sm:$0xf0]  ;;  %v8820_v53 = vor.u32 %v12580_v46, %v8817_v11  ;;  %v7721_v6 = vpop.f32.mrf.mxu1 }
 0x69e   : > { %v13440_v44 = vld [vmem:[%s13911_s23 + $0x1e34] sm:$0xf0]  ;;  %7915 = vmatmul.bf16.vlgmr.msrb.gmra.mxu0 %v14257_v24  ;;  %v12508_v0 = vld [vmem:[%s13911_s23 + $0x11c] sm:$0xf]  ;;  %v9332_v58 = vor.u32 %v12708_v56, %v9329_v15 }
 0x69f   : > { %v12240_v14 = vor.u32 %v13440_v44, %v12239_v49  ;;  %7940 = vmatpush.bf16.msrb.mxu2 %v11984_v54  ;;  %7959 = vmatpush.bf16.msra.mxu0 %v8628_v8  ;;  %v9076_v49 = vor.u32 %v12644_v59, %v9073_v55  ;;  %v8529_v44 = vld [vmem:[%s13911_s23 + $0x138] sm:$0xf0]  ;;  %v7709_v54 = vadd.f32 %v7708_v4, %v7696_v2  ;;  %v7710_v55 = vpop.f32.mrf.mxu0 }
 0x6a0   : > { %7928 = vmatmul.bf16.vlgmr.msrb.gmra.mxu1 %v14264_v32  ;;  %v12636_v1 = vld [vmem:[%s13911_s23 + $0x51c] sm:$0xf]  ;;  %v8532_v9 = vor.u32 %v12508_v0, %v8529_v44 }
 0x6a1   : > { %7953 = vmatpush.bf16.msrb.mxu3 %v12240_v14  ;;  %7972 = vmatpush.bf16.msra.mxu1 %v8884_v12  ;;  %v12700_v20 = vld [vmem:[%s13911_s23 + $0x71c] sm:$0xf]  ;;  %v9044_v47 = vor.u32 %v12636_v1, %v9041_v48  ;;  %v7722_v51 = vadd.f32 %v7721_v6, %v7709_v54 }
 0x6a2   : > { %7941 = vmatmul.bf16.vlgmr.msrb.gmra.mxu2 %v14262_v29  ;;  %v9297_v38 = vld [vmem:[%s13911_s23 + $0x738] sm:$0xf0] }
 0x6a3   : > { %7985 = vmatpush.bf16.msra.mxu2 %v9140_v18  ;;  %7960 = vmatpush.bf16.msra.mxu0 %v8596_v33  ;;  %v12500_v14 = vld [vmem:[%s13911_s23 + $0xdc] sm:$0xf]  ;;  %v9300_v57 = vor.u32 %v12700_v20, %v9297_v38 }
 0x6a4   : > { %7954 = vmatmul.bf16.vlgmr.msrb.gmra.mxu3 %v14268_v36  ;;  %v8497_v8 = vld [vmem:[%s13911_s23 + $0xf8] sm:$0xf0] }
 0x6a5   : > { %7998 = vmatpush.bf16.msra.mxu3 %v9396_v23  ;;  %7973 = vmatpush.bf16.msra.mxu1 %v8852_v13  ;;  %v12564_v52 = vld [vmem:[%s13911_s23 + $0x2dc] sm:$0xf]  ;;  %v8500_v23 = vor.u32 %v12500_v14, %v8497_v8  ;;  %v7734_v13 = vpop.f32.mrf.mxu2  ;;  %v7723_v15 = vpop.f32.mrf.mxu1 }
 0x6a6   : > { %v8753_v12 = vld [vmem:[%s13911_s23 + $0x2f8] sm:$0xf0]  ;;  %v7735_v46 = vadd.f32 %v7734_v13, %v7722_v51 }
 0x6a7   : > { %7986 = vmatpush.bf16.msra.mxu2 %v9108_v28  ;;  %7961 = vmatpush.bf16.msra.mxu0 %v8564_v61  ;;  %v12628_v18 = vld [vmem:[%s13911_s23 + $0x4dc] sm:$0xf]  ;;  %v8756_v62 = vor.u32 %v12564_v52, %v8753_v12 }
 0x6a8   : > { %v9009_v16 = vld [vmem:[%s13911_s23 + $0x4f8] sm:$0xf0] }
 0x6a9   : > { %7999 = vmatpush.bf16.msra.mxu3 %v9364_v50  ;;  %7974 = vmatpush.bf16.msra.mxu1 %v8820_v53  ;;  %v12692_v3 = vld [vmem:[%s13911_s23 + $0x6dc] sm:$0xf]  ;;  %v9012_v35 = vor.u32 %v12628_v18, %v9009_v16  ;;  %v7747_v50 = vpop.f32.mrf.mxu3 }
 0x6aa   : > { %v9265_v27 = vld [vmem:[%s13911_s23 + $0x6f8] sm:$0xf0]  ;;  %v7748_v61 = vadd.f32 %v7747_v50, %v7735_v46 }
 0x6ab   : > { %7987 = vmatpush.bf16.msra.mxu2 %v9076_v49  ;;  %7962 = vmatpush.bf16.msra.mxu0 %v8532_v9  ;;  %v12492_v19 = vld [vmem:[%s13911_s23 + $0x9c] sm:$0xf]  ;;  %v9268_v25 = vor.u32 %v12692_v3, %v9265_v27 }
 0x6ac   : > { %v8465_v40 = vld [vmem:[%s13911_s23 + $0xb8] sm:$0xf0]  ;;  %v8172_v2 = vadd.f32 %v7748_v61, %v292_v17 }
 0x6ad   : > { %8000 = vmatpush.bf16.msra.mxu3 %v9332_v58  ;;  %7975 = vmatpush.bf16.msra.mxu1 %v8788_v37  ;;  %v12556_v33 = vld [vmem:[%s13911_s23 + $0x29c] sm:$0xf]  ;;  %v8468_v56 = vor.u32 %v12492_v19, %v8465_v40  ;;  %v7736_v16 = vpop.f32.mrf.mxu2 }
 0x6ae   : > { %v8721_v28 = vld [vmem:[%s13911_s23 + $0x2b8] sm:$0xf0]  ;;  %8180 = vst [vmem:[%s13935_s11 + $0x28] sm:$0xff] %v8172_v2 }
 0x6af   : > { %7988 = vmatpush.bf16.msra.mxu2 %v9044_v47  ;;  %v12620_v10 = vld [vmem:[%s13911_s23 + $0x49c] sm:$0xf]  ;;  %7963 = vmatpush.bf16.msra.mxu0 %v8500_v23  ;;  %v8724_v53 = vor.u32 %v12556_v33, %v8721_v28 }
 0x6b0   : > { %v8977_v41 = vld [vmem:[%s13911_s23 + $0x4b8] sm:$0xf0] }
 0x6b1   : > { %8001 = vmatpush.bf16.msra.mxu3 %v9300_v57  ;;  %v12684_v11 = vld [vmem:[%s13911_s23 + $0x69c] sm:$0xf]  ;;  %7976 = vmatpush.bf16.msra.mxu1 %v8756_v62  ;;  %v8980_v49 = vor.u32 %v12620_v10, %v8977_v41  ;;  %v7749_v51 = vpop.f32.mrf.mxu3 }
 0x6b2   : > { %v9233_v59 = vld [vmem:[%s13911_s23 + $0x6b8] sm:$0xf0] }
 0x6b3   : > { %7989 = vmatpush.bf16.msra.mxu2 %v9012_v35  ;;  %v12484_v0 = vld [vmem:[%s13911_s23 + $0x5c] sm:$0xf]  ;;  %v9236_v58 = vor.u32 %v12684_v11, %v9233_v59  ;;  %7964 = vmatpush.bf16.msra.mxu0 %v8468_v56 }
 0x6b4   : > { %v8433_v44 = vld [vmem:[%s13911_s23 + $0x78] sm:$0xf0] }
 0x6b5   : > { %v12548_v60 = vld [vmem:[%s13911_s23 + $0x25c] sm:$0xf]  ;;  %8002 = vmatpush.bf16.msra.mxu3 %v9268_v25  ;;  %v8436_v38 = vor.u32 %v12484_v0, %v8433_v44  ;;  %7977 = vmatpush.bf16.msra.mxu1 %v8724_v53 }
 0x6b6   : > { %v8689_v63 = vld [vmem:[%s13911_s23 + $0x278] sm:$0xf0] }
 0x6b7   : > { %v12612_v1 = vld [vmem:[%s13911_s23 + $0x45c] sm:$0xf]  ;;  %7990 = vmatpush.bf16.msra.mxu2 %v8980_v49  ;;  %v8692_v37 = vor.u32 %v12548_v60, %v8689_v63  ;;  %7965 = vmatpush.bf16.msra.mxu0 %v8436_v38 }
 0x6b8   : > { %v8945_v48 = vld [vmem:[%s13911_s23 + $0x478] sm:$0xf0] }
 0x6b9   : > { %v12676_v4 = vld [vmem:[%s13911_s23 + $0x65c] sm:$0xf]  ;;  %v8948_v47 = vor.u32 %v12612_v1, %v8945_v48  ;;  %8003 = vmatpush.bf16.msra.mxu3 %v9236_v58  ;;  %7978 = vmatpush.bf16.msra.mxu1 %v8692_v37 }
 0x6ba   : > { %v9201_v20 = vld [vmem:[%s13911_s23 + $0x678] sm:$0xf0] }
 0x6bb   : > { %v12476_v9 = vld [vmem:[%s13911_s23 + $0x1c] sm:$0xf]  ;;  %v9204_v52 = vor.u32 %v12676_v4, %v9201_v20  ;;  %7991 = vmatpush.bf16.msra.mxu2 %v8948_v47 }
 0x6bc   : > { %v8401_v6 = vld [vmem:[%s13911_s23 + $0x38] sm:$0xf0] }
 0x6bd   : > { %v12540_v54 = vld [vmem:[%s13911_s23 + $0x21c] sm:$0xf]  ;;  %v8404_v62 = vor.u32 %v12476_v9, %v8401_v6  ;;  %8004 = vmatpush.bf16.msra.mxu3 %v9204_v52 }
 0x6be   : > { %v8657_v14 = vld [vmem:[%s13911_s23 + $0x238] sm:$0xf0] }
 0x6bf   : > { %v12604_v8 = vld [vmem:[%s13911_s23 + $0x41c] sm:$0xf]  ;;  %v8660_v33 = vor.u32 %v12540_v54, %v8657_v14  ;;  %7966 = vmatpush.bf16.msra.mxu0 %v8404_v62  ;;  %v7773_v62 = vpop.f32.mrf.mxu1 }
 0x6c0   : > { %v8913_v57 = vld [vmem:[%s13911_s23 + $0x438] sm:$0xf0] }
 0x6c1   : > { %v12668_v12 = vld [vmem:[%s13911_s23 + $0x61c] sm:$0xf]  ;;  %v8916_v25 = vor.u32 %v12604_v8, %v8913_v57  ;;  %7979 = vmatpush.bf16.msra.mxu1 %v8660_v33 }
 0x6c2   : > { %v9169_v18 = vld [vmem:[%s13911_s23 + $0x638] sm:$0xf0]  ;;  %7967 = vmatmul.bf16.vlgmr.msra.gmra.mxu0 %v14049_v21 }
 0x6c3   : > { %v12788_v3 = vld [vmem:[%s13911_s23 + $0x9dc] sm:$0xf]  ;;  %v9172_v10 = vor.u32 %v12668_v12, %v9169_v18  ;;  %7992 = vmatpush.bf16.msra.mxu2 %v8916_v25  ;;  %v7760_v18 = vpop.f32.mrf.mxu0 }
 0x6c4   : > { %v9649_v27 = vld [vmem:[%s13911_s23 + $0x9f8] sm:$0xf0]  ;;  %7980 = vmatmul.bf16.vlgmr.msra.gmra.mxu1 %v14052_v22  ;;  %v7774_v25 = vadd.f32 %v7773_v62, %v7760_v18 }
 0x6c5   : > { %v12852_v23 = vld [vmem:[%s13911_s23 + $0xbdc] sm:$0xf]  ;;  %v9652_v41 = vor.u32 %v12788_v3, %v9649_v27  ;;  %8005 = vmatpush.bf16.msra.mxu3 %v9172_v10 }
 0x6c6   : > { %v9905_v35 = vld [vmem:[%s13911_s23 + $0xbf8] sm:$0xf0]  ;;  %7993 = vmatmul.bf16.vlgmr.msra.gmra.mxu2 %v14035_v5 }
 0x6c7   : > { %v12916_v19 = vld [vmem:[%s13911_s23 + $0xddc] sm:$0xf]  ;;  %v9908_v46 = vor.u32 %v12852_v23, %v9905_v35  ;;  %8011 = vmatpush.bf16.msrb.mxu0 %v9652_v41 }
 0x6c8   : > { %v10161_v40 = vld [vmem:[%s13911_s23 + $0xdf8] sm:$0xf0]  ;;  %8006 = vmatmul.bf16.vlgmr.msra.gmra.mxu3 %v14038_v7 }
 0x6c9   : > { %v12980_v13 = vld [vmem:[%s13911_s23 + $0xfdc] sm:$0xf]  ;;  %v10164_v50 = vor.u32 %v12916_v19, %v10161_v40  ;;  %8024 = vmatpush.bf16.msrb.mxu1 %v9908_v46 }
 0x6ca   : > { %v10417_v28 = vld [vmem:[%s13911_s23 + $0xff8] sm:$0xf0] }
 0x6cb   : > { %v12780_v11 = vld [vmem:[%s13911_s23 + $0x99c] sm:$0xf]  ;;  %v10420_v17 = vor.u32 %v12980_v13, %v10417_v28  ;;  %8037 = vmatpush.bf16.msrb.mxu2 %v10164_v50 }
 0x6cc   : > { %v9617_v59 = vld [vmem:[%s13911_s23 + $0x9b8] sm:$0xf0] }
 0x6cd   : > { %v12844_v55 = vld [vmem:[%s13911_s23 + $0xb9c] sm:$0xf]  ;;  %v9620_v0 = vor.u32 %v12780_v11, %v9617_v59  ;;  %8050 = vmatpush.bf16.msrb.mxu3 %v10420_v17 }
 0x6ce   : > { %v9873_v56 = vld [vmem:[%s13911_s23 + $0xbb8] sm:$0xf0] }
 0x6cf   : > { %v12908_v15 = vld [vmem:[%s13911_s23 + $0xd9c] sm:$0xf]  ;;  %v9876_v44 = vor.u32 %v12844_v55, %v9873_v56  ;;  %8012 = vmatpush.bf16.msrb.mxu0 %v9620_v0  ;;  %v7786_v55 = vpop.f32.mrf.mxu2 }
 0x6d0   : > { %v10129_v61 = vld [vmem:[%s13911_s23 + $0xdb8] sm:$0xf0] }
 0x6d1   : > { %v12972_v53 = vld [vmem:[%s13911_s23 + $0xf9c] sm:$0xf]  ;;  %v10132_v60 = vor.u32 %v12908_v15, %v10129_v61  ;;  %8025 = vmatpush.bf16.msrb.mxu1 %v9876_v44 }
 0x6d2   : > { %v10385_v49 = vld [vmem:[%s13911_s23 + $0xfb8] sm:$0xf0] }
 0x6d3   : > { %v12772_v58 = vld [vmem:[%s13911_s23 + $0x95c] sm:$0xf]  ;;  %v10388_v48 = vor.u32 %v12972_v53, %v10385_v49  ;;  %8038 = vmatpush.bf16.msrb.mxu2 %v10132_v60  ;;  %v7787_v53 = vadd.f32 %v7786_v55, %v7774_v25  ;;  %v7799_v49 = vpop.f32.mrf.mxu3 }
 0x6d4   : > { %v9585_v63 = vld [vmem:[%s13911_s23 + $0x978] sm:$0xf0] }
 0x6d5   : > { %v12836_v1 = vld [vmem:[%s13911_s23 + $0xb5c] sm:$0xf]  ;;  %v9588_v6 = vor.u32 %v12772_v58, %v9585_v63  ;;  %8051 = vmatpush.bf16.msrb.mxu3 %v10388_v48  ;;  %v16189_v58 = vadd.f32 %v7799_v49, %v7787_v53  ;;  %v7762_v63 = vpop.f32.mrf.mxu0 }
 0x6d6   : > { %v9841_v2 = vld [vmem:[%s13911_s23 + $0xb78] sm:$0xf0] }
 0x6d7   : > { %v12900_v4 = vld [vmem:[%s13911_s23 + $0xd5c] sm:$0xf]  ;;  %v9844_v54 = vor.u32 %v12836_v1, %v9841_v2  ;;  %8013 = vmatpush.bf16.msrb.mxu0 %v9588_v6  ;;  %v7788_v18 = vpop.f32.mrf.mxu2 }
 0x6d8   : > { %v10097_v20 = vld [vmem:[%s13911_s23 + $0xd78] sm:$0xf0] }
 0x6d9   : > { %v12964_v38 = vld [vmem:[%s13911_s23 + $0xf5c] sm:$0xf]  ;;  %v10100_v37 = vor.u32 %v12900_v4, %v10097_v20  ;;  %8026 = vmatpush.bf16.msrb.mxu1 %v9844_v54 }
 0x6da   : > { %v10353_v9 = vld [vmem:[%s13911_s23 + $0xf78] sm:$0xf0] }
 0x6db   : > { %v12764_v5 = vld [vmem:[%s13911_s23 + $0x91c] sm:$0xf]  ;;  %v10356_v21 = vor.u32 %v12964_v38, %v10353_v9  ;;  %8039 = vmatpush.bf16.msrb.mxu2 %v10100_v37  ;;  %v7775_v38 = vpop.f32.mrf.mxu1 }
 0x6dc   : > { %v9553_v47 = vld [vmem:[%s13911_s23 + $0x938] sm:$0xf0] }
 0x6dd   : > { %v12828_v14 = vld [vmem:[%s13911_s23 + $0xb1c] sm:$0xf]  ;;  %v9556_v22 = vor.u32 %v12764_v5, %v9553_v47  ;;  %8052 = vmatpush.bf16.msrb.mxu3 %v10356_v21  ;;  %v16243_v18 = vpop.f32.mrf.mxu0 }
 0x6de   : > { %v9809_v8 = vld [vmem:[%s13911_s23 + $0xb38] sm:$0xf0] }
 0x6df   : > { %v12892_v7 = vld [vmem:[%s13911_s23 + $0xd1c] sm:$0xf]  ;;  %v9812_v16 = vor.u32 %v12828_v14, %v9809_v8  ;;  %8014 = vmatpush.bf16.msrb.mxu0 %v9556_v22 }
 0x6e0   : > { %v10065_v52 = vld [vmem:[%s13911_s23 + $0xd38] sm:$0xf0] }
 0x6e1   : > { %v12956_v57 = vld [vmem:[%s13911_s23 + $0xf1c] sm:$0xf]  ;;  %v10068_v3 = vor.u32 %v12892_v7, %v10065_v52  ;;  %8027 = vmatpush.bf16.msrb.mxu1 %v9812_v16 }
 0x6e2   : > { %v10321_v12 = vld [vmem:[%s13911_s23 + $0xf38] sm:$0xf0] }
 0x6e3   : > { %v12756_v27 = vld [vmem:[%s13911_s23 + $0x8dc] sm:$0xf]  ;;  %v10324_v35 = vor.u32 %v12956_v57, %v10321_v12  ;;  %8040 = vmatpush.bf16.msrb.mxu2 %v10068_v3 }
 0x6e4   : > { %v9521_v23 = vld [vmem:[%s13911_s23 + $0x8f8] sm:$0xf0] }
 0x6e5   : > { %v12820_v51 = vld [vmem:[%s13911_s23 + $0xadc] sm:$0xf]  ;;  %v9524_v10 = vor.u32 %v12756_v27, %v9521_v23  ;;  %8053 = vmatpush.bf16.msrb.mxu3 %v10324_v35 }
 0x6e6   : > { %v9777_v19 = vld [vmem:[%s13911_s23 + $0xaf8] sm:$0xf0] }
 0x6e7   : > { %v12884_v40 = vld [vmem:[%s13911_s23 + $0xcdc] sm:$0xf]  ;;  %v9780_v41 = vor.u32 %v12820_v51, %v9777_v19  ;;  %8015 = vmatpush.bf16.msrb.mxu0 %v9524_v10  ;;  %v7801_v51 = vpop.f32.mrf.mxu3 }
 0x6e8   : > { %v10033_v33 = vld [vmem:[%s13911_s23 + $0xcf8] sm:$0xf0] }
 0x6e9   : > { %v12948_v13 = vld [vmem:[%s13911_s23 + $0xedc] sm:$0xf]  ;;  %v10036_v46 = vor.u32 %v12884_v40, %v10033_v33  ;;  %8028 = vmatpush.bf16.msrb.mxu1 %v9780_v41 }
 0x6ea   : > { %v10289_v28 = vld [vmem:[%s13911_s23 + $0xef8] sm:$0xf0] }
 0x6eb   : > { %v12748_v50 = vld [vmem:[%s13911_s23 + $0x89c] sm:$0xf]  ;;  %v10292_v17 = vor.u32 %v12948_v13, %v10289_v28  ;;  %8041 = vmatpush.bf16.msrb.mxu2 %v10036_v46 }
 0x6ec   : > { %v9489_v11 = vld [vmem:[%s13911_s23 + $0x8b8] sm:$0xf0] }
 0x6ed   : > { %v12812_v59 = vld [vmem:[%s13911_s23 + $0xa9c] sm:$0xf]  ;;  %v9492_v60 = vor.u32 %v12748_v50, %v9489_v11  ;;  %8054 = vmatpush.bf16.msrb.mxu3 %v10292_v17 }
 0x6ee   : > { %v9745_v56 = vld [vmem:[%s13911_s23 + $0xab8] sm:$0xf0] }
 0x6ef   : > { %v12876_v15 = vld [vmem:[%s13911_s23 + $0xc9c] sm:$0xf]  ;;  %v9748_v1 = vor.u32 %v12812_v59, %v9745_v56  ;;  %8016 = vmatpush.bf16.msrb.mxu0 %v9492_v60 }
 0x6f0   : > { %v10001_v61 = vld [vmem:[%s13911_s23 + $0xcb8] sm:$0xf0] }
 0x6f1   : > { %v12940_v0 = vld [vmem:[%s13911_s23 + $0xe9c] sm:$0xf]  ;;  %v10004_v48 = vor.u32 %v12876_v15, %v10001_v61  ;;  %8029 = vmatpush.bf16.msrb.mxu1 %v9748_v1 }
 0x6f2   : > { %v10257_v44 = vld [vmem:[%s13911_s23 + $0xeb8] sm:$0xf0] }
 0x6f3   : > { %v12740_v2 = vld [vmem:[%s13911_s23 + $0x85c] sm:$0xf]  ;;  %v10260_v9 = vor.u32 %v12940_v0, %v10257_v44  ;;  %8042 = vmatpush.bf16.msrb.mxu2 %v10004_v48 }
 0x6f4   : > { %v9457_v4 = vld [vmem:[%s13911_s23 + $0x878] sm:$0xf0] }
 0x6f5   : > { %v12804_v20 = vld [vmem:[%s13911_s23 + $0xa5c] sm:$0xf]  ;;  %v9460_v14 = vor.u32 %v12740_v2, %v9457_v4  ;;  %8055 = vmatpush.bf16.msrb.mxu3 %v10260_v9 }
 0x6f6   : > { %v9713_v6 = vld [vmem:[%s13911_s23 + $0xa78] sm:$0xf0] }
 0x6f7   : > { %v12868_v54 = vld [vmem:[%s13911_s23 + $0xc5c] sm:$0xf]  ;;  %v9716_v7 = vor.u32 %v12804_v20, %v9713_v6  ;;  %8017 = vmatpush.bf16.msrb.mxu0 %v9460_v14 }
 0x6f8   : > { %v9969_v37 = vld [vmem:[%s13911_s23 + $0xc78] sm:$0xf0] }
 0x6f9   : > { %v12932_v5 = vld [vmem:[%s13911_s23 + $0xe5c] sm:$0xf]  ;;  %v9972_v52 = vor.u32 %v12868_v54, %v9969_v37  ;;  %8030 = vmatpush.bf16.msrb.mxu1 %v9716_v7 }
 0x6fa   : > { %v10225_v47 = vld [vmem:[%s13911_s23 + $0xe78] sm:$0xf0] }
 0x6fb   : > { %v12732_v21 = vld [vmem:[%s13911_s23 + $0x81c] sm:$0xf]  ;;  %v10228_v16 = vor.u32 %v12932_v5, %v10225_v47  ;;  %8043 = vmatpush.bf16.msrb.mxu2 %v9972_v52 }
 0x6fc   : > { %v9425_v8 = vld [vmem:[%s13911_s23 + $0x838] sm:$0xf0] }
 0x6fd   : > { %v12796_v57 = vld [vmem:[%s13911_s23 + $0xa1c] sm:$0xf]  ;;  %v9428_v40 = vor.u32 %v12732_v21, %v9425_v8  ;;  %8056 = vmatpush.bf16.msrb.mxu3 %v10228_v16 }
 0x6fe   : > { %v9681_v12 = vld [vmem:[%s13911_s23 + $0xa38] sm:$0xf0] }
 0x6ff   : > { %v12860_v22 = vld [vmem:[%s13911_s23 + $0xc1c] sm:$0xf]  ;;  %v9684_v28 = vor.u32 %v12796_v57, %v9681_v12  ;;  %8018 = vmatpush.bf16.msrb.mxu0 %v9428_v40 }
 0x700   : > { %v9937_v3 = vld [vmem:[%s13911_s23 + $0xc38] sm:$0xf0] }
 0x701   : > { %v12924_v27 = vld [vmem:[%s13911_s23 + $0xe1c] sm:$0xf]  ;;  %v9940_v10 = vor.u32 %v12860_v22, %v9937_v3  ;;  %8031 = vmatpush.bf16.msrb.mxu1 %v9684_v28 }
 0x702   : > { %v10193_v23 = vld [vmem:[%s13911_s23 + $0xe38] sm:$0xf0]  ;;  %8019 = vmatmul.bf16.vlgmr.msrb.gmra.mxu0 %v14108_v42 }
 0x703   : > { %v13044_v62 = vld [vmem:[%s13911_s23 + $0x11dc] sm:$0xf]  ;;  %v10196_v50 = vor.u32 %v12924_v27, %v10193_v23  ;;  %8044 = vmatpush.bf16.msrb.mxu2 %v9940_v10 }
 0x704   : > { %v10673_v35 = vld [vmem:[%s13911_s23 + $0x11f8] sm:$0xf0]  ;;  %8032 = vmatmul.bf16.vlgmr.msrb.gmra.mxu1 %v14112_v45 }
 0x705   : > { %v13108_v19 = vld [vmem:[%s13911_s23 + $0x13dc] sm:$0xf]  ;;  %v10676_v11 = vor.u32 %v13044_v62, %v10673_v35  ;;  %8057 = vmatpush.bf16.msrb.mxu3 %v10196_v50  ;;  %v16248_v62 = vpop.f32.mrf.mxu1 }
 0x706   : > { %v10929_v33 = vld [vmem:[%s13911_s23 + $0x13f8] sm:$0xf0]  ;;  %8045 = vmatmul.bf16.vlgmr.msrb.gmra.mxu2 %v14104_v39 }
 0x707   : > { %v13172_v25 = vld [vmem:[%s13911_s23 + $0x15dc] sm:$0xf]  ;;  %v10932_v59 = vor.u32 %v13108_v19, %v10929_v33  ;;  %8063 = vmatpush.bf16.msra.mxu0 %v10676_v11 }
 0x708   : > { %v11185_v13 = vld [vmem:[%s13911_s23 + $0x15f8] sm:$0xf0]  ;;  %8058 = vmatmul.bf16.vlgmr.msrb.gmra.mxu3 %v14110_v43 }
 0x709   : > { %v13236_v41 = vld [vmem:[%s13911_s23 + $0x17dc] sm:$0xf]  ;;  %v11188_v55 = vor.u32 %v13172_v25, %v11185_v13  ;;  %8076 = vmatpush.bf16.msra.mxu1 %v10932_v59  ;;  %v16258_v59 = vpop.f32.mrf.mxu2 }
 0x70a   : > { %v11441_v46 = vld [vmem:[%s13911_s23 + $0x17f8] sm:$0xf0] }
 0x70b   : > { %v13036_v17 = vld [vmem:[%s13911_s23 + $0x119c] sm:$0xf]  ;;  %v11444_v61 = vor.u32 %v13236_v41, %v11441_v46  ;;  %8089 = vmatpush.bf16.msra.mxu2 %v11188_v55 }
 0x70c   : > { %v10641_v56 = vld [vmem:[%s13911_s23 + $0x11b8] sm:$0xf0] }
 0x70d   : > { %v13100_v15 = vld [vmem:[%s13911_s23 + $0x139c] sm:$0xf]  ;;  %v10644_v63 = vor.u32 %v13036_v17, %v10641_v56  ;;  %8102 = vmatpush.bf16.msra.mxu3 %v11444_v61  ;;  %v16263_v61 = vpop.f32.mrf.mxu3 }
 0x70e   : > { %v10897_v53 = vld [vmem:[%s13911_s23 + $0x13b8] sm:$0xf0] }
 0x70f   : > { %v13164_v49 = vld [vmem:[%s13911_s23 + $0x159c] sm:$0xf]  ;;  %v10900_v1 = vor.u32 %v13100_v15, %v10897_v53  ;;  %8064 = vmatpush.bf16.msra.mxu0 %v10644_v63 }
 0x710   : > { %v11153_v0 = vld [vmem:[%s13911_s23 + $0x15b8] sm:$0xf0] }
 0x711   : > { %v13228_v44 = vld [vmem:[%s13911_s23 + $0x179c] sm:$0xf]  ;;  %v11156_v48 = vor.u32 %v13164_v49, %v11153_v0  ;;  %8077 = vmatpush.bf16.msra.mxu1 %v10900_v1 }
 0x712   : > { %v11409_v60 = vld [vmem:[%s13911_s23 + $0x17b8] sm:$0xf0] }
 0x713   : > { %v13028_v2 = vld [vmem:[%s13911_s23 + $0x115c] sm:$0xf]  ;;  %v11412_v38 = vor.u32 %v13228_v44, %v11409_v60  ;;  %8090 = vmatpush.bf16.msra.mxu2 %v11156_v48  ;;  %v7814_v44 = vpop.f32.mrf.mxu0 }
 0x714   : > { %v10609_v4 = vld [vmem:[%s13911_s23 + $0x1178] sm:$0xf0] }
 0x715   : > { %v13092_v20 = vld [vmem:[%s13911_s23 + $0x135c] sm:$0xf]  ;;  %v10612_v47 = vor.u32 %v13028_v2, %v10609_v4  ;;  %8103 = vmatpush.bf16.msra.mxu3 %v11412_v38  ;;  %v7827_v4 = vpop.f32.mrf.mxu1 }
 0x716   : > { %v10865_v9 = vld [vmem:[%s13911_s23 + $0x1378] sm:$0xf0] }
 0x717   : > { %v13156_v6 = vld [vmem:[%s13911_s23 + $0x155c] sm:$0xf]  ;;  %v10868_v39 = vor.u32 %v13092_v20, %v10865_v9  ;;  %8065 = vmatpush.bf16.msra.mxu0 %v10612_v47 }
 0x718   : > { %v11121_v54 = vld [vmem:[%s13911_s23 + $0x1578] sm:$0xf0] }
 0x719   : > { %v13220_v37 = vld [vmem:[%s13911_s23 + $0x175c] sm:$0xf]  ;;  %v11124_v14 = vor.u32 %v13156_v6, %v11121_v54  ;;  %8078 = vmatpush.bf16.msra.mxu1 %v10868_v39 }
 0x71a   : > { %v11377_v5 = vld [vmem:[%s13911_s23 + $0x1778] sm:$0xf0] }
 0x71b   : > { %v13020_v21 = vld [vmem:[%s13911_s23 + $0x111c] sm:$0xf]  ;;  %v11380_v43 = vor.u32 %v13220_v37, %v11377_v5  ;;  %8091 = vmatpush.bf16.msra.mxu2 %v11124_v14 }
 0x71c   : > { %v10577_v8 = vld [vmem:[%s13911_s23 + $0x1138] sm:$0xf0] }
 0x71d   : > { %v13084_v42 = vld [vmem:[%s13911_s23 + $0x131c] sm:$0xf]  ;;  %v10580_v45 = vor.u32 %v13020_v21, %v10577_v8  ;;  %8104 = vmatpush.bf16.msra.mxu3 %v11380_v43 }
 0x71e   : > { %v10833_v7 = vld [vmem:[%s13911_s23 + $0x1338] sm:$0xf0] }
 0x71f   : > { %v13148_v52 = vld [vmem:[%s13911_s23 + $0x151c] sm:$0xf]  ;;  %v10836_v16 = vor.u32 %v13084_v42, %v10833_v7  ;;  %8066 = vmatpush.bf16.msra.mxu0 %v10580_v45  ;;  %v7840_v7 = vpop.f32.mrf.mxu2  ;;  %v7853_v45 = vpop.f32.mrf.mxu3 }
 0x720   : > { %v11089_v57 = vld [vmem:[%s13911_s23 + $0x1538] sm:$0xf0] }
 0x721   : > { %v13212_v12 = vld [vmem:[%s13911_s23 + $0x171c] sm:$0xf]  ;;  %v11092_v3 = vor.u32 %v13148_v52, %v11089_v57  ;;  %8079 = vmatpush.bf16.msra.mxu1 %v10836_v16 }
 0x722   : > { %v11345_v22 = vld [vmem:[%s13911_s23 + $0x1738] sm:$0xf0] }
 0x723   : > { %v13012_v27 = vld [vmem:[%s13911_s23 + $0x10dc] sm:$0xf]  ;;  %v11348_v35 = vor.u32 %v13212_v12, %v11345_v22  ;;  %8092 = vmatpush.bf16.msra.mxu2 %v11092_v3 }
 0x724   : > { %v10545_v23 = vld [vmem:[%s13911_s23 + $0x10f8] sm:$0xf0] }
 0x725   : > { %v13076_v51 = vld [vmem:[%s13911_s23 + $0x12dc] sm:$0xf]  ;;  %v10548_v28 = vor.u32 %v13012_v27, %v10545_v23  ;;  %8105 = vmatpush.bf16.msra.mxu3 %v11348_v35 }
 0x726   : > { %v10801_v19 = vld [vmem:[%s13911_s23 + $0x12f8] sm:$0xf0] }
 0x727   : > { %v13140_v40 = vld [vmem:[%s13911_s23 + $0x14dc] sm:$0xf]  ;;  %v10804_v10 = vor.u32 %v13076_v51, %v10801_v19  ;;  %8067 = vmatpush.bf16.msra.mxu0 %v10548_v28 }
 0x728   : > { %v11057_v33 = vld [vmem:[%s13911_s23 + $0x14f8] sm:$0xf0] }
 0x729   : > { %v13204_v25 = vld [vmem:[%s13911_s23 + $0x16dc] sm:$0xf]  ;;  %v11060_v41 = vor.u32 %v13140_v40, %v11057_v33  ;;  %8080 = vmatpush.bf16.msra.mxu1 %v10804_v10 }
 0x72a   : > { %v11313_v13 = vld [vmem:[%s13911_s23 + $0x16f8] sm:$0xf0] }
 0x72b   : > { %v13004_v46 = vld [vmem:[%s13911_s23 + $0x109c] sm:$0xf]  ;;  %v11316_v55 = vor.u32 %v13204_v25, %v11313_v13  ;;  %8093 = vmatpush.bf16.msra.mxu2 %v11060_v41 }
 0x72c   : > { %v10513_v50 = vld [vmem:[%s13911_s23 + $0x10b8] sm:$0xf0] }
 0x72d   : > { %v13068_v11 = vld [vmem:[%s13911_s23 + $0x129c] sm:$0xf]  ;;  %v10516_v0 = vor.u32 %v13004_v46, %v10513_v50  ;;  %8106 = vmatpush.bf16.msra.mxu3 %v11316_v55 }
 0x72e   : > { %v10769_v17 = vld [vmem:[%s13911_s23 + $0x12b8] sm:$0xf0] }
 0x72f   : > { %v13132_v56 = vld [vmem:[%s13911_s23 + $0x149c] sm:$0xf]  ;;  %v10772_v60 = vor.u32 %v13068_v11, %v10769_v17  ;;  %8068 = vmatpush.bf16.msra.mxu0 %v10516_v0 }
 0x730   : > { %v11025_v15 = vld [vmem:[%s13911_s23 + $0x14b8] sm:$0xf0] }
 0x731   : > { %v13196_v53 = vld [vmem:[%s13911_s23 + $0x169c] sm:$0xf]  ;;  %v11028_v63 = vor.u32 %v13132_v56, %v11025_v15  ;;  %8081 = vmatpush.bf16.msra.mxu1 %v10772_v60 }
 0x732   : > { %v11281_v49 = vld [vmem:[%s13911_s23 + $0x16b8] sm:$0xf0] }
 0x733   : > { %v12996_v1 = vld [vmem:[%s13911_s23 + $0x105c] sm:$0xf]  ;;  %v11284_v20 = vor.u32 %v13196_v53, %v11281_v49  ;;  %8094 = vmatpush.bf16.msra.mxu2 %v11028_v63 }
 0x734   : > { %v10481_v48 = vld [vmem:[%s13911_s23 + $0x1078] sm:$0xf0] }
 0x735   : > { %v13060_v2 = vld [vmem:[%s13911_s23 + $0x125c] sm:$0xf]  ;;  %v10484_v5 = vor.u32 %v12996_v1, %v10481_v48  ;;  %8107 = vmatpush.bf16.msra.mxu3 %v11284_v20 }
 0x736   : > { %v10737_v38 = vld [vmem:[%s13911_s23 + $0x1278] sm:$0xf0] }
 0x737   : > { %v13124_v9 = vld [vmem:[%s13911_s23 + $0x145c] sm:$0xf]  ;;  %v10740_v14 = vor.u32 %v13060_v2, %v10737_v38  ;;  %8069 = vmatpush.bf16.msra.mxu0 %v10484_v5 }
 0x738   : > { %v10993_v6 = vld [vmem:[%s13911_s23 + $0x1478] sm:$0xf0] }
 0x739   : > { %v13188_v54 = vld [vmem:[%s13911_s23 + $0x165c] sm:$0xf]  ;;  %v10996_v21 = vor.u32 %v13124_v9, %v10993_v6  ;;  %8082 = vmatpush.bf16.msra.mxu1 %v10740_v14 }
 0x73a   : > { %v11249_v37 = vld [vmem:[%s13911_s23 + $0x1678] sm:$0xf0] }
 0x73b   : > { %v12988_v47 = vld [vmem:[%s13911_s23 + $0x101c] sm:$0xf]  ;;  %v11252_v52 = vor.u32 %v13188_v54, %v11249_v37  ;;  %8095 = vmatpush.bf16.msra.mxu2 %v10996_v21 }
 0x73c   : > { %v10449_v39 = vld [vmem:[%s13911_s23 + $0x1038] sm:$0xf0] }
 0x73d   : > { %v13052_v8 = vld [vmem:[%s13911_s23 + $0x121c] sm:$0xf]  ;;  %v10452_v23 = vor.u32 %v12988_v47, %v10449_v39  ;;  %8108 = vmatpush.bf16.msra.mxu3 %v11252_v52  ;;  %v16321_v52 = vpop.f32.mrf.mxu1 }
 0x73e   : > { %v10705_v42 = vld [vmem:[%s13911_s23 + $0x1238] sm:$0xf0] }
 0x73f   : > { %v13116_v43 = vld [vmem:[%s13911_s23 + $0x141c] sm:$0xf]  ;;  %v10708_v40 = vor.u32 %v13052_v8, %v10705_v42  ;;  %8070 = vmatpush.bf16.msra.mxu0 %v10452_v23 }
 0x740   : > { %v10961_v57 = vld [vmem:[%s13911_s23 + $0x1438] sm:$0xf0] }
 0x741   : > { %v13180_v12 = vld [vmem:[%s13911_s23 + $0x161c] sm:$0xf]  ;;  %v10964_v33 = vor.u32 %v13116_v43, %v10961_v57  ;;  %8083 = vmatpush.bf16.msra.mxu1 %v10708_v40 }
 0x742   : > { %v11217_v22 = vld [vmem:[%s13911_s23 + $0x1638] sm:$0xf0]  ;;  %8071 = vmatmul.bf16.vlgmr.msra.gmra.mxu0 %v14179_v26 }
 0x743   : > { %v13300_v16 = vld [vmem:[%s13911_s23 + $0x19dc] sm:$0xf]  ;;  %v11220_v28 = vor.u32 %v13180_v12, %v11217_v22  ;;  %8096 = vmatpush.bf16.msra.mxu2 %v10964_v33  ;;  %v7813_v33 = vadd.f32 %v16243_v18, %v16189_v58 }
 0x744   : > { %v11697_v3 = vld [vmem:[%s13911_s23 + $0x19f8] sm:$0xf0]  ;;  %8084 = vmatmul.bf16.vlgmr.msra.gmra.mxu1 %v14186_v31 }
 0x745   : > { %v13364_v27 = vld [vmem:[%s13911_s23 + $0x1bdc] sm:$0xf]  ;;  %v11700_v10 = vor.u32 %v13300_v16, %v11697_v3  ;;  %8109 = vmatpush.bf16.msra.mxu3 %v11220_v28 }
 0x746   : > { %v11953_v51 = vld [vmem:[%s13911_s23 + $0x1bf8] sm:$0xf0]  ;;  %8097 = vmatmul.bf16.vlgmr.msra.gmra.mxu2 %v14184_v30 }
 0x747   : > { %v13428_v35 = vld [vmem:[%s13911_s23 + $0x1ddc] sm:$0xf]  ;;  %v11956_v41 = vor.u32 %v13364_v27, %v11953_v51  ;;  %8115 = vmatpush.bf16.msrb.mxu0 %v11700_v10 }
 0x748   : > { %v12209_v19 = vld [vmem:[%s13911_s23 + $0x1df8] sm:$0xf0]  ;;  %8110 = vmatmul.bf16.vlgmr.msra.gmra.mxu3 %v14190_v34  ;;  %v16317_v34 = vpop.f32.mrf.mxu0 }
 0x749   : > { %v13492_v25 = vld [vmem:[%s13911_s23 + $0x1fdc] sm:$0xf]  ;;  %v12212_v46 = vor.u32 %v13428_v35, %v12209_v19  ;;  %8128 = vmatpush.bf16.msrb.mxu1 %v11956_v41 }
 0x74a   : > { %v12465_v13 = vld [vmem:[%s13911_s23 + $0x1ff8] sm:$0xf0] }
 0x74b   : > { %v13292_v50 = vld [vmem:[%s13911_s23 + $0x199c] sm:$0xf]  ;;  %v12468_v17 = vor.u32 %v13492_v25, %v12465_v13  ;;  %8141 = vmatpush.bf16.msrb.mxu2 %v12212_v46 }
 0x74c   : > { %v11665_v11 = vld [vmem:[%s13911_s23 + $0x19b8] sm:$0xf0] }
 0x74d   : > { %v13356_v55 = vld [vmem:[%s13911_s23 + $0x1b9c] sm:$0xf]  ;;  %v11668_v44 = vor.u32 %v13292_v50, %v11665_v11  ;;  %8154 = vmatpush.bf16.msrb.mxu3 %v12468_v17  ;;  %v16336_v50 = vpop.f32.mrf.mxu2 }
 0x74e   : > { %v11921_v56 = vld [vmem:[%s13911_s23 + $0x1bb8] sm:$0xf0] }
 0x74f   : > { %v13420_v15 = vld [vmem:[%s13911_s23 + $0x1d9c] sm:$0xf]  ;;  %v11924_v60 = vor.u32 %v13356_v55, %v11921_v56  ;;  %8116 = vmatpush.bf16.msrb.mxu0 %v11668_v44  ;;  %v7903_v56 = vpop.f32.mrf.mxu3 }
 0x750   : > { %v12177_v53 = vld [vmem:[%s13911_s23 + $0x1db8] sm:$0xf0] }
 0x751   : > { %v13484_v49 = vld [vmem:[%s13911_s23 + $0x1f9c] sm:$0xf]  ;;  %v12180_v63 = vor.u32 %v13420_v15, %v12177_v53  ;;  %8129 = vmatpush.bf16.msrb.mxu1 %v11924_v60  ;;  %v7866_v15 = vpop.f32.mrf.mxu0 }
 0x752   : > { %v12433_v0 = vld [vmem:[%s13911_s23 + $0x1fb8] sm:$0xf0] }
 0x753   : > { %v13284_v1 = vld [vmem:[%s13911_s23 + $0x195c] sm:$0xf]  ;;  %v12436_v4 = vor.u32 %v13484_v49, %v12433_v0  ;;  %8142 = vmatpush.bf16.msrb.mxu2 %v12180_v63  ;;  %v7879_v49 = vpop.f32.mrf.mxu1  ;;  %v7826_v0 = vadd.f32 %v16248_v62, %v7813_v33 }
 0x754   : > { %v11633_v48 = vld [vmem:[%s13911_s23 + $0x1978] sm:$0xf0] }
 0x755   : > { %v13348_v2 = vld [vmem:[%s13911_s23 + $0x1b5c] sm:$0xf]  ;;  %v11636_v26 = vor.u32 %v13284_v1, %v11633_v48  ;;  %8155 = vmatpush.bf16.msrb.mxu3 %v12436_v4 }
 0x756   : > { %v11889_v20 = vld [vmem:[%s13911_s23 + $0x1b78] sm:$0xf0] }
 0x757   : > { %v13412_v38 = vld [vmem:[%s13911_s23 + $0x1d5c] sm:$0xf]  ;;  %v11892_v37 = vor.u32 %v13348_v2, %v11889_v20  ;;  %8117 = vmatpush.bf16.msrb.mxu0 %v11636_v26 }
 0x758   : > { %v12145_v9 = vld [vmem:[%s13911_s23 + $0x1d78] sm:$0xf0] }
 0x759   : > { %v13476_v6 = vld [vmem:[%s13911_s23 + $0x1f5c] sm:$0xf]  ;;  %v12148_v5 = vor.u32 %v13412_v38, %v12145_v9  ;;  %8130 = vmatpush.bf16.msrb.mxu1 %v11892_v37 }
 0x75a   : > { %v12401_v54 = vld [vmem:[%s13911_s23 + $0x1f78] sm:$0xf0] }
 0x75b   : > { %v13276_v47 = vld [vmem:[%s13911_s23 + $0x191c] sm:$0xf]  ;;  %v12404_v31 = vor.u32 %v13476_v6, %v12401_v54  ;;  %8143 = vmatpush.bf16.msrb.mxu2 %v12148_v5  ;;  %v7839_v54 = vadd.f32 %v16258_v59, %v7826_v0 }
 0x75c   : > { %v11601_v39 = vld [vmem:[%s13911_s23 + $0x1938] sm:$0xf0] }
 0x75d   : > { %v13340_v30 = vld [vmem:[%s13911_s23 + $0x1b1c] sm:$0xf]  ;;  %v11604_v7 = vor.u32 %v13276_v47, %v11601_v39  ;;  %8156 = vmatpush.bf16.msrb.mxu3 %v12404_v31  ;;  %v7852_v59 = vadd.f32 %v16263_v61, %v7839_v54 }
 0x75e   : > { %v11857_v14 = vld [vmem:[%s13911_s23 + $0x1b38] sm:$0xf0] }
 0x75f   : > { %v13404_v21 = vld [vmem:[%s13911_s23 + $0x1d1c] sm:$0xf]  ;;  %v11860_v57 = vor.u32 %v13340_v30, %v11857_v14  ;;  %8118 = vmatpush.bf16.msrb.mxu0 %v11604_v7  ;;  %v7905_v7 = vpop.f32.mrf.mxu3 }
 0x760   : > { %v12113_v8 = vld [vmem:[%s13911_s23 + $0x1d38] sm:$0xf0] }
 0x761   : > { %v13468_v42 = vld [vmem:[%s13911_s23 + $0x1f1c] sm:$0xf]  ;;  %v12116_v12 = vor.u32 %v13404_v21, %v12113_v8  ;;  %8131 = vmatpush.bf16.msrb.mxu1 %v11860_v57  ;;  %v7892_v8 = vpop.f32.mrf.mxu2 }
 0x762   : > { %v12369_v43 = vld [vmem:[%s13911_s23 + $0x1f38] sm:$0xf0] }
 0x763   : > { %v13268_v22 = vld [vmem:[%s13911_s23 + $0x18dc] sm:$0xf]  ;;  %v12372_v3 = vor.u32 %v13468_v42, %v12369_v43  ;;  %8144 = vmatpush.bf16.msrb.mxu2 %v12116_v12 }
 0x764   : > { %v11569_v45 = vld [vmem:[%s13911_s23 + $0x18f8] sm:$0xf0] }
 0x765   : > { %v13332_v16 = vld [vmem:[%s13911_s23 + $0x1adc] sm:$0xf]  ;;  %v11572_v40 = vor.u32 %v13268_v22, %v11569_v45  ;;  %8157 = vmatpush.bf16.msrb.mxu3 %v12372_v3 }
 0x766   : > { %v11825_v27 = vld [vmem:[%s13911_s23 + $0x1af8] sm:$0xf0] }
 0x767   : > { %v13396_v23 = vld [vmem:[%s13911_s23 + $0x1cdc] sm:$0xf]  ;;  %v11828_v25 = vor.u32 %v13332_v16, %v11825_v27  ;;  %8119 = vmatpush.bf16.msrb.mxu0 %v11572_v40  ;;  %v7865_v16 = vadd.f32 %v16317_v34, %v7852_v59  ;;  %v7916_v34 = vpop.f32.mrf.mxu0  ;;  %v7955_v33 = vpop.f32.mrf.mxu3 }
 0x768   : > { %v12081_v51 = vld [vmem:[%s13911_s23 + $0x1cf8] sm:$0xf0] }
 0x769   : > { %v13460_v35 = vld [vmem:[%s13911_s23 + $0x1edc] sm:$0xf]  ;;  %v12084_v13 = vor.u32 %v13396_v23, %v12081_v51  ;;  %8132 = vmatpush.bf16.msrb.mxu1 %v11828_v25  ;;  %v7878_v3 = vadd.f32 %v16321_v52, %v7865_v16  ;;  %v7929_v23 = vpop.f32.mrf.mxu1  ;;  %v293_v25 = vld [vmem:[%s13935_s11 + $0x30] sm:$0xff] }
 0x76a   : > { %v12337_v19 = vld [vmem:[%s13911_s23 + $0x1ef8] sm:$0xf0] }
 0x76b   : > { %v13260_v28 = vld [vmem:[%s13911_s23 + $0x189c] sm:$0xf]  ;;  %v12340_v46 = vor.u32 %v13460_v35, %v12337_v19  ;;  %8145 = vmatpush.bf16.msrb.mxu2 %v12084_v13  ;;  %v7891_v61 = vadd.f32 %v16336_v50, %v7878_v3  ;;  %v7942_v19 = vpop.f32.mrf.mxu2 }
 0x76c   : > { %v11537_v10 = vld [vmem:[%s13911_s23 + $0x18b8] sm:$0xf0] }
 0x76d   : > { %v13324_v41 = vld [vmem:[%s13911_s23 + $0x1a9c] sm:$0xf]  ;;  %v11540_v53 = vor.u32 %v13260_v28, %v11537_v10  ;;  %8158 = vmatpush.bf16.msrb.mxu3 %v12340_v46  ;;  %v7904_v27 = vadd.f32 %v7903_v56, %v7891_v61 }
 0x76e   : > { %v11793_v11 = vld [vmem:[%s13911_s23 + $0x1ab8] sm:$0xf0] }
 0x76f   : > { %v13388_v55 = vld [vmem:[%s13911_s23 + $0x1c9c] sm:$0xf]  ;;  %v11796_v44 = vor.u32 %v13324_v41, %v11793_v11  ;;  %8120 = vmatpush.bf16.msrb.mxu0 %v11540_v53  ;;  %v7917_v51 = vadd.f32 %v7916_v34, %v7904_v27  ;;  %v7918_v52 = vpop.f32.mrf.mxu0  ;;  %v7957_v28 = vpop.f32.mrf.mxu3 }
 0x770   : > { %v12049_v17 = vld [vmem:[%s13911_s23 + $0x1cb8] sm:$0xf0] }
 0x771   : > { %v13452_v58 = vld [vmem:[%s13911_s23 + $0x1e9c] sm:$0xf]  ;;  %v12052_v60 = vor.u32 %v13388_v55, %v12049_v17  ;;  %8133 = vmatpush.bf16.msrb.mxu1 %v11796_v44  ;;  %v7930_v35 = vadd.f32 %v7929_v23, %v7917_v51 }
 0x772   : > { %v12305_v18 = vld [vmem:[%s13911_s23 + $0x1eb8] sm:$0xf0] }
 0x773   : > { %v13252_v63 = vld [vmem:[%s13911_s23 + $0x185c] sm:$0xf]  ;;  %v12308_v2 = vor.u32 %v13452_v58, %v12305_v18  ;;  %8146 = vmatpush.bf16.msrb.mxu2 %v12052_v60  ;;  %v7943_v40 = vadd.f32 %v7942_v19, %v7930_v35 }
 0x774   : > { %v11505_v1 = vld [vmem:[%s13911_s23 + $0x1878] sm:$0xf0] }
 0x775   : > { %v13316_v48 = vld [vmem:[%s13911_s23 + $0x1a5c] sm:$0xf]  ;;  %v11508_v6 = vor.u32 %v13252_v63, %v11505_v1  ;;  %8159 = vmatpush.bf16.msrb.mxu3 %v12308_v2  ;;  %v7956_v13 = vadd.f32 %v7955_v33, %v7943_v40 }
 0x776   : > { %v11761_v4 = vld [vmem:[%s13911_s23 + $0x1a78] sm:$0xf0] }
 0x777   : > { %v13380_v20 = vld [vmem:[%s13911_s23 + $0x1c5c] sm:$0xf]  ;;  %v11764_v26 = vor.u32 %v13316_v48, %v11761_v4  ;;  %8121 = vmatpush.bf16.msrb.mxu0 %v11508_v6  ;;  %v7968_v10 = vpop.f32.mrf.mxu0  ;;  %v8007_v11 = vpop.f32.mrf.mxu3 }
 0x778   : > { %v12017_v38 = vld [vmem:[%s13911_s23 + $0x1c78] sm:$0xf0] }
 0x779   : > { %v13444_v9 = vld [vmem:[%s13911_s23 + $0x1e5c] sm:$0xf]  ;;  %v12020_v37 = vor.u32 %v13380_v20, %v12017_v38  ;;  %8134 = vmatpush.bf16.msrb.mxu1 %v11764_v26 }
 0x77a   : > { %v12273_v62 = vld [vmem:[%s13911_s23 + $0x1e78] sm:$0xf0] }
 0x77b   : > { %v13244_v5 = vld [vmem:[%s13911_s23 + $0x181c] sm:$0xf]  ;;  %v12276_v30 = vor.u32 %v13444_v9, %v12273_v62  ;;  %8147 = vmatpush.bf16.msrb.mxu2 %v12020_v37 }
 0x77c   : > { %v11473_v47 = vld [vmem:[%s13911_s23 + $0x1838] sm:$0xf0] }
 0x77d   : > { %v13308_v39 = vld [vmem:[%s13911_s23 + $0x1a1c] sm:$0xf]  ;;  %v11476_v57 = vor.u32 %v13244_v5, %v11473_v47  ;;  %8160 = vmatpush.bf16.msrb.mxu3 %v12276_v30 }
 0x77e   : > { %v11729_v31 = vld [vmem:[%s13911_s23 + $0x1a38] sm:$0xf0] }
 0x77f   : > { %v13372_v14 = vld [vmem:[%s13911_s23 + $0x1c1c] sm:$0xf]  ;;  %v11732_v12 = vor.u32 %v13308_v39, %v11729_v31  ;;  %8122 = vmatpush.bf16.msrb.mxu0 %v11476_v57  ;;  %v7970_v17 = vpop.f32.mrf.mxu0  ;;  %v8009_v18 = vpop.f32.mrf.mxu3 }
 0x780   : > { %v11985_v21 = vld [vmem:[%s13911_s23 + $0x1c38] sm:$0xf0] }
 0x781   : > { %v13436_v42 = vld [vmem:[%s13911_s23 + $0x1e1c] sm:$0xf]  ;;  %v11988_v22 = vor.u32 %v13372_v14, %v11985_v21  ;;  %8135 = vmatpush.bf16.msrb.mxu1 %v11732_v12 }
 0x782   : > { %v12241_v43 = vld [vmem:[%s13911_s23 + $0x1e38] sm:$0xf0]  ;;  %8123 = vmatmul.bf16.vlgmr.msrb.gmra.mxu0 %v14257_v24  ;;  %v7931_v24 = vpop.f32.mrf.mxu1 }
 0x783   : > { %v12244_v45 = vor.u32 %v13436_v42, %v12241_v43  ;;  %8148 = vmatpush.bf16.msrb.mxu2 %v11988_v22  ;;  %v294_v12 = vld [vmem:[%s13935_s11 + $0x38] sm:$0xff] }
 0x784   : > { %8136 = vmatmul.bf16.vlgmr.msrb.gmra.mxu1 %v14264_v32  ;;  %v8173_v32 = vadd.f32 %v7956_v13, %v293_v25 }
 0x785   : > { %8161 = vmatpush.bf16.msrb.mxu3 %v12244_v45 }
 0x786   : > { %8149 = vmatmul.bf16.vlgmr.msrb.gmra.mxu2 %v14262_v29  ;;  %8181 = vst [vmem:[%s13935_s11 + $0x30] sm:$0xff] %v8173_v32  ;;  %v7944_v29 = vpop.f32.mrf.mxu2 }
 0x787   : > { %v8020_v15 = vpop.f32.mrf.mxu0 }
 0x788   : > { %8162 = vmatmul.bf16.vlgmr.msrb.gmra.mxu3 %v14268_v36 }
 0x78a   : > { %v7981_v41 = vpop.f32.mrf.mxu1 }
 0x78b   : > { %v7982_v46 = vadd.f32 %v7981_v41, %v7968_v10  ;;  %v8059_v0 = vpop.f32.mrf.mxu3 }
 0x78e   : > { %v7994_v36 = vpop.f32.mrf.mxu2 }
 0x78f   : > { %v7995_v50 = vadd.f32 %v7994_v36, %v7982_v46  ;;  %v8022_v44 = vpop.f32.mrf.mxu0 }
 0x791   : > { %v8008_v55 = vadd.f32 %v8007_v11, %v7995_v50 }
 0x792   : > { %v7983_v56 = vpop.f32.mrf.mxu1 }
 0x793   : > { %v8061_v1 = vpop.f32.mrf.mxu3  ;;  %v8021_v4 = vadd.f32 %v8020_v15, %v8008_v55 }
 0x796   : > { %v7996_v58 = vpop.f32.mrf.mxu2 }
 0x79a   : > { %v8033_v53 = vpop.f32.mrf.mxu1 }
 0x79b   : > { %v8034_v62 = vadd.f32 %v8033_v53, %v8021_v4 }
 0x79e   : > { %v8046_v49 = vpop.f32.mrf.mxu2 }
 0x79f   : > { %v8047_v54 = vadd.f32 %v8046_v49, %v8034_v62 }
 0x7a1   : > { %v8060_v5 = vadd.f32 %v8059_v0, %v8047_v54 }
 0x7a2   : > { %v8035_v60 = vpop.f32.mrf.mxu1 }
 0x7a6   : > { %v8048_v63 = vpop.f32.mrf.mxu2 }
 0x7bf   : > { %v8072_v48 = vpop.f32.mrf.mxu0 }
 0x7c0   : > { %v8073_v47 = vadd.f32 %v8072_v48, %v8060_v5 }
 0x7c1   : > { %v8085_v2 = vpop.f32.mrf.mxu1 }
 0x7c2   : > { %v8086_v39 = vadd.f32 %v8085_v2, %v8073_v47 }
 0x7c7   : > { %v8074_v9 = vpop.f32.mrf.mxu0 }
 0x7c9   : > { %v8098_v20 = vpop.f32.mrf.mxu2  ;;  %v8087_v6 = vpop.f32.mrf.mxu1 }
 0x7ca   : > { %v8099_v30 = vadd.f32 %v8098_v20, %v8086_v39 }
 0x7cb   : > { %v8111_v38 = vpop.f32.mrf.mxu3 }
 0x7cc   : > { %v8112_v31 = vadd.f32 %v8111_v38, %v8099_v30 }
 0x7d1   : > { %v8100_v26 = vpop.f32.mrf.mxu2 }
 0x7d3   : > { %v8113_v37 = vpop.f32.mrf.mxu3 }
 0x7ff   : > { %v8124_v14 = vpop.f32.mrf.mxu0 }
 0x800   : > { %v8125_v8 = vadd.f32 %v8124_v14, %v8112_v31 }
 0x801   : > { %v8137_v21 = vpop.f32.mrf.mxu1 }
 0x802   : > { %v8138_v42 = vadd.f32 %v8137_v21, %v8125_v8 }
 0x807   : > { %v8126_v59 = vpop.f32.mrf.mxu0 }
 0x809   : > { %v8150_v43 = vpop.f32.mrf.mxu2  ;;  %v8139_v22 = vpop.f32.mrf.mxu1 }
 0x80a   : > { %v8151_v7 = vadd.f32 %v8150_v43, %v8138_v42 }
 0x80b   : > { %v8163_v57 = vpop.f32.mrf.mxu3 }
 0x80c   : > { %v8164_v45 = vadd.f32 %v8163_v57, %v8151_v7 }
 0x80e   : > { %v8174_v16 = vadd.f32 %v8164_v45, %v294_v12 }
 0x80f   : > { %8186 = sbr.rel (%p12469_p9) target bundleno = 2084 (0x824), region = 48 }
 0x810   : > { %8182 = vst [vmem:[%s13935_s11 + $0x38] sm:$0xff] %v8174_v16 }
 0x811   : > { %v8152_v3 = vpop.f32.mrf.mxu2 }
 0x813   : > { %v8165_v61 = vpop.f32.mrf.mxu3 }
 0x814   : > { %v8187_v27 = vld [vmem:[%s13935_s11] sm:$0xff]  ;;  %v8188_v23 = vld [vmem:[%s13935_s11 + $0x8] sm:$0xff]  ;;  %v8189_v19 = vld [vmem:[%s13935_s11 + $0x10] sm:$0xff] }
 0x815   : > { %v8195_v34 = vld [vmem:[%s226_s29] sm:$0xff]  ;;  %v8190_v33 = vld [vmem:[%s13935_s11 + $0x18] sm:$0xff]  ;;  %v8193_v29 = vld [vmem:[%s13935_s11 + $0x30] sm:$0xff] }
 0x816   : > { %v8197_v51 = vperm.slane %v8195_v34, 0  ;;  %v8198_v35 = vperm.slane %v8195_v34, 1  ;;  %v8199_v40 = vperm.slane %v8195_v34, 2  ;;  %v8200_v52 = vperm.slane %v8195_v34, 3  ;;  %v8191_v25 = vld [vmem:[%s13935_s11 + $0x20] sm:$0xff]  ;;  %v8192_v13 = vld [vmem:[%s13935_s11 + $0x28] sm:$0xff] }
 0x817   : > { %v8201_v24 = vperm.slane %v8195_v34, 4  ;;  %v8202_v32 = vperm.slane %v8195_v34, 5  ;;  %v8203_v28 = vperm.slane %v8195_v34, 6  ;;  %v8194_v50 = vld [vmem:[%s13935_s11 + $0x38] sm:$0xff]  ;;  %v8204_v17 = vperm.slane %v8195_v34, 7 }
 0x818   : > { %v8213_v10 = vadd.f32 %v8197_v51, %v8187_v27  ;;  %v8214_v41 = vadd.f32 %v8198_v35, %v8188_v23  ;;  %v8215_v46 = vadd.f32 %v8199_v40, %v8189_v19  ;;  %v8216_v36 = vadd.f32 %v8200_v52, %v8190_v33 }
 0x819   : > { %v8217_v11 = vadd.f32 %v8201_v24, %v8191_v25  ;;  %v8218_v55 = vadd.f32 %v8202_v32, %v8192_v13  ;;  %v8219_v15 = vadd.f32 %v8203_v28, %v8193_v29  ;;  %v8220_v49 = vadd.f32 %v8204_v17, %v8194_v50 }
 0x81a   : > { %v8221_v56 = vmax.f32 %v8213_v10, 0.0  ;;  %v8222_v58 = vmax.f32 %v8214_v41, 0.0  ;;  %v8223_v18 = vmax.f32 %v8215_v46, 0.0  ;;  %v8224_v53 = vmax.f32 %v8216_v36, 0.0 }
 0x81b   : > { %v8225_v0 = vmax.f32 %v8217_v11, 0.0  ;;  %v8226_v44 = vmax.f32 %v8218_v55, 0.0  ;;  %v8227_v60 = vmax.f32 %v8219_v15, 0.0  ;;  %v8228_v63 = vmax.f32 %v8220_v49, 0.0 }
 0x81c   : > { %8229 = vst [vmem:[%s13935_s11] sm:$0xff] %v8221_v56 }
 0x81d   : > { %8230 = vst [vmem:[%s13935_s11 + $0x8] sm:$0xff] %v8222_v58 }
 0x81e   : > { %8231 = vst [vmem:[%s13935_s11 + $0x10] sm:$0xff] %v8223_v18 }
 0x81f   : > { %8232 = vst [vmem:[%s13935_s11 + $0x18] sm:$0xff] %v8224_v53 }
 0x820   : > { %8233 = vst [vmem:[%s13935_s11 + $0x20] sm:$0xff] %v8225_v0 }
 0x821   : > { %8234 = vst [vmem:[%s13935_s11 + $0x28] sm:$0xff] %v8226_v44 }
 0x822   : > { %8235 = vst [vmem:[%s13935_s11 + $0x30] sm:$0xff] %v8227_v60 }
 0x823   : > { %8236 = vst [vmem:[%s13935_s11 + $0x38] sm:$0xff] %v8228_v63 }
 0x824 PF: > { %s19_s22 = sadd.s32 1, %s13755_s22   ;;  %s16438_s18 = smov %s13892_s15 }
 0x825   : > { %p16_p10 = scmp.ge.s32.totalorder %s19_s22, 14   ;;  %s16439_s23 = sld [smem:[#allocation8_spill]] }
 0x826   : > { %s16440_s25 = sld [smem:[#allocation9_spill]]  ;;  %s16441_s12 = smov %s13719_s13 }
 0x827   : > { %s16442_s13 = smov %s13723_s14  ;;  %s16443_s14 = smov %s13887_s10 }
 0x828   : > { %s16444_s15 = smov %s13731_s16  ;;  %s16445_s16 = smov %s13735_s17 }
 0x829   : > { %s16446_s17 = smov %s16438_s18  ;;  %s16447_s18 = smov %s13747_s20 }
 0x82a   : > { %s16448_s19 = smov %s13751_s21  ;;  %18 = sbr.rel (!%p16_p10) target bundleno = 11 (0xb), region = 96 }
 0x82b   : > { %s16449_s20 = smov %s16439_s23 }
 0x82c   : > { %s16450_s21 = smov %s16440_s25 }
 0x82f   :  { %8259 = vsyncpa [#allocation3], 1 }
 0x830   :  { %8261 = vsyncpa [#allocation3 + $0x1], 1 }
 0x831   :  { %8262 = vsyncpa [#allocation5], 1 }
 0x832   :  { %8264 = vsyncpa [#allocation5 + $0x1], 1 }

</bundles_post_ra>
